<compile_context>
chip_gen: v6e
topology: v6e:2x2x1
jax: 0.10.0
libtpu: 0.0.40
codegen_flags: <defaults>
</compile_context>

<pallas_src>
import jax
import jax.numpy as jnp
from jax import lax
from jax.experimental import pallas as pl
from jax.experimental.pallas import tpu as pltpu

INPUT_DIM = 6
SIZE = 500
OUTPUT_DIM = 100 * 3
HIDDEN_PAD = 512   # 500 padded to 4*128
OUT_PAD = 384      # 300 padded to 3*128
EPS = 1e-5
NEG_SLOPE = 0.01   # nn.LeakyReLU() default


def _leaky_relu(h):
    return jnp.where(h > 0, h, NEG_SLOPE * h)


def _round_up(n, m):
    return (n + m - 1) // m * m


# ----------------------------------------------------------------------------- kernel
def mlp_kernel(x_ref, w1_ref, b1_ref, w2_ref, b2_ref, w3_ref, b3_ref,
               w4_ref, b4_ref, out_ref):
    # Block 1: Linear(6,512) -> tanh.  K=6 is <1% of FLOPs; keep it in f32.
    h = jnp.dot(x_ref[...], w1_ref[...], preferred_element_type=jnp.float32)
    h = jnp.tanh(h + b1_ref[...])

    # Block 2: (BN1 folded) Linear(512,512) -> leaky_relu.  bf16 MXU, f32 accumulate.
    h = jnp.dot(h.astype(jnp.bfloat16), w2_ref[...],
                preferred_element_type=jnp.float32) + b2_ref[...]
    h = _leaky_relu(h)

    # Block 3: (BN2 folded) Linear(512,512) -> leaky_relu.  Dropout = identity (eval).
    h = jnp.dot(h.astype(jnp.bfloat16), w3_ref[...],
                preferred_element_type=jnp.float32) + b3_ref[...]
    h = _leaky_relu(h)

    # Output head: (BN3 folded) Linear(512,384).
    out = jnp.dot(h.astype(jnp.bfloat16), w4_ref[...],
                  preferred_element_type=jnp.float32) + b4_ref[...]
    out_ref[...] = out.astype(out_ref.dtype)


# ----------------------------------------------------------------------------- wrapper
def mlp_forward(x, packed_params, *, tile_b=256):
    """x: (B, 6) f32.  packed_params: folded/padded params from fold_and_pad_params."""
    w1, b1, w2, b2, w3, b3, w4, b4 = packed_params
    batch = x.shape[0]
    tile_b = min(tile_b, _round_up(batch, 8))       # multiple of 8 sublanes
    batch_pad = _round_up(batch, tile_b)
    if batch_pad != batch:
        x = jnp.pad(x, ((0, batch_pad - batch), (0, 0)))

    grid = (batch_pad // tile_b,)
    const = lambda i: (0, 0)                        # weights stay VMEM-resident

    in_specs = [
        pl.BlockSpec((tile_b, INPUT_DIM), lambda i: (i, 0)),
        pl.BlockSpec((INPUT_DIM, HIDDEN_PAD), const),
        pl.BlockSpec((1, HIDDEN_PAD), const),
        pl.BlockSpec((HIDDEN_PAD, HIDDEN_PAD), const),
        pl.BlockSpec((1, HIDDEN_PAD), const),
        pl.BlockSpec((HIDDEN_PAD, HIDDEN_PAD), const),
        pl.BlockSpec((1, HIDDEN_PAD), const),
        pl.BlockSpec((HIDDEN_PAD, OUT_PAD), const),
        pl.BlockSpec((1, OUT_PAD), const),
    ]
    out_spec = pl.BlockSpec((tile_b, OUT_PAD), lambda i: (i, 0))

    out = pl.pallas_call(
        mlp_kernel,
        out_shape=jax.ShapeDtypeStruct((batch_pad, OUT_PAD), jnp.float32),
        grid=grid,
        in_specs=in_specs,
        out_specs=out_spec,
        compiler_params=pltpu.CompilerParams(
            dimension_semantics=("parallel",),
            vmem_limit_bytes=32 * 1024 * 1024,      # safe on v5e/v6e/v7x, well above usage
        ),
    )(x, w1, b1, w2, b2, w3, b3, w4, b4)
    return out[:batch, :OUTPUT_DIM]


# ----------------------------------------------------------------------------- params
def init_raw_params(key):
    """PyTorch-like eval-mode state.  Linear weights stored as (in, out) = weight.T."""
    ks = jax.random.split(key, 20)

    def linear(kw, kb, fan_in, fan_out):
        bound = 1.0 / jnp.sqrt(jnp.float32(fan_in))
        w = jax.random.uniform(kw, (fan_in, fan_out), jnp.float32, -bound, bound)
        b = jax.random.uniform(kb, (1, fan_out), jnp.float32, -bound, bound)
        return w, b

    def bn(kg, kb, km, kv, n):
        gamma = 1.0 + 0.1 * jax.random.normal(kg, (1, n), jnp.float32)
        beta = 0.1 * jax.random.normal(kb, (1, n), jnp.float32)
        mean = 0.1 * jax.random.normal(km, (1, n), jnp.float32)
        var = 1.0 + 0.1 * jax.random.uniform(kv, (1, n), jnp.float32)
        return gamma, beta, mean, var

    w1, b1 = linear(ks[0], ks[1], INPUT_DIM, SIZE)
    bn1 = bn(ks[2], ks[3], ks[4], ks[5], SIZE)
    w2, b2 = linear(ks[6], ks[7], SIZE, SIZE)
    bn2 = bn(ks[8], ks[9], ks[10], ks[11], SIZE)
    w3, b3 = linear(ks[12], ks[13], SIZE, SIZE)
    bn3 = bn(ks[14], ks[15], ks[16], ks[17], SIZE)
    w4, b4 = linear(ks[18], ks[19], SIZE, OUTPUT_DIM)
    return (w1, b1, bn1, w2, b2, bn2, w3, b3, bn3, w4, b4)


def fold_and_pad_params(raw):
    """Host-side transform: fold eval-mode BN into the next Linear, zero-pad feature
    dims to lane multiples, and cast the big weights to bf16."""
    (w1, b1, (g1, be1, m1, v1),
     w2, b2, (g2, be2, m2, v2),
     w3, b3, (g3, be3, m3, v3),
     w4, b4) = raw

    def scale_shift(g, be, m, v):
        s = g * lax.rsqrt(v + EPS)       # (1, 500)
        t = be - m * s                   # (1, 500)
        return s, t

    s1, t1 = scale_shift(g1, be1, m1, v1)
    s2, t2 = scale_shift(g2, be2, m2, v2)
    s3, t3 = scale_shift(g3, be3, m3, v3)

    # Fold BN_k into the following Linear:  (h*s + t) @ W + b == h @ (s.T*W) + (t@W + b)
    w2f, b2f = s1.reshape(-1, 1) * w2, t1 @ w2 + b2
    w3f, b3f = s2.reshape(-1, 1) * w3, t2 @ w3 + b3
    w4f, b4f = s3.reshape(-1, 1) * w4, t3 @ w4 + b4

    def pad2(a, rows, cols):
        return jnp.pad(a, ((0, rows - a.shape[0]), (0, cols - a.shape[1])))

    w1p = pad2(w1, INPUT_DIM, HIDDEN_PAD)                            # f32 (tiny)
    b1p = pad2(b1, 1, HIDDEN_PAD)
    w2p = pad2(w2f, HIDDEN_PAD, HIDDEN_PAD).astype(jnp.bfloat16)
    b2p = pad2(b2f, 1, HIDDEN_PAD)
    w3p = pad2(w3f, HIDDEN_PAD, HIDDEN_PAD).astype(jnp.bfloat16)
    b3p = pad2(b3f, 1, HIDDEN_PAD)
    w4p = pad2(w4f, HIDDEN_PAD, OUT_PAD).astype(jnp.bfloat16)
    b4p = pad2(b4f, 1, OUT_PAD)
    return (w1p, b1p, w2p, b2p, w3p, b3p, w4p, b4p)


# ----------------------------------------------------------------------------- references
def mlp_reference_f32(x, raw):
    """Unfolded full-f32 eval-mode reference (matches the PyTorch module)."""
    (w1, b1, (g1, be1, m1, v1),
     w2, b2, (g2, be2, m2, v2),
     w3, b3, (g3, be3, m3, v3),
     w4, b4) = raw

    def bn(h, g, be, m, v):
        return (h - m) * lax.rsqrt(v + EPS) * g + be

    h = jnp.tanh(x @ w1 + b1)
    h = bn(h, g1, be1, m1, v1)
    h = _leaky_relu(h @ w2 + b2)
    h = bn(h, g2, be2, m2, v2)
    h = _leaky_relu(h @ w3 + b3)
    h = bn(h, g3, be3, m3, v3)
    return h @ w4 + b4


def mlp_reference_packed(x, packed):
    """Same folded/padded/bf16 math as the kernel, in plain JAX (tight check)."""
    w1, b1, w2, b2, w3, b3, w4, b4 = packed
    h = jnp.tanh(jnp.dot(x, w1, preferred_element_type=jnp.float32) + b1)
    h = _leaky_relu(jnp.dot(h.astype(jnp.bfloat16), w2,
                            preferred_element_type=jnp.float32) + b2)
    h = _leaky_relu(jnp.dot(h.astype(jnp.bfloat16), w3,
                            preferred_element_type=jnp.float32) + b3)
    out = jnp.dot(h.astype(jnp.bfloat16), w4,
                  preferred_element_type=jnp.float32) + b4
    return out[:, :OUTPUT_DIM]


# ----------------------------------------------------------------------------- main
if __name__ == "__main__":
    key = jax.random.PRNGKey(0)
    kx, kp = jax.random.split(key)

    batch = 512                      # exercises the batch grid: 2 tiles of 256
    x = jax.random.normal(kx, (batch, INPUT_DIM), jnp.float32)

    raw_params = init_raw_params(kp)
    packed_params = fold_and_pad_params(raw_params)

    out = jax.block_until_ready(mlp_forward(x, packed_params, tile_b=256))
    assert out.shape == (batch, OUTPUT_DIM), out.shape

    # Tight check: kernel vs identical folded/bf16 math in plain JAX.
    ref_tight = jax.block_until_ready(mlp_reference_packed(x, packed_params))
    if not jnp.allclose(out, ref_tight, atol=1e-3, rtol=1e-3):
        raise RuntimeError("Pallas kernel mismatch vs matched-precision reference")

    # Looser semantic check: kernel (folded + padded + bf16 weights) vs unfolded f32 module.
    ref_f32 = jax.block_until_ready(mlp_reference_f32(x, raw_params))
    if not jnp.allclose(out, ref_f32, atol=5e-2, rtol=5e-2):
        raise RuntimeError("Pallas kernel mismatch vs f32 eval-mode reference")

    print("KERNEL_OK")
</pallas_src>

<mosaic_0001>
module attributes {stable_mosaic.version = 11 : i64} {
  func.func @mlp_kernel(%arg0: i32, %arg1: memref<256x6xf32, #tpu.memory_space<vmem>>, %arg2: memref<6x512xf32, #tpu.memory_space<vmem>>, %arg3: memref<1x512xf32, #tpu.memory_space<vmem>>, %arg4: memref<512x512xbf16, #tpu.memory_space<vmem>>, %arg5: memref<1x512xf32, #tpu.memory_space<vmem>>, %arg6: memref<512x512xbf16, #tpu.memory_space<vmem>>, %arg7: memref<1x512xf32, #tpu.memory_space<vmem>>, %arg8: memref<512x384xbf16, #tpu.memory_space<vmem>>, %arg9: memref<1x384xf32, #tpu.memory_space<vmem>>, %arg10: memref<256x384xf32, #tpu.memory_space<vmem>>) attributes {dimension_semantics = [#tpu.dimension_semantics<parallel>], iteration_bounds = array<i64: 2>, scalar_prefetch = 0 : i64, scratch_operands = 0 : i64, tpu.core_type = #tpu.core_type<tc>, window_params = [{transform_indices = @transform_0, window_bounds = array<i64: 256, 6>}, {pipeline_mode = #tpu.pipeline_mode<synchronous>, transform_indices = @transform_1, window_bounds = array<i64: 6, 512>}, {pipeline_mode = #tpu.pipeline_mode<synchronous>, transform_indices = @transform_2, window_bounds = array<i64: 1, 512>}, {pipeline_mode = #tpu.pipeline_mode<synchronous>, transform_indices = @transform_3, window_bounds = array<i64: 512, 512>}, {pipeline_mode = #tpu.pipeline_mode<synchronous>, transform_indices = @transform_4, window_bounds = array<i64: 1, 512>}, {pipeline_mode = #tpu.pipeline_mode<synchronous>, transform_indices = @transform_5, window_bounds = array<i64: 512, 512>}, {pipeline_mode = #tpu.pipeline_mode<synchronous>, transform_indices = @transform_6, window_bounds = array<i64: 1, 512>}, {pipeline_mode = #tpu.pipeline_mode<synchronous>, transform_indices = @transform_7, window_bounds = array<i64: 512, 384>}, {pipeline_mode = #tpu.pipeline_mode<synchronous>, transform_indices = @transform_8, window_bounds = array<i64: 1, 384>}, {transform_indices = @transform_9, window_bounds = array<i64: 256, 384>}]} {
    %c0 = arith.constant 0 : index
    %c0_0 = arith.constant 0 : index
    %0 = vector.load %arg1[%c0, %c0_0] : memref<256x6xf32, #tpu.memory_space<vmem>>, vector<256x6xf32>
    %c0_1 = arith.constant 0 : index
    %c0_2 = arith.constant 0 : index
    %1 = vector.load %arg2[%c0_1, %c0_2] : memref<6x512xf32, #tpu.memory_space<vmem>>, vector<6x512xf32>
    %cst = arith.constant dense<0.000000e+00> : vector<256x512xf32>
    %2 = tpu.matmul %0, %1, %cst {dimension_numbers = #tpu.dot_dimension_numbers<[1], [0], [0], [1], [0, 0, 1, 1], [], []>} : vector<256x6xf32>, vector<6x512xf32>, vector<256x512xf32> -> vector<256x512xf32>
    %c0_3 = arith.constant 0 : index
    %c0_4 = arith.constant 0 : index
    %3 = vector.load %arg3[%c0_3, %c0_4] : memref<1x512xf32, #tpu.memory_space<vmem>>, vector<1x512xf32>
    %4 = vector.broadcast %3 : vector<1x512xf32> to vector<256x512xf32>
    %5 = arith.addf %2, %4 : vector<256x512xf32>
    %6 = math.tanh %5 : vector<256x512xf32>
    %7 = arith.truncf %6 : vector<256x512xf32> to vector<256x512xbf16>
    %c0_5 = arith.constant 0 : index
    %c0_6 = arith.constant 0 : index
    %8 = vector.load %arg4[%c0_5, %c0_6] : memref<512x512xbf16, #tpu.memory_space<vmem>>, vector<512x512xbf16>
    %cst_7 = arith.constant dense<0.000000e+00> : vector<256x512xf32>
    %9 = tpu.matmul %7, %8, %cst_7 {dimension_numbers = #tpu.dot_dimension_numbers<[1], [0], [0], [1], [0, 0, 1, 1], [], []>} : vector<256x512xbf16>, vector<512x512xbf16>, vector<256x512xf32> -> vector<256x512xf32>
    %c0_8 = arith.constant 0 : index
    %c0_9 = arith.constant 0 : index
    %10 = vector.load %arg5[%c0_8, %c0_9] : memref<1x512xf32, #tpu.memory_space<vmem>>, vector<1x512xf32>
    %11 = vector.broadcast %10 : vector<1x512xf32> to vector<256x512xf32>
    %12 = arith.addf %9, %11 : vector<256x512xf32>
    %cst_10 = arith.constant 0.000000e+00 : f32
    %13 = vector.broadcast %cst_10 : f32 to vector<256x512xf32>
    %14 = arith.cmpf ogt, %12, %13 : vector<256x512xf32>
    %cst_11 = arith.constant 0.00999999977 : f32
    %15 = vector.broadcast %cst_11 : f32 to vector<256x512xf32>
    %16 = arith.mulf %15, %12 : vector<256x512xf32>
    %17 = arith.select %14, %12, %16 : vector<256x512xi1>, vector<256x512xf32>
    %18 = arith.truncf %17 : vector<256x512xf32> to vector<256x512xbf16>
    %c0_12 = arith.constant 0 : index
    %c0_13 = arith.constant 0 : index
    %19 = vector.load %arg6[%c0_12, %c0_13] : memref<512x512xbf16, #tpu.memory_space<vmem>>, vector<512x512xbf16>
    %cst_14 = arith.constant dense<0.000000e+00> : vector<256x512xf32>
    %20 = tpu.matmul %18, %19, %cst_14 {dimension_numbers = #tpu.dot_dimension_numbers<[1], [0], [0], [1], [0, 0, 1, 1], [], []>} : vector<256x512xbf16>, vector<512x512xbf16>, vector<256x512xf32> -> vector<256x512xf32>
    %c0_15 = arith.constant 0 : index
    %c0_16 = arith.constant 0 : index
    %21 = vector.load %arg7[%c0_15, %c0_16] : memref<1x512xf32, #tpu.memory_space<vmem>>, vector<1x512xf32>
    %22 = vector.broadcast %21 : vector<1x512xf32> to vector<256x512xf32>
    %23 = arith.addf %20, %22 : vector<256x512xf32>
    %cst_17 = arith.constant 0.000000e+00 : f32
    %24 = vector.broadcast %cst_17 : f32 to vector<256x512xf32>
    %25 = arith.cmpf ogt, %23, %24 : vector<256x512xf32>
    %cst_18 = arith.constant 0.00999999977 : f32
    %26 = vector.broadcast %cst_18 : f32 to vector<256x512xf32>
    %27 = arith.mulf %26, %23 : vector<256x512xf32>
    %28 = arith.select %25, %23, %27 : vector<256x512xi1>, vector<256x512xf32>
    %29 = arith.truncf %28 : vector<256x512xf32> to vector<256x512xbf16>
    %c0_19 = arith.constant 0 : index
    %c0_20 = arith.constant 0 : index
    %30 = vector.load %arg8[%c0_19, %c0_20] : memref<512x384xbf16, #tpu.memory_space<vmem>>, vector<512x384xbf16>
    %cst_21 = arith.constant dense<0.000000e+00> : vector<256x384xf32>
    %31 = tpu.matmul %29, %30, %cst_21 {dimension_numbers = #tpu.dot_dimension_numbers<[1], [0], [0], [1], [0, 0, 1, 1], [], []>} : vector<256x512xbf16>, vector<512x384xbf16>, vector<256x384xf32> -> vector<256x384xf32>
    %c0_22 = arith.constant 0 : index
    %c0_23 = arith.constant 0 : index
    %32 = vector.load %arg9[%c0_22, %c0_23] : memref<1x384xf32, #tpu.memory_space<vmem>>, vector<1x384xf32>
    %33 = vector.broadcast %32 : vector<1x384xf32> to vector<256x384xf32>
    %34 = arith.addf %31, %33 : vector<256x384xf32>
    %c0_24 = arith.constant 0 : index
    %c0_25 = arith.constant 0 : index
    %35 = vector.load %arg10[%c0_24, %c0_25] : memref<256x384xf32, #tpu.memory_space<vmem>>, vector<256x384xf32>
    tpu.vector_store %arg10[%c0_24, %c0_25], %34 {strides = array<i32>} : memref<256x384xf32, #tpu.memory_space<vmem>>, vector<256x384xf32>,
    return
  }
  func.func @transform_0(%arg0: i32) -> (i32, i32) {
    %c0_i32 = arith.constant 0 : i32
    %c0_i32_0 = arith.constant 0 : i32
    return %arg0, %c0_i32 : i32, i32
  }
  func.func @transform_1(%arg0: i32) -> (i32, i32) {
    %c0_i32 = arith.constant 0 : i32
    %c0_i32_0 = arith.constant 0 : i32
    %c0_i32_1 = arith.constant 0 : i32
    return %c0_i32, %c0_i32_0 : i32, i32
  }
  func.func @transform_2(%arg0: i32) -> (i32, i32) {
    %c0_i32 = arith.constant 0 : i32
    %c0_i32_0 = arith.constant 0 : i32
    %c0_i32_1 = arith.constant 0 : i32
    return %c0_i32, %c0_i32_0 : i32, i32
  }
  func.func @transform_3(%arg0: i32) -> (i32, i32) {
    %c0_i32 = arith.constant 0 : i32
    %c0_i32_0 = arith.constant 0 : i32
    %c0_i32_1 = arith.constant 0 : i32
    return %c0_i32, %c0_i32_0 : i32, i32
  }
  func.func @transform_4(%arg0: i32) -> (i32, i32) {
    %c0_i32 = arith.constant 0 : i32
    %c0_i32_0 = arith.constant 0 : i32
    %c0_i32_1 = arith.constant 0 : i32
    return %c0_i32, %c0_i32_0 : i32, i32
  }
  func.func @transform_5(%arg0: i32) -> (i32, i32) {
    %c0_i32 = arith.constant 0 : i32
    %c0_i32_0 = arith.constant 0 : i32
    %c0_i32_1 = arith.constant 0 : i32
    return %c0_i32, %c0_i32_0 : i32, i32
  }
  func.func @transform_6(%arg0: i32) -> (i32, i32) {
    %c0_i32 = arith.constant 0 : i32
    %c0_i32_0 = arith.constant 0 : i32
    %c0_i32_1 = arith.constant 0 : i32
    return %c0_i32, %c0_i32_0 : i32, i32
  }
  func.func @transform_7(%arg0: i32) -> (i32, i32) {
    %c0_i32 = arith.constant 0 : i32
    %c0_i32_0 = arith.constant 0 : i32
    %c0_i32_1 = arith.constant 0 : i32
    return %c0_i32, %c0_i32_0 : i32, i32
  }
  func.func @transform_8(%arg0: i32) -> (i32, i32) {
    %c0_i32 = arith.constant 0 : i32
    %c0_i32_0 = arith.constant 0 : i32
    %c0_i32_1 = arith.constant 0 : i32
    return %c0_i32, %c0_i32_0 : i32, i32
  }
  func.func @transform_9(%arg0: i32) -> (i32, i32) {
    %c0_i32 = arith.constant 0 : i32
    %c0_i32_0 = arith.constant 0 : i32
    return %arg0, %c0_i32 : i32, i32
  }
}

</mosaic_0001>

<bundles_post_ra>
// kernel: tpu_custom_call.1
= control target key start
LH: loop header
LB: loop body
LE: loop exit
PB: predicated region body
PF: predicated region fallthrough
CT: control target
= control target key end

     0   :  { %14 = vsyncpa [#allocation3], 0  ;;  %s11564_s0 = inlined_call_operand.vmem [shape: f32[512,6], index: 0, kind: input, shape index: {}]   ;;  %s11565_s1 = inlined_call_operand.vmem [shape: f32[6,512], index: 1, kind: input, shape index: {}]   ;;  %s11566_s2 = inlined_call_operand.vmem [shape: f32[1,512], index: 2, kind: input, shape index: {}]   ;;  %s11567_s3 = inlined_call_operand.hbm [shape: bf16[512,512], index: 3, kind: input, shape index: {}]   ;;  %s11568_s4 = inlined_call_operand.vmem [shape: f32[1,512], index: 4, kind: input, shape index: {}]   ;;  %s11569_s5 = inlined_call_operand.hbm [shape: bf16[512,512], index: 5, kind: input, shape index: {}]   ;;  %s11570_s6 = inlined_call_operand.vmem [shape: f32[1,512], index: 6, kind: input, shape index: {}]   ;;  %s11571_s7 = inlined_call_operand.hbm [shape: bf16[512,384], index: 7, kind: input, shape index: {}]   ;;  %s11572_s8 = inlined_call_operand.vmem [shape: f32[1,384], index: 8, kind: input, shape index: {}]   ;;  %s11573_s9 = inlined_call_operand.hbm [shape: f32[512,384], index: 9, kind: output, shape index: {}]  }
   0x1   :  { %15 = vsyncpa [#allocation6], 0 }
   0x2   :  { %16 = vsyncpa [#allocation4], 0 }
   0x3   :  { %18 = vsyncpa [#allocation4 + $0x1], 0  ;;  %s8560_s30 = smov 0   ;;  %s8562_s10 = smov 0  }
   0x4   :  { %s8564_s11 = smov 0   ;;  %s8566_s12 = smov 0  }
   0x5 LB: > { %s8581_s13 = sadd.s32 4294967295, %s8497_s12   ;;  %s6842_s14 = sadd.s32 4294967294, %s8497_s12   ;;  %s8497_s12 = sphi %s8566_s12, %s11952_s12   ;;  %s8493_s11 = sphi %s8564_s11, %s11951_s11   ;;  %s8489_s10 = sphi %s8562_s10, %s11950_s10   ;;  %s8485_s30 = sphi %s8560_s30, %s11949_s30  }
   0x6   : > { %s8585_s15 = sadd.s32 1, %s8497_s12   ;;  %s225_s16 = sadd.s32 1, %s8493_s11 }
   0x7   : > { %s222_s17 = ssub.s32 %s8497_s12, %s8585_s15  ;;  %p235_p0 = scmp.ne.s32.totalorder %s8493_s11, %s8489_s10 }
   0x8   : > { %p223_p1 = scmp.eq.s32.totalorder %s222_s17, 0  ;;  %p236_p2 = scmp.eq.s32.totalorder %s8581_s13, 1 }
   0x9   : > { %p241_p3 = scmp.ne.s32.totalorder %s8489_s10, %s8485_s30  ;;  %p242_p4 = scmp.eq.s32.totalorder %s6842_s14, 1 }
   0xa   : > { %s8596_s18 = scalar_select %p223_p1, %s8493_s11, %s225_s16  }
   0xb   : > { %p8598_p5 = por %p236_p2, %p235_p0  ;;  %p8602_p6 = por %p242_p4, %p241_p3 }
   0xc   : > { %p6843_p7 = scmp.ge.s32.totalorder %s8497_s12, 1  ;;  %p249_p8 = scmp.lt.s32.totalorder %s8497_s12, 3 }
   0xd   : > { %s11662_s19 = scalar_select %p8598_p5, 1, 0 }
   0xe   : > { %s11663_s20 = scalar_select %p8602_p6, 1, 0 }
   0xf   : > { %p11574_p9 = scmp.eq.s32.totalorder %s8581_s13, 0  ;;  %p8609_p10 = pnand %p6843_p7, %p249_p8 }
  0x10   : > { %s8499_s22 = smov [#allocation5]   ;;  %s8500_s25 = smov [#allocation2]  }
  0x11   : > { %p7519_p11 = pneg %p8609_p10  ;;  %s283_s23 = sshll.u32 %s8499_s22, 4  ;;  %s284_s23 = int_to_ptr.vmem [resolvable:$true] %s283_s23 }
  0x12   : > { %s267_s26 = sshll.u32 %s8500_s25, 4  ;;  %s8501_s27 = smov [#allocation7]   ;;  %s268_s26 = int_to_ptr.vmem [resolvable:$true] %s267_s26 }
  0x13   : > { %p8617_p12 = pnand %p11574_p9, %p7519_p11  ;;  %s299_s28 = sshll.u32 %s8501_s27, 4  ;;  %s300_s28 = int_to_ptr.vmem [resolvable:$true] %s299_s28 }
  0x14   : > { %s8362_s29 = scalar_lea.vmem %s284_s23, 16384  ;;  %p8370_p3 = scmp.lt.s32.totalorder %s284_s23, %s284_s23 }
  0x15   : > { %p8353_p13 = pneg %p8617_p12  ;;  %p8363_p0 = scmp.ne.s32.totalorder %s284_s23, %s8362_s29 }
  0x16   : > { %p8371_p4 = scmp.lt.s32.totalorder %s8362_s29, %s8362_s29 }
  0x17   : > { %p8365_p1 = pnand %p8363_p0, %p8353_p13 }
  0x18   : > { %p8372_p7 = por %p8371_p4, %p8370_p3 }
  0x19   : > { %p8366_p2 = pneg %p8365_p1 }
  0x1b   : > { %p8373_p8 = pnand %p8372_p7, %p8366_p2 }
  0x1d   : > { %8376 = shalt.err (!%p8373_p8)
}
  0x1e   : > { %s8502_s14 = smov 256   ;;  %s8503_s16 = smov 16  }
  0x1f   : > { %7525 = dma.hbm_to_vmem [thread:$0]  (!%p8617_p12), %s11569_s5, 16384, %s284_s23, [#allocation6], %s8502_s14, %s8502_s14, %s8503_s16  }
  0x20   : > { %s8388_s25 = scalar_lea.vmem %s268_s26, 16384  ;;  %p8396_p9 = scmp.lt.s32.totalorder %s268_s26, %s268_s26 }
  0x21   : > { %p8389_p11 = scmp.ne.s32.totalorder %s268_s26, %s8388_s25  ;;  %p8397_p6 = scmp.lt.s32.totalorder %s8388_s25, %s8388_s25 }
  0x23   : > { %p8391_p0 = pnand %p8389_p11, %p8353_p13  ;;  %p8398_p3 = por %p8397_p6, %p8396_p9 }
  0x25   : > { %p8392_p1 = pneg %p8391_p0 }
  0x27   : > { %p8399_p2 = pnand %p8398_p3, %p8392_p1 }
  0x29   : > { %8402 = shalt.err (!%p8399_p2)
}
  0x2a   : > { %7522 = dma.hbm_to_vmem [thread:$0]  (!%p8617_p12), %s11567_s3, 16384, %s268_s26, [#allocation3], %s8502_s14, %s8502_s14, %s8503_s16  }
  0x2b   : > { %s8414_s23 = scalar_lea.vmem %s300_s28, 12288  ;;  %p8422_p11 = scmp.lt.s32.totalorder %s300_s28, %s300_s28 }
  0x2c   : > { %p8415_p4 = scmp.ne.s32.totalorder %s300_s28, %s8414_s23  ;;  %p8423_p0 = scmp.lt.s32.totalorder %s8414_s23, %s8414_s23 }
  0x2e   : > { %p8417_p7 = pnand %p8415_p4, %p8353_p13  ;;  %p8424_p5 = por %p8423_p0, %p8422_p11 }
  0x30   : > { %p8418_p8 = pneg %p8417_p7 }
  0x32   : > { %p8425_p6 = pnand %p8424_p5, %p8418_p8 }
  0x34   : > { %8428 = shalt.err (!%p8425_p6)
}
  0x35   : > { %s8504_s17 = smov 192   ;;  %s8505_s22 = smov 12  }
  0x36   : > { %7528 = dma.hbm_to_vmem [thread:$0]  (!%p8617_p12), %s11571_s7, 12288, %s300_s28, [#allocation6], %s8504_s17, %s8504_s17, %s8505_s22  }
  0x37   : > { %327 = sbr.rel (%p8609_p10) target bundleno = 1429 (0x595), region = 56 }
  0x3c   : > { %p11666_p9 = scmp.eq.s32.totalorder %s8581_s13, 0 }
  0x3e   : > { %8472 = dma.done.wait (%p11666_p9), [#allocation3], 16384   ;;  %p11667_p13 = pmov %p11666_p9 }
  0x3f   : > { %p11668_p5 = pmov %p11666_p9 }
  0x40   : > { %8474 = vsyncadd (%p11667_p13), [#allocation3], 4294950912 }
  0x41   : > { %8476 = dma.done.wait (%p11668_p5), [#allocation6], 28672   ;;  %p11669_p1 = pmov %p11668_p5 }
  0x42   : > { %s6852_s24 = sshll.u32 %s8581_s13, 5  ;;  %v8506_v0 = vmov 0.0   ;;  %vm534_vm0 = vcmask 1045504   ;;  %vm437_vm1 = vcmask 48128   ;;  %v412_v1 = vld [vmem:[%s11565_s1 + $0x8] sm:$0x3f] }
  0x43   : > { %8478 = vsyncadd (%p11669_p1), [#allocation6], 4294938624  ;;  %611 = vmatprep.mubr.f32.mxu0 %v8506_v0  ;;  %868 = vmatprep.mubr.f32.mxu1 %v8506_v0  ;;  %p372_p10 = scmp.lt.s32.totalorder %s6852_s24, 63  ;;  %v414_v2 = vld [vmem:[%s11565_s1 + $0x18] sm:$0x3f]  ;;  %s368_s27 = sand.u32 1, %s8489_s10  }
  0x44   : > { %v411_v3 = vld [vmem:[%s11565_s1] sm:$0x3f]  ;;  %6854 = vmatprep.subr.msk.mxu0 %vm534_vm0, %v412_v1  ;;  %6888 = vmatprep.subr.msk.mxu1 %vm534_vm0, %v414_v2  ;;  %v413_v4 = vld [vmem:[%s11565_s1 + $0x10] sm:$0x3f]  ;;  %s7504_s26 = smul.u32 12288, %s8581_s13  ;;  %s11524_s13 = scalar_lea.sflag [#allocation4], %s368_s27 }
  0x45   : > { %s11954_s24 = smov (!%p372_p10, %s6852_s24), 63  ;;  %6855 = vmatpush1.msk.msra.mxu0 %vm534_vm0, %v411_v3  ;;  %6889 = vmatpush1.msk.msra.mxu1 %vm534_vm0, %v413_v4  ;;  %v7582_v8 = vld [vmem:[#allocation2 + $0xe0] ss:$16 sps:$4 sm:$0xff]   ;;  %v7584_v9 = vld [vmem:[#allocation2 + $0xe4] ss:$16 sps:$4 sm:$0xff]   ;;  %p11947_p3 = scmp.ne.s32.totalorder %s11662_s19, 0 }
  0x46   : > { %s6853_s21 = sshll.u32 %s11954_s24, 3  ;;  %v7585_v10 = vld [vmem:[#allocation2 + $0x2e0] ss:$16 sps:$4 sm:$0xff]   ;;  %v7587_v11 = vld [vmem:[#allocation2 + $0x2e4] ss:$16 sps:$4 sm:$0xff]   ;;  %2043 = vmatprep.subr.bf16.mxu0 %v7584_v9  ;;  %s7503_s24 = smul.u32 768, %s368_s27 }
  0x47   : > { %s8663_s14 = scalar_lea.vmem %s11564_s0, %s6853_s21  ;;  %2236 = vmatprep.subr.bf16.mxu1 %v7587_v11  ;;  %v7588_v13 = vld [vmem:[#allocation2 + $0xc0] ss:$16 sps:$4 sm:$0xff]   ;;  %v7590_v14 = vld [vmem:[#allocation2 + $0xc4] ss:$16 sps:$4 sm:$0xff]   ;;  %s11517_s29 = scalar_lea.hbm %s11573_s9, %s7504_s26 }
  0x48   : > { %v379_v5 = vld [vmem:[%s8663_s14] sm:$0xff]  ;;  %v380_v6 = vld [vmem:[%s8663_s14 + $0x8] sm:$0xff]  ;;  %v381_v7 = vld [vmem:[%s8663_s14 + $0x10] sm:$0xff]  ;;  %s11101_s21 = scalar_lea.vmem [#allocation8], %s7503_s24  ;;  %s8507_s17 = smov [#allocation8]  }
  0x49   : > { %6856 = vmatmul.mubr.msk.f32.vlgmr.msra.gmra.mxu0 %vm437_vm1, %v379_v5  ;;  %6890 = vmatmul.mubr.msk.f32.vlgmr.msra.gmra.mxu1 %vm437_vm1, %v379_v5  ;;  %v382_v12 = vld [vmem:[%s8663_s14 + $0x18] sm:$0xff]  ;;  %v7591_v15 = vld [vmem:[#allocation2 + $0x2c0] ss:$16 sps:$4 sm:$0xff]   ;;  %v7593_v16 = vld [vmem:[#allocation2 + $0x2c4] ss:$16 sps:$4 sm:$0xff]   ;;  %s6749_s28 = sshll.u32 %s11101_s21, 4  ;;  %s11519_s28 = int_to_ptr.vmem [resolvable:$true] %s6749_s28 }
  0x4a   : > { %617 = vmatprep.mubr.f32.mxu0 %v8506_v0  ;;  %874 = vmatprep.mubr.f32.mxu1 %v8506_v0  ;;  %v383_v17 = vld [vmem:[%s8663_s14 + $0x20] sm:$0xff]  ;;  %v384_v22 = vld [vmem:[%s8663_s14 + $0x28] sm:$0xff]  ;;  %v385_v27 = vld [vmem:[%s8663_s14 + $0x30] sm:$0xff]  ;;  %s8429_s23 = scalar_lea.vmem %s11519_s28, 12288  ;;  %s8433_s22 = sshll.u32 %s8507_s17, 4  ;;  %s8434_s22 = int_to_ptr.vmem [resolvable:$false] %s8433_s22 }
  0x4b   : > { %2044 = vmatpush1.bf16.msra.mxu0 %v7582_v8  ;;  %2237 = vmatpush1.bf16.msra.mxu1 %v7585_v10  ;;  %v7596_v18 = vld [vmem:[#allocation2 + $0xa4] ss:$16 sps:$4 sm:$0xff]   ;;  %v7594_v19 = vld [vmem:[#allocation2 + $0xa0] ss:$16 sps:$4 sm:$0xff]   ;;  %v386_v32 = vld [vmem:[%s8663_s14 + $0x38] sm:$0xff]  ;;  %p8430_p12 = scmp.ne.s32.totalorder %s11519_s28, %s8429_s23  ;;  %s8435_s25 = scalar_lea.vmem %s8434_s22, 24576 }
  0x4c   : > { %2045 = vmatprep.subr.bf16.mxu0 %v7590_v14  ;;  %2238 = vmatprep.subr.bf16.mxu1 %v7593_v16  ;;  %v7597_v20 = vld [vmem:[#allocation2 + $0x2a0] ss:$16 sps:$4 sm:$0xff]   ;;  %v7599_v21 = vld [vmem:[#allocation2 + $0x2a4] ss:$16 sps:$4 sm:$0xff]   ;;  %v388_v42 = vld [vmem:[%s8663_s14 + $0x48] sm:$0xff]  ;;  %p8436_p7 = scmp.lt.s32.totalorder %s11519_s28, %s8434_s22  ;;  %p8437_p8 = scmp.lt.s32.totalorder %s8435_s25, %s8429_s23 }
  0x4d   : > { %6857 = vmatmul.mubr.msk.f32.gmra.mxu0 %vm437_vm1, %v380_v6  ;;  %6891 = vmatmul.mubr.msk.f32.gmra.mxu1 %vm437_vm1, %v380_v6  ;;  %v7600_v23 = vld [vmem:[#allocation2 + $0x80] ss:$16 sps:$4 sm:$0xff]   ;;  %v7602_v24 = vld [vmem:[#allocation2 + $0x84] ss:$16 sps:$4 sm:$0xff]   ;;  %v390_v52 = vld [vmem:[%s8663_s14 + $0x58] sm:$0xff]  ;;  %p8431_p2 = pnand %p8430_p12, %p11947_p3 }
  0x4e   : > { %623 = vmatprep.mubr.f32.mxu0 %v8506_v0  ;;  %880 = vmatprep.mubr.f32.mxu1 %v8506_v0  ;;  %v7605_v25 = vld [vmem:[#allocation2 + $0x284] ss:$16 sps:$4 sm:$0xff]   ;;  %v7603_v26 = vld [vmem:[#allocation2 + $0x280] ss:$16 sps:$4 sm:$0xff]   ;;  %v392_v62 = vld [vmem:[%s8663_s14 + $0x68] sm:$0xff]  ;;  %p8438_p11 = por %p8437_p8, %p8436_p7 }
  0x4f   : > { %2046 = vmatpush1.bf16.msra.mxu0 %v7588_v13  ;;  %2239 = vmatpush1.bf16.msra.mxu1 %v7591_v15  ;;  %v7608_v28 = vld [vmem:[#allocation2 + $0x64] ss:$16 sps:$4 sm:$0xff]   ;;  %v7606_v30 = vld [vmem:[#allocation2 + $0x60] ss:$16 sps:$4 sm:$0xff]   ;;  %v394_v9 = vld [vmem:[%s8663_s14 + $0x78] sm:$0xff]  ;;  %p8432_p4 = pneg %p8431_p2 }
  0x50   : > { %2047 = vmatprep.subr.bf16.mxu0 %v7596_v18  ;;  %2240 = vmatprep.subr.bf16.mxu1 %v7599_v21  ;;  %v7611_v29 = vld [vmem:[#allocation2 + $0x264] ss:$16 sps:$4 sm:$0xff]   ;;  %v7609_v31 = vld [vmem:[#allocation2 + $0x260] ss:$16 sps:$4 sm:$0xff]   ;;  %v396_v11 = vld [vmem:[%s8663_s14 + $0x88] sm:$0xff] }
  0x51   : > { %6858 = vmatmul.mubr.msk.f32.gmra.mxu0 %vm437_vm1, %v381_v7  ;;  %6892 = vmatmul.mubr.msk.f32.gmra.mxu1 %vm437_vm1, %v381_v7  ;;  %v7614_v33 = vld [vmem:[#allocation2 + $0x44] ss:$16 sps:$4 sm:$0xff]   ;;  %v7612_v35 = vld [vmem:[#allocation2 + $0x40] ss:$16 sps:$4 sm:$0xff]   ;;  %p8439_p0 = pnand %p8438_p11, %p8432_p4 }
  0x52   : > { %629 = vmatprep.mubr.f32.mxu0 %v8506_v0  ;;  %886 = vmatprep.mubr.f32.mxu1 %v8506_v0  ;;  %v7617_v34 = vld [vmem:[#allocation2 + $0x244] ss:$16 sps:$4 sm:$0xff]   ;;  %v7615_v36 = vld [vmem:[#allocation2 + $0x240] ss:$16 sps:$4 sm:$0xff]  }
  0x53   : > { %2048 = vmatpush1.bf16.msra.mxu0 %v7594_v19  ;;  %2241 = vmatpush1.bf16.msra.mxu1 %v7597_v20  ;;  %v387_v37 = vld [vmem:[%s8663_s14 + $0x40] sm:$0xff]  ;;  %v389_v47 = vld [vmem:[%s8663_s14 + $0x50] sm:$0xff] }
  0x54   : > { %2049 = vmatprep.subr.bf16.mxu0 %v7602_v24  ;;  %2242 = vmatprep.subr.bf16.mxu1 %v7605_v25  ;;  %v7620_v38 = vld [vmem:[#allocation2 + $0x24] ss:$16 sps:$4 sm:$0xff]   ;;  %v7618_v40 = vld [vmem:[#allocation2 + $0x20] ss:$16 sps:$4 sm:$0xff]  }
  0x55   : > { %6859 = vmatmul.mubr.msk.f32.gmra.mxu0 %vm437_vm1, %v382_v12  ;;  %6893 = vmatmul.mubr.msk.f32.gmra.mxu1 %vm437_vm1, %v382_v12  ;;  %v7623_v39 = vld [vmem:[#allocation2 + $0x224] ss:$16 sps:$4 sm:$0xff]   ;;  %v7621_v41 = vld [vmem:[#allocation2 + $0x220] ss:$16 sps:$4 sm:$0xff]  }
  0x56   : > { %635 = vmatprep.mubr.f32.mxu0 %v8506_v0  ;;  %892 = vmatprep.mubr.f32.mxu1 %v8506_v0  ;;  %v7626_v43 = vld [vmem:[#allocation2 + $0x4] ss:$16 sps:$4 sm:$0xff]   ;;  %v7624_v45 = vld [vmem:[#allocation2] ss:$16 sps:$4 sm:$0xff]  }
  0x57   : > { %2050 = vmatpush1.bf16.msra.mxu0 %v7600_v23  ;;  %2243 = vmatpush1.bf16.msra.mxu1 %v7603_v26  ;;  %v7629_v44 = vld [vmem:[#allocation2 + $0x204] ss:$16 sps:$4 sm:$0xff]   ;;  %v7627_v46 = vld [vmem:[#allocation2 + $0x200] ss:$16 sps:$4 sm:$0xff]   ;;  %v400_v23 = vld [vmem:[%s8663_s14 + $0xa8] sm:$0xff] }
  0x58   : > { %2051 = vmatprep.subr.bf16.mxu0 %v7608_v28  ;;  %2244 = vmatprep.subr.bf16.mxu1 %v7611_v29  ;;  %v7632_v48 = vld [vmem:[#allocation2 + $0x1e4] ss:$16 sps:$4 sm:$0xff]   ;;  %v7630_v50 = vld [vmem:[#allocation2 + $0x1e0] ss:$16 sps:$4 sm:$0xff]   ;;  %v402_v29 = vld [vmem:[%s8663_s14 + $0xb8] sm:$0xff] }
  0x59   : > { %6860 = vmatmul.mubr.msk.f32.gmra.mxu0 %vm437_vm1, %v383_v17  ;;  %6894 = vmatmul.mubr.msk.f32.gmra.mxu1 %vm437_vm1, %v383_v17  ;;  %v7635_v49 = vld [vmem:[#allocation2 + $0x3e4] ss:$16 sps:$4 sm:$0xff]   ;;  %v7633_v51 = vld [vmem:[#allocation2 + $0x3e0] ss:$16 sps:$4 sm:$0xff]   ;;  %v398_v17 = vld [vmem:[%s8663_s14 + $0x98] sm:$0xff] }
  0x5a   : > { %641 = vmatprep.mubr.f32.mxu0 %v8506_v0  ;;  %898 = vmatprep.mubr.f32.mxu1 %v8506_v0  ;;  %v7638_v53 = vld [vmem:[#allocation2 + $0x1c4] ss:$16 sps:$4 sm:$0xff]   ;;  %v7636_v56 = vld [vmem:[#allocation2 + $0x1c0] ss:$16 sps:$4 sm:$0xff]  }
  0x5b   : > { %2052 = vmatpush1.bf16.msra.mxu0 %v7606_v30  ;;  %2245 = vmatpush1.bf16.msra.mxu1 %v7609_v31  ;;  %v7641_v54 = vld [vmem:[#allocation2 + $0x3c4] ss:$16 sps:$4 sm:$0xff]   ;;  %v7639_v57 = vld [vmem:[#allocation2 + $0x3c0] ss:$16 sps:$4 sm:$0xff]   ;;  %v7680_v31 = vld [vmem:[#allocation2 + $0xec] ss:$16 sps:$4 sm:$0xff]  }
  0x5c   : > { %2053 = vmatprep.subr.bf16.mxu0 %v7614_v33  ;;  %2246 = vmatprep.subr.bf16.mxu1 %v7617_v34  ;;  %v391_v55 = vld [vmem:[%s8663_s14 + $0x60] sm:$0xff]  ;;  %v393_v4 = vld [vmem:[%s8663_s14 + $0x70] sm:$0xff]  ;;  %v404_v33 = vld [vmem:[%s8663_s14 + $0xc8] sm:$0xff] }
  0x5d   : > { %6861 = vmatmul.mubr.msk.f32.gmra.mxu0 %vm437_vm1, %v384_v22  ;;  %6895 = vmatmul.mubr.msk.f32.gmra.mxu1 %vm437_vm1, %v384_v22  ;;  %v7644_v58 = vld [vmem:[#allocation2 + $0x1a4] ss:$16 sps:$4 sm:$0xff]   ;;  %v7642_v60 = vld [vmem:[#allocation2 + $0x1a0] ss:$16 sps:$4 sm:$0xff]  }
  0x5e   : > { %647 = vmatprep.mubr.f32.mxu0 %v8506_v0  ;;  %904 = vmatprep.mubr.f32.mxu1 %v8506_v0  ;;  %v7647_v59 = vld [vmem:[#allocation2 + $0x3a4] ss:$16 sps:$4 sm:$0xff]   ;;  %v7645_v61 = vld [vmem:[#allocation2 + $0x3a0] ss:$16 sps:$4 sm:$0xff]  }
  0x5f   : > { %2054 = vmatpush1.bf16.msra.mxu0 %v7612_v35  ;;  %2247 = vmatpush1.bf16.msra.mxu1 %v7615_v36  ;;  %v7650_v63 = vld [vmem:[#allocation2 + $0x184] ss:$16 sps:$4 sm:$0xff]   ;;  %v7648_v2 = vld [vmem:[#allocation2 + $0x180] ss:$16 sps:$4 sm:$0xff]   ;;  %v406_v35 = vld [vmem:[%s8663_s14 + $0xd8] sm:$0xff] }
  0x60   : > { %2055 = vmatprep.subr.bf16.mxu0 %v7620_v38  ;;  %2248 = vmatprep.subr.bf16.mxu1 %v7623_v39  ;;  %v7653_v1 = vld [vmem:[#allocation2 + $0x384] ss:$16 sps:$4 sm:$0xff]   ;;  %v7651_v3 = vld [vmem:[#allocation2 + $0x380] ss:$16 sps:$4 sm:$0xff]   ;;  %v410_v39 = vld [vmem:[%s8663_s14 + $0xf8] sm:$0xff] }
  0x61   : > { %6862 = vmatmul.mubr.msk.f32.gmra.mxu0 %vm437_vm1, %v385_v27  ;;  %6896 = vmatmul.mubr.msk.f32.gmra.mxu1 %vm437_vm1, %v385_v27  ;;  %v7656_v5 = vld [vmem:[#allocation2 + $0x164] ss:$16 sps:$4 sm:$0xff]   ;;  %v7654_v7 = vld [vmem:[#allocation2 + $0x160] ss:$16 sps:$4 sm:$0xff]  }
  0x62   : > { %653 = vmatprep.mubr.f32.mxu0 %v8506_v0  ;;  %910 = vmatprep.mubr.f32.mxu1 %v8506_v0  ;;  %v7659_v6 = vld [vmem:[#allocation2 + $0x364] ss:$16 sps:$4 sm:$0xff]   ;;  %v7657_v8 = vld [vmem:[#allocation2 + $0x360] ss:$16 sps:$4 sm:$0xff]  }
  0x63   : > { %2056 = vmatpush1.bf16.msra.mxu0 %v7618_v40  ;;  %2249 = vmatpush1.bf16.msra.mxu1 %v7621_v41  ;;  %v395_v10 = vld [vmem:[%s8663_s14 + $0x80] sm:$0xff]  ;;  %v397_v12 = vld [vmem:[%s8663_s14 + $0x90] sm:$0xff]  ;;  %v417_v40 = vlaneseq }
  0x64   : > { %2057 = vmatprep.subr.bf16.mxu0 %v7626_v43  ;;  %2250 = vmatprep.subr.bf16.mxu1 %v7629_v44  ;;  %v7660_v13 = vld [vmem:[#allocation2 + $0x140] ss:$16 sps:$4 sm:$0xff]   ;;  %v7662_v14 = vld [vmem:[#allocation2 + $0x144] ss:$16 sps:$4 sm:$0xff]  }
  0x65   : > { %6863 = vmatmul.mubr.msk.f32.gmra.mxu0 %vm437_vm1, %v386_v32  ;;  %6897 = vmatmul.mubr.msk.f32.gmra.mxu1 %vm437_vm1, %v386_v32  ;;  %v7663_v15 = vld [vmem:[#allocation2 + $0x340] ss:$16 sps:$4 sm:$0xff]   ;;  %v7665_v16 = vld [vmem:[#allocation2 + $0x344] ss:$16 sps:$4 sm:$0xff]   ;;  %v7683_v32 = vld [vmem:[#allocation2 + $0x2ec] ss:$16 sps:$4 sm:$0xff]  }
  0x66   : > { %659 = vmatprep.mubr.f32.mxu0 %v8506_v0  ;;  %916 = vmatprep.mubr.f32.mxu1 %v8506_v0  ;;  %v399_v18 = vld [vmem:[%s8663_s14 + $0xa0] sm:$0xff]  ;;  %v401_v24 = vld [vmem:[%s8663_s14 + $0xb0] sm:$0xff]  ;;  %v418_v41 = vshrl.u32 %v417_v40, 7 }
  0x67   : > { %2058 = vmatpush1.bf16.msra.mxu0 %v7624_v45  ;;  %2251 = vmatpush1.bf16.msra.mxu1 %v7627_v46  ;;  %v7666_v19 = vld [vmem:[#allocation2 + $0x120] ss:$16 sps:$4 sm:$0xff]   ;;  %v7668_v20 = vld [vmem:[#allocation2 + $0x124] ss:$16 sps:$4 sm:$0xff]  }
  0x68   : > { %2059 = vmatprep.subr.bf16.mxu0 %v7632_v48  ;;  %2252 = vmatprep.subr.bf16.mxu1 %v7635_v49  ;;  %v7669_v21 = vld [vmem:[#allocation2 + $0x320] ss:$16 sps:$4 sm:$0xff]   ;;  %v7671_v22 = vld [vmem:[#allocation2 + $0x324] ss:$16 sps:$4 sm:$0xff]   ;;  %v8840_v44 = vsub.s32 1, %v418_v41  ;;  %v8842_v45 = vsub.s32 3, %v418_v41 }
  0x69   : > { %6864 = vmatmul.mubr.msk.f32.gmra.mxu0 %vm437_vm1, %v387_v37  ;;  %6898 = vmatmul.mubr.msk.f32.gmra.mxu1 %vm437_vm1, %v387_v37  ;;  %v7672_v25 = vld [vmem:[#allocation2 + $0x100] ss:$16 sps:$4 sm:$0xff]   ;;  %v7674_v26 = vld [vmem:[#allocation2 + $0x104] ss:$16 sps:$4 sm:$0xff]   ;;  %v408_v37 = vld [vmem:[%s8663_s14 + $0xe8] sm:$0xff] }
  0x6a   : > { %665 = vmatprep.mubr.f32.mxu0 %v8506_v0  ;;  %922 = vmatprep.mubr.f32.mxu1 %v8506_v0  ;;  %v7677_v27 = vld [vmem:[#allocation2 + $0x304] ss:$16 sps:$4 sm:$0xff]   ;;  %v7675_v28 = vld [vmem:[#allocation2 + $0x300] ss:$16 sps:$4 sm:$0xff]   ;;  %11671 = vst [vmem:[#allocation13_spill] sm:$0xff] %v8840_v44  ;;  %11672 = vst [vmem:[#allocation14_spill] sm:$0xff] %v8842_v45 }
  0x6b   : > { %2060 = vmatpush2.bf16.msra.mxu0 %v7630_v50  ;;  %2253 = vmatpush2.bf16.msra.mxu1 %v7633_v51  ;;  %v403_v30 = vld [vmem:[%s8663_s14 + $0xc0] sm:$0xff]  ;;  %v405_v34 = vld [vmem:[%s8663_s14 + $0xd0] sm:$0xff] }
  0x6c   : > { %2061 = vmatprep.subr.bf16.mxu0 %v7638_v53  ;;  %2254 = vmatprep.subr.bf16.mxu1 %v7641_v54  ;;  %v407_v36 = vld [vmem:[%s8663_s14 + $0xe0] sm:$0xff]  ;;  %v409_v38 = vld [vmem:[%s8663_s14 + $0xf0] sm:$0xff] }
  0x6d   : > { %6865 = vmatmul.mubr.msk.f32.gmra.mxu0 %vm437_vm1, %v388_v42  ;;  %6899 = vmatmul.mubr.msk.f32.gmra.mxu1 %vm437_vm1, %v388_v42  ;;  %v8835_v42 = vsub.s32 0, %v418_v41  ;;  %v415_v43 = vld [vmem:[%s11566_s2] sm:$0xf] }
  0x6e   : > { %671 = vmatprep.mubr.f32.mxu0 %v8506_v0  ;;  %928 = vmatprep.mubr.f32.mxu1 %v8506_v0  ;;  %v8853_v48 = vrot.slane %v415_v43, %v8842_v45 }
  0x6f   : > { %2062 = vmatpush2.bf16.msra.mxu0 %v7636_v56  ;;  %2255 = vmatpush2.bf16.msra.mxu1 %v7639_v57  ;;  %11670 = vst [vmem:[#allocation12_spill] sm:$0xff] %v8835_v42  ;;  %v8845_v46 = vrot.slane %v415_v43, %v8835_v42 }
  0x70   : > { %2063 = vmatprep.subr.bf16.mxu0 %v7644_v58  ;;  %2256 = vmatprep.subr.bf16.mxu1 %v7647_v59 }
  0x71   : > { %6866 = vmatmul.mubr.msk.f32.gmra.mxu0 %vm437_vm1, %v389_v47  ;;  %6900 = vmatmul.mubr.msk.f32.gmra.mxu1 %vm437_vm1, %v389_v47  ;;  %v8850_v47 = vrot.slane %v415_v43, %v8840_v44 }
  0x72   : > { %677 = vmatprep.mubr.f32.mxu0 %v8506_v0  ;;  %934 = vmatprep.mubr.f32.mxu1 %v8506_v0 }
  0x73   : > { %2064 = vmatpush2.bf16.msra.mxu0 %v7642_v60  ;;  %2257 = vmatpush2.bf16.msra.mxu1 %v7645_v61 }
  0x74   : > { %2065 = vmatprep.subr.bf16.mxu0 %v7650_v63  ;;  %2258 = vmatprep.subr.bf16.mxu1 %v7653_v1 }
  0x75   : > { %6867 = vmatmul.mubr.msk.f32.gmra.mxu0 %vm437_vm1, %v390_v52  ;;  %6901 = vmatmul.mubr.msk.f32.gmra.mxu1 %vm437_vm1, %v390_v52 }
  0x76   : > { %683 = vmatprep.mubr.f32.mxu0 %v8506_v0  ;;  %940 = vmatprep.mubr.f32.mxu1 %v8506_v0 }
  0x77   : > { %2066 = vmatpush2.bf16.msra.mxu0 %v7648_v2  ;;  %2259 = vmatpush2.bf16.msra.mxu1 %v7651_v3 }
  0x78   : > { %2067 = vmatprep.subr.bf16.mxu0 %v7656_v5  ;;  %2260 = vmatprep.subr.bf16.mxu1 %v7659_v6 }
  0x79   : > { %6868 = vmatmul.mubr.msk.f32.gmra.mxu0 %vm437_vm1, %v391_v55  ;;  %6902 = vmatmul.mubr.msk.f32.gmra.mxu1 %vm437_vm1, %v391_v55 }
  0x7a   : > { %689 = vmatprep.mubr.f32.mxu0 %v8506_v0  ;;  %946 = vmatprep.mubr.f32.mxu1 %v8506_v0 }
  0x7b   : > { %2068 = vmatpush2.bf16.msra.mxu0 %v7654_v7  ;;  %2261 = vmatpush2.bf16.msra.mxu1 %v7657_v8 }
  0x7c   : > { %2069 = vmatprep.subr.bf16.mxu0 %v7662_v14  ;;  %2262 = vmatprep.subr.bf16.mxu1 %v7665_v16 }
  0x7d   : > { %6869 = vmatmul.mubr.msk.f32.gmra.mxu0 %vm437_vm1, %v392_v62  ;;  %6903 = vmatmul.mubr.msk.f32.gmra.mxu1 %vm437_vm1, %v392_v62 }
  0x7e   : > { %695 = vmatprep.mubr.f32.mxu0 %v8506_v0  ;;  %952 = vmatprep.mubr.f32.mxu1 %v8506_v0 }
  0x7f   : > { %2070 = vmatpush2.bf16.msra.mxu0 %v7660_v13  ;;  %2263 = vmatpush2.bf16.msra.mxu1 %v7663_v15 }
  0x80   : > { %2071 = vmatprep.subr.bf16.mxu0 %v7668_v20  ;;  %2264 = vmatprep.subr.bf16.mxu1 %v7671_v22 }
  0x81   : > { %6870 = vmatmul.mubr.msk.f32.gmra.mxu0 %vm437_vm1, %v393_v4  ;;  %6904 = vmatmul.mubr.msk.f32.gmra.mxu1 %vm437_vm1, %v393_v4 }
  0x82   : > { %701 = vmatprep.mubr.f32.mxu0 %v8506_v0  ;;  %958 = vmatprep.mubr.f32.mxu1 %v8506_v0 }
  0x83   : > { %2072 = vmatpush2.bf16.msra.mxu0 %v7666_v19  ;;  %2265 = vmatpush2.bf16.msra.mxu1 %v7669_v21 }
  0x84   : > { %2073 = vmatprep.subr.bf16.mxu0 %v7674_v26  ;;  %2266 = vmatprep.subr.bf16.mxu1 %v7677_v27 }
  0x85   : > { %6871 = vmatmul.mubr.msk.f32.gmra.mxu0 %vm437_vm1, %v394_v9  ;;  %6905 = vmatmul.mubr.msk.f32.gmra.mxu1 %vm437_vm1, %v394_v9 }
  0x86   : > { %707 = vmatprep.mubr.f32.mxu0 %v8506_v0  ;;  %964 = vmatprep.mubr.f32.mxu1 %v8506_v0 }
  0x87   : > { %2074 = vmatpush2.bf16.msra.mxu0 %v7672_v25  ;;  %2267 = vmatpush2.bf16.msra.mxu1 %v7675_v28 }
  0x88   : > { %2429 = vmatprep.subr.bf16.mxu0 %v7680_v31  ;;  %2622 = vmatprep.subr.bf16.mxu1 %v7683_v32 }
  0x89   : > { %6872 = vmatmul.mubr.msk.f32.gmra.mxu0 %vm437_vm1, %v395_v10  ;;  %6906 = vmatmul.mubr.msk.f32.gmra.mxu1 %vm437_vm1, %v395_v10 }
  0x8a   : > { %713 = vmatprep.mubr.f32.mxu0 %v8506_v0  ;;  %970 = vmatprep.mubr.f32.mxu1 %v8506_v0 }
  0x8d   : > { %6873 = vmatmul.mubr.msk.f32.gmra.mxu0 %vm437_vm1, %v396_v11  ;;  %6907 = vmatmul.mubr.msk.f32.gmra.mxu1 %vm437_vm1, %v396_v11 }
  0x8e   : > { %719 = vmatprep.mubr.f32.mxu0 %v8506_v0  ;;  %976 = vmatprep.mubr.f32.mxu1 %v8506_v0 }
  0x91   : > { %6874 = vmatmul.mubr.msk.f32.gmra.mxu0 %vm437_vm1, %v397_v12  ;;  %6908 = vmatmul.mubr.msk.f32.gmra.mxu1 %vm437_vm1, %v397_v12 }
  0x92   : > { %725 = vmatprep.mubr.f32.mxu0 %v8506_v0  ;;  %982 = vmatprep.mubr.f32.mxu1 %v8506_v0 }
  0x95   : > { %6875 = vmatmul.mubr.msk.f32.gmra.mxu0 %vm437_vm1, %v398_v17  ;;  %6909 = vmatmul.mubr.msk.f32.gmra.mxu1 %vm437_vm1, %v398_v17 }
  0x96   : > { %731 = vmatprep.mubr.f32.mxu0 %v8506_v0  ;;  %988 = vmatprep.mubr.f32.mxu1 %v8506_v0 }
  0x99   : > { %6876 = vmatmul.mubr.msk.f32.gmra.mxu0 %vm437_vm1, %v399_v18  ;;  %6910 = vmatmul.mubr.msk.f32.gmra.mxu1 %vm437_vm1, %v399_v18 }
  0x9a   : > { %737 = vmatprep.mubr.f32.mxu0 %v8506_v0  ;;  %994 = vmatprep.mubr.f32.mxu1 %v8506_v0 }
  0x9d   : > { %6877 = vmatmul.mubr.msk.f32.gmra.mxu0 %vm437_vm1, %v400_v23  ;;  %6911 = vmatmul.mubr.msk.f32.gmra.mxu1 %vm437_vm1, %v400_v23 }
  0x9e   : > { %743 = vmatprep.mubr.f32.mxu0 %v8506_v0  ;;  %1000 = vmatprep.mubr.f32.mxu1 %v8506_v0 }
  0xa1   : > { %6878 = vmatmul.mubr.msk.f32.gmra.mxu0 %vm437_vm1, %v401_v24  ;;  %6912 = vmatmul.mubr.msk.f32.gmra.mxu1 %vm437_vm1, %v401_v24 }
  0xa2   : > { %749 = vmatprep.mubr.f32.mxu0 %v8506_v0  ;;  %1006 = vmatprep.mubr.f32.mxu1 %v8506_v0 }
  0xa5   : > { %6879 = vmatmul.mubr.msk.f32.gmra.mxu0 %vm437_vm1, %v402_v29  ;;  %6913 = vmatmul.mubr.msk.f32.gmra.mxu1 %vm437_vm1, %v402_v29 }
  0xa6   : > { %755 = vmatprep.mubr.f32.mxu0 %v8506_v0  ;;  %1012 = vmatprep.mubr.f32.mxu1 %v8506_v0 }
  0xa9   : > { %6880 = vmatmul.mubr.msk.f32.gmra.mxu0 %vm437_vm1, %v403_v30  ;;  %6914 = vmatmul.mubr.msk.f32.gmra.mxu1 %vm437_vm1, %v403_v30 }
  0xaa   : > { %761 = vmatprep.mubr.f32.mxu0 %v8506_v0  ;;  %1018 = vmatprep.mubr.f32.mxu1 %v8506_v0 }
  0xad   : > { %6881 = vmatmul.mubr.msk.f32.gmra.mxu0 %vm437_vm1, %v404_v33  ;;  %6915 = vmatmul.mubr.msk.f32.gmra.mxu1 %vm437_vm1, %v404_v33 }
  0xae   : > { %767 = vmatprep.mubr.f32.mxu0 %v8506_v0  ;;  %1024 = vmatprep.mubr.f32.mxu1 %v8506_v0 }
  0xb1   : > { %6882 = vmatmul.mubr.msk.f32.gmra.mxu0 %vm437_vm1, %v405_v34  ;;  %6916 = vmatmul.mubr.msk.f32.gmra.mxu1 %vm437_vm1, %v405_v34 }
  0xb2   : > { %773 = vmatprep.mubr.f32.mxu0 %v8506_v0  ;;  %1030 = vmatprep.mubr.f32.mxu1 %v8506_v0 }
  0xb5   : > { %6883 = vmatmul.mubr.msk.f32.gmra.mxu0 %vm437_vm1, %v406_v35  ;;  %6917 = vmatmul.mubr.msk.f32.gmra.mxu1 %vm437_vm1, %v406_v35 }
  0xb6   : > { %779 = vmatprep.mubr.f32.mxu0 %v8506_v0  ;;  %1036 = vmatprep.mubr.f32.mxu1 %v8506_v0 }
  0xb9   : > { %6884 = vmatmul.mubr.msk.f32.gmra.mxu0 %vm437_vm1, %v407_v36  ;;  %6918 = vmatmul.mubr.msk.f32.gmra.mxu1 %vm437_vm1, %v407_v36 }
  0xba   : > { %785 = vmatprep.mubr.f32.mxu0 %v8506_v0  ;;  %1042 = vmatprep.mubr.f32.mxu1 %v8506_v0 }
  0xbd   : > { %6885 = vmatmul.mubr.msk.f32.gmra.mxu0 %vm437_vm1, %v408_v37  ;;  %6919 = vmatmul.mubr.msk.f32.gmra.mxu1 %vm437_vm1, %v408_v37 }
  0xbe   : > { %791 = vmatprep.mubr.f32.mxu0 %v8506_v0  ;;  %1048 = vmatprep.mubr.f32.mxu1 %v8506_v0 }
  0xc1   : > { %6886 = vmatmul.mubr.msk.f32.gmra.mxu0 %vm437_vm1, %v409_v38  ;;  %6920 = vmatmul.mubr.msk.f32.gmra.mxu1 %vm437_vm1, %v409_v38 }
  0xc2   : > { %797 = vmatprep.mubr.f32.mxu0 %v8506_v0  ;;  %1054 = vmatprep.mubr.f32.mxu1 %v8506_v0  ;;  %v8847_v0 = vsub.s32 2, %v418_v41 }
  0xc4   : > { %11673 = vst [vmem:[#allocation15_spill] sm:$0xff] %v8847_v0  ;;  %v8857_v54 = vrot.slane %v415_v43, %v8847_v0 }
  0xc5   : > { %6887 = vmatmul.mubr.msk.f32.gmra.mxu0 %vm437_vm1, %v410_v39  ;;  %6921 = vmatmul.mubr.msk.f32.gmra.mxu1 %vm437_vm1, %v410_v39 }
 0x109   : > { %v613_v49 = vpop.f32.mrf.mxu0  ;;  %v870_v50 = vpop.f32.mrf.mxu1 }
 0x10a   : > { %v614_v51 = vadd.f32 %v613_v49, %v8845_v46  ;;  %v871_v63 = vadd.f32 %v870_v50, %v8857_v54  ;;  %v7678_v49 = vld [vmem:[#allocation2 + $0xe8] ss:$16 sps:$4 sm:$0xff]  }
 0x10b   : > { %v615_v52 = vpop.f32.mrf.mxu0  ;;  %v872_v53 = vpop.f32.mrf.mxu1 }
 0x10c   : > { %v616_v55 = vadd.f32 %v615_v52, %v8850_v47  ;;  %v873_v56 = vadd.f32 %v872_v53, %v8853_v48  ;;  %8094 = vtanh.f32 %v614_v51 }
 0x10d   : > { %v619_v57 = vpop.f32.mrf.mxu0  ;;  %v876_v58 = vpop.f32.mrf.mxu1 }
 0x10e   : > { %8096 = vtanh.f32 %v616_v55  ;;  %v620_v59 = vadd.f32 %v619_v57, %v8845_v46  ;;  %v877_v60 = vadd.f32 %v876_v58, %v8857_v54  ;;  %v7686_v57 = vld [vmem:[#allocation2 + $0xcc] ss:$16 sps:$4 sm:$0xff]  }
 0x10f   : > { %8098 = vtanh.f32 %v873_v56  ;;  %v621_v61 = vpop.f32.mrf.mxu0  ;;  %v878_v62 = vpop.f32.mrf.mxu1  ;;  %v7681_v56 = vld [vmem:[#allocation2 + $0x2e8] ss:$16 sps:$4 sm:$0xff]  }
 0x110   : > { %8100 = vtanh.f32 %v620_v59  ;;  %v622_v1 = vadd.f32 %v621_v61, %v8850_v47  ;;  %v879_v2 = vadd.f32 %v878_v62, %v8853_v48  ;;  %v7689_v61 = vld [vmem:[#allocation2 + $0x2cc] ss:$16 sps:$4 sm:$0xff]  }
 0x111   : > { %8102 = vtanh.f32 %v877_v60  ;;  %v625_v3 = vpop.f32.mrf.mxu0  ;;  %v882_v4 = vpop.f32.mrf.mxu1 }
 0x112   : > { %8104 = vtanh.f32 %v622_v1  ;;  %v626_v5 = vadd.f32 %v625_v3, %v8845_v46  ;;  %v883_v16 = vadd.f32 %v882_v4, %v8857_v54 }
 0x113   : > { %8106 = vtanh.f32 %v879_v2  ;;  %v627_v6 = vpop.f32.mrf.mxu0  ;;  %v884_v7 = vpop.f32.mrf.mxu1 }
 0x114   : > { %8108 = vtanh.f32 %v871_v63  ;;  %v628_v8 = vadd.f32 %v627_v6, %v8850_v47  ;;  %v885_v9 = vadd.f32 %v884_v7, %v8853_v48 }
 0x115   : > { %8110 = vtanh.f32 %v626_v5  ;;  %v631_v10 = vpop.f32.mrf.mxu0  ;;  %v888_v11 = vpop.f32.mrf.mxu1  ;;  %v7684_v5 = vld [vmem:[#allocation2 + $0xc8] ss:$16 sps:$4 sm:$0xff]  }
 0x116   : > { %8112 = vtanh.f32 %v628_v8  ;;  %v632_v12 = vadd.f32 %v631_v10, %v8845_v46  ;;  %v889_v13 = vadd.f32 %v888_v11, %v8857_v54  ;;  %v7692_v10 = vld [vmem:[#allocation2 + $0xac] ss:$16 sps:$4 sm:$0xff]  }
 0x117   : > { %8114 = vtanh.f32 %v885_v9  ;;  %v633_v14 = vpop.f32.mrf.mxu0  ;;  %v890_v15 = vpop.f32.mrf.mxu1  ;;  %v7687_v9 = vld [vmem:[#allocation2 + $0x2c8] ss:$16 sps:$4 sm:$0xff]  }
 0x118   : > { %8116 = vtanh.f32 %v632_v12  ;;  %v634_v17 = vadd.f32 %v633_v14, %v8850_v47  ;;  %v891_v18 = vadd.f32 %v890_v15, %v8853_v48  ;;  %v7695_v14 = vld [vmem:[#allocation2 + $0x2ac] ss:$16 sps:$4 sm:$0xff]  }
 0x119   : > { %8118 = vtanh.f32 %v889_v13  ;;  %v637_v19 = vpop.f32.mrf.mxu0  ;;  %v894_v20 = vpop.f32.mrf.mxu1 }
 0x11a   : > { %v8095_v21 = vpop.eup %8094  ;;  %8120 = vtanh.f32 %v634_v17  ;;  %v638_v22 = vadd.f32 %v637_v19, %v8845_v46  ;;  %v895_v36 = vadd.f32 %v894_v20, %v8857_v54 }
 0x11b   : > { %v8097_v23 = vpop.eup %8096  ;;  %8122 = vtanh.f32 %v891_v18  ;;  %v639_v24 = vpop.f32.mrf.mxu0 }
 0x11c   : > { %v896_v25 = vpop.f32.mrf.mxu1  ;;  %v8099_v26 = vpop.eup %8098  ;;  %8124 = vtanh.f32 %v883_v16  ;;  %v640_v27 = vadd.f32 %v639_v24, %v8850_v47 }
 0x11d   : > { %v897_v28 = vadd.f32 %v896_v25, %v8853_v48  ;;  %v8101_v29 = vpop.eup %8100  ;;  %8126 = vtanh.f32 %v638_v22  ;;  %v643_v30 = vpop.f32.mrf.mxu0 }
 0x11e   : > { %v900_v31 = vpop.f32.mrf.mxu1  ;;  %v8103_v32 = vpop.eup %8102  ;;  %8128 = vtanh.f32 %v640_v27  ;;  %v644_v33 = vadd.f32 %v643_v30, %v8845_v46  ;;  %v8886_v55 = vpack.c.bf16 %v8101_v29, %v8095_v21  ;;  %v7693_v29 = vld [vmem:[#allocation2 + $0x2a8] ss:$16 sps:$4 sm:$0xff]   ;;  %v7698_v30 = vld [vmem:[#allocation2 + $0x8c] ss:$16 sps:$4 sm:$0xff]  }
 0x11f   : > { %v901_v34 = vadd.f32 %v900_v31, %v8857_v54  ;;  %v8105_v35 = vpop.eup %8104  ;;  %8130 = vtanh.f32 %v897_v28  ;;  %v645_v37 = vpop.f32.mrf.mxu0 }
 0x120   : > { %v902_v38 = vpop.f32.mrf.mxu1  ;;  %v8107_v39 = vpop.eup %8106  ;;  %8132 = vtanh.f32 %v644_v33  ;;  %v646_v40 = vadd.f32 %v645_v37, %v8850_v47  ;;  %v8882_v43 = vpack.c.bf16 %v8105_v35, %v8097_v23  ;;  %v7690_v23 = vld [vmem:[#allocation2 + $0xa8] ss:$16 sps:$4 sm:$0xff]  }
 0x121   : > { %v903_v41 = vadd.f32 %v902_v38, %v8853_v48  ;;  %v8109_v50 = vpop.eup %8108  ;;  %8134 = vtanh.f32 %v901_v34  ;;  %v649_v51 = vpop.f32.mrf.mxu0  ;;  %v8884_v53 = vpack.c.bf16 %v8107_v39, %v8099_v26  ;;  %v7701_v34 = vld [vmem:[#allocation2 + $0x28c] ss:$16 sps:$4 sm:$0xff]  }
 0x122   : > { %v906_v52 = vpop.f32.mrf.mxu1  ;;  %v8111_v58 = vpop.eup %8110  ;;  %8136 = vtanh.f32 %v646_v40  ;;  %v650_v59 = vadd.f32 %v649_v51, %v8845_v46  ;;  %2075 = vmatprep.mubr.bf16.mxu0 %v8882_v43  ;;  %v8890_v60 = vpack.c.bf16 %v8103_v32, %v8109_v50 }
 0x123   : > { %v8113_v62 = vpop.eup %8112  ;;  %8138 = vtanh.f32 %v903_v41  ;;  %2268 = vmatprep.mubr.bf16.mxu1 %v8884_v53  ;;  %v651_v63 = vpop.f32.mrf.mxu0  ;;  %2076 = vmatmul.mubr.bf16.vlgmr.msra.gmra.mxu0 %v8886_v55  ;;  %v907_v16 = vadd.f32 %v906_v52, %v8857_v54  ;;  %v7696_v41 = vld [vmem:[#allocation2 + $0x88] ss:$16 sps:$4 sm:$0xff]  }
 0x124   : > { %v908_v1 = vpop.f32.mrf.mxu1  ;;  %v8115_v2 = vpop.eup %8114  ;;  %8140 = vtanh.f32 %v895_v36  ;;  %v652_v3 = vadd.f32 %v651_v63, %v8850_v47  ;;  %2269 = vmatmul.mubr.bf16.vlgmr.msra.gmra.mxu1 %v8890_v60  ;;  %2430 = vmatpush1.bf16.msra.mxu0 %v7678_v49  ;;  %v7699_v52 = vld [vmem:[#allocation2 + $0x288] ss:$16 sps:$4 sm:$0xff]  }
 0x125   : > { %v909_v4 = vadd.f32 %v908_v1, %v8853_v48  ;;  %v8117_v6 = vpop.eup %8116  ;;  %8142 = vtanh.f32 %v650_v59  ;;  %v655_v7 = vpop.f32.mrf.mxu0  ;;  %2623 = vmatpush1.bf16.msra.mxu1 %v7681_v56  ;;  %2431 = vmatprep.subr.bf16.mxu0 %v7686_v57  ;;  %v7704_v56 = vld [vmem:[#allocation2 + $0x6c] ss:$16 sps:$4 sm:$0xff]  }
 0x126   : > { %v912_v8 = vpop.f32.mrf.mxu1  ;;  %v8119_v11 = vpop.eup %8118  ;;  %8144 = vtanh.f32 %v652_v3  ;;  %v656_v12 = vadd.f32 %v655_v7, %v8845_v46  ;;  %2624 = vmatprep.subr.bf16.mxu1 %v7689_v61  ;;  %v8906_v28 = vpack.c.bf16 %v8117_v6, %v8111_v58  ;;  %v7707_v61 = vld [vmem:[#allocation2 + $0x26c] ss:$16 sps:$4 sm:$0xff]   ;;  %v7702_v7 = vld [vmem:[#allocation2 + $0x68] ss:$16 sps:$4 sm:$0xff]  }
 0x127   : > { %v913_v13 = vadd.f32 %v912_v8, %v8857_v54  ;;  %v8121_v15 = vpop.eup %8120  ;;  %8146 = vtanh.f32 %v909_v4  ;;  %v657_v17 = vpop.f32.mrf.mxu0 }
 0x128   : > { %v914_v18 = vpop.f32.mrf.mxu1  ;;  %v8123_v19 = vpop.eup %8122  ;;  %8148 = vtanh.f32 %v656_v12  ;;  %v658_v20 = vadd.f32 %v657_v17, %v8850_v47  ;;  %v8902_v22 = vpack.c.bf16 %v8121_v15, %v8113_v62  ;;  %2432 = vmatpush1.bf16.msra.mxu0 %v7684_v5 }
 0x129   : > { %v915_v21 = vadd.f32 %v914_v18, %v8853_v48  ;;  %v8125_v24 = vpop.eup %8124  ;;  %8150 = vtanh.f32 %v913_v13  ;;  %v661_v25 = vpop.f32.mrf.mxu0  ;;  %v8904_v27 = vpack.c.bf16 %v8123_v19, %v8115_v2  ;;  %2625 = vmatpush1.bf16.msra.mxu1 %v7687_v9  ;;  %2433 = vmatprep.subr.bf16.mxu0 %v7692_v10  ;;  %v7705_v13 = vld [vmem:[#allocation2 + $0x268] ss:$16 sps:$4 sm:$0xff]   ;;  %v7713_v18 = vld [vmem:[#allocation2 + $0x24c] ss:$16 sps:$4 sm:$0xff]  }
 0x12a   : > { %v918_v26 = vpop.f32.mrf.mxu1  ;;  %v8127_v31 = vpop.eup %8126  ;;  %8152 = vtanh.f32 %v658_v20  ;;  %v662_v32 = vadd.f32 %v661_v25, %v8845_v46  ;;  %2085 = vmatprep.mubr.bf16.mxu0 %v8902_v22  ;;  %v8910_v33 = vpack.c.bf16 %v8119_v11, %v8125_v24  ;;  %2626 = vmatprep.subr.bf16.mxu1 %v7695_v14  ;;  %v7710_v14 = vld [vmem:[#allocation2 + $0x4c] ss:$16 sps:$4 sm:$0xff]  }
 0x12b   : > { %v8129_v35 = vpop.eup %8128  ;;  %8154 = vtanh.f32 %v915_v21  ;;  %2278 = vmatprep.mubr.bf16.mxu1 %v8904_v27  ;;  %v663_v36 = vpop.f32.mrf.mxu0  ;;  %2086 = vmatmul.mubr.bf16.gmra.mxu0 %v8906_v28  ;;  %v919_v63 = vadd.f32 %v918_v26, %v8857_v54  ;;  %v7708_v26 = vld [vmem:[#allocation2 + $0x48] ss:$16 sps:$4 sm:$0xff]  }
 0x12c   : > { %v920_v37 = vpop.f32.mrf.mxu1  ;;  %v8131_v38 = vpop.eup %8130  ;;  %8156 = vtanh.f32 %v907_v16  ;;  %v664_v39 = vadd.f32 %v663_v36, %v8850_v47  ;;  %2279 = vmatmul.mubr.bf16.gmra.mxu1 %v8910_v33  ;;  %2434 = vmatpush1.bf16.msra.mxu0 %v7690_v23 }
 0x12d   : > { %v921_v40 = vadd.f32 %v920_v37, %v8853_v48  ;;  %v8133_v49 = vpop.eup %8132  ;;  %8158 = vtanh.f32 %v662_v32  ;;  %v667_v50 = vpop.f32.mrf.mxu0  ;;  %2627 = vmatpush1.bf16.msra.mxu1 %v7693_v29  ;;  %2435 = vmatprep.subr.bf16.mxu0 %v7698_v30  ;;  %v7711_v32 = vld [vmem:[#allocation2 + $0x248] ss:$16 sps:$4 sm:$0xff]  }
 0x12e   : > { %v924_v51 = vpop.f32.mrf.mxu1  ;;  %v8135_v57 = vpop.eup %8134  ;;  %8160 = vtanh.f32 %v664_v39  ;;  %v668_v58 = vadd.f32 %v667_v50, %v8845_v46  ;;  %2628 = vmatprep.subr.bf16.mxu1 %v7701_v34  ;;  %v8926_v12 = vpack.c.bf16 %v8133_v49, %v8127_v31  ;;  %v7716_v34 = vld [vmem:[#allocation2 + $0x2c] ss:$16 sps:$4 sm:$0xff]  }
 0x12f   : > { %v925_v59 = vadd.f32 %v924_v51, %v8857_v54  ;;  %v8137_v62 = vpop.eup %8136  ;;  %8162 = vtanh.f32 %v921_v40  ;;  %v669_v1 = vpop.f32.mrf.mxu0 }
 0x130   : > { %v926_v2 = vpop.f32.mrf.mxu1  ;;  %v8139_v3 = vpop.eup %8138  ;;  %8164 = vtanh.f32 %v668_v58  ;;  %v670_v4 = vadd.f32 %v669_v1, %v8850_v47  ;;  %v8922_v6 = vpack.c.bf16 %v8137_v62, %v8129_v35  ;;  %2436 = vmatpush1.bf16.msra.mxu0 %v7696_v41  ;;  %v7717_v1 = vld [vmem:[#allocation2 + $0x228] ss:$16 sps:$4 sm:$0xff]  }
 0x131   : > { %v927_v5 = vadd.f32 %v926_v2, %v8853_v48  ;;  %v8141_v8 = vpop.eup %8140  ;;  %8166 = vtanh.f32 %v925_v59  ;;  %v673_v9 = vpop.f32.mrf.mxu0  ;;  %v8924_v11 = vpack.c.bf16 %v8139_v3, %v8131_v38  ;;  %2629 = vmatpush1.bf16.msra.mxu1 %v7699_v52  ;;  %2437 = vmatprep.subr.bf16.mxu0 %v7704_v56  ;;  %v7719_v38 = vld [vmem:[#allocation2 + $0x22c] ss:$16 sps:$4 sm:$0xff]  }
 0x132   : > { %v930_v10 = vpop.f32.mrf.mxu1  ;;  %v8143_v15 = vpop.eup %8142  ;;  %8168 = vtanh.f32 %v670_v4  ;;  %v674_v16 = vadd.f32 %v673_v9, %v8845_v46  ;;  %2095 = vmatprep.mubr.bf16.mxu0 %v8922_v6  ;;  %v8930_v17 = vpack.c.bf16 %v8135_v57, %v8141_v8  ;;  %2630 = vmatprep.subr.bf16.mxu1 %v7707_v61  ;;  %v7714_v57 = vld [vmem:[#allocation2 + $0x28] ss:$16 sps:$4 sm:$0xff]   ;;  %v7722_v2 = vld [vmem:[#allocation2 + $0xc] ss:$16 sps:$4 sm:$0xff]  }
 0x133   : > { %v8145_v19 = vpop.eup %8144  ;;  %8170 = vtanh.f32 %v927_v5  ;;  %2288 = vmatprep.mubr.bf16.mxu1 %v8924_v11  ;;  %v675_v20 = vpop.f32.mrf.mxu0  ;;  %2096 = vmatmul.mubr.bf16.gmra.mxu0 %v8926_v12  ;;  %v931_v40 = vadd.f32 %v930_v10, %v8857_v54 }
 0x134   : > { %v932_v21 = vpop.f32.mrf.mxu1  ;;  %v8147_v23 = vpop.eup %8146  ;;  %8172 = vtanh.f32 %v919_v63  ;;  %v676_v24 = vadd.f32 %v675_v20, %v8850_v47  ;;  %2289 = vmatmul.mubr.bf16.gmra.mxu1 %v8930_v17  ;;  %2438 = vmatpush1.bf16.msra.mxu0 %v7702_v7  ;;  %v7725_v7 = vld [vmem:[#allocation2 + $0x20c] ss:$16 sps:$4 sm:$0xff]  }
 0x135   : > { %v933_v25 = vadd.f32 %v932_v21, %v8853_v48  ;;  %v8149_v29 = vpop.eup %8148  ;;  %8174 = vtanh.f32 %v674_v16  ;;  %v679_v30 = vpop.f32.mrf.mxu0  ;;  %2631 = vmatpush1.bf16.msra.mxu1 %v7705_v13  ;;  %2439 = vmatprep.subr.bf16.mxu0 %v7710_v14  ;;  %v7720_v16 = vld [vmem:[#allocation2 + $0x8] ss:$16 sps:$4 sm:$0xff]  }
 0x136   : > { %v936_v31 = vpop.f32.mrf.mxu1  ;;  %v8151_v35 = vpop.eup %8150  ;;  %8176 = vtanh.f32 %v676_v24  ;;  %v680_v36 = vadd.f32 %v679_v30, %v8845_v46  ;;  %2632 = vmatprep.subr.bf16.mxu1 %v7713_v18  ;;  %v8946_v63 = vpack.c.bf16 %v8149_v29, %v8143_v15  ;;  %v7723_v21 = vld [vmem:[#allocation2 + $0x208] ss:$16 sps:$4 sm:$0xff]   ;;  %v7731_v29 = vld [vmem:[#allocation2 + $0x3ec] ss:$16 sps:$4 sm:$0xff]  }
 0x137   : > { %v937_v37 = vadd.f32 %v936_v31, %v8857_v54  ;;  %v8153_v39 = vpop.eup %8152  ;;  %8178 = vtanh.f32 %v933_v25  ;;  %v681_v41 = vpop.f32.mrf.mxu0 }
 0x138   : > { %v938_v49 = vpop.f32.mrf.mxu1  ;;  %v8155_v50 = vpop.eup %8154  ;;  %8180 = vtanh.f32 %v680_v36  ;;  %v682_v51 = vadd.f32 %v681_v41, %v8850_v47  ;;  %v8942_v56 = vpack.c.bf16 %v8153_v39, %v8145_v19  ;;  %2440 = vmatpush1.bf16.msra.mxu0 %v7708_v26  ;;  %v7726_v39 = vld [vmem:[#allocation2 + $0x1e8] ss:$16 sps:$4 sm:$0xff]  }
 0x139   : > { %v939_v52 = vadd.f32 %v938_v49, %v8853_v48  ;;  %v8157_v58 = vpop.eup %8156  ;;  %8182 = vtanh.f32 %v937_v37  ;;  %v685_v59 = vpop.f32.mrf.mxu0  ;;  %v8944_v62 = vpack.c.bf16 %v8155_v50, %v8147_v23  ;;  %2633 = vmatpush1.bf16.msra.mxu1 %v7711_v32  ;;  %2441 = vmatprep.subr.bf16.mxu0 %v7716_v34  ;;  %v7728_v23 = vld [vmem:[#allocation2 + $0x1ec] ss:$16 sps:$4 sm:$0xff]  }
 0x13a   : > { %v942_v61 = vpop.f32.mrf.mxu1  ;;  %v8159_v3 = vpop.eup %8158  ;;  %8184 = vtanh.f32 %v682_v51  ;;  %v686_v4 = vadd.f32 %v685_v59, %v8845_v46  ;;  %2105 = vmatprep.mubr.bf16.mxu0 %v8942_v56  ;;  %v8950_v5 = vpack.c.bf16 %v8151_v35, %v8157_v58  ;;  %2634 = vmatprep.subr.bf16.mxu1 %v7719_v38 }
 0x13b   : > { %v8161_v8 = vpop.eup %8160  ;;  %8186 = vtanh.f32 %v939_v52  ;;  %2298 = vmatprep.mubr.bf16.mxu1 %v8944_v62  ;;  %v687_v9 = vpop.f32.mrf.mxu0  ;;  %2106 = vmatmul.mubr.bf16.gmra.mxu0 %v8946_v63  ;;  %v943_v31 = vadd.f32 %v942_v61, %v8857_v54  ;;  %v7729_v52 = vld [vmem:[#allocation2 + $0x3e8] ss:$16 sps:$4 sm:$0xff]  }
 0x13c   : > { %v944_v10 = vpop.f32.mrf.mxu1  ;;  %v8163_v13 = vpop.eup %8162  ;;  %8188 = vtanh.f32 %v931_v40  ;;  %v688_v14 = vadd.f32 %v687_v9, %v8850_v47  ;;  %2299 = vmatmul.mubr.bf16.gmra.mxu1 %v8950_v5  ;;  %2442 = vmatpush1.bf16.msra.mxu0 %v7714_v57  ;;  %v7734_v57 = vld [vmem:[#allocation2 + $0x1cc] ss:$16 sps:$4 sm:$0xff]  }
 0x13d   : > { %v945_v15 = vadd.f32 %v944_v10, %v8853_v48  ;;  %v8165_v18 = vpop.eup %8164  ;;  %8190 = vtanh.f32 %v686_v4  ;;  %v691_v19 = vpop.f32.mrf.mxu0  ;;  %2635 = vmatpush1.bf16.msra.mxu1 %v7717_v1  ;;  %2443 = vmatprep.subr.bf16.mxu0 %v7722_v2  ;;  %v7737_v1 = vld [vmem:[#allocation2 + $0x3cc] ss:$16 sps:$4 sm:$0xff]   ;;  %v7732_v10 = vld [vmem:[#allocation2 + $0x1c8] ss:$16 sps:$4 sm:$0xff]  }
 0x13e   : > { %v948_v20 = vpop.f32.mrf.mxu1  ;;  %v8167_v24 = vpop.eup %8166  ;;  %8192 = vtanh.f32 %v688_v14  ;;  %v692_v25 = vadd.f32 %v691_v19, %v8845_v46  ;;  %2636 = vmatprep.subr.bf16.mxu1 %v7725_v7  ;;  %v8966_v51 = vpack.c.bf16 %v8165_v18, %v8159_v3  ;;  %v7740_v18 = vld [vmem:[#allocation2 + $0x1ac] ss:$16 sps:$4 sm:$0xff]  }
 0x13f   : > { %v949_v26 = vadd.f32 %v948_v20, %v8857_v54  ;;  %v8169_v30 = vpop.eup %8168  ;;  %8194 = vtanh.f32 %v945_v15  ;;  %v693_v32 = vpop.f32.mrf.mxu0 }
 0x140   : > { %v950_v34 = vpop.f32.mrf.mxu1  ;;  %v8171_v35 = vpop.eup %8170  ;;  %8196 = vtanh.f32 %v692_v25  ;;  %v694_v36 = vadd.f32 %v693_v32, %v8850_v47  ;;  %v8962_v38 = vpack.c.bf16 %v8169_v30, %v8161_v8  ;;  %2444 = vmatpush1.bf16.msra.mxu0 %v7720_v16  ;;  %v7735_v16 = vld [vmem:[#allocation2 + $0x3c8] ss:$16 sps:$4 sm:$0xff]  }
 0x141   : > { %v951_v37 = vadd.f32 %v950_v34, %v8853_v48  ;;  %v8173_v40 = vpop.eup %8172  ;;  %8198 = vtanh.f32 %v949_v26  ;;  %v697_v41 = vpop.f32.mrf.mxu0  ;;  %v8964_v50 = vpack.c.bf16 %v8171_v35, %v8163_v13  ;;  %2637 = vmatpush1.bf16.msra.mxu1 %v7723_v21  ;;  %2445 = vmatprep.subr.bf16.mxu0 %v7728_v23  ;;  %v7743_v23 = vld [vmem:[#allocation2 + $0x3ac] ss:$16 sps:$4 sm:$0xff]   ;;  %v7738_v35 = vld [vmem:[#allocation2 + $0x1a8] ss:$16 sps:$4 sm:$0xff]  }
 0x142   : > { %v954_v49 = vpop.f32.mrf.mxu1  ;;  %v8175_v58 = vpop.eup %8174  ;;  %8200 = vtanh.f32 %v694_v36  ;;  %v698_v59 = vadd.f32 %v697_v41, %v8845_v46  ;;  %2115 = vmatprep.mubr.bf16.mxu0 %v8962_v38  ;;  %v8970_v61 = vpack.c.bf16 %v8167_v24, %v8173_v40  ;;  %2638 = vmatprep.subr.bf16.mxu1 %v7731_v29 }
 0x143   : > { %v8177_v2 = vpop.eup %8176  ;;  %8202 = vtanh.f32 %v951_v37  ;;  %2308 = vmatprep.mubr.bf16.mxu1 %v8964_v50  ;;  %v699_v3 = vpop.f32.mrf.mxu0  ;;  %2116 = vmatmul.mubr.bf16.gmra.mxu0 %v8966_v51  ;;  %v955_v25 = vadd.f32 %v954_v49, %v8857_v54  ;;  %v7741_v49 = vld [vmem:[#allocation2 + $0x3a8] ss:$16 sps:$4 sm:$0xff]  }
 0x144   : > { %v956_v4 = vpop.f32.mrf.mxu1  ;;  %v8179_v7 = vpop.eup %8178  ;;  %8204 = vtanh.f32 %v943_v31  ;;  %v700_v8 = vadd.f32 %v699_v3, %v8850_v47  ;;  %2309 = vmatmul.mubr.bf16.gmra.mxu1 %v8970_v61  ;;  %2446 = vmatpush2.bf16.msra.mxu0 %v7726_v39 }
 0x145   : > { %v957_v9 = vadd.f32 %v956_v4, %v8853_v48  ;;  %v8181_v13 = vpop.eup %8180  ;;  %8206 = vtanh.f32 %v698_v59  ;;  %v703_v14 = vpop.f32.mrf.mxu0  ;;  %2639 = vmatpush2.bf16.msra.mxu1 %v7729_v52  ;;  %2447 = vmatprep.subr.bf16.mxu0 %v7734_v57  ;;  %v7746_v52 = vld [vmem:[#allocation2 + $0x18c] ss:$16 sps:$4 sm:$0xff]  }
 0x146   : > { %v960_v15 = vpop.f32.mrf.mxu1  ;;  %v8183_v19 = vpop.eup %8182  ;;  %8208 = vtanh.f32 %v700_v8  ;;  %v704_v20 = vadd.f32 %v703_v14, %v8845_v46  ;;  %2640 = vmatprep.subr.bf16.mxu1 %v7737_v1  ;;  %v8986_v41 = vpack.c.bf16 %v8181_v13, %v8175_v58 }
 0x147   : > { %v961_v21 = vadd.f32 %v960_v15, %v8857_v54  ;;  %v8185_v24 = vpop.eup %8184  ;;  %8210 = vtanh.f32 %v957_v9  ;;  %v705_v26 = vpop.f32.mrf.mxu0 }
 0x148   : > { %v962_v29 = vpop.f32.mrf.mxu1  ;;  %v8187_v30 = vpop.eup %8186  ;;  %8212 = vtanh.f32 %v704_v20  ;;  %v706_v31 = vadd.f32 %v705_v26, %v8850_v47  ;;  %v8982_v34 = vpack.c.bf16 %v8185_v24, %v8177_v2  ;;  %2448 = vmatpush2.bf16.msra.mxu0 %v7732_v10  ;;  %v7749_v2 = vld [vmem:[#allocation2 + $0x38c] ss:$16 sps:$4 sm:$0xff]   ;;  %v7744_v10 = vld [vmem:[#allocation2 + $0x188] ss:$16 sps:$4 sm:$0xff]  }
 0x149   : > { %v963_v32 = vadd.f32 %v962_v29, %v8853_v48  ;;  %v8189_v36 = vpop.eup %8188  ;;  %8214 = vtanh.f32 %v961_v21  ;;  %v709_v37 = vpop.f32.mrf.mxu0  ;;  %v8984_v40 = vpack.c.bf16 %v8187_v30, %v8179_v7  ;;  %2641 = vmatpush2.bf16.msra.mxu1 %v7735_v16  ;;  %2449 = vmatprep.subr.bf16.mxu0 %v7740_v18  ;;  %v7747_v16 = vld [vmem:[#allocation2 + $0x388] ss:$16 sps:$4 sm:$0xff]   ;;  %v7752_v18 = vld [vmem:[#allocation2 + $0x16c] ss:$16 sps:$4 sm:$0xff]  }
 0x14a   : > { %v966_v39 = vpop.f32.mrf.mxu1  ;;  %v8191_v57 = vpop.eup %8190  ;;  %8216 = vtanh.f32 %v706_v31  ;;  %v710_v59 = vadd.f32 %v709_v37, %v8845_v46  ;;  %2125 = vmatprep.mubr.bf16.mxu0 %v8982_v34  ;;  %v8990_v1 = vpack.c.bf16 %v8183_v19, %v8189_v36  ;;  %2642 = vmatprep.subr.bf16.mxu1 %v7743_v23  ;;  %v7755_v23 = vld [vmem:[#allocation2 + $0x36c] ss:$16 sps:$4 sm:$0xff]   ;;  %v7750_v36 = vld [vmem:[#allocation2 + $0x168] ss:$16 sps:$4 sm:$0xff]  }
 0x14b   : > { %v8193_v3 = vpop.eup %8192  ;;  %8218 = vtanh.f32 %v963_v32  ;;  %2318 = vmatprep.mubr.bf16.mxu1 %v8984_v40  ;;  %v711_v58 = vpop.f32.mrf.mxu0  ;;  %2126 = vmatmul.mubr.bf16.gmra.mxu0 %v8986_v41 }
 0x14c   : > { %v968_v4 = vpop.f32.mrf.mxu1  ;;  %v8195_v7 = vpop.eup %8194  ;;  %8220 = vtanh.f32 %v955_v25  ;;  %v712_v8 = vadd.f32 %v711_v58, %v8850_v47  ;;  %2319 = vmatmul.mubr.bf16.gmra.mxu1 %v8990_v1  ;;  %2450 = vmatpush2.bf16.msra.mxu0 %v7738_v35  ;;  %v967_v25 = vadd.f32 %v966_v39, %v8857_v54  ;;  %v7758_v58 = vld [vmem:[#allocation2 + $0x14c] ss:$16 sps:$4 sm:$0xff]  }
 0x14d   : > { %v969_v9 = vadd.f32 %v968_v4, %v8853_v48  ;;  %v8197_v13 = vpop.eup %8196  ;;  %8222 = vtanh.f32 %v710_v59  ;;  %v715_v14 = vpop.f32.mrf.mxu0  ;;  %2643 = vmatpush2.bf16.msra.mxu1 %v7741_v49  ;;  %2451 = vmatprep.subr.bf16.mxu0 %v7746_v52 }
 0x14e   : > { %v972_v15 = vpop.f32.mrf.mxu1  ;;  %v8199_v19 = vpop.eup %8198  ;;  %8224 = vtanh.f32 %v712_v8  ;;  %v716_v20 = vadd.f32 %v715_v14, %v8845_v46  ;;  %2644 = vmatprep.subr.bf16.mxu1 %v7749_v2  ;;  %v9006_v39 = vpack.c.bf16 %v8197_v13, %v8191_v57  ;;  %v7753_v2 = vld [vmem:[#allocation2 + $0x368] ss:$16 sps:$4 sm:$0xff]  }
 0x14f   : > { %v973_v21 = vadd.f32 %v972_v15, %v8857_v54  ;;  %v8201_v24 = vpop.eup %8200  ;;  %8226 = vtanh.f32 %v969_v9  ;;  %v717_v26 = vpop.f32.mrf.mxu0  ;;  %v7761_v9 = vld [vmem:[#allocation2 + $0x34c] ss:$16 sps:$4 sm:$0xff]  }
 0x150   : > { %v974_v29 = vpop.f32.mrf.mxu1  ;;  %v8203_v30 = vpop.eup %8202  ;;  %8228 = vtanh.f32 %v716_v20  ;;  %v718_v31 = vadd.f32 %v717_v26, %v8850_v47  ;;  %v9002_v35 = vpack.c.bf16 %v8201_v24, %v8193_v3  ;;  %2452 = vmatpush2.bf16.msra.mxu0 %v7744_v10 }
 0x151   : > { %v975_v32 = vadd.f32 %v974_v29, %v8853_v48  ;;  %v8205_v37 = vpop.eup %8204  ;;  %8230 = vtanh.f32 %v973_v21  ;;  %v721_v49 = vpop.f32.mrf.mxu0  ;;  %v9004_v59 = vpack.c.bf16 %v8203_v30, %v8195_v7  ;;  %2645 = vmatpush2.bf16.msra.mxu1 %v7747_v16  ;;  %2453 = vmatprep.subr.bf16.mxu0 %v7752_v18  ;;  %v7756_v16 = vld [vmem:[#allocation2 + $0x148] ss:$16 sps:$4 sm:$0xff]   ;;  %v7767_v29 = vld [vmem:[#allocation2 + $0x32c] ss:$16 sps:$4 sm:$0xff]  }
 0x152   : > { %v978_v52 = vpop.f32.mrf.mxu1  ;;  %v8207_v4 = vpop.eup %8206  ;;  %8232 = vtanh.f32 %v718_v31  ;;  %v722_v8 = vadd.f32 %v721_v49, %v8845_v46  ;;  %2135 = vmatprep.mubr.bf16.mxu0 %v9002_v35  ;;  %v9010_v3 = vpack.c.bf16 %v8199_v19, %v8205_v37  ;;  %2646 = vmatprep.subr.bf16.mxu1 %v7755_v23  ;;  %v7759_v21 = vld [vmem:[#allocation2 + $0x348] ss:$16 sps:$4 sm:$0xff]   ;;  %v7764_v23 = vld [vmem:[#allocation2 + $0x12c] ss:$16 sps:$4 sm:$0xff]  }
 0x153   : > { %v8209_v10 = vpop.eup %8208  ;;  %8234 = vtanh.f32 %v975_v32  ;;  %2328 = vmatprep.mubr.bf16.mxu1 %v9004_v59  ;;  %v723_v57 = vpop.f32.mrf.mxu0  ;;  %2136 = vmatmul.mubr.bf16.gmra.mxu0 %v9006_v39  ;;  %v979_v31 = vadd.f32 %v978_v52, %v8857_v54 }
 0x154   : > { %v980_v7 = vpop.f32.mrf.mxu1  ;;  %v8211_v13 = vpop.eup %8210  ;;  %8236 = vtanh.f32 %v967_v25  ;;  %v724_v14 = vadd.f32 %v723_v57, %v8850_v47  ;;  %2329 = vmatmul.mubr.bf16.gmra.mxu1 %v9010_v3  ;;  %2454 = vmatpush2.bf16.msra.mxu0 %v7750_v36 }
 0x155   : > { %v981_v15 = vadd.f32 %v980_v7, %v8853_v48  ;;  %v8213_v18 = vpop.eup %8212  ;;  %8238 = vtanh.f32 %v722_v8  ;;  %v727_v19 = vpop.f32.mrf.mxu0  ;;  %2647 = vmatpush2.bf16.msra.mxu1 %v7753_v2  ;;  %2455 = vmatprep.subr.bf16.mxu0 %v7758_v58  ;;  %v7762_v8 = vld [vmem:[#allocation2 + $0x128] ss:$16 sps:$4 sm:$0xff]  }
 0x156   : > { %v984_v20 = vpop.f32.mrf.mxu1  ;;  %v8215_v24 = vpop.eup %8214  ;;  %8240 = vtanh.f32 %v724_v14  ;;  %v728_v25 = vadd.f32 %v727_v19, %v8845_v46  ;;  %2648 = vmatprep.subr.bf16.mxu1 %v7761_v9  ;;  %v9026_v52 = vpack.c.bf16 %v8213_v18, %v8207_v4  ;;  %v7770_v19 = vld [vmem:[#allocation2 + $0x10c] ss:$16 sps:$4 sm:$0xff]  }
 0x157   : > { %v985_v26 = vadd.f32 %v984_v20, %v8857_v54  ;;  %v8217_v30 = vpop.eup %8216  ;;  %8242 = vtanh.f32 %v981_v15  ;;  %v729_v32 = vpop.f32.mrf.mxu0  ;;  %v7765_v15 = vld [vmem:[#allocation2 + $0x328] ss:$16 sps:$4 sm:$0xff]  }
 0x158   : > { %v986_v36 = vpop.f32.mrf.mxu1  ;;  %v8219_v37 = vpop.eup %8218  ;;  %8244 = vtanh.f32 %v728_v25  ;;  %v730_v49 = vadd.f32 %v729_v32, %v8850_v47  ;;  %v9022_v58 = vpack.c.bf16 %v8217_v30, %v8209_v10  ;;  %2456 = vmatpush2.bf16.msra.mxu0 %v7756_v16  ;;  %v7773_v16 = vld [vmem:[#allocation2 + $0x30c] ss:$16 sps:$4 sm:$0xff]  }
 0x159   : > { %v987_v2 = vadd.f32 %v986_v36, %v8853_v48  ;;  %v8221_v57 = vpop.eup %8220  ;;  %8246 = vtanh.f32 %v985_v26  ;;  %v733_v9 = vpop.f32.mrf.mxu0  ;;  %v9024_v14 = vpack.c.bf16 %v8219_v37, %v8211_v13  ;;  %2649 = vmatpush2.bf16.msra.mxu1 %v7759_v21  ;;  %2457 = vmatprep.subr.bf16.mxu0 %v7764_v23  ;;  %v7771_v36 = vld [vmem:[#allocation2 + $0x308] ss:$16 sps:$4 sm:$0xff]  }
 0x15a   : > { %v990_v7 = vpop.f32.mrf.mxu1  ;;  %v8223_v20 = vpop.eup %8222  ;;  %8248 = vtanh.f32 %v730_v49  ;;  %v734_v25 = vadd.f32 %v733_v9, %v8845_v46  ;;  %2145 = vmatprep.mubr.bf16.mxu0 %v9022_v58  ;;  %v9030_v10 = vpack.c.bf16 %v8215_v24, %v8221_v57  ;;  %2650 = vmatprep.subr.bf16.mxu1 %v7767_v29  ;;  %v7768_v24 = vld [vmem:[#allocation2 + $0x108] ss:$16 sps:$4 sm:$0xff]  }
 0x15b   : > { %v8225_v26 = vpop.eup %8224  ;;  %8250 = vtanh.f32 %v987_v2  ;;  %2338 = vmatprep.mubr.bf16.mxu1 %v9024_v14  ;;  %v735_v4 = vpop.f32.mrf.mxu0  ;;  %2146 = vmatmul.mubr.bf16.gmra.mxu0 %v9026_v52  ;;  %v991_v57 = vadd.f32 %v990_v7, %v8857_v54 }
 0x15c   : > { %v992_v13 = vpop.f32.mrf.mxu1  ;;  %v8227_v18 = vpop.eup %8226  ;;  %8252 = vtanh.f32 %v979_v31  ;;  %v736_v21 = vadd.f32 %v735_v4, %v8850_v47  ;;  %2339 = vmatmul.mubr.bf16.gmra.mxu1 %v9030_v10  ;;  %2458 = vmatpush2.bf16.msra.mxu0 %v7762_v8 }
 0x15d   : > { %v993_v23 = vadd.f32 %v992_v13, %v8853_v48  ;;  %v8229_v29 = vpop.eup %8228  ;;  %8254 = vtanh.f32 %v734_v25  ;;  %v739_v30 = vpop.f32.mrf.mxu0  ;;  %2651 = vmatpush2.bf16.msra.mxu1 %v7765_v15  ;;  %2459 = vmatprep.subr.bf16.mxu0 %v7770_v19 }
 0x15e   : > { %v996_v32 = vpop.f32.mrf.mxu1  ;;  %v8231_v37 = vpop.eup %8230  ;;  %8256 = vtanh.f32 %v736_v21  ;;  %v740_v49 = vadd.f32 %v739_v30, %v8845_v46  ;;  %2652 = vmatprep.subr.bf16.mxu1 %v7773_v16 }
 0x15f   : > { %v997_v31 = vadd.f32 %v996_v32, %v8857_v54  ;;  %v8233_v2 = vpop.eup %8232  ;;  %8258 = vtanh.f32 %v993_v23  ;;  %v741_v8 = vpop.f32.mrf.mxu0  ;;  %v9046_v32 = vpack.c.bf16 %v8229_v29, %v8223_v20 }
 0x160   : > { %v998_v9 = vpop.f32.mrf.mxu1  ;;  %v8235_v4 = vpop.eup %8234  ;;  %8260 = vtanh.f32 %v740_v49  ;;  %v742_v25 = vadd.f32 %v741_v8, %v8850_v47  ;;  %v9042_v19 = vpack.c.bf16 %v8233_v2, %v8225_v26  ;;  %2460 = vmatpush2.bf16.msra.mxu0 %v7768_v24  ;;  %v7776_v26 = vld [vmem:[#allocation5 + $0xe4] ss:$16 sps:$4 sm:$0xff]  }
 0x161   : > { %v999_v15 = vadd.f32 %v998_v9, %v8853_v48  ;;  %v8237_v13 = vpop.eup %8236  ;;  %8262 = vtanh.f32 %v997_v31  ;;  %v745_v21 = vpop.f32.mrf.mxu0  ;;  %v9044_v16 = vpack.c.bf16 %v8235_v4, %v8227_v18  ;;  %2653 = vmatpush2.bf16.msra.mxu1 %v7771_v36  ;;  %4053 = vmatprep.subr.bf16.mxu0 %v7776_v26 }
 0x162   : > { %v1002_v30 = vpop.f32.mrf.mxu1  ;;  %v8239_v7 = vpop.eup %8238  ;;  %8264 = vtanh.f32 %v742_v25  ;;  %v746_v23 = vadd.f32 %v745_v21, %v8845_v46  ;;  %2155 = vmatprep.mubr.bf16.mxu0 %v9042_v19  ;;  %v9050_v49 = vpack.c.bf16 %v8231_v37, %v8237_v13 }
 0x163   : > { %v8241_v2 = vpop.eup %8240  ;;  %8266 = vtanh.f32 %v999_v15  ;;  %2348 = vmatprep.mubr.bf16.mxu1 %v9044_v16  ;;  %v747_v24 = vpop.f32.mrf.mxu0  ;;  %2156 = vmatmul.mubr.bf16.gmra.mxu0 %v9046_v32 }
 0x164   : > { %v1004_v31 = vpop.f32.mrf.mxu1  ;;  %v8243_v20 = vpop.eup %8242  ;;  %8268 = vtanh.f32 %v991_v57  ;;  %v748_v18 = vadd.f32 %v747_v24, %v8850_v47  ;;  %2349 = vmatmul.mubr.bf16.gmra.mxu1 %v9050_v49  ;;  %v1003_v57 = vadd.f32 %v1002_v30, %v8857_v54 }
 0x165   : > { %v1005_v29 = vadd.f32 %v1004_v31, %v8853_v48  ;;  %v8245_v36 = vpop.eup %8244  ;;  %8270 = vtanh.f32 %v746_v23  ;;  %v751_v37 = vpop.f32.mrf.mxu0 }
 0x166   : > { %v1008_v8 = vpop.f32.mrf.mxu1  ;;  %v8247_v9 = vpop.eup %8246  ;;  %8272 = vtanh.f32 %v748_v18  ;;  %v752_v4 = vadd.f32 %v751_v37, %v8845_v46 }
 0x167   : > { %v1009_v25 = vadd.f32 %v1008_v8, %v8857_v54  ;;  %v8249_v15 = vpop.eup %8248  ;;  %8274 = vtanh.f32 %v1005_v29  ;;  %v753_v13 = vpop.f32.mrf.mxu0  ;;  %v9066_v8 = vpack.c.bf16 %v8245_v36, %v8239_v7 }
 0x168   : > { %v1010_v21 = vpop.f32.mrf.mxu1  ;;  %v8251_v24 = vpop.eup %8250  ;;  %8276 = vtanh.f32 %v752_v4  ;;  %v754_v26 = vadd.f32 %v753_v13, %v8850_v47  ;;  %v9062_v31 = vpack.c.bf16 %v8249_v15, %v8241_v2 }
 0x169   : > { %v1011_v23 = vadd.f32 %v1010_v21, %v8853_v48  ;;  %v8253_v45 = vpop.eup %8252  ;;  %8278 = vtanh.f32 %v1009_v25  ;;  %v757_v18 = vpop.f32.mrf.mxu0  ;;  %v9064_v0 = vpack.c.bf16 %v8251_v24, %v8243_v20  ;;  %11674 = vst [vmem:[#allocation16_spill] sm:$0xff] %v9066_v8 }
 0x16a   : > { %v1014_v37 = vpop.f32.mrf.mxu1  ;;  %v8255_v30 = vpop.eup %8254  ;;  %8280 = vtanh.f32 %v754_v26  ;;  %v758_v29 = vadd.f32 %v757_v18, %v8845_v46  ;;  %2165 = vmatprep.mubr.bf16.mxu0 %v9062_v31  ;;  %v9070_v4 = vpack.c.bf16 %v8247_v9, %v8253_v45 }
 0x16b   : > { %v8257_v13 = vpop.eup %8256  ;;  %8282 = vtanh.f32 %v1011_v23  ;;  %2358 = vmatprep.mubr.bf16.mxu1 %v9064_v0  ;;  %v759_v2 = vpop.f32.mrf.mxu0  ;;  %2166 = vmatmul.mubr.bf16.gmra.mxu0 %v9066_v8  ;;  %v1015_v18 = vadd.f32 %v1014_v37, %v8857_v54 }
 0x16c   : > { %11675 = vst [vmem:[#allocation17_spill] sm:$0xff] %v9070_v4  ;;  %v1016_v25 = vpop.f32.mrf.mxu1  ;;  %v8259_v20 = vpop.eup %8258  ;;  %8284 = vtanh.f32 %v1003_v57  ;;  %v760_v7 = vadd.f32 %v759_v2, %v8850_v47  ;;  %2359 = vmatmul.mubr.bf16.gmra.mxu1 %v9070_v4 }
 0x16d   : > { %v1017_v36 = vadd.f32 %v1016_v25, %v8853_v48  ;;  %v8261_v15 = vpop.eup %8260  ;;  %8286 = vtanh.f32 %v758_v29  ;;  %v763_v45 = vpop.f32.mrf.mxu0 }
 0x16e   : > { %v1020_v9 = vpop.f32.mrf.mxu1  ;;  %v8263_v21 = vpop.eup %8262  ;;  %8288 = vtanh.f32 %v760_v7  ;;  %v764_v24 = vadd.f32 %v763_v45, %v8845_v46 }
 0x16f   : > { %v1021_v26 = vadd.f32 %v1020_v9, %v8857_v54  ;;  %v8265_v23 = vpop.eup %8264  ;;  %8290 = vtanh.f32 %v1017_v36  ;;  %v765_v57 = vpop.f32.mrf.mxu0  ;;  %v9086_v9 = vpack.c.bf16 %v8261_v15, %v8255_v30 }
 0x170   : > { %v1022_v2 = vpop.f32.mrf.mxu1  ;;  %v8267_v42 = vpop.eup %8266  ;;  %8292 = vtanh.f32 %v764_v24  ;;  %v766_v25 = vadd.f32 %v765_v57, %v8850_v47  ;;  %v9082_v44 = vpack.c.bf16 %v8265_v23, %v8257_v13 }
 0x171   : > { %v1023_v29 = vadd.f32 %v1022_v2, %v8853_v48  ;;  %v8269_v4 = vpop.eup %8268  ;;  %8294 = vtanh.f32 %v1021_v26  ;;  %v769_v7 = vpop.f32.mrf.mxu0  ;;  %v9084_v8 = vpack.c.bf16 %v8267_v42, %v8259_v20  ;;  %11678 = vst [vmem:[#allocation20_spill] sm:$0xff] %v9086_v9 }
 0x172   : > { %11676 = vst [vmem:[#allocation18_spill] sm:$0xff] %v9082_v44  ;;  %v1026_v45 = vpop.f32.mrf.mxu1  ;;  %v8271_v37 = vpop.eup %8270  ;;  %8296 = vtanh.f32 %v766_v25  ;;  %v770_v36 = vadd.f32 %v769_v7, %v8845_v46  ;;  %2175 = vmatprep.mubr.bf16.mxu0 %v9082_v44  ;;  %v9090_v24 = vpack.c.bf16 %v8263_v21, %v8269_v4 }
 0x173   : > { %11677 = vst [vmem:[#allocation19_spill] sm:$0xff] %v9084_v8  ;;  %v8273_v57 = vpop.eup %8272  ;;  %8298 = vtanh.f32 %v1023_v29  ;;  %2368 = vmatprep.mubr.bf16.mxu1 %v9084_v8  ;;  %v771_v13 = vpop.f32.mrf.mxu0  ;;  %2176 = vmatmul.mubr.bf16.gmra.mxu0 %v9086_v9  ;;  %v1027_v7 = vadd.f32 %v1026_v45, %v8857_v54 }
 0x174   : > { %11679 = vst [vmem:[#allocation21_spill] sm:$0xff] %v9090_v24  ;;  %v1028_v26 = vpop.f32.mrf.mxu1  ;;  %v8275_v42 = vpop.eup %8274  ;;  %8300 = vtanh.f32 %v1015_v18  ;;  %v772_v30 = vadd.f32 %v771_v13, %v8850_v47  ;;  %2369 = vmatmul.mubr.bf16.gmra.mxu1 %v9090_v24 }
 0x175   : > { %v1029_v20 = vadd.f32 %v1028_v26, %v8853_v48  ;;  %v8277_v15 = vpop.eup %8276  ;;  %8302 = vtanh.f32 %v770_v36  ;;  %v775_v4 = vpop.f32.mrf.mxu0 }
 0x176   : > { %v1032_v21 = vpop.f32.mrf.mxu1  ;;  %v8279_v23 = vpop.eup %8278  ;;  %8304 = vtanh.f32 %v772_v30  ;;  %v776_v2 = vadd.f32 %v775_v4, %v8845_v46 }
 0x177   : > { %v1033_v25 = vadd.f32 %v1032_v21, %v8857_v54  ;;  %v8281_v29 = vpop.eup %8280  ;;  %8306 = vtanh.f32 %v1029_v20  ;;  %v777_v18 = vpop.f32.mrf.mxu0  ;;  %v9106_v21 = vpack.c.bf16 %v8277_v15, %v8271_v37 }
 0x178   : > { %v1034_v13 = vpop.f32.mrf.mxu1  ;;  %v8283_v9 = vpop.eup %8282  ;;  %8308 = vtanh.f32 %v776_v2  ;;  %v778_v26 = vadd.f32 %v777_v18, %v8850_v47  ;;  %v9102_v24 = vpack.c.bf16 %v8281_v29, %v8273_v57  ;;  %v7791_v18 = vld [vmem:[#allocation5 + $0x2e4] ss:$16 sps:$4 sm:$0xff]  }
 0x179   : > { %v1035_v36 = vadd.f32 %v1034_v13, %v8853_v48  ;;  %v8285_v8 = vpop.eup %8284  ;;  %8310 = vtanh.f32 %v1033_v25  ;;  %v781_v30 = vpop.f32.mrf.mxu0  ;;  %v9104_v44 = vpack.c.bf16 %v8283_v9, %v8275_v42  ;;  %11682 = vst [vmem:[#allocation24_spill] sm:$0xff] %v9106_v21  ;;  %4246 = vmatprep.subr.bf16.mxu1 %v7791_v18 }
 0x17a   : > { %11680 = vst [vmem:[#allocation22_spill] sm:$0xff] %v9102_v24  ;;  %v1038_v4 = vpop.f32.mrf.mxu1  ;;  %v8287_v45 = vpop.eup %8286  ;;  %8312 = vtanh.f32 %v778_v26  ;;  %v782_v20 = vadd.f32 %v781_v30, %v8845_v46  ;;  %2185 = vmatprep.mubr.bf16.mxu0 %v9102_v24  ;;  %v9110_v2 = vpack.c.bf16 %v8279_v23, %v8285_v8 }
 0x17b   : > { %11681 = vst [vmem:[#allocation23_spill] sm:$0xff] %v9104_v44  ;;  %v8289_v13 = vpop.eup %8288  ;;  %8314 = vtanh.f32 %v1035_v36  ;;  %2378 = vmatprep.mubr.bf16.mxu1 %v9104_v44  ;;  %v783_v57 = vpop.f32.mrf.mxu0  ;;  %2186 = vmatmul.mubr.bf16.gmra.mxu0 %v9106_v21 }
 0x17c   : > { %11683 = vst [vmem:[#allocation25_spill] sm:$0xff] %v9110_v2  ;;  %v1040_v25 = vpop.f32.mrf.mxu1  ;;  %v8291_v9 = vpop.eup %8290  ;;  %8316 = vtanh.f32 %v1027_v7  ;;  %v784_v37 = vadd.f32 %v783_v57, %v8850_v47  ;;  %2379 = vmatmul.mubr.bf16.gmra.mxu1 %v9110_v2  ;;  %v1039_v7 = vadd.f32 %v1038_v4, %v8857_v54 }
 0x17d   : > { %v1041_v42 = vadd.f32 %v1040_v25, %v8853_v48  ;;  %v8293_v8 = vpop.eup %8292  ;;  %8318 = vtanh.f32 %v782_v20  ;;  %v787_v15 = vpop.f32.mrf.mxu0 }
 0x17e   : > { %v1044_v23 = vpop.f32.mrf.mxu1  ;;  %v8295_v29 = vpop.eup %8294  ;;  %8320 = vtanh.f32 %v784_v37  ;;  %v788_v26 = vadd.f32 %v787_v15, %v8845_v46 }
 0x17f   : > { %v1045_v36 = vadd.f32 %v1044_v23, %v8857_v54  ;;  %v8297_v30 = vpop.eup %8296  ;;  %8322 = vtanh.f32 %v1041_v42  ;;  %v789_v57 = vpop.f32.mrf.mxu0  ;;  %v9126_v23 = vpack.c.bf16 %v8293_v8, %v8287_v45 }
 0x180   : > { %v1046_v21 = vpop.f32.mrf.mxu1  ;;  %v8299_v25 = vpop.eup %8298  ;;  %8324 = vtanh.f32 %v788_v26  ;;  %v790_v18 = vadd.f32 %v789_v57, %v8850_v47  ;;  %v9122_v2 = vpack.c.bf16 %v8297_v30, %v8289_v13 }
 0x181   : > { %v1047_v20 = vadd.f32 %v1046_v21, %v8853_v48  ;;  %v8301_v44 = vpop.eup %8300  ;;  %8326 = vtanh.f32 %v1045_v36  ;;  %v793_v37 = vpop.f32.mrf.mxu0  ;;  %v9124_v24 = vpack.c.bf16 %v8299_v25, %v8291_v9  ;;  %11685 = vst [vmem:[#allocation27_spill] sm:$0xff] %v9126_v23 }
 0x182   : > { %v1050_v15 = vpop.f32.mrf.mxu1  ;;  %v8303_v4 = vpop.eup %8302  ;;  %8328 = vtanh.f32 %v790_v18  ;;  %v794_v42 = vadd.f32 %v793_v37, %v8845_v46  ;;  %2195 = vmatprep.mubr.bf16.mxu0 %v9122_v2  ;;  %v9130_v26 = vpack.c.bf16 %v8295_v29, %v8301_v44 }
 0x183   : > { %11684 = vst [vmem:[#allocation26_spill] sm:$0xff] %v9124_v24  ;;  %v8305_v57 = vpop.eup %8304  ;;  %8330 = vtanh.f32 %v1047_v20  ;;  %2388 = vmatprep.mubr.bf16.mxu1 %v9124_v24  ;;  %v795_v21 = vpop.f32.mrf.mxu0  ;;  %2196 = vmatmul.mubr.bf16.gmra.mxu0 %v9126_v23  ;;  %v1051_v37 = vadd.f32 %v1050_v15, %v8857_v54 }
 0x184   : > { %11686 = vst [vmem:[#allocation28_spill] sm:$0xff] %v9130_v26  ;;  %v1052_v13 = vpop.f32.mrf.mxu1  ;;  %v8307_v9 = vpop.eup %8306  ;;  %8332 = vtanh.f32 %v1039_v7  ;;  %v796_v45 = vadd.f32 %v795_v21, %v8850_v47  ;;  %2389 = vmatmul.mubr.bf16.gmra.mxu1 %v9130_v26 }
 0x185   : > { %v1053_v8 = vadd.f32 %v1052_v13, %v8853_v48  ;;  %v8309_v36 = vpop.eup %8308  ;;  %8334 = vtanh.f32 %v794_v42  ;;  %v799_v44 = vpop.f32.mrf.mxu0 }
 0x186   : > { %v1056_v29 = vpop.f32.mrf.mxu1  ;;  %v8311_v30 = vpop.eup %8310  ;;  %8336 = vtanh.f32 %v796_v45  ;;  %v800_v25 = vadd.f32 %v799_v44, %v8845_v46  ;;  %v9146_v46 = vpack.c.bf16 %v8309_v36, %v8303_v4 }
 0x187   : > { %v1057_v18 = vadd.f32 %v1056_v29, %v8857_v54  ;;  %v8313_v20 = vpop.eup %8312  ;;  %8338 = vtanh.f32 %v1053_v8  ;;  %v801_v7 = vpop.f32.mrf.mxu0 }
 0x188   : > { %v1058_v21 = vpop.f32.mrf.mxu1  ;;  %v8315_v23 = vpop.eup %8314  ;;  %8340 = vtanh.f32 %v800_v25  ;;  %v802_v13 = vadd.f32 %v801_v7, %v8850_v47  ;;  %v9142_v26 = vpack.c.bf16 %v8313_v20, %v8305_v57 }
 0x189   : > { %v1059_v42 = vadd.f32 %v1058_v21, %v8853_v48  ;;  %v8317_v24 = vpop.eup %8316  ;;  %8342 = vtanh.f32 %v1057_v18  ;;  %v9144_v45 = vpack.c.bf16 %v8315_v23, %v8307_v9 }
 0x18a   : > { %v8319_v44 = vpop.eup %8318  ;;  %8344 = vtanh.f32 %v802_v13  ;;  %2205 = vmatprep.mubr.bf16.mxu0 %v9142_v26  ;;  %v9149_v54 = vpack.c.bf16 %v8311_v30, %v8317_v24 }
 0x18b   : > { %v8321_v15 = vpop.eup %8320  ;;  %8346 = vtanh.f32 %v1059_v42  ;;  %2398 = vmatprep.mubr.bf16.mxu1 %v9144_v45  ;;  %2206 = vmatmul.mubr.bf16.gmra.mxu0 %v9146_v46 }
 0x18c   : > { %v8323_v47 = vpop.eup %8322  ;;  %8348 = vtanh.f32 %v1051_v37  ;;  %2399 = vmatmul.mubr.bf16.gmra.mxu1 %v9149_v54 }
 0x18d   : > { %v8325_v48 = vpop.eup %8324 }
 0x18e   : > { %v8327_v23 = vpop.eup %8326  ;;  %v9158_v24 = vpack.c.bf16 %v8325_v48, %v8319_v44  ;;  %v7774_v48 = vld [vmem:[#allocation5 + $0xe0] ss:$16 sps:$4 sm:$0xff]  }
 0x18f   : > { %v8329_v4 = vpop.eup %8328 }
 0x190   : > { %v8331_v57 = vpop.eup %8330  ;;  %v9154_v9 = vpack.c.bf16 %v8329_v4, %v8321_v15  ;;  %v7789_v4 = vld [vmem:[#allocation5 + $0x2e0] ss:$16 sps:$4 sm:$0xff]  }
 0x191   : > { %v8333_v8 = vpop.eup %8332  ;;  %v9156_v36 = vpack.c.bf16 %v8331_v57, %v8323_v47  ;;  %v7800_v57 = vld [vmem:[#allocation5 + $0x2c4] ss:$16 sps:$4 sm:$0xff]  }
 0x192   : > { %v8335_v29 = vpop.eup %8334  ;;  %2215 = vmatprep.mubr.bf16.mxu0 %v9154_v9  ;;  %v9161_v30 = vpack.c.bf16 %v8327_v23, %v8333_v8  ;;  %v7779_v23 = vld [vmem:[#allocation5 + $0xc4] ss:$16 sps:$4 sm:$0xff]   ;;  %v7777_v8 = vld [vmem:[#allocation5 + $0xc0] ss:$16 sps:$4 sm:$0xff]  }
 0x193   : > { %v8337_v25 = vpop.eup %8336  ;;  %2408 = vmatprep.mubr.bf16.mxu1 %v9156_v36  ;;  %2216 = vmatmul.mubr.bf16.gmra.mxu0 %v9158_v24 }
 0x194   : > { %v8339_v18 = vpop.eup %8338  ;;  %2409 = vmatmul.mubr.bf16.gmra.mxu1 %v9161_v30 }
 0x195   : > { %v8341_v20 = vpop.eup %8340 }
 0x196   : > { %v8343_v37 = vpop.eup %8342  ;;  %v9170_v15 = vpack.c.bf16 %v8341_v20, %v8335_v29  ;;  %v7782_v29 = vld [vmem:[#allocation5 + $0xa4] ss:$16 sps:$4 sm:$0xff]   ;;  %v7816_v20 = vld [vmem:[#allocation5 + $0x280] ss:$16 sps:$4 sm:$0xff]  }
 0x197   : > { %v8345_v7 = vpop.eup %8344 }
 0x198   : > { %v8347_v21 = vpop.eup %8346  ;;  %v9166_v13 = vpack.c.bf16 %v8345_v7, %v8337_v25  ;;  %v7780_v25 = vld [vmem:[#allocation5 + $0xa0] ss:$16 sps:$4 sm:$0xff]  }
 0x199   : > { %v8349_v42 = vpop.eup %8348  ;;  %v9168_v44 = vpack.c.bf16 %v8347_v21, %v8339_v18  ;;  %v7785_v18 = vld [vmem:[#allocation5 + $0x84] ss:$16 sps:$4 sm:$0xff]   ;;  %v7786_v7 = vld [vmem:[#allocation5 + $0x60] ss:$16 sps:$4 sm:$0xff]  }
 0x19a   : > { %2225 = vmatprep.mubr.bf16.mxu0 %v9166_v13  ;;  %v9173_v47 = vpack.c.bf16 %v8343_v37, %v8349_v42  ;;  %v7827_v37 = vld [vmem:[#allocation5 + $0x264] ss:$16 sps:$4 sm:$0xff]   ;;  %v7825_v21 = vld [vmem:[#allocation5 + $0x260] ss:$16 sps:$4 sm:$0xff]  }
 0x19b   : > { %2418 = vmatprep.mubr.bf16.mxu1 %v9168_v44  ;;  %2226 = vmatmul.mubr.bf16.gmra.mxu0 %v9170_v15  ;;  %v7834_v42 = vld [vmem:[#allocation5 + $0x240] ss:$16 sps:$4 sm:$0xff]  }
 0x19c   : > { %2419 = vmatmul.mubr.bf16.gmra.mxu1 %v9173_v47  ;;  %2461 = vmatprep.mubr.bf16.mxu0 %v8882_v43  ;;  %v7798_v43 = vld [vmem:[#allocation5 + $0x2c0] ss:$16 sps:$4 sm:$0xff]  }
 0x19d   : > { %2654 = vmatprep.mubr.bf16.mxu1 %v8884_v53  ;;  %v7809_v53 = vld [vmem:[#allocation5 + $0x2a4] ss:$16 sps:$4 sm:$0xff]  }
 0x1a3   : > { %2462 = vmatmul.mubr.bf16.vlgmr.msra.gmra.mxu0 %v8886_v55  ;;  %v7807_v55 = vld [vmem:[#allocation5 + $0x2a0] ss:$16 sps:$4 sm:$0xff]  }
 0x1a4   : > { %2655 = vmatmul.mubr.bf16.vlgmr.msra.gmra.mxu1 %v8890_v60  ;;  %2471 = vmatprep.mubr.bf16.mxu0 %v8902_v22  ;;  %v7818_v60 = vld [vmem:[#allocation5 + $0x284] ss:$16 sps:$4 sm:$0xff]   ;;  %v7783_v22 = vld [vmem:[#allocation5 + $0x80] ss:$16 sps:$4 sm:$0xff]  }
 0x1a5   : > { %2664 = vmatprep.mubr.bf16.mxu1 %v8904_v27  ;;  %4054 = vmatpush1.bf16.msra.mxu0 %v7774_v48  ;;  %v7788_v27 = vld [vmem:[#allocation5 + $0x64] ss:$16 sps:$4 sm:$0xff]  }
 0x1a6   : > { %4055 = vmatprep.subr.bf16.mxu0 %v7779_v23  ;;  %4247 = vmatpush1.bf16.msra.mxu1 %v7789_v4  ;;  %v7842_v48 = vld [vmem:[#allocation5 + $0x224] ss:$16 sps:$4 sm:$0xff]   ;;  %v7795_v23 = vld [vmem:[#allocation5 + $0x20] ss:$16 sps:$4 sm:$0xff]  }
 0x1a7   : > { %4248 = vmatprep.subr.bf16.mxu1 %v7800_v57  ;;  %v7840_v4 = vld [vmem:[#allocation5 + $0x220] ss:$16 sps:$4 sm:$0xff]  }
 0x1a8   : > { %v7843_v57 = vld [vmem:[#allocation5 + $0x200] ss:$16 sps:$4 sm:$0xff]  }
 0x1a9   : > { %4056 = vmatpush1.bf16.msra.mxu0 %v7777_v8  ;;  %v7848_v8 = vld [vmem:[#allocation5 + $0x3e4] ss:$16 sps:$4 sm:$0xff]  }
 0x1aa   : > { %4057 = vmatprep.subr.bf16.mxu0 %v7782_v29  ;;  %4249 = vmatpush1.bf16.msra.mxu1 %v7798_v43  ;;  %v7804_v29 = vld [vmem:[#allocation5 + $0x1e0] ss:$16 sps:$4 sm:$0xff]  }
 0x1ab   : > { %2472 = vmatmul.mubr.bf16.gmra.mxu0 %v8906_v28  ;;  %4250 = vmatprep.subr.bf16.mxu1 %v7809_v53  ;;  %v7794_v28 = vld [vmem:[#allocation5 + $0x44] ss:$16 sps:$4 sm:$0xff]   ;;  %v7846_v43 = vld [vmem:[#allocation5 + $0x3e0] ss:$16 sps:$4 sm:$0xff]  }
 0x1ac   : > { %2665 = vmatmul.mubr.bf16.gmra.mxu1 %v8910_v33  ;;  %2481 = vmatprep.mubr.bf16.mxu0 %v8922_v6  ;;  %v7836_v33 = vld [vmem:[#allocation5 + $0x244] ss:$16 sps:$4 sm:$0xff]   ;;  %v7792_v6 = vld [vmem:[#allocation5 + $0x40] ss:$16 sps:$4 sm:$0xff]  }
 0x1ad   : > { %2674 = vmatprep.mubr.bf16.mxu1 %v8924_v11  ;;  %4058 = vmatpush1.bf16.msra.mxu0 %v7780_v25  ;;  %v7797_v11 = vld [vmem:[#allocation5 + $0x24] ss:$16 sps:$4 sm:$0xff]   ;;  %v7849_v53 = vld [vmem:[#allocation5 + $0x3c0] ss:$16 sps:$4 sm:$0xff]  }
 0x1ae   : > { %4059 = vmatprep.subr.bf16.mxu0 %v7785_v18  ;;  %4251 = vmatpush1.bf16.msra.mxu1 %v7807_v55  ;;  %v7813_v25 = vld [vmem:[#allocation5 + $0x1a0] ss:$16 sps:$4 sm:$0xff]   ;;  %v7821_v18 = vld [vmem:[#allocation5 + $0x184] ss:$16 sps:$4 sm:$0xff]  }
 0x1af   : > { %4252 = vmatprep.subr.bf16.mxu1 %v7818_v60  ;;  %v7822_v55 = vld [vmem:[#allocation5 + $0x160] ss:$16 sps:$4 sm:$0xff]   ;;  %v7830_v60 = vld [vmem:[#allocation5 + $0x144] ss:$16 sps:$4 sm:$0xff]  }
 0x1b1   : > { %4060 = vmatpush1.bf16.msra.mxu0 %v7783_v22  ;;  %v7857_v22 = vld [vmem:[#allocation5 + $0x384] ss:$16 sps:$4 sm:$0xff]  }
 0x1b2   : > { %4061 = vmatprep.subr.bf16.mxu0 %v7788_v27  ;;  %4253 = vmatpush1.bf16.msra.mxu1 %v7816_v20  ;;  %v7839_v27 = vld [vmem:[#allocation5 + $0x104] ss:$16 sps:$4 sm:$0xff]  }
 0x1b3   : > { %2482 = vmatmul.mubr.bf16.gmra.mxu0 %v8926_v12  ;;  %4254 = vmatprep.subr.bf16.mxu1 %v7827_v37  ;;  %v7803_v12 = vld [vmem:[#allocation5 + $0x4] ss:$16 sps:$4 sm:$0xff]  }
 0x1b4   : > { %2675 = vmatmul.mubr.bf16.gmra.mxu1 %v8930_v17  ;;  %2491 = vmatprep.mubr.bf16.mxu0 %v8942_v56  ;;  %v7845_v17 = vld [vmem:[#allocation5 + $0x204] ss:$16 sps:$4 sm:$0xff]   ;;  %v7801_v56 = vld [vmem:[#allocation5] ss:$16 sps:$4 sm:$0xff]  }
 0x1b5   : > { %2684 = vmatprep.mubr.bf16.mxu1 %v8944_v62  ;;  %4062 = vmatpush1.bf16.msra.mxu0 %v7786_v7  ;;  %v7806_v62 = vld [vmem:[#allocation5 + $0x1e4] ss:$16 sps:$4 sm:$0xff]  }
 0x1b6   : > { %4063 = vmatprep.subr.bf16.mxu0 %v7794_v28  ;;  %4255 = vmatpush1.bf16.msra.mxu1 %v7825_v21  ;;  %v7860_v20 = vld [vmem:[#allocation5 + $0x364] ss:$16 sps:$4 sm:$0xff]  }
 0x1b7   : > { %4256 = vmatprep.subr.bf16.mxu1 %v7836_v33  ;;  %v7864_v33 = vld [vmem:[#allocation5 + $0x320] ss:$16 sps:$4 sm:$0xff]  }
 0x1b9   : > { %4064 = vmatpush1.bf16.msra.mxu0 %v7792_v6 }
 0x1ba   : > { %4065 = vmatprep.subr.bf16.mxu0 %v7797_v11  ;;  %4257 = vmatpush1.bf16.msra.mxu1 %v7834_v42  ;;  %v11688_v11 = vld [vmem:[#allocation17_spill] sm:$0xff]  ;;  %v11689_v42 = vld [vmem:[#allocation18_spill] sm:$0xff] }
 0x1bb   : > { %2492 = vmatmul.mubr.bf16.gmra.mxu0 %v8946_v63  ;;  %4258 = vmatprep.subr.bf16.mxu1 %v7842_v48  ;;  %v7812_v63 = vld [vmem:[#allocation5 + $0x1c4] ss:$16 sps:$4 sm:$0xff]   ;;  %v11690_v48 = vld [vmem:[#allocation19_spill] sm:$0xff] }
 0x1bc   : > { %2685 = vmatmul.mubr.bf16.gmra.mxu1 %v8950_v5  ;;  %2501 = vmatprep.mubr.bf16.mxu0 %v8962_v38  ;;  %v7851_v5 = vld [vmem:[#allocation5 + $0x3c4] ss:$16 sps:$4 sm:$0xff]   ;;  %v7810_v38 = vld [vmem:[#allocation5 + $0x1c0] ss:$16 sps:$4 sm:$0xff]  }
 0x1bd   : > { %2694 = vmatprep.mubr.bf16.mxu1 %v8964_v50  ;;  %4066 = vmatpush1.bf16.msra.mxu0 %v7795_v23  ;;  %v7815_v50 = vld [vmem:[#allocation5 + $0x1a4] ss:$16 sps:$4 sm:$0xff]  }
 0x1be   : > { %4067 = vmatprep.subr.bf16.mxu0 %v7803_v12  ;;  %4259 = vmatpush1.bf16.msra.mxu1 %v7840_v4 }
 0x1bf   : > { %4260 = vmatprep.subr.bf16.mxu1 %v7845_v17 }
 0x1c1   : > { %4068 = vmatpush1.bf16.msra.mxu0 %v7801_v56  ;;  %v7875_v56 = vld [vmem:[#allocation5 + $0x304] ss:$16 sps:$4 sm:$0xff]  }
 0x1c2   : > { %4069 = vmatprep.subr.bf16.mxu0 %v7806_v62  ;;  %4261 = vmatpush1.bf16.msra.mxu1 %v7843_v57  ;;  %v7873_v57 = vld [vmem:[#allocation5 + $0x300] ss:$16 sps:$4 sm:$0xff]  }
 0x1c3   : > { %2502 = vmatmul.mubr.bf16.gmra.mxu0 %v8966_v51  ;;  %4262 = vmatprep.subr.bf16.mxu1 %v7848_v8  ;;  %v7854_v51 = vld [vmem:[#allocation5 + $0x3a4] ss:$16 sps:$4 sm:$0xff]  }
 0x1c4   : > { %2695 = vmatmul.mubr.bf16.gmra.mxu1 %v8970_v61  ;;  %2511 = vmatprep.mubr.bf16.mxu0 %v8982_v34  ;;  %v7852_v61 = vld [vmem:[#allocation5 + $0x3a0] ss:$16 sps:$4 sm:$0xff]  }
 0x1c5   : > { %2704 = vmatprep.mubr.bf16.mxu1 %v8984_v40  ;;  %4070 = vmatpush2.bf16.msra.mxu0 %v7804_v29  ;;  %v7819_v34 = vld [vmem:[#allocation5 + $0x180] ss:$16 sps:$4 sm:$0xff]   ;;  %v7824_v40 = vld [vmem:[#allocation5 + $0x164] ss:$16 sps:$4 sm:$0xff]  }
 0x1c6   : > { %4071 = vmatprep.subr.bf16.mxu0 %v7812_v63  ;;  %4263 = vmatpush2.bf16.msra.mxu1 %v7846_v43  ;;  %v11691_v63 = vld [vmem:[#allocation20_spill] sm:$0xff] }
 0x1c7   : > { %4264 = vmatprep.subr.bf16.mxu1 %v7851_v5  ;;  %v11692_v5 = vld [vmem:[#allocation21_spill] sm:$0xff] }
 0x1c9   : > { %4072 = vmatpush2.bf16.msra.mxu0 %v7810_v38  ;;  %v11693_v38 = vld [vmem:[#allocation22_spill] sm:$0xff] }
 0x1ca   : > { %4073 = vmatprep.subr.bf16.mxu0 %v7815_v50  ;;  %4265 = vmatpush2.bf16.msra.mxu1 %v7849_v53  ;;  %v11694_v50 = vld [vmem:[#allocation23_spill] sm:$0xff] }
 0x1cb   : > { %2512 = vmatmul.mubr.bf16.gmra.mxu0 %v8986_v41  ;;  %4266 = vmatprep.subr.bf16.mxu1 %v7854_v51  ;;  %v7855_v41 = vld [vmem:[#allocation5 + $0x380] ss:$16 sps:$4 sm:$0xff]  }
 0x1cc   : > { %2705 = vmatmul.mubr.bf16.gmra.mxu1 %v8990_v1  ;;  %2521 = vmatprep.mubr.bf16.mxu0 %v9002_v35  ;;  %v7828_v1 = vld [vmem:[#allocation5 + $0x140] ss:$16 sps:$4 sm:$0xff]   ;;  %v7833_v35 = vld [vmem:[#allocation5 + $0x124] ss:$16 sps:$4 sm:$0xff]  }
 0x1cd   : > { %2714 = vmatprep.mubr.bf16.mxu1 %v9004_v59  ;;  %4074 = vmatpush2.bf16.msra.mxu0 %v7813_v25  ;;  %v7831_v59 = vld [vmem:[#allocation5 + $0x120] ss:$16 sps:$4 sm:$0xff]  }
 0x1ce   : > { %4075 = vmatprep.subr.bf16.mxu0 %v7821_v18  ;;  %4267 = vmatpush2.bf16.msra.mxu1 %v7852_v61 }
 0x1cf   : > { %4268 = vmatprep.subr.bf16.mxu1 %v7857_v22 }
 0x1d1   : > { %4076 = vmatpush2.bf16.msra.mxu0 %v7819_v34 }
 0x1d2   : > { %4077 = vmatprep.subr.bf16.mxu0 %v7824_v40  ;;  %4269 = vmatpush2.bf16.msra.mxu1 %v7855_v41  ;;  %v11696_v41 = vld [vmem:[#allocation25_spill] sm:$0xff] }
 0x1d3   : > { %2522 = vmatmul.mubr.bf16.gmra.mxu0 %v9006_v39  ;;  %v7858_v39 = vld [vmem:[#allocation5 + $0x360] ss:$16 sps:$4 sm:$0xff]   ;;  %4270 = vmatprep.subr.bf16.mxu1 %v7860_v20 }
 0x1d4   : > { %2715 = vmatmul.mubr.bf16.gmra.mxu1 %v9010_v3  ;;  %2531 = vmatprep.mubr.bf16.mxu0 %v9022_v58  ;;  %v7837_v3 = vld [vmem:[#allocation5 + $0x100] ss:$16 sps:$4 sm:$0xff]  }
 0x1d5   : > { %2724 = vmatprep.mubr.bf16.mxu1 %v9024_v14  ;;  %4078 = vmatpush2.bf16.msra.mxu0 %v7822_v55  ;;  %v7861_v58 = vld [vmem:[#allocation5 + $0x340] ss:$16 sps:$4 sm:$0xff]   ;;  %v7863_v14 = vld [vmem:[#allocation5 + $0x344] ss:$16 sps:$4 sm:$0xff]  }
 0x1d6   : > { %4079 = vmatprep.subr.bf16.mxu0 %v7830_v60  ;;  %4271 = vmatpush2.bf16.msra.mxu1 %v7858_v39  ;;  %v11695_v55 = vld [vmem:[#allocation24_spill] sm:$0xff]  ;;  %v7887_v60 = vld [vmem:[#allocation5 + $0x2ec] ss:$16 sps:$4 sm:$0xff]  }
 0x1d7   : > { %4272 = vmatprep.subr.bf16.mxu1 %v7863_v14  ;;  %v11698_v14 = vld [vmem:[#allocation27_spill] sm:$0xff] }
 0x1d9   : > { %4080 = vmatpush2.bf16.msra.mxu0 %v7828_v1  ;;  %v11697_v1 = vld [vmem:[#allocation26_spill] sm:$0xff] }
 0x1da   : > { %4081 = vmatprep.subr.bf16.mxu0 %v7833_v35  ;;  %4273 = vmatpush2.bf16.msra.mxu1 %v7861_v58 }
 0x1db   : > { %2532 = vmatmul.mubr.bf16.gmra.mxu0 %v9026_v52  ;;  %v7869_v52 = vld [vmem:[#allocation5 + $0xec] ss:$16 sps:$4 sm:$0xff]  }
 0x1dc   : > { %2725 = vmatmul.mubr.bf16.gmra.mxu1 %v9030_v10  ;;  %2541 = vmatprep.mubr.bf16.mxu0 %v9042_v19 }
 0x1dd   : > { %2734 = vmatprep.mubr.bf16.mxu1 %v9044_v16  ;;  %4082 = vmatpush2.bf16.msra.mxu0 %v7831_v59 }
 0x1de   : > { %4083 = vmatprep.subr.bf16.mxu0 %v7839_v27 }
 0x1e1   : > { %4084 = vmatpush2.bf16.msra.mxu0 %v7837_v3 }
 0x1e2   : > { %4439 = vmatprep.subr.bf16.mxu0 %v7869_v52  ;;  %v11699_v52 = vld [vmem:[#allocation28_spill] sm:$0xff] }
 0x1e3   : > { %v9212_v37 = vpop.f32.mrf.mxu0  ;;  %2542 = vmatmul.mubr.bf16.gmra.mxu0 %v9046_v32 }
 0x1e4   : > { %v9215_v7 = vpop.f32.mrf.mxu1  ;;  %2735 = vmatmul.mubr.bf16.gmra.mxu1 %v9050_v49  ;;  %2551 = vmatprep.mubr.bf16.mxu0 %v9062_v31  ;;  %v11687_v31 = vld [vmem:[#allocation16_spill] sm:$0xff] }
 0x1e5   : > { %2744 = vmatprep.mubr.bf16.mxu1 %v9064_v0  ;;  %v9220_v10 = vpop.f32.mrf.mxu0  ;;  %v7866_v0 = vld [vmem:[#allocation5 + $0x324] ss:$16 sps:$4 sm:$0xff]  }
 0x1e6   : > { %v9222_v19 = vpop.f32.mrf.mxu1  ;;  %4274 = vmatprep.subr.bf16.mxu1 %v7866_v0 }
 0x1e7   : > { %v9224_v16 = vpop.f32.mrf.mxu0  ;;  %4275 = vmatpush2.bf16.msra.mxu1 %v7864_v33 }
 0x1e8   : > { %v9226_v28 = vpop.f32.mrf.mxu1  ;;  %4276 = vmatprep.subr.bf16.mxu1 %v7875_v56 }
 0x1e9   : > { %v2083_v32 = vpop.f32.mrf.mxu0 }
 0x1ea   : > { %v9228_v21 = vpop.f32.mrf.mxu1 }
 0x1eb   : > { %v9230_v49 = vpop.f32.mrf.mxu0  ;;  %2552 = vmatmul.mubr.bf16.gmra.mxu0 %v11687_v31  ;;  %4277 = vmatpush2.bf16.msra.mxu1 %v7873_v57 }
 0x1ec   : > { %v9233_v6 = vpop.f32.mrf.mxu1  ;;  %2745 = vmatmul.mubr.bf16.gmra.mxu1 %v11688_v11  ;;  %2561 = vmatprep.mubr.bf16.mxu0 %v11689_v42  ;;  %v9307_v11 = vld [vmem:[%s11568_s4] sm:$0xf] }
 0x1ed   : > { %2754 = vmatprep.mubr.bf16.mxu1 %v11690_v48  ;;  %v9238_v23 = vpop.f32.mrf.mxu0  ;;  %4632 = vmatprep.subr.bf16.mxu1 %v7887_v60  ;;  %11700 = vst [vmem:[#allocation16_spill] sm:$0xff] %v9307_v11  ;;  %v11701_v48 = vld [vmem:[#allocation13_spill] sm:$0xff] }
 0x1ee   : > { %v9240_v12 = vpop.f32.mrf.mxu1  ;;  %v9313_v56 = vrot.slane %v9307_v11, %v11701_v48 }
 0x1ef   : > { %v9242_v4 = vpop.f32.mrf.mxu0 }
 0x1f0   : > { %v9244_v17 = vpop.f32.mrf.mxu1  ;;  %v2084_v57 = vadd.f32 %v2083_v32, %v9313_v56 }
 0x1f1   : > { %v9246_v62 = vpop.f32.mrf.mxu0 }
 0x1f2   : > { %v9248_v8 = vpop.f32.mrf.mxu1  ;;  %v2277_v32 = vadd.f32 %v9228_v21, %v2084_v57  ;;  %v2094_v21 = vadd.f32 %v9246_v62, %v9313_v56 }
 0x1f3   : > { %v9250_v29 = vpop.f32.mrf.mxu0  ;;  %2562 = vmatmul.mubr.bf16.gmra.mxu0 %v11691_v63 }
 0x1f4   : > { %v9253_v43 = vpop.f32.mrf.mxu1  ;;  %2755 = vmatmul.mubr.bf16.gmra.mxu1 %v11692_v5  ;;  %2571 = vmatprep.mubr.bf16.mxu0 %v11693_v38  ;;  %v2080_v38 = vadd.f32 %v9220_v10, %v9313_v56  ;;  %vm2820_vm2 = vcmp.gt.f32.partialorder %v2277_v32, 0.0 }
 0x1f5   : > { %2764 = vmatprep.mubr.bf16.mxu1 %v11694_v50  ;;  %v9258_v53 = vpop.f32.mrf.mxu0 }
 0x1f6   : > { %v9260_v25 = vpop.f32.mrf.mxu1 }
 0x1f7   : > { %v9262_v18 = vpop.f32.mrf.mxu0 }
 0x1f8   : > { %v9264_v51 = vpop.f32.mrf.mxu1 }
 0x1f9   : > { %v9266_v61 = vpop.f32.mrf.mxu0 }
 0x1fa   : > { %v9268_v34 = vpop.f32.mrf.mxu1 }
 0x1fb   : > { %v9270_v40 = vpop.f32.mrf.mxu0  ;;  %2572 = vmatmul.mubr.bf16.gmra.mxu0 %v11695_v55 }
 0x1fc   : > { %v9273_v22 = vpop.f32.mrf.mxu1  ;;  %2765 = vmatmul.mubr.bf16.gmra.mxu1 %v11696_v41  ;;  %2581 = vmatprep.mubr.bf16.mxu0 %v9122_v2 }
 0x1fd   : > { %2774 = vmatprep.mubr.bf16.mxu1 %v11697_v1  ;;  %v9278_v35 = vpop.f32.mrf.mxu0 }
 0x1fe   : > { %v9280_v59 = vpop.f32.mrf.mxu1 }
 0x1ff   : > { %v9282_v27 = vpop.f32.mrf.mxu0 }
 0x200   : > { %v9284_v20 = vpop.f32.mrf.mxu1 }
 0x201   : > { %v9286_v39 = vpop.f32.mrf.mxu0 }
 0x202   : > { %v9288_v3 = vpop.f32.mrf.mxu1 }
 0x203   : > { %v9290_v58 = vpop.f32.mrf.mxu0  ;;  %2582 = vmatmul.mubr.bf16.gmra.mxu0 %v11698_v14  ;;  %v2948_v14 = vmul.f32 0.01, %v2277_v32 }
 0x204   : > { %v9293_v2 = vpop.f32.mrf.mxu1  ;;  %2775 = vmatmul.mubr.bf16.gmra.mxu1 %v11699_v52  ;;  %2591 = vmatprep.mubr.bf16.mxu0 %v9142_v26 }
 0x205   : > { %2784 = vmatprep.mubr.bf16.mxu1 %v9144_v45  ;;  %v9298_v33 = vpop.f32.mrf.mxu0 }
 0x206   : > { %v9300_v31 = vpop.f32.mrf.mxu1 }
 0x207   : > { %v9302_v0 = vpop.f32.mrf.mxu0 }
 0x208   : > { %v9309_v42 = vpop.f32.mrf.mxu1 }
 0x209   : > { %v9315_v26 = vpop.f32.mrf.mxu0 }
 0x20a   : > { %v9317_v45 = vpop.f32.mrf.mxu1 }
 0x20b   : > { %v9320_v63 = vpop.f32.mrf.mxu0  ;;  %2592 = vmatmul.mubr.bf16.gmra.mxu0 %v9146_v46  ;;  %v11702_v46 = vld [vmem:[#allocation12_spill] sm:$0xff] }
 0x20c   : > { %v9323_v5 = vpop.f32.mrf.mxu1  ;;  %2785 = vmatmul.mubr.bf16.gmra.mxu1 %v9149_v54  ;;  %2601 = vmatprep.mubr.bf16.mxu0 %v9154_v9  ;;  %v9339_v41 = vrot.slane %v9307_v11, %v11702_v46  ;;  %v2273_v9 = vadd.f32 %v9222_v19, %v2080_v38  ;;  %v2090_v38 = vadd.f32 %v9238_v23, %v9313_v56 }
 0x20d   : > { %2794 = vmatprep.mubr.bf16.mxu1 %v9156_v36  ;;  %v9330_v50 = vpop.f32.mrf.mxu0 }
 0x20e   : > { %v9332_v55 = vpop.f32.mrf.mxu1  ;;  %v2082_v36 = vadd.f32 %v9224_v16, %v9339_v41  ;;  %v2078_v57 = vadd.f32 %v9212_v37, %v9339_v41  ;;  %v2944_v16 = vmul.f32 0.01, %v2273_v9  ;;  %vm2816_vm3 = vcmp.gt.f32.partialorder %v2273_v9, 0.0 }
 0x20f   : > { %v9335_v60 = vpop.f32.mrf.mxu0  ;;  %v2287_v37 = vadd.f32 %v9248_v8, %v2094_v21  ;;  %v2283_v23 = vadd.f32 %v9240_v12, %v2090_v38 }
 0x210   : > { %v9341_v54 = vpop.f32.mrf.mxu1 }
 0x211   : > { %v9344_v1 = vpop.f32.mrf.mxu0  ;;  %v2956_v8 = vmul.f32 0.01, %v2287_v37  ;;  %vm2828_vm5 = vcmp.gt.f32.partialorder %v2287_v37, 0.0  ;;  %vm2824_vm7 = vcmp.gt.f32.partialorder %v2283_v23, 0.0 }
 0x212   : > { %v9348_v10 = vpop.f32.mrf.mxu1 }
 0x213   : > { %v9352_v52 = vpop.f32.mrf.mxu0  ;;  %2602 = vmatmul.mubr.bf16.gmra.mxu0 %v9158_v24  ;;  %v2275_v24 = vadd.f32 %v9226_v28, %v2082_v36  ;;  %v2092_v28 = vadd.f32 %v9242_v4, %v9339_v41  ;;  %v2952_v4 = vmul.f32 0.01, %v2283_v23 }
 0x214   : > { %11703 = vst [vmem:[#allocation17_spill] sm:$0xff] %v9352_v52  ;;  %v9357_v19 = vpop.f32.mrf.mxu1  ;;  %2795 = vmatmul.mubr.bf16.gmra.mxu1 %v9161_v30  ;;  %2611 = vmatprep.mubr.bf16.mxu0 %v9166_v13  ;;  %v3076_v30 = vsel %vm2820_vm2, %v2277_v32, %v2948_v14  ;;  %v2271_v13 = vadd.f32 %v9215_v7, %v2078_v57 }
 0x215   : > { %11704 = vst [vmem:[#allocation18_spill] sm:$0xff] %v9357_v19  ;;  %2804 = vmatprep.mubr.bf16.mxu1 %v9168_v44  ;;  %v9364_v62 = vpop.f32.mrf.mxu0  ;;  %v3072_v44 = vsel %vm2816_vm3, %v2273_v9, %v2944_v16  ;;  %v2947_v52 = vmul.f32 0.01, %v2275_v24  ;;  %vm2819_vm4 = vcmp.gt.f32.partialorder %v2275_v24, 0.0  ;;  %v2104_v7 = vadd.f32 %v9266_v61, %v9313_v56 }
 0x216   : > { %v9367_v46 = vpop.f32.mrf.mxu1  ;;  %v2943_v12 = vmul.f32 0.01, %v2271_v13  ;;  %v2088_v9 = vadd.f32 %v9230_v49, %v9339_v41  ;;  %vm2815_vm6 = vcmp.gt.f32.partialorder %v2271_v13, 0.0  ;;  %v2100_v61 = vadd.f32 %v9258_v53, %v9313_v56 }
 0x217   : > { %11705 = vst [vmem:[#allocation19_spill] sm:$0xff] %v9367_v46  ;;  %v9370_v48 = vpop.f32.mrf.mxu0  ;;  %v9382_v46 = vpack.c.bf16 %v3076_v30, %v3072_v44  ;;  %v3075_v57 = vsel %vm2819_vm4, %v2275_v24, %v2947_v52  ;;  %v2297_v49 = vadd.f32 %v9268_v34, %v2104_v7  ;;  %v2102_v34 = vadd.f32 %v9262_v18, %v9339_v41  ;;  %v7870_v18 = vld [vmem:[#allocation5 + $0xc8] ss:$16 sps:$4 sm:$0xff]  }
 0x218   : > { %v9373_v11 = vpop.f32.mrf.mxu1  ;;  %v3071_v30 = vsel %vm2815_vm6, %v2271_v13, %v2943_v12  ;;  %v2281_v44 = vadd.f32 %v9233_v6, %v2088_v9  ;;  %v2293_v52 = vadd.f32 %v9260_v25, %v2100_v61  ;;  %v2114_v13 = vadd.f32 %v9286_v39, %v9313_v56  ;;  %v7878_v61 = vld [vmem:[#allocation5 + $0xac] ss:$16 sps:$4 sm:$0xff]  }
 0x219   : > { %v9376_v19 = vpop.f32.mrf.mxu0  ;;  %11706 = vst [vmem:[#allocation20_spill] sm:$0xff] %v9382_v46  ;;  %v9408_v53 = vpack.c.bf16 %v3075_v57, %v3071_v30  ;;  %v2964_v6 = vmul.f32 0.01, %v2297_v49  ;;  %vm2836_vm9 = vcmp.gt.f32.partialorder %v2297_v49, 0.0  ;;  %v2110_v39 = vadd.f32 %v9278_v35, %v9313_v56 }
 0x21a   : > { %v9380_v36 = vpop.f32.mrf.mxu1  ;;  %v2951_v25 = vmul.f32 0.01, %v2281_v44  ;;  %vm2823_vm10 = vcmp.gt.f32.partialorder %v2281_v44, 0.0  ;;  %v2960_v9 = vmul.f32 0.01, %v2293_v52  ;;  %vm2832_vm11 = vcmp.gt.f32.partialorder %v2293_v52, 0.0 }
 0x21b   : > { %v9386_v32 = vpop.f32.mrf.mxu0  ;;  %2612 = vmatmul.mubr.bf16.gmra.mxu0 %v9170_v15  ;;  %v2285_v15 = vadd.f32 %v9244_v17, %v2092_v28  ;;  %11709 = vst [vmem:[#allocation23_spill] sm:$0xff] %v9408_v53  ;;  %v3080_v17 = vsel %vm2824_vm7, %v2283_v23, %v2952_v4  ;;  %v7872_v28 = vld [vmem:[#allocation5 + $0xcc] ss:$16 sps:$4 sm:$0xff]   ;;  %v2098_v23 = vadd.f32 %v9250_v29, %v9339_v41 }
 0x21c   : > { %v9391_v14 = vpop.f32.mrf.mxu1  ;;  %2805 = vmatmul.mubr.bf16.gmra.mxu1 %v9173_v47  ;;  %4085 = vmatprep.mubr.bf16.mxu0 %v9382_v46  ;;  %v3084_v47 = vsel %vm2828_vm5, %v2287_v37, %v2956_v8  ;;  %v2295_v29 = vadd.f32 %v9264_v51, %v2102_v34  ;;  %v2307_v30 = vadd.f32 %v9288_v3, %v2114_v13  ;;  %v7881_v34 = vld [vmem:[#allocation5 + $0x8c] ss:$16 sps:$4 sm:$0xff]  }
 0x21d   : > { %11707 = vst [vmem:[#allocation21_spill] sm:$0xff] %v9391_v14  ;;  %v9397_v21 = vpop.f32.mrf.mxu0  ;;  %v7867_v14 = vld [vmem:[#allocation5 + $0xe8] ss:$16 sps:$4 sm:$0xff]   ;;  %v9417_v37 = vpack.c.bf16 %v3084_v47, %v3080_v17  ;;  %vm2827_vm8 = vcmp.gt.f32.partialorder %v2285_v15, 0.0  ;;  %v3092_v17 = vsel %vm2836_vm9, %v2297_v49, %v2964_v6  ;;  %v2291_v35 = vadd.f32 %v9253_v43, %v2098_v23 }
 0x21e   : > { %v9400_v16 = vpop.f32.mrf.mxu1  ;;  %v2112_v51 = vadd.f32 %v9282_v27, %v9339_v41  ;;  %v3088_v3 = vsel %vm2832_vm11, %v2293_v52, %v2960_v9  ;;  %v2963_v49 = vmul.f32 0.01, %v2295_v29  ;;  %vm2835_vm12 = vcmp.gt.f32.partialorder %v2295_v29, 0.0  ;;  %v7884_v9 = vld [vmem:[#allocation5 + $0x6c] ss:$16 sps:$4 sm:$0xff]  }
 0x21f   : > { %11708 = vst [vmem:[#allocation22_spill] sm:$0xff] %v9400_v16  ;;  %v9403_v38 = vpop.f32.mrf.mxu0  ;;  %v2955_v16 = vmul.f32 0.01, %v2285_v15  ;;  %11710 = vst [vmem:[#allocation24_spill] sm:$0xff] %v9417_v37  ;;  %v9453_v43 = vpack.c.bf16 %v3092_v17, %v3088_v3  ;;  %v2972_v6 = vmul.f32 0.01, %v2307_v30 }
 0x220   : > { %v9406_v46 = vpop.f32.mrf.mxu1  ;;  %v2959_v27 = vmul.f32 0.01, %v2291_v35  ;;  %vm2844_vm13 = vcmp.gt.f32.partialorder %v2307_v30, 0.0  ;;  %vm2831_vm14 = vcmp.gt.f32.partialorder %v2291_v35, 0.0 }
 0x221   : > { %v9411_v24 = vpop.f32.mrf.mxu0  ;;  %v3083_v57 = vsel %vm2827_vm8, %v2285_v15, %v2955_v16  ;;  %v2303_v15 = vadd.f32 %v9280_v59, %v2110_v39  ;;  %11713 = vst [vmem:[#allocation27_spill] sm:$0xff] %v9453_v43  ;;  %v2124_v59 = vadd.f32 %v9315_v26, %v9313_v56  ;;  %v3091_v39 = vsel %vm2835_vm12, %v2295_v29, %v2963_v49 }
 0x222   : > { %v9415_v7 = vpop.f32.mrf.mxu1 }
 0x223   : > { %v9421_v8 = vpop.f32.mrf.mxu0  ;;  %4086 = vmatmul.mubr.bf16.vlgmr.msra.gmra.mxu0 %v9408_v53  ;;  %v2968_v23 = vmul.f32 0.01, %v2303_v15  ;;  %vm2840_vm15 = vcmp.gt.f32.partialorder %v2303_v15, 0.0  ;;  %v2317_v17 = vadd.f32 %v9317_v45, %v2124_v59 }
 0x224   : > { %v9426_v12 = vpop.f32.mrf.mxu1  ;;  %4095 = vmatprep.mubr.bf16.mxu0 %v9417_v37  ;;  %4440 = vmatpush1.bf16.msra.mxu0 %v7867_v14  ;;  %v3079_v37 = vsel %vm2823_vm10, %v2281_v44, %v2951_v25  ;;  %v7879_v25 = vld [vmem:[#allocation5 + $0x88] ss:$16 sps:$4 sm:$0xff]  }
 0x225   : > { %11711 = vst [vmem:[#allocation25_spill] sm:$0xff] %v9426_v12  ;;  %v9431_v4 = vpop.f32.mrf.mxu0  ;;  %4441 = vmatprep.subr.bf16.mxu0 %v7872_v28  ;;  %v7876_v28 = vld [vmem:[#allocation5 + $0xa8] ss:$16 sps:$4 sm:$0xff]   ;;  %v9444_v12 = vpack.c.bf16 %v3083_v57, %v3079_v37  ;;  %v2108_v37 = vadd.f32 %v9270_v40, %v9339_v41  ;;  %v2305_v40 = vadd.f32 %v9284_v20, %v2112_v51  ;;  %v2980_v59 = vmul.f32 0.01, %v2317_v17 }
 0x226   : > { %v9435_v47 = vpop.f32.mrf.mxu1  ;;  %v3100_v20 = vsel %vm2844_vm13, %v2307_v30, %v2972_v6  ;;  %v3087_v51 = vsel %vm2831_vm14, %v2291_v35, %v2959_v27  ;;  %v3096_v45 = vsel %vm2840_vm15, %v2303_v15, %v2968_v23  ;;  %v2118_v30 = vadd.f32 %v9290_v58, %v9339_v41  ;;  %v7888_v23 = vld [vmem:[#allocation5 + $0x48] ss:$16 sps:$4 sm:$0xff]  }
 0x227   : > { %v9438_v14 = vpop.f32.mrf.mxu0  ;;  %11712 = vst [vmem:[#allocation26_spill] sm:$0xff] %v9444_v12  ;;  %v2301_v57 = vadd.f32 %v9273_v22, %v2108_v37  ;;  %v9482_v29 = vpack.c.bf16 %v3091_v39, %v3087_v51  ;;  %v2971_v49 = vmul.f32 0.01, %v2305_v40  ;;  %v7890_v37 = vld [vmem:[#allocation5 + $0x4c] ss:$16 sps:$4 sm:$0xff]   ;;  %vm2843_vm0 = vcmp.gt.f32.partialorder %v2305_v40, 0.0 }
 0x228   : > { %v9442_v53 = vpop.f32.mrf.mxu1  ;;  %4442 = vmatpush1.bf16.msra.mxu0 %v7870_v18  ;;  %v2120_v18 = vadd.f32 %v9298_v33, %v9313_v56  ;;  %v2122_v33 = vadd.f32 %v9302_v0, %v9339_v41  ;;  %v9491_v0 = vpack.c.bf16 %v3100_v20, %v3096_v45  ;;  %v2134_v27 = vadd.f32 %v9344_v1, %v9313_v56 }
 0x229   : > { %v9449_v16 = vpop.f32.mrf.mxu0  ;;  %4443 = vmatprep.subr.bf16.mxu0 %v7878_v61  ;;  %11714 = vst [vmem:[#allocation28_spill] sm:$0xff] %v9482_v29  ;;  %v2967_v6 = vmul.f32 0.01, %v2301_v57  ;;  %vm2839_vm1 = vcmp.gt.f32.partialorder %v2301_v57, 0.0  ;;  %vm2852_vm2 = vcmp.gt.f32.partialorder %v2317_v17, 0.0  ;;  %v2130_v58 = vadd.f32 %v9330_v50, %v9313_v56 }
 0x22a   : > { %v9451_v44 = vpop.f32.mrf.mxu1  ;;  %11715 = vst [vmem:[#allocation29_spill] sm:$0xff] %v9491_v0  ;;  %v2311_v20 = vadd.f32 %v9293_v2, %v2118_v30  ;;  %v7891_v30 = vld [vmem:[#allocation5 + $0x28] ss:$16 sps:$4 sm:$0xff]  }
 0x22b   : > { %v9459_v13 = vpop.f32.mrf.mxu0  ;;  %4096 = vmatmul.mubr.bf16.gmra.mxu0 %v9444_v12  ;;  %v3095_v51 = vsel %vm2839_vm1, %v2301_v57, %v2967_v6 }
 0x22c   : > { %v9462_v52 = vpop.f32.mrf.mxu1  ;;  %4105 = vmatprep.mubr.bf16.mxu0 %v9453_v43  ;;  %4444 = vmatpush1.bf16.msra.mxu0 %v7876_v28  ;;  %v2313_v43 = vadd.f32 %v9300_v31, %v2120_v18  ;;  %v2315_v31 = vadd.f32 %v9309_v42, %v2122_v33  ;;  %v3099_v18 = vsel %vm2843_vm0, %v2305_v40, %v2971_v49  ;;  %v7893_v42 = vld [vmem:[#allocation5 + $0x2c] ss:$16 sps:$4 sm:$0xff]   ;;  %vm2847_vm5 = vcmp.gt.f32.partialorder %v2311_v20, 0.0 }
 0x22d   : > { %v9468_v26 = vpop.f32.mrf.mxu0  ;;  %4445 = vmatprep.subr.bf16.mxu0 %v7881_v34  ;;  %v7882_v34 = vld [vmem:[#allocation5 + $0x68] ss:$16 sps:$4 sm:$0xff]   ;;  %v2128_v33 = vadd.f32 %v9320_v63, %v9339_v41  ;;  %v2327_v40 = vadd.f32 %v9348_v10, %v2134_v27  ;;  %v9519_v49 = vpack.c.bf16 %v3099_v18, %v3095_v51  ;;  %v2144_v63 = vadd.f32 %v9376_v19, %v9313_v56 }
 0x22e   : > { %v9471_v61 = vpop.f32.mrf.mxu1  ;;  %v2976_v1 = vmul.f32 0.01, %v2313_v43  ;;  %vm2848_vm3 = vcmp.gt.f32.partialorder %v2313_v43, 0.0  ;;  %v2979_v45 = vmul.f32 0.01, %v2315_v31  ;;  %vm2851_vm4 = vcmp.gt.f32.partialorder %v2315_v31, 0.0 }
 0x22f   : > { %v9475_v28 = vpop.f32.mrf.mxu0  ;;  %11716 = vst [vmem:[#allocation30_spill] sm:$0xff] %v9519_v49  ;;  %vm2860_vm6 = vcmp.gt.f32.partialorder %v2327_v40, 0.0 }
 0x230   : > { %v9480_v3 = vpop.f32.mrf.mxu1  ;;  %4446 = vmatpush1.bf16.msra.mxu0 %v7879_v25  ;;  %v3104_v6 = vsel %vm2848_vm3, %v2313_v43, %v2976_v1  ;;  %v3107_v19 = vsel %vm2851_vm4, %v2315_v31, %v2979_v45  ;;  %v2142_v1 = vadd.f32 %v9370_v48, %v9339_v41  ;;  %v7902_v31 = vld [vmem:[#allocation5 + $0x1ec] ss:$16 sps:$4 sm:$0xff]   ;;  %v2152_v48 = vadd.f32 %v9403_v38, %v9339_v41 }
 0x231   : > { %v9485_v22 = vpop.f32.mrf.mxu0  ;;  %4447 = vmatprep.subr.bf16.mxu0 %v7884_v9  ;;  %v2132_v9 = vadd.f32 %v9335_v60, %v9339_v41  ;;  %v3108_v60 = vsel %vm2852_vm2, %v2317_v17, %v2980_v59  ;;  %v7899_v17 = vld [vmem:[#allocation5 + $0xc] ss:$16 sps:$4 sm:$0xff]   ;;  %v2975_v59 = vmul.f32 0.01, %v2311_v20 }
 0x232   : > { %v9489_v35 = vpop.f32.mrf.mxu1 }
 0x233   : > { %v9495_v25 = vpop.f32.mrf.mxu0  ;;  %4106 = vmatmul.mubr.bf16.gmra.mxu0 %v9482_v29  ;;  %v2325_v57 = vadd.f32 %v9341_v54, %v2132_v9  ;;  %v2140_v54 = vadd.f32 %v9364_v62, %v9313_v56  ;;  %v11718_v62 = vld [vmem:[#allocation17_spill] sm:$0xff]  ;;  %v3103_v45 = vsel %vm2847_vm5, %v2311_v20, %v2975_v59  ;;  %v2148_v20 = vadd.f32 %v9386_v32, %v9339_v41 }
 0x234   : > { %v9501_v15 = vpop.f32.mrf.mxu1  ;;  %4115 = vmatprep.mubr.bf16.mxu0 %v9491_v0  ;;  %4448 = vmatpush1.bf16.msra.mxu0 %v7882_v34  ;;  %v2138_v51 = vadd.f32 %v11718_v62, %v9339_v41  ;;  %v7900_v59 = vld [vmem:[#allocation5 + $0x1e8] ss:$16 sps:$4 sm:$0xff]   ;;  %v2345_v32 = vadd.f32 %v9406_v46, %v2152_v48 }
 0x235   : > { %v9507_v39 = vpop.f32.mrf.mxu0  ;;  %4449 = vmatprep.subr.bf16.mxu0 %v7890_v37  ;;  %v2323_v37 = vadd.f32 %v9332_v55, %v2130_v58  ;;  %v9532_v55 = vpack.c.bf16 %v3108_v60, %v3104_v6  ;;  %v2321_v58 = vadd.f32 %v9323_v5, %v2128_v33  ;;  %v7897_v5 = vld [vmem:[#allocation5 + $0x8] ss:$16 sps:$4 sm:$0xff]   ;;  %v2337_v33 = vadd.f32 %v9380_v36, %v2144_v63 }
 0x236   : > { %v9510_v50 = vpop.f32.mrf.mxu1  ;;  %vm2859_vm8 = vcmp.gt.f32.partialorder %v2325_v57, 0.0  ;;  %v2335_v63 = vadd.f32 %v9373_v11, %v2142_v1  ;;  %v7908_v11 = vld [vmem:[#allocation5 + $0x1cc] ss:$16 sps:$4 sm:$0xff]   ;;  %vm2875_vm14 = vcmp.gt.f32.partialorder %v2345_v32, 0.0 }
 0x237   : > { %v9516_v34 = vpop.f32.mrf.mxu0  ;;  %11717 = vst [vmem:[#allocation31_spill] sm:$0xff] %v9532_v55  ;;  %v2984_v43 = vmul.f32 0.01, %v2323_v37  ;;  %vm2856_vm7 = vcmp.gt.f32.partialorder %v2323_v37, 0.0  ;;  %vm2855_vm9 = vcmp.gt.f32.partialorder %v2321_v58, 0.0  ;;  %vm2868_vm10 = vcmp.gt.f32.partialorder %v2337_v33, 0.0 }
 0x238   : > { %v9522_v2 = vpop.f32.mrf.mxu1  ;;  %4450 = vmatpush1.bf16.msra.mxu0 %v7888_v23  ;;  %v2988_v23 = vmul.f32 0.01, %v2327_v40  ;;  %v2995_v48 = vmul.f32 0.01, %v2335_v63  ;;  %vm2867_vm13 = vcmp.gt.f32.partialorder %v2335_v63, 0.0 }
 0x239   : > { %v9527_v10 = vpop.f32.mrf.mxu0  ;;  %4451 = vmatprep.subr.bf16.mxu0 %v7893_v42  ;;  %v2987_v42 = vmul.f32 0.01, %v2325_v57  ;;  %v3112_v38 = vsel %vm2856_vm7, %v2323_v37, %v2984_v43 }
 0x23a   : > { %v9530_v27 = vpop.f32.mrf.mxu1  ;;  %v3116_v36 = vsel %vm2860_vm6, %v2327_v40, %v2988_v23  ;;  %v2154_v23 = vadd.f32 %v9411_v24, %v9313_v56 }
 0x23b   : > { %v9537_v18 = vpop.f32.mrf.mxu0  ;;  %4116 = vmatmul.mubr.bf16.gmra.mxu0 %v9519_v49  ;;  %v11720_v49 = vld [vmem:[#allocation19_spill] sm:$0xff]  ;;  %v9578_v43 = vpack.c.bf16 %v3116_v36, %v3112_v38  ;;  %v11728_v36 = vld [vmem:[#allocation21_spill] sm:$0xff] }
 0x23c   : > { %v9543_v9 = vpop.f32.mrf.mxu1  ;;  %4125 = vmatprep.mubr.bf16.mxu0 %v9532_v55  ;;  %4452 = vmatpush1.bf16.msra.mxu0 %v7891_v30  ;;  %v9556_v30 = vpack.c.bf16 %v3107_v19, %v3103_v45  ;;  %v2983_v55 = vmul.f32 0.01, %v2321_v58  ;;  %v2333_v0 = vadd.f32 %v11720_v49, %v2140_v54  ;;  %v3115_v19 = vsel %vm2859_vm8, %v2325_v57, %v2987_v42  ;;  %v11721_v45 = vld [vmem:[#allocation18_spill] sm:$0xff]  ;;  %v11724_v42 = vld [vmem:[#allocation16_spill] sm:$0xff] }
 0x23d   : > { %v9549_v60 = vpop.f32.mrf.mxu0  ;;  %4453 = vmatprep.subr.bf16.mxu0 %v7899_v17  ;;  %v2331_v29 = vadd.f32 %v11721_v45, %v2138_v51  ;;  %v2996_v49 = vmul.f32 0.01, %v2337_v33  ;;  %v2150_v54 = vadd.f32 %v9397_v21, %v9313_v56  ;;  %11722 = vst [vmem:[#allocation19_spill] sm:$0xff] %v9578_v43  ;;  %v11723_v21 = vld [vmem:[#allocation15_spill] sm:$0xff]  ;;  %v2341_v38 = vadd.f32 %v11728_v36, %v2148_v20  ;;  %v11729_v45 = vld [vmem:[#allocation22_spill] sm:$0xff] }
 0x23e   : > { %v9554_v6 = vpop.f32.mrf.mxu1  ;;  %11719 = vst [vmem:[#allocation17_spill] sm:$0xff] %v9556_v30  ;;  %v3111_v57 = vsel %vm2855_vm9, %v2321_v58, %v2983_v55  ;;  %v2992_v1 = vmul.f32 0.01, %v2333_v0  ;;  %v9586_v51 = vrot.slane %v11724_v42, %v11723_v21  ;;  %vm2864_vm11 = vcmp.gt.f32.partialorder %v2333_v0, 0.0  ;;  %v7906_v58 = vld [vmem:[#allocation5 + $0x1c8] ss:$16 sps:$4 sm:$0xff]  }
 0x23f   : > { %v9559_v62 = vpop.f32.mrf.mxu0  ;;  %v9592_v24 = vpack.c.bf16 %v3115_v19, %v3111_v57  ;;  %vm2863_vm12 = vcmp.gt.f32.partialorder %v2331_v29, 0.0  ;;  %v2343_v21 = vadd.f32 %v11729_v45, %v2150_v54  ;;  %v7911_v19 = vld [vmem:[#allocation5 + $0x1ac] ss:$16 sps:$4 sm:$0xff]   ;;  %v3003_v57 = vmul.f32 0.01, %v2345_v32 }
 0x240   : > { %v9565_v17 = vpop.f32.mrf.mxu1  ;;  %4454 = vmatpush1.bf16.msra.mxu0 %v7897_v5  ;;  %11725 = vst [vmem:[#allocation18_spill] sm:$0xff] %v9586_v51  ;;  %v2158_v20 = vadd.f32 %v9421_v8, %v9339_v41  ;;  %v2160_v54 = vadd.f32 %v9431_v4, %v9313_v56  ;;  %vm2871_vm15 = vcmp.gt.f32.partialorder %v2341_v38, 0.0  ;;  %v2164_v8 = vadd.f32 %v9449_v16, %v9313_v56 }
 0x241   : > { %v9571_v40 = vpop.f32.mrf.mxu0  ;;  %4455 = vmatprep.subr.bf16.mxu0 %v7902_v31  ;;  %v11726_v31 = vld [vmem:[#allocation14_spill] sm:$0xff]  ;;  %vm2872_vm0 = vcmp.gt.f32.partialorder %v2343_v21, 0.0  ;;  %v2168_v4 = vadd.f32 %v9459_v13, %v9339_v41 }
 0x242   : > { %v9576_v37 = vpop.f32.mrf.mxu1  ;;  %v9590_v46 = vrot.slane %v11724_v42, %v11726_v31  ;;  %v3124_v42 = vsel %vm2868_vm10, %v2337_v33, %v2996_v49  ;;  %v2347_v31 = vadd.f32 %v9415_v7, %v2154_v23  ;;  %v3120_v33 = vsel %vm2864_vm11, %v2333_v0, %v2992_v1  ;;  %v7917_v0 = vld [vmem:[#allocation5 + $0x18c] ss:$16 sps:$4 sm:$0xff]  }
 0x243   : > { %v9581_v5 = vpop.f32.mrf.mxu0  ;;  %4126 = vmatmul.mubr.bf16.gmra.mxu0 %v9556_v30  ;;  %v3123_v49 = vsel %vm2867_vm13, %v2335_v63, %v2995_v48  ;;  %v2999_v7 = vmul.f32 0.01, %v2341_v38  ;;  %v3000_v23 = vmul.f32 0.01, %v2343_v21  ;;  %v3131_v63 = vsel %vm2875_vm14, %v2345_v32, %v3003_v57  ;;  %v11731_v48 = vld [vmem:[#allocation25_spill] sm:$0xff] }
 0x244   : > { %11727 = vst [vmem:[#allocation16_spill] sm:$0xff] %v9590_v46  ;;  %v9595_v55 = vpop.f32.mrf.mxu1  ;;  %4135 = vmatprep.mubr.bf16.mxu0 %v9578_v43  ;;  %4456 = vmatpush2.bf16.msra.mxu0 %v7900_v59  ;;  %v2162_v59 = vadd.f32 %v9438_v14, %v9339_v41  ;;  %v2991_v43 = vmul.f32 0.01, %v2331_v29  ;;  %v7909_v14 = vld [vmem:[#allocation5 + $0x1a8] ss:$16 sps:$4 sm:$0xff]   ;;  %v9623_v46 = vpack.c.bf16 %v3124_v42, %v3120_v33  ;;  %vm2876_vm1 = vcmp.gt.f32.partialorder %v2347_v31, 0.0 }
 0x245   : > { %v9599_v30 = vpop.f32.mrf.mxu0  ;;  %4457 = vmatprep.subr.bf16.mxu0 %v7908_v11  ;;  %v3004_v1 = vmul.f32 0.01, %v2347_v31  ;;  %v2351_v16 = vadd.f32 %v11731_v48, %v2158_v20  ;;  %v2353_v13 = vadd.f32 %v9435_v47, %v2160_v54  ;;  %v2172_v42 = vadd.f32 %v9475_v28, %v9339_v41 }
 0x246   : > { %v9607_v36 = vpop.f32.mrf.mxu1  ;;  %v2355_v51 = vadd.f32 %v9442_v53, %v2162_v59  ;;  %v2357_v53 = vadd.f32 %v9451_v44, %v2164_v8  ;;  %v2361_v28 = vadd.f32 %v9462_v52, %v2168_v4  ;;  %v3128_v59 = vsel %vm2872_vm0, %v2343_v21, %v3000_v23  ;;  %v7918_v4 = vld [vmem:[#allocation5 + $0x168] ss:$16 sps:$4 sm:$0xff]  }
 0x247   : > { %11730 = vst [vmem:[#allocation21_spill] sm:$0xff] %v9607_v36  ;;  %v9611_v45 = vpop.f32.mrf.mxu0  ;;  %v3119_v36 = vsel %vm2863_vm12, %v2331_v29, %v2991_v43  ;;  %v7915_v29 = vld [vmem:[#allocation5 + $0x188] ss:$16 sps:$4 sm:$0xff]   ;;  %v2174_v43 = vadd.f32 %v9485_v22, %v9313_v56  ;;  %v3007_v44 = vmul.f32 0.01, %v2351_v16  ;;  %v2170_v54 = vadd.f32 %v9468_v26, %v9313_v56 }
 0x248   : > { %v9617_v11 = vpop.f32.mrf.mxu1  ;;  %4458 = vmatpush2.bf16.msra.mxu0 %v7906_v58  ;;  %v9637_v32 = vpack.c.bf16 %v3123_v49, %v3119_v36  ;;  %v3011_v36 = vmul.f32 0.01, %v2355_v51  ;;  %v3008_v8 = vmul.f32 0.01, %v2353_v13  ;;  %vm2883_vm2 = vcmp.gt.f32.partialorder %v2355_v51, 0.0 }
 0x249   : > { %v9621_v12 = vpop.f32.mrf.mxu0  ;;  %4459 = vmatprep.subr.bf16.mxu0 %v7911_v19  ;;  %v3127_v19 = vsel %vm2871_vm15, %v2341_v38, %v2999_v7  ;;  %v7920_v38 = vld [vmem:[#allocation5 + $0x16c] ss:$16 sps:$4 sm:$0xff]   ;;  %v3132_v7 = vsel %vm2876_vm1, %v2347_v31, %v3004_v1  ;;  %v2365_v52 = vadd.f32 %v9480_v3, %v2172_v42  ;;  %v2178_v22 = vadd.f32 %v9495_v25, %v9339_v41 }
 0x24a   : > { %v9628_v58 = vpop.f32.mrf.mxu1  ;;  %v9644_v47 = vpack.c.bf16 %v3131_v63, %v3127_v19  ;;  %vm2879_vm3 = vcmp.gt.f32.partialorder %v2351_v16, 0.0  ;;  %vm2880_vm4 = vcmp.gt.f32.partialorder %v2353_v13, 0.0  ;;  %v3012_v21 = vmul.f32 0.01, %v2357_v53  ;;  %v7926_v63 = vld [vmem:[#allocation5 + $0x14c] ss:$16 sps:$4 sm:$0xff]  }
 0x24b   : > { %v9634_v33 = vpop.f32.mrf.mxu0  ;;  %4136 = vmatmul.mubr.bf16.gmra.mxu0 %v9592_v24  ;;  %v2180_v23 = vadd.f32 %v9507_v39, %v9313_v56  ;;  %vm2884_vm5 = vcmp.gt.f32.partialorder %v2357_v53, 0.0  ;;  %v3015_v31 = vmul.f32 0.01, %v2361_v28  ;;  %v2182_v3 = vadd.f32 %v9516_v34, %v9339_v41 }
 0x24c   : > { %v9641_v57 = vpop.f32.mrf.mxu1  ;;  %4145 = vmatprep.mubr.bf16.mxu0 %v9623_v46  ;;  %4460 = vmatpush2.bf16.msra.mxu0 %v7909_v14  ;;  %v3139_v1 = vsel %vm2883_vm2, %v2355_v51, %v3011_v36  ;;  %vm2887_vm6 = vcmp.gt.f32.partialorder %v2361_v28, 0.0  ;;  %v2363_v39 = vadd.f32 %v9471_v61, %v2170_v54  ;;  %v9675_v42 = vpack.c.bf16 %v3132_v7, %v3128_v59 }
 0x24d   : > { %v9649_v20 = vpop.f32.mrf.mxu0  ;;  %4461 = vmatprep.subr.bf16.mxu0 %v7917_v0  ;;  %v2367_v0 = vadd.f32 %v9489_v35, %v2174_v43  ;;  %v3135_v19 = vsel %vm2879_vm3, %v2351_v16, %v3007_v44  ;;  %v2371_v35 = vadd.f32 %v9501_v15, %v2178_v22  ;;  %v3136_v34 = vsel %vm2880_vm4, %v2353_v13, %v3008_v8  ;;  %v7924_v15 = vld [vmem:[#allocation5 + $0x148] ss:$16 sps:$4 sm:$0xff]  }
 0x24e   : > { %v9654_v49 = vpop.f32.mrf.mxu1  ;;  %vm2891_vm7 = vcmp.gt.f32.partialorder %v2365_v52, 0.0  ;;  %v2373_v51 = vadd.f32 %v9510_v50, %v2180_v23  ;;  %v2184_v61 = vadd.f32 %v9527_v10, %v9313_v56  ;;  %v3140_v16 = vsel %vm2884_vm5, %v2357_v53, %v3012_v21  ;;  %v7929_v50 = vld [vmem:[#allocation5 + $0x12c] ss:$16 sps:$4 sm:$0xff]  }
 0x24f   : > { %v9660_v14 = vpop.f32.mrf.mxu0  ;;  %v9690_v59 = vpack.c.bf16 %v3139_v1, %v3135_v19  ;;  %v3143_v44 = vsel %vm2887_vm6, %v2361_v28, %v3015_v31  ;;  %v3020_v36 = vmul.f32 0.01, %v2367_v0  ;;  %v2375_v13 = vadd.f32 %v9522_v2, %v2182_v3  ;;  %v7935_v19 = vld [vmem:[#allocation5 + $0x10c] ss:$16 sps:$4 sm:$0xff]  }
 0x250   : > { %v9664_v26 = vpop.f32.mrf.mxu1  ;;  %4462 = vmatpush2.bf16.msra.mxu0 %v7915_v29  ;;  %v3019_v29 = vmul.f32 0.01, %v2365_v52  ;;  %vm2888_vm8 = vcmp.gt.f32.partialorder %v2363_v39, 0.0  ;;  %vm2892_vm9 = vcmp.gt.f32.partialorder %v2367_v0, 0.0  ;;  %v2188_v10 = vadd.f32 %v9537_v18, %v9339_v41 }
 0x251   : > { %v9669_v25 = vpop.f32.mrf.mxu0  ;;  %4463 = vmatprep.subr.bf16.mxu0 %v7920_v38  ;;  %11732 = vst [vmem:[#allocation22_spill] sm:$0xff] %v9690_v59  ;;  %v2192_v53 = vadd.f32 %v9559_v62, %v9339_v41  ;;  %v3016_v8 = vmul.f32 0.01, %v2363_v39  ;;  %v3023_v22 = vmul.f32 0.01, %v2371_v35  ;;  %v9705_v2 = vpack.c.bf16 %v3140_v16, %v3136_v34 }
 0x252   : > { %v9673_v48 = vpop.f32.mrf.mxu1  ;;  %v3147_v28 = vsel %vm2891_vm7, %v2365_v52, %v3019_v29  ;;  %vm2895_vm10 = vcmp.gt.f32.partialorder %v2371_v35, 0.0  ;;  %v3024_v23 = vmul.f32 0.01, %v2373_v51  ;;  %v2190_v18 = vadd.f32 %v9549_v60, %v9313_v56  ;;  %v7927_v62 = vld [vmem:[#allocation5 + $0x128] ss:$16 sps:$4 sm:$0xff]  }
 0x253   : > { %v9679_v43 = vpop.f32.mrf.mxu0  ;;  %4146 = vmatmul.mubr.bf16.gmra.mxu0 %v9637_v32  ;;  %vm2896_vm11 = vcmp.gt.f32.partialorder %v2373_v51, 0.0  ;;  %v3027_v3 = vmul.f32 0.01, %v2375_v13  ;;  %v2194_v52 = vadd.f32 %v9571_v40, %v9313_v56  ;;  %v3148_v1 = vsel %vm2892_vm9, %v2367_v0, %v3020_v36 }
 0x254   : > { %v9686_v38 = vpop.f32.mrf.mxu1  ;;  %4155 = vmatprep.mubr.bf16.mxu0 %v9675_v42  ;;  %4464 = vmatpush2.bf16.msra.mxu0 %v7918_v4  ;;  %v2377_v4 = vadd.f32 %v9530_v27, %v2184_v61  ;;  %vm2899_vm12 = vcmp.gt.f32.partialorder %v2375_v13, 0.0  ;;  %v2381_v27 = vadd.f32 %v9543_v9, %v2188_v10  ;;  %v2385_v60 = vadd.f32 %v9565_v17, %v2192_v53 }
 0x255   : > { %v9694_v54 = vpop.f32.mrf.mxu0  ;;  %4465 = vmatprep.subr.bf16.mxu0 %v7926_v63  ;;  %v2198_v29 = vadd.f32 %v9581_v5, %v9339_v41  ;;  %v9723_v61 = vpack.c.bf16 %v3147_v28, %v3143_v44  ;;  %v3151_v40 = vsel %vm2895_vm10, %v2371_v35, %v3023_v22  ;;  %v2202_v16 = vadd.f32 %v9611_v45, %v9339_v41  ;;  %v7933_v44 = vld [vmem:[#allocation5 + $0x108] ss:$16 sps:$4 sm:$0xff]  }
 0x256   : > { %v9700_v7 = vpop.f32.mrf.mxu1  ;;  %v3144_v9 = vsel %vm2888_vm8, %v2363_v39, %v3016_v8  ;;  %v2383_v17 = vadd.f32 %v9554_v6, %v2190_v18  ;;  %v3152_v35 = vsel %vm2896_vm11, %v2373_v51, %v3024_v23  ;;  %v3155_v45 = vsel %vm2899_vm12, %v2375_v13, %v3027_v3 }
 0x257   : > { %v9703_v21 = vpop.f32.mrf.mxu0  ;;  %11733 = vst [vmem:[#allocation25_spill] sm:$0xff] %v9723_v61  ;;  %v9736_v5 = vpack.c.bf16 %v3148_v1, %v3144_v9  ;;  %vm2900_vm13 = vcmp.gt.f32.partialorder %v2377_v4, 0.0  ;;  %v2204_v39 = vadd.f32 %v9621_v12, %v9313_v56  ;;  %vm2903_vm14 = vcmp.gt.f32.partialorder %v2381_v27, 0.0 }
 0x258   : > { %v9710_v31 = vpop.f32.mrf.mxu1  ;;  %4466 = vmatpush2.bf16.msra.mxu0 %v7924_v15  ;;  %v3028_v15 = vmul.f32 0.01, %v2377_v4  ;;  %v3031_v6 = vmul.f32 0.01, %v2381_v27  ;;  %v3035_v53 = vmul.f32 0.01, %v2385_v60  ;;  %v2391_v8 = vadd.f32 %v9595_v55, %v2198_v29 }
 0x259   : > { %v9714_v63 = vpop.f32.mrf.mxu0  ;;  %4467 = vmatprep.subr.bf16.mxu0 %v7929_v50  ;;  %11734 = vst [vmem:[#allocation32_spill] sm:$0xff] %v9736_v5  ;;  %v2387_v50 = vadd.f32 %v9576_v37, %v2194_v52  ;;  %vm2907_vm15 = vcmp.gt.f32.partialorder %v2385_v60, 0.0  ;;  %v2200_v51 = vadd.f32 %v9599_v30, %v9313_v56  ;;  %v2395_v13 = vadd.f32 %v9617_v11, %v2202_v16 }
 0x25a   : > { %v9721_v34 = vpop.f32.mrf.mxu1  ;;  %v2208_v37 = vadd.f32 %v9634_v33, %v9339_v41  ;;  %v9755_v22 = vpack.c.bf16 %v3155_v45, %v3151_v40  ;;  %v3032_v23 = vmul.f32 0.01, %v2383_v17  ;;  %v2210_v18 = vadd.f32 %v9649_v20, %v9313_v56 }
 0x25b   : > { %v9728_v0 = vpop.f32.mrf.mxu0  ;;  %4156 = vmatmul.mubr.bf16.gmra.mxu0 %v9644_v47  ;;  %vm2904_vm0 = vcmp.gt.f32.partialorder %v2383_v17, 0.0  ;;  %v3036_v30 = vmul.f32 0.01, %v2387_v50  ;;  %v2397_v11 = vadd.f32 %v9628_v58, %v2204_v39  ;;  %v2212_v33 = vadd.f32 %v9660_v14, %v9339_v41 }
 0x25c   : > { %v9733_v36 = vpop.f32.mrf.mxu1  ;;  %4165 = vmatprep.mubr.bf16.mxu0 %v9705_v2  ;;  %4468 = vmatpush2.bf16.msra.mxu0 %v7927_v62  ;;  %v3156_v62 = vsel %vm2900_vm13, %v2377_v4, %v3028_v15  ;;  %v3159_v52 = vsel %vm2903_vm14, %v2381_v27, %v3031_v6  ;;  %v3163_v1 = vsel %vm2907_vm15, %v2385_v60, %v3035_v53  ;;  %vm2908_vm1 = vcmp.gt.f32.partialorder %v2387_v50, 0.0  ;;  %v11735_v4 = vld [vmem:[#allocation21_spill] sm:$0xff]  ;;  %v11737_v53 = vld [vmem:[#allocation18_spill] sm:$0xff] }
 0x25d   : > { %v9743_v10 = vpop.f32.mrf.mxu0  ;;  %4469 = vmatprep.subr.bf16.mxu0 %v7935_v19  ;;  %v3039_v20 = vmul.f32 0.01, %v2391_v8  ;;  %vm2911_vm2 = vcmp.gt.f32.partialorder %v2391_v8, 0.0  ;;  %v2393_v29 = vadd.f32 %v11735_v4, %v2200_v51  ;;  %v3043_v40 = vmul.f32 0.01, %v2395_v13  ;;  %v11738_v51 = vld [vmem:[#allocation16_spill] sm:$0xff] }
 0x25e   : > { %v9746_v28 = vpop.f32.mrf.mxu1  ;;  %v2401_v16 = vadd.f32 %v9641_v57, %v2208_v37  ;;  %vm2915_vm3 = vcmp.gt.f32.partialorder %v2395_v13, 0.0  ;;  %v2403_v14 = vadd.f32 %v9654_v49, %v2210_v18  ;;  %v9776_v27 = vpack.c.bf16 %v3156_v62, %v3152_v35 }
 0x25f   : > { %v9753_v12 = vpop.f32.mrf.mxu0  ;;  %v3160_v60 = vsel %vm2904_vm0, %v2383_v17, %v3032_v23  ;;  %v9779_v15 = vpack.c.bf16 %v3163_v1, %v3159_v52  ;;  %v2405_v45 = vadd.f32 %v9664_v26, %v2212_v33  ;;  %v3164_v57 = vsel %vm2908_vm1, %v2387_v50, %v3036_v30 }
 0x260   : > { %v9759_v55 = vpop.f32.mrf.mxu1  ;;  %4470 = vmatpush2.bf16.msra.mxu0 %v7933_v44  ;;  %11736 = vst [vmem:[#allocation21_spill] sm:$0xff] %v9776_v27  ;;  %v3044_v44 = vmul.f32 0.01, %v2397_v11  ;;  %v3167_v6 = vsel %vm2911_vm2, %v2391_v8, %v3039_v20  ;;  %vm2916_vm4 = vcmp.gt.f32.partialorder %v2397_v11, 0.0  ;;  %vm2912_vm5 = vcmp.gt.f32.partialorder %v2393_v29, 0.0 }
 0x261   : > { %v9765_v3 = vpop.f32.mrf.mxu0  ;;  %v3040_v35 = vmul.f32 0.01, %v2393_v29  ;;  %v3171_v17 = vsel %vm2915_vm3, %v2395_v13, %v3043_v40  ;;  %vm2919_vm6 = vcmp.gt.f32.partialorder %v2401_v16, 0.0  ;;  %v3047_v62 = vmul.f32 0.01, %v2401_v16 }
 0x262   : > { %v9769_v19 = vpop.f32.mrf.mxu1  ;;  %v3048_v52 = vmul.f32 0.01, %v2403_v14  ;;  %v2214_v26 = vadd.f32 %v9669_v25, %v9313_v56  ;;  %vm2920_vm7 = vcmp.gt.f32.partialorder %v2403_v14, 0.0  ;;  %v3051_v30 = vmul.f32 0.01, %v2405_v45 }
 0x263   : > { %v2463_v58 = vpop.f32.mrf.mxu0  ;;  %4166 = vmatmul.mubr.bf16.gmra.mxu0 %v9690_v59  ;;  %v2218_v33 = vadd.f32 %v9679_v43, %v9339_v41  ;;  %v3172_v20 = vsel %vm2916_vm4, %v2397_v11, %v3044_v44  ;;  %vm2923_vm8 = vcmp.gt.f32.partialorder %v2405_v45, 0.0  ;;  %v3168_v59 = vsel %vm2912_vm5, %v2393_v29, %v3040_v35 }
 0x264   : > { %v2656_v9 = vpop.f32.mrf.mxu1  ;;  %4175 = vmatprep.mubr.bf16.mxu0 %v9736_v5  ;;  %v2464_v49 = vadd.f32 %v2463_v58, %v11737_v53  ;;  %v3175_v43 = vsel %vm2919_vm6, %v2401_v16, %v3047_v62  ;;  %v2407_v11 = vadd.f32 %v9673_v48, %v2214_v26 }
 0x265   : > { %v2465_v39 = vpop.f32.mrf.mxu0 }
 0x266   : > { %v2466_v37 = vadd.f32 %v2465_v39, %v11738_v51  ;;  %v2658_v18 = vpop.f32.mrf.mxu1  ;;  %v2657_v13 = vadd.f32 %v2656_v9, %v2464_v49  ;;  %v9793_v39 = vpack.c.bf16 %v3171_v17, %v3167_v6  ;;  %v9803_v9 = vpack.c.bf16 %v3172_v20, %v3168_v59 }
 0x267   : > { %v2467_v23 = vpop.f32.mrf.mxu0  ;;  %v9806_v6 = vsel %vm2920_vm7, %v2403_v14, %v3048_v52  ;;  %v3179_v49 = vsel %vm2923_vm8, %v2405_v45, %v3051_v30  ;;  %vm2924_vm12 = vcmp.gt.f32.partialorder %v2407_v11, 0.0  ;;  %v2220_v45 = vadd.f32 %v9694_v54, %v9313_v56 }
 0x268   : > { %v2468_v50 = vadd.f32 %v2467_v23, %v11737_v53  ;;  %v2660_v8 = vpop.f32.mrf.mxu1  ;;  %v2659_v4 = vadd.f32 %v2658_v18, %v2466_v37  ;;  %v9797_v23 = vpack.c.bf16 %v3164_v57, %v3160_v60  ;;  %v2411_v37 = vadd.f32 %v9686_v38, %v2218_v33 }
 0x269   : > { %v2469_v1 = vpop.f32.mrf.mxu0  ;;  %v2945_v29 = vmul.f32 0.01, %v2657_v13  ;;  %vm2817_vm13 = vcmp.gt.f32.partialorder %v2657_v13, 0.0  ;;  %v3052_v52 = vmul.f32 0.01, %v2407_v11 }
 0x26a   : > { %v2661_v40 = vadd.f32 %v2660_v8, %v2468_v50  ;;  %v2662_v58 = vpop.f32.mrf.mxu1  ;;  %v2470_v25 = vadd.f32 %v2469_v1, %v11738_v51  ;;  %v2946_v35 = vmul.f32 0.01, %v2659_v4  ;;  %vm2818_vm10 = vcmp.gt.f32.partialorder %v2659_v4, 0.0 }
 0x26b   : > { %v2473_v5 = vpop.f32.mrf.mxu0  ;;  %4176 = vmatmul.mubr.bf16.gmra.mxu0 %v9723_v61  ;;  %vm2927_vm14 = vcmp.gt.f32.partialorder %v2411_v37, 0.0  ;;  %v3055_v30 = vmul.f32 0.01, %v2411_v37  ;;  %v9820_v61 = vpack.c.bf16 %v3179_v49, %v3175_v43  ;;  %v3180_v49 = vsel %vm2924_vm12, %v2407_v11, %v3052_v52 }
 0x26c   : > { %v2666_v44 = vpop.f32.mrf.mxu1  ;;  %4185 = vmatprep.mubr.bf16.mxu0 %v9776_v27  ;;  %v2949_v60 = vmul.f32 0.01, %v2661_v40  ;;  %v2663_v57 = vadd.f32 %v2662_v58, %v2470_v25  ;;  %vm2821_vm9 = vcmp.gt.f32.partialorder %v2661_v40, 0.0  ;;  %v2474_v17 = vadd.f32 %v2473_v5, %v11737_v53  ;;  %v7885_v27 = vld [vmem:[#allocation5 + $0x2e8] ss:$16 sps:$4 sm:$0xff]  }
 0x26d   : > { %v2475_v18 = vpop.f32.mrf.mxu0  ;;  %v3074_v5 = vsel %vm2818_vm10, %v2659_v4, %v2946_v35  ;;  %v3073_v58 = vsel %vm2817_vm13, %v2657_v13, %v2945_v29  ;;  %v7896_v4 = vld [vmem:[#allocation5 + $0x2cc] ss:$16 sps:$4 sm:$0xff]   ;;  %v2224_v11 = vadd.f32 %v9714_v63, %v9313_v56  ;;  %v9848_v63 = vpack.c.bf16 %v3180_v49, %v9806_v6 }
 0x26e   : > { %v2476_v48 = vadd.f32 %v2475_v18, %v11738_v51  ;;  %v2668_v16 = vpop.f32.mrf.mxu1  ;;  %vm2822_vm11 = vcmp.gt.f32.partialorder %v2663_v57, 0.0  ;;  %v2950_v59 = vmul.f32 0.01, %v2663_v57  ;;  %v3077_v26 = vsel %vm2821_vm9, %v2661_v40, %v2949_v60 }
 0x26f   : > { %v2477_v14 = vpop.f32.mrf.mxu0  ;;  %v2667_v25 = vadd.f32 %v2666_v44, %v2474_v17  ;;  %v9823_v40 = vadd.f32 %v9700_v7, %v2220_v45  ;;  %v2222_v60 = vadd.f32 %v9703_v21, %v9339_v41  ;;  %v9834_v7 = vsel %vm2927_vm14, %v2411_v37, %v3055_v30 }
 0x270   : > { %v2478_v38 = vadd.f32 %v2477_v14, %v11737_v53  ;;  %v2670_v62 = vpop.f32.mrf.mxu1  ;;  %v3078_v8 = vsel %vm2822_vm11, %v2663_v57, %v2950_v59  ;;  %v2669_v33 = vadd.f32 %v2668_v16, %v2476_v48  ;;  %v9827_v57 = vpack.c.bf16 %v3077_v26, %v3073_v58  ;;  %v7894_v59 = vld [vmem:[#allocation5 + $0x2c8] ss:$16 sps:$4 sm:$0xff]   ;;  %v7905_v26 = vld [vmem:[#allocation5 + $0x2ac] ss:$16 sps:$4 sm:$0xff]  }
 0x271   : > { %v2479_v50 = vpop.f32.mrf.mxu0  ;;  %v9818_v14 = vpack.c.bf16 %v3078_v8, %v3074_v5  ;;  %v2953_v17 = vmul.f32 0.01, %v2667_v25  ;;  %vm2825_vm2 = vcmp.gt.f32.partialorder %v2667_v25, 0.0  ;;  %vm2928_vm3 = vcmp.gt.f32.partialorder %v9823_v40, 0.0 }
 0x272   : > { %v2671_v1 = vadd.f32 %v2670_v62, %v2478_v38  ;;  %v2672_v20 = vpop.f32.mrf.mxu1  ;;  %v2480_v18 = vadd.f32 %v2479_v50, %v11738_v51  ;;  %v2954_v48 = vmul.f32 0.01, %v2669_v33  ;;  %vm2826_vm0 = vcmp.gt.f32.partialorder %v2669_v33, 0.0 }
 0x273   : > { %v2483_v54 = vpop.f32.mrf.mxu0  ;;  %4186 = vmatmul.mubr.bf16.gmra.mxu0 %v9755_v22  ;;  %4278 = vmatprep.mubr.bf16.mxu1 %v9818_v14  ;;  %v9839_v62 = vadd.f32 %v9710_v31, %v2222_v60  ;;  %v2417_v6 = vadd.f32 %v9721_v34, %v2224_v11 }
 0x274   : > { %v2676_v13 = vpop.f32.mrf.mxu1  ;;  %4195 = vmatprep.mubr.bf16.mxu0 %v9797_v23  ;;  %v2957_v44 = vmul.f32 0.01, %v2671_v1  ;;  %v2673_v29 = vadd.f32 %v2672_v20, %v2480_v18  ;;  %v2484_v35 = vadd.f32 %v2483_v54, %v11737_v53  ;;  %vm2829_vm15 = vcmp.gt.f32.partialorder %v2671_v1, 0.0  ;;  %4279 = vmatmul.mubr.bf16.vlgmr.msra.gmra.mxu1 %v9827_v57 }
 0x275   : > { %v2485_v43 = vpop.f32.mrf.mxu0  ;;  %4633 = vmatpush1.bf16.msra.mxu1 %v7885_v27  ;;  %v3082_v58 = vsel %vm2826_vm0, %v2669_v33, %v2954_v48  ;;  %v3056_v18 = vmul.f32 0.01, %v9823_v40  ;;  %v3081_v54 = vsel %vm2825_vm2, %v2667_v25, %v2953_v17  ;;  %vm2931_vm4 = vcmp.gt.f32.partialorder %v9839_v62, 0.0  ;;  %v7914_v25 = vld [vmem:[#allocation5 + $0x28c] ss:$16 sps:$4 sm:$0xff]  }
 0x276   : > { %v2486_v21 = vadd.f32 %v2485_v43, %v11738_v51  ;;  %v2678_v16 = vpop.f32.mrf.mxu1  ;;  %vm2830_vm1 = vcmp.gt.f32.partialorder %v2673_v29, 0.0  ;;  %v2958_v45 = vmul.f32 0.01, %v2673_v29  ;;  %4634 = vmatprep.subr.bf16.mxu1 %v7896_v4  ;;  %v3085_v50 = vsel %vm2829_vm15, %v2671_v1, %v2957_v44 }
 0x277   : > { %v2487_v38 = vpop.f32.mrf.mxu0  ;;  %v2677_v8 = vadd.f32 %v2676_v13, %v2484_v35  ;;  %v7903_v13 = vld [vmem:[#allocation5 + $0x2a8] ss:$16 sps:$4 sm:$0xff]   ;;  %v3059_v33 = vmul.f32 0.01, %v9839_v62  ;;  %v9859_v44 = vpack.c.bf16 %v3085_v50, %v3081_v54  ;;  %v9864_v35 = vadd.f32 %v9728_v0, %v9339_v41 }
 0x278   : > { %v2488_v37 = vadd.f32 %v2487_v38, %v11737_v53  ;;  %v2680_v52 = vpop.f32.mrf.mxu1  ;;  %v3086_v27 = vsel %vm2830_vm1, %v2673_v29, %v2958_v45  ;;  %v2679_v20 = vadd.f32 %v2678_v16, %v2486_v21  ;;  %v7912_v38 = vld [vmem:[#allocation5 + $0x288] ss:$16 sps:$4 sm:$0xff]   ;;  %v3060_v11 = vmul.f32 0.01, %v2417_v6 }
 0x279   : > { %v2489_v30 = vpop.f32.mrf.mxu0  ;;  %v9854_v1 = vpack.c.bf16 %v3086_v27, %v3082_v58  ;;  %4635 = vmatpush1.bf16.msra.mxu1 %v7894_v59  ;;  %vm2833_vm5 = vcmp.gt.f32.partialorder %v2677_v8, 0.0  ;;  %v2961_v21 = vmul.f32 0.01, %v2677_v8  ;;  %v3184_v50 = vsel %vm2928_vm3, %v9823_v40, %v3056_v18 }
 0x27a   : > { %v2681_v5 = vadd.f32 %v2680_v52, %v2488_v37  ;;  %v2682_v31 = vpop.f32.mrf.mxu1  ;;  %v2490_v60 = vadd.f32 %v2489_v30, %v11738_v51  ;;  %4636 = vmatprep.subr.bf16.mxu1 %v7905_v26  ;;  %v2962_v16 = vmul.f32 0.01, %v2679_v20  ;;  %vm2834_vm7 = vcmp.gt.f32.partialorder %v2679_v20, 0.0  ;;  %v7923_v30 = vld [vmem:[#allocation5 + $0x26c] ss:$16 sps:$4 sm:$0xff]  }
 0x27b   : > { %v2493_v4 = vpop.f32.mrf.mxu0  ;;  %4196 = vmatmul.mubr.bf16.gmra.mxu0 %v9779_v15  ;;  %4288 = vmatprep.mubr.bf16.mxu1 %v9854_v1  ;;  %v2230_v37 = vadd.f32 %v9743_v10, %v9313_v56  ;;  %vm2932_vm9 = vcmp.gt.f32.partialorder %v2417_v6, 0.0  ;;  %v2234_v27 = vadd.f32 %v9765_v3, %v9313_v56  ;;  %v3089_v10 = vsel %vm2833_vm5, %v2677_v8, %v2961_v21  ;;  %v7921_v56 = vld [vmem:[#allocation5 + $0x268] ss:$16 sps:$4 sm:$0xff]  }
 0x27c   : > { %v2686_v29 = vpop.f32.mrf.mxu1  ;;  %4205 = vmatprep.mubr.bf16.mxu0 %v9803_v9  ;;  %v2965_v43 = vmul.f32 0.01, %v2681_v5  ;;  %v2683_v49 = vadd.f32 %v2682_v31, %v2490_v60  ;;  %vm2837_vm6 = vcmp.gt.f32.partialorder %v2681_v5, 0.0  ;;  %4289 = vmatmul.mubr.bf16.gmra.mxu1 %v9859_v44  ;;  %v2494_v0 = vadd.f32 %v2493_v4, %v11737_v53  ;;  %v7968_v3 = vld [vmem:[#allocation7 + $0xac] ss:$12 sps:$4 sm:$0xff]  }
 0x27d   : > { %v2495_v48 = vpop.f32.mrf.mxu0  ;;  %4637 = vmatpush1.bf16.msra.mxu1 %v7903_v13  ;;  %v9889_v8 = vsel %vm2931_vm4, %v9839_v62, %v3059_v33  ;;  %5930 = vmatprep.subr.bf16.mxu0 %v7968_v3  ;;  %v9899_v62 = vadd.f32 %v9746_v28, %v2230_v37 }
 0x27e   : > { %v2496_v34 = vadd.f32 %v2495_v48, %v11738_v51  ;;  %v2688_v59 = vpop.f32.mrf.mxu1  ;;  %vm2838_vm8 = vcmp.gt.f32.partialorder %v2683_v49, 0.0  ;;  %v2966_v17 = vmul.f32 0.01, %v2683_v49  ;;  %4638 = vmatprep.subr.bf16.mxu1 %v7914_v25  ;;  %v3093_v31 = vsel %vm2837_vm6, %v2681_v5, %v2965_v43 }
 0x27f   : > { %v2497_v45 = vpop.f32.mrf.mxu0  ;;  %v3090_v25 = vsel %vm2834_vm7, %v2679_v20, %v2962_v16  ;;  %v2687_v48 = vadd.f32 %v2686_v29, %v2494_v0  ;;  %v9891_v5 = vpack.c.bf16 %v3093_v31, %v3089_v10  ;;  %v3188_v20 = vsel %vm2932_vm9, %v2417_v6, %v3060_v11  ;;  %v7932_v29 = vld [vmem:[#allocation5 + $0x24c] ss:$16 sps:$4 sm:$0xff]   ;;  %v7930_v0 = vld [vmem:[#allocation5 + $0x248] ss:$16 sps:$4 sm:$0xff]  }
 0x280   : > { %v2498_v52 = vadd.f32 %v2497_v45, %v11737_v53  ;;  %v2690_v26 = vpop.f32.mrf.mxu1  ;;  %v3094_v54 = vsel %vm2838_vm8, %v2683_v49, %v2966_v17  ;;  %v2689_v60 = vadd.f32 %v2688_v59, %v2496_v34  ;;  %v2427_v49 = vadd.f32 %v9769_v19, %v2234_v27 }
 0x281   : > { %v2499_v58 = vpop.f32.mrf.mxu0  ;;  %v9884_v45 = vpack.c.bf16 %v3094_v54, %v3090_v25  ;;  %4639 = vmatpush1.bf16.msra.mxu1 %v7912_v38  ;;  %v2969_v19 = vmul.f32 0.01, %v2687_v48  ;;  %vm2841_vm13 = vcmp.gt.f32.partialorder %v2687_v48, 0.0  ;;  %vm2936_vm15 = vcmp.gt.f32.partialorder %v9899_v62, 0.0 }
 0x282   : > { %v2691_v4 = vadd.f32 %v2690_v26, %v2498_v52  ;;  %v2692_v13 = vpop.f32.mrf.mxu1  ;;  %v2500_v40 = vadd.f32 %v2499_v58, %v11738_v51  ;;  %4640 = vmatprep.subr.bf16.mxu1 %v7923_v30  ;;  %v2970_v33 = vmul.f32 0.01, %v2689_v60  ;;  %vm2842_vm11 = vcmp.gt.f32.partialorder %v2689_v60, 0.0  ;;  %v7938_v30 = vld [vmem:[#allocation5 + $0x22c] ss:$16 sps:$4 sm:$0xff]  }
 0x283   : > { %v2503_v18 = vpop.f32.mrf.mxu0  ;;  %4206 = vmatmul.mubr.bf16.gmra.mxu0 %v9793_v39  ;;  %4298 = vmatprep.mubr.bf16.mxu1 %v9884_v45  ;;  %v2232_v52 = vadd.f32 %v9753_v12, %v9339_v41  ;;  %v9906_v26 = vpack.c.bf16 %v3188_v20, %v3184_v50  ;;  %v3068_v27 = vmul.f32 0.01, %v2427_v49  ;;  %vm2940_vm14 = vcmp.gt.f32.partialorder %v2427_v49, 0.0 }
 0x284   : > { %v2696_v43 = vpop.f32.mrf.mxu1  ;;  %4215 = vmatprep.mubr.bf16.mxu0 %v9848_v63  ;;  %v2973_v21 = vmul.f32 0.01, %v2691_v4  ;;  %v2693_v16 = vadd.f32 %v2692_v13, %v2500_v40  ;;  %v2504_v34 = vadd.f32 %v2503_v18, %v11737_v53  ;;  %vm2845_vm10 = vcmp.gt.f32.partialorder %v2691_v4, 0.0  ;;  %4299 = vmatmul.mubr.bf16.gmra.mxu1 %v9891_v5 }
 0x285   : > { %v2505_v59 = vpop.f32.mrf.mxu0  ;;  %4641 = vmatpush1.bf16.msra.mxu1 %v7921_v56  ;;  %v3098_v41 = vsel %vm2842_vm11, %v2689_v60, %v2970_v33  ;;  %v3097_v12 = vsel %vm2841_vm13, %v2687_v48, %v2969_v19  ;;  %v3064_v3 = vmul.f32 0.01, %v9899_v62  ;;  %v7941_v48 = vld [vmem:[#allocation5 + $0x20c] ss:$16 sps:$4 sm:$0xff]  }
 0x286   : > { %v2506_v6 = vadd.f32 %v2505_v59, %v11738_v51  ;;  %v2698_v17 = vpop.f32.mrf.mxu1  ;;  %vm2846_vm12 = vcmp.gt.f32.partialorder %v2693_v16, 0.0  ;;  %v2974_v38 = vmul.f32 0.01, %v2693_v16  ;;  %4642 = vmatprep.subr.bf16.mxu1 %v7932_v29  ;;  %v3101_v31 = vsel %vm2845_vm10, %v2691_v4, %v2973_v21  ;;  %v7936_v4 = vld [vmem:[#allocation5 + $0x228] ss:$16 sps:$4 sm:$0xff]  }
 0x287   : > { %v2507_v11 = vpop.f32.mrf.mxu0  ;;  %v2697_v58 = vadd.f32 %v2696_v43, %v2504_v34  ;;  %v9918_v43 = vadd.f32 %v9759_v55, %v2232_v52  ;;  %v9920_v20 = vpack.c.bf16 %v3101_v31, %v3097_v12  ;;  %v3196_v34 = vsel %vm2940_vm14, %v2427_v49, %v3068_v27 }
 0x288   : > { %v2508_v28 = vadd.f32 %v2507_v11, %v11737_v53  ;;  %v2700_v37 = vpop.f32.mrf.mxu1  ;;  %v3102_v10 = vsel %vm2846_vm12, %v2693_v16, %v2974_v38  ;;  %v2699_v13 = vadd.f32 %v2698_v17, %v2506_v6  ;;  %v7939_v38 = vld [vmem:[#allocation5 + $0x208] ss:$16 sps:$4 sm:$0xff]   ;;  %v9930_v11 = vpack.c.bf16 %v9889_v8, %v9834_v7 }
 0x289   : > { %v2509_v54 = vpop.f32.mrf.mxu0  ;;  %v9913_v56 = vpack.c.bf16 %v3102_v10, %v3098_v41  ;;  %4643 = vmatpush1.bf16.msra.mxu1 %v7930_v0  ;;  %vm2849_vm0 = vcmp.gt.f32.partialorder %v2697_v58, 0.0  ;;  %v2977_v59 = vmul.f32 0.01, %v2697_v58  ;;  %v2421_v49 = vadd.f32 %v9733_v36, %v9864_v35 }
 0x28a   : > { %v2701_v25 = vadd.f32 %v2700_v37, %v2508_v28  ;;  %v2702_v40 = vpop.f32.mrf.mxu1  ;;  %v2510_v18 = vadd.f32 %v2509_v54, %v11738_v51  ;;  %4644 = vmatprep.subr.bf16.mxu1 %v7938_v30  ;;  %v2978_v33 = vmul.f32 0.01, %v2699_v13  ;;  %vm2850_vm2 = vcmp.gt.f32.partialorder %v2699_v13, 0.0  ;;  %v7944_v30 = vld [vmem:[#allocation5 + $0x3ec] ss:$16 sps:$4 sm:$0xff]  }
 0x28b   : > { %v2513_v50 = vpop.f32.mrf.mxu0  ;;  %4216 = vmatmul.mubr.bf16.gmra.mxu0 %v9820_v61  ;;  %4308 = vmatprep.mubr.bf16.mxu1 %v9913_v56  ;;  %v3192_v37 = vsel %vm2936_vm15, %v9899_v62, %v3064_v3  ;;  %v3067_v27 = vmul.f32 0.01, %v9918_v43  ;;  %v3105_v36 = vsel %vm2849_vm0, %v2697_v58, %v2977_v59  ;;  %vm2939_vm4 = vcmp.gt.f32.partialorder %v9918_v43, 0.0 }
 0x28c   : > { %v2706_v60 = vpop.f32.mrf.mxu1  ;;  %4225 = vmatprep.mubr.bf16.mxu0 %v9906_v26  ;;  %v2981_v29 = vmul.f32 0.01, %v2701_v25  ;;  %v2703_v21 = vadd.f32 %v2702_v40, %v2510_v18  ;;  %vm2853_vm1 = vcmp.gt.f32.partialorder %v2701_v25, 0.0  ;;  %4309 = vmatmul.mubr.bf16.gmra.mxu1 %v9920_v20  ;;  %v2514_v0 = vadd.f32 %v2513_v50, %v11737_v53  ;;  %v7942_v50 = vld [vmem:[#allocation5 + $0x3e8] ss:$16 sps:$4 sm:$0xff]  }
 0x28d   : > { %v2515_v16 = vpop.f32.mrf.mxu0  ;;  %4645 = vmatpush1.bf16.msra.mxu1 %v7936_v4  ;;  %v9941_v8 = vpack.c.bf16 %v3196_v34, %v3192_v37  ;;  %v3106_v41 = vsel %vm2850_vm2, %v2699_v13, %v2978_v33  ;;  %v3063_v4 = vmul.f32 0.01, %v2421_v49  ;;  %v7947_v13 = vld [vmem:[#allocation5 + $0x3cc] ss:$16 sps:$4 sm:$0xff]   ;;  %vm2935_vm5 = vcmp.gt.f32.partialorder %v2421_v49, 0.0 }
 0x28e   : > { %v2516_v55 = vadd.f32 %v2515_v16, %v11738_v51  ;;  %v2708_v6 = vpop.f32.mrf.mxu1  ;;  %vm2854_vm3 = vcmp.gt.f32.partialorder %v2703_v21, 0.0  ;;  %v2982_v17 = vmul.f32 0.01, %v2703_v21  ;;  %4646 = vmatprep.subr.bf16.mxu1 %v7941_v48  ;;  %v3109_v31 = vsel %vm2853_vm1, %v2701_v25, %v2981_v29 }
 0x28f   : > { %v2517_v19 = vpop.f32.mrf.mxu0  ;;  %v2707_v62 = vadd.f32 %v2706_v60, %v2514_v0  ;;  %v9950_v3 = vpack.c.bf16 %v3109_v31, %v3105_v36  ;;  %v3195_v16 = vsel %vm2939_vm4, %v9918_v43, %v3067_v27 }
 0x290   : > { %v2518_v52 = vadd.f32 %v2517_v19, %v11737_v53  ;;  %v2710_v28 = vpop.f32.mrf.mxu1  ;;  %v3110_v7 = vsel %vm2854_vm3, %v2703_v21, %v2982_v17  ;;  %v2709_v35 = vadd.f32 %v2708_v6, %v2516_v55  ;;  %v7945_v55 = vld [vmem:[#allocation5 + $0x3c8] ss:$16 sps:$4 sm:$0xff]   ;;  %v3191_v19 = vsel %vm2935_vm5, %v2421_v49, %v3063_v4 }
 0x291   : > { %v2519_v54 = vpop.f32.mrf.mxu0  ;;  %v9948_v25 = vpack.c.bf16 %v3110_v7, %v3106_v41  ;;  %4647 = vmatpush1.bf16.msra.mxu1 %v7939_v38  ;;  %v2985_v6 = vmul.f32 0.01, %v2707_v62  ;;  %vm2857_vm9 = vcmp.gt.f32.partialorder %v2707_v62, 0.0 }
 0x292   : > { %v2711_v10 = vadd.f32 %v2710_v28, %v2518_v52  ;;  %v2712_v40 = vpop.f32.mrf.mxu1  ;;  %v2520_v12 = vadd.f32 %v2519_v54, %v11738_v51  ;;  %4648 = vmatprep.subr.bf16.mxu1 %v7944_v30  ;;  %v2986_v34 = vmul.f32 0.01, %v2709_v35  ;;  %vm2858_vm7 = vcmp.gt.f32.partialorder %v2709_v35, 0.0  ;;  %v7950_v52 = vld [vmem:[#allocation5 + $0x3ac] ss:$16 sps:$4 sm:$0xff]  }
 0x293   : > { %v2523_v18 = vpop.f32.mrf.mxu0  ;;  %4226 = vmatmul.mubr.bf16.gmra.mxu0 %v9930_v11  ;;  %4318 = vmatprep.mubr.bf16.mxu1 %v9948_v25  ;;  %v9962_v28 = vpack.c.bf16 %v3195_v16, %v3191_v19  ;;  %v3113_v41 = vsel %vm2857_vm9, %v2707_v62, %v2985_v6 }
 0x294   : > { %v2716_v58 = vpop.f32.mrf.mxu1  ;;  %4235 = vmatprep.mubr.bf16.mxu0 %v9941_v8  ;;  %v2989_v48 = vmul.f32 0.01, %v2711_v10  ;;  %v2713_v60 = vadd.f32 %v2712_v40, %v2520_v12  ;;  %v2524_v29 = vadd.f32 %v2523_v18, %v11737_v53  ;;  %vm2861_vm6 = vcmp.gt.f32.partialorder %v2711_v10, 0.0  ;;  %4319 = vmatmul.mubr.bf16.gmra.mxu1 %v9950_v3 }
 0x295   : > { %v2525_v21 = vpop.f32.mrf.mxu0  ;;  %4649 = vmatpush2.bf16.msra.mxu1 %v7942_v50  ;;  %v3114_v40 = vsel %vm2858_vm7, %v2709_v35, %v2986_v34  ;;  %v7948_v50 = vld [vmem:[#allocation5 + $0x3a8] ss:$16 sps:$4 sm:$0xff]  }
 0x296   : > { %v2526_v59 = vadd.f32 %v2525_v21, %v11738_v51  ;;  %v2718_v33 = vpop.f32.mrf.mxu1  ;;  %vm2862_vm8 = vcmp.gt.f32.partialorder %v2713_v60, 0.0  ;;  %v2990_v17 = vmul.f32 0.01, %v2713_v60  ;;  %4650 = vmatprep.subr.bf16.mxu1 %v7947_v13  ;;  %v3117_v37 = vsel %vm2861_vm6, %v2711_v10, %v2989_v48  ;;  %v7953_v13 = vld [vmem:[#allocation5 + $0x38c] ss:$16 sps:$4 sm:$0xff]  }
 0x297   : > { %v2527_v0 = vpop.f32.mrf.mxu0  ;;  %v2717_v30 = vadd.f32 %v2716_v58, %v2524_v29  ;;  %v9970_v4 = vpack.c.bf16 %v3117_v37, %v3113_v41  ;;  %v11739_v58 = vld [vmem:[#allocation20_spill] sm:$0xff] }
 0x298   : > { %v2528_v38 = vadd.f32 %v2527_v0, %v11737_v53  ;;  %v2720_v43 = vpop.f32.mrf.mxu1  ;;  %v3118_v31 = vsel %vm2862_vm8, %v2713_v60, %v2990_v17  ;;  %v2719_v54 = vadd.f32 %v2718_v33, %v2526_v59  ;;  %v7956_v0 = vld [vmem:[#allocation5 + $0x36c] ss:$16 sps:$4 sm:$0xff]   ;;  %v7971_v41 = vld [vmem:[#allocation7 + $0x94] ss:$12 sps:$4 sm:$0xff]  }
 0x299   : > { %v2529_v27 = vpop.f32.mrf.mxu0  ;;  %v9968_v18 = vpack.c.bf16 %v3118_v31, %v3114_v40  ;;  %4651 = vmatpush2.bf16.msra.mxu1 %v7945_v55  ;;  %vm2865_vm10 = vcmp.gt.f32.partialorder %v2717_v30, 0.0  ;;  %v2993_v60 = vmul.f32 0.01, %v2717_v30  ;;  %v7951_v55 = vld [vmem:[#allocation5 + $0x388] ss:$16 sps:$4 sm:$0xff]  }
 0x29a   : > { %v2721_v7 = vadd.f32 %v2720_v43, %v2528_v38  ;;  %v2722_v36 = vpop.f32.mrf.mxu1  ;;  %v2530_v49 = vadd.f32 %v2529_v27, %v11738_v51  ;;  %4652 = vmatprep.subr.bf16.mxu1 %v7950_v52  ;;  %v2994_v29 = vmul.f32 0.01, %v2719_v54  ;;  %vm2866_vm12 = vcmp.gt.f32.partialorder %v2719_v54, 0.0  ;;  %v7966_v52 = vld [vmem:[#allocation7 + $0xa8] ss:$12 sps:$4 sm:$0xff]  }
 0x29b   : > { %v2533_v12 = vpop.f32.mrf.mxu0  ;;  %4236 = vmatmul.mubr.bf16.gmra.mxu0 %v9962_v28  ;;  %4328 = vmatprep.mubr.bf16.mxu1 %v9968_v18  ;;  %v3121_v37 = vsel %vm2865_vm10, %v2717_v30, %v2993_v60  ;;  %v11742_v30 = vld [vmem:[#allocation24_spill] sm:$0xff] }
 0x29c   : > { %v2726_v10 = vpop.f32.mrf.mxu1  ;;  %4471 = vmatprep.mubr.bf16.mxu0 %v11739_v58  ;;  %v2997_v48 = vmul.f32 0.01, %v2721_v7  ;;  %v2723_v35 = vadd.f32 %v2722_v36, %v2530_v49  ;;  %vm2869_vm11 = vcmp.gt.f32.partialorder %v2721_v7, 0.0  ;;  %4329 = vmatmul.mubr.bf16.gmra.mxu1 %v9970_v4  ;;  %v2534_v59 = vadd.f32 %v2533_v12, %v11737_v53 }
 0x29d   : > { %v2535_v62 = vpop.f32.mrf.mxu0  ;;  %4653 = vmatpush2.bf16.msra.mxu1 %v7948_v50  ;;  %v3122_v40 = vsel %vm2866_vm12, %v2719_v54, %v2994_v29 }
 0x29e   : > { %v2536_v21 = vadd.f32 %v2535_v62, %v11738_v51  ;;  %v2728_v16 = vpop.f32.mrf.mxu1  ;;  %vm2870_vm13 = vcmp.gt.f32.partialorder %v2723_v35, 0.0  ;;  %v2998_v34 = vmul.f32 0.01, %v2723_v35  ;;  %4654 = vmatprep.subr.bf16.mxu1 %v7953_v13  ;;  %v3125_v19 = vsel %vm2869_vm11, %v2721_v7, %v2997_v48  ;;  %v11740_v13 = vld [vmem:[#allocation23_spill] sm:$0xff] }
 0x29f   : > { %v2537_v33 = vpop.f32.mrf.mxu0  ;;  %v2727_v49 = vadd.f32 %v2726_v10, %v2534_v59  ;;  %v7954_v7 = vld [vmem:[#allocation5 + $0x368] ss:$16 sps:$4 sm:$0xff]   ;;  %v9984_v48 = vpack.c.bf16 %v3125_v19, %v3121_v37  ;;  %v7959_v62 = vld [vmem:[#allocation5 + $0x34c] ss:$16 sps:$4 sm:$0xff]  }
 0x2a0   : > { %v2538_v6 = vadd.f32 %v2537_v33, %v11737_v53  ;;  %v2730_v17 = vpop.f32.mrf.mxu1  ;;  %v3126_v43 = vsel %vm2870_vm13, %v2723_v35, %v2998_v34  ;;  %v2729_v27 = vadd.f32 %v2728_v16, %v2536_v21  ;;  %v7957_v21 = vld [vmem:[#allocation5 + $0x348] ss:$16 sps:$4 sm:$0xff]   ;;  %v7969_v16 = vld [vmem:[#allocation7 + $0x90] ss:$12 sps:$4 sm:$0xff]  }
 0x2a1   : > { %v2539_v38 = vpop.f32.mrf.mxu0  ;;  %v9981_v58 = vpack.c.bf16 %v3126_v43, %v3122_v40  ;;  %4655 = vmatpush2.bf16.msra.mxu1 %v7951_v55  ;;  %11741 = vst [vmem:[#allocation18_spill] sm:$0xff] %v9984_v48  ;;  %v7974_v55 = vld [vmem:[#allocation7 + $0x7c] ss:$12 sps:$4 sm:$0xff]   ;;  %vm2873_vm1 = vcmp.gt.f32.partialorder %v2727_v49, 0.0 }
 0x2a2   : > { %v2731_v31 = vadd.f32 %v2730_v17, %v2538_v6  ;;  %v2732_v36 = vpop.f32.mrf.mxu1  ;;  %v2540_v12 = vadd.f32 %v2539_v38, %v11738_v51  ;;  %4656 = vmatprep.subr.bf16.mxu1 %v7956_v0  ;;  %v3002_v34 = vmul.f32 0.01, %v2729_v27  ;;  %v3001_v6 = vmul.f32 0.01, %v2727_v49  ;;  %v7962_v43 = vld [vmem:[#allocation5 + $0x32c] ss:$16 sps:$4 sm:$0xff]  }
 0x2a3   : > { %v2543_v50 = vpop.f32.mrf.mxu0  ;;  %4472 = vmatmul.mubr.bf16.vlgmr.msra.gmra.mxu0 %v11740_v13  ;;  %4338 = vmatprep.mubr.bf16.mxu1 %v9981_v58  ;;  %vm2874_vm15 = vcmp.gt.f32.partialorder %v2729_v27, 0.0 }
 0x2a4   : > { %v2736_v35 = vpop.f32.mrf.mxu1  ;;  %4481 = vmatprep.mubr.bf16.mxu0 %v11742_v30  ;;  %v3005_v60 = vmul.f32 0.01, %v2731_v31  ;;  %v2733_v54 = vadd.f32 %v2732_v36, %v2540_v12  ;;  %v2544_v10 = vadd.f32 %v2543_v50, %v11737_v53  ;;  %5931 = vmatpush1.bf16.msra.mxu0 %v7966_v52  ;;  %vm2877_vm14 = vcmp.gt.f32.partialorder %v2731_v31, 0.0 }
 0x2a5   : > { %v2545_v29 = vpop.f32.mrf.mxu0  ;;  %4339 = vmatmul.mubr.bf16.gmra.mxu1 %v9984_v48  ;;  %5932 = vmatprep.subr.bf16.mxu0 %v7971_v41  ;;  %v7972_v41 = vld [vmem:[#allocation7 + $0x78] ss:$12 sps:$4 sm:$0xff]   ;;  %v3130_v30 = vsel %vm2874_vm15, %v2729_v27, %v3002_v34  ;;  %v7965_v27 = vld [vmem:[#allocation5 + $0x30c] ss:$16 sps:$4 sm:$0xff]  }
 0x2a6   : > { %v2546_v59 = vadd.f32 %v2545_v29, %v11738_v51  ;;  %v2738_v33 = vpop.f32.mrf.mxu1  ;;  %vm2878_vm0 = vcmp.gt.f32.partialorder %v2733_v54, 0.0  ;;  %v3006_v17 = vmul.f32 0.01, %v2733_v54  ;;  %4657 = vmatpush2.bf16.msra.mxu1 %v7954_v7  ;;  %v3133_v52 = vsel %vm2877_vm14, %v2731_v31, %v3005_v60  ;;  %v7977_v7 = vld [vmem:[#allocation7 + $0x64] ss:$12 sps:$4 sm:$0xff]  }
 0x2a7   : > { %v2547_v0 = vpop.f32.mrf.mxu0  ;;  %4658 = vmatprep.subr.bf16.mxu1 %v7959_v62  ;;  %v2737_v37 = vadd.f32 %v2736_v35, %v2544_v10  ;;  %v3129_v29 = vsel %vm2873_vm1, %v2727_v49, %v3001_v6  ;;  %v11744_v31 = vld [vmem:[#allocation26_spill] sm:$0xff]  ;;  %v7960_v35 = vld [vmem:[#allocation5 + $0x328] ss:$16 sps:$4 sm:$0xff]  }
 0x2a8   : > { %v2548_v19 = vadd.f32 %v2547_v0, %v11737_v53  ;;  %v2740_v38 = vpop.f32.mrf.mxu1  ;;  %v3134_v40 = vsel %vm2878_vm0, %v2733_v54, %v3006_v17  ;;  %5933 = vmatpush1.bf16.msra.mxu0 %v7969_v16  ;;  %v2739_v12 = vadd.f32 %v2738_v33, %v2546_v59  ;;  %v9999_v60 = vpack.c.bf16 %v3133_v52, %v3129_v29  ;;  %v11746_v10 = vld [vmem:[#allocation27_spill] sm:$0xff]  ;;  %v7975_v16 = vld [vmem:[#allocation7 + $0x60] ss:$12 sps:$4 sm:$0xff]   ;;  %v7978_v29 = vld [vmem:[#allocation7 + $0x48] ss:$12 sps:$4 sm:$0xff]  }
 0x2a9   : > { %v2549_v36 = vpop.f32.mrf.mxu0  ;;  %5934 = vmatprep.subr.bf16.mxu0 %v7974_v55  ;;  %v9996_v48 = vpack.c.bf16 %v3134_v40, %v3130_v30  ;;  %vm2881_vm2 = vcmp.gt.f32.partialorder %v2737_v37, 0.0  ;;  %v7980_v33 = vld [vmem:[#allocation7 + $0x4c] ss:$12 sps:$4 sm:$0xff]   ;;  %v3009_v55 = vmul.f32 0.01, %v2737_v37 }
 0x2aa   : > { %v2741_v50 = vadd.f32 %v2740_v38, %v2548_v19  ;;  %v2742_v13 = vpop.f32.mrf.mxu1  ;;  %v2550_v0 = vadd.f32 %v2549_v36, %v11738_v51  ;;  %4659 = vmatpush2.bf16.msra.mxu1 %v7957_v21  ;;  %11745 = vst [vmem:[#allocation20_spill] sm:$0xff] %v9999_v60  ;;  %v3010_v6 = vmul.f32 0.01, %v2739_v12  ;;  %vm2882_vm4 = vcmp.gt.f32.partialorder %v2739_v12, 0.0  ;;  %v7963_v52 = vld [vmem:[#allocation5 + $0x308] ss:$16 sps:$4 sm:$0xff]  }
 0x2ab   : > { %v2553_v62 = vpop.f32.mrf.mxu0  ;;  %11743 = vst [vmem:[#allocation16_spill] sm:$0xff] %v9996_v48  ;;  %4482 = vmatmul.mubr.bf16.gmra.mxu0 %v11744_v31  ;;  %4660 = vmatprep.subr.bf16.mxu1 %v7962_v43 }
 0x2ac   : > { %v2746_v54 = vpop.f32.mrf.mxu1  ;;  %4491 = vmatprep.mubr.bf16.mxu0 %v11746_v10  ;;  %v3013_v34 = vmul.f32 0.01, %v2741_v50  ;;  %v2743_v49 = vadd.f32 %v2742_v13, %v2550_v0  ;;  %4348 = vmatprep.mubr.bf16.mxu1 %v9996_v48  ;;  %vm2885_vm3 = vcmp.gt.f32.partialorder %v2741_v50, 0.0  ;;  %v2554_v38 = vadd.f32 %v2553_v62, %v11737_v53  ;;  %v7983_v62 = vld [vmem:[#allocation7 + $0x34] ss:$12 sps:$4 sm:$0xff]  }
 0x2ad   : > { %v2555_v59 = vpop.f32.mrf.mxu0  ;;  %5935 = vmatpush1.bf16.msra.mxu0 %v7972_v41  ;;  %4349 = vmatmul.mubr.bf16.gmra.mxu1 %v9999_v60  ;;  %v3137_v0 = vsel %vm2881_vm2, %v2737_v37, %v3009_v55  ;;  %v11749_v37 = vld [vmem:[#allocation29_spill] sm:$0xff] }
 0x2ae   : > { %v2556_v21 = vadd.f32 %v2555_v59, %v11738_v51  ;;  %v2748_v17 = vpop.f32.mrf.mxu1  ;;  %5936 = vmatprep.subr.bf16.mxu0 %v7977_v7  ;;  %vm2886_vm5 = vcmp.gt.f32.partialorder %v2743_v49, 0.0  ;;  %v3014_v19 = vmul.f32 0.01, %v2743_v49  ;;  %4661 = vmatpush2.bf16.msra.mxu1 %v7960_v35  ;;  %v3141_v41 = vsel %vm2885_vm3, %v2741_v50, %v3013_v34  ;;  %v11747_v50 = vld [vmem:[#allocation28_spill] sm:$0xff] }
 0x2af   : > { %v2557_v43 = vpop.f32.mrf.mxu0  ;;  %4662 = vmatprep.subr.bf16.mxu1 %v7965_v27  ;;  %v3138_v59 = vsel %vm2882_vm4, %v2739_v12, %v3010_v6  ;;  %v2747_v35 = vadd.f32 %v2746_v54, %v2554_v38  ;;  %v10013_v27 = vpack.c.bf16 %v3141_v41, %v3137_v0  ;;  %v7981_v54 = vld [vmem:[#allocation7 + $0x30] ss:$12 sps:$4 sm:$0xff]  }
 0x2b0   : > { %v2558_v36 = vadd.f32 %v2557_v43, %v11737_v53  ;;  %v2750_v40 = vpop.f32.mrf.mxu1  ;;  %v3142_v30 = vsel %vm2886_vm5, %v2743_v49, %v3014_v19  ;;  %v2749_v7 = vadd.f32 %v2748_v17, %v2556_v21  ;;  %v7986_v17 = vld [vmem:[#allocation7 + $0x1c] ss:$12 sps:$4 sm:$0xff]  }
 0x2b1   : > { %v2559_v13 = vpop.f32.mrf.mxu0  ;;  %5937 = vmatpush1.bf16.msra.mxu0 %v7975_v16  ;;  %v10010_v48 = vpack.c.bf16 %v3142_v30, %v3138_v59  ;;  %11748 = vst [vmem:[#allocation23_spill] sm:$0xff] %v10013_v27  ;;  %v3017_v19 = vmul.f32 0.01, %v2747_v35  ;;  %vm2889_vm9 = vcmp.gt.f32.partialorder %v2747_v35, 0.0  ;;  %v7984_v30 = vld [vmem:[#allocation7 + $0x18] ss:$12 sps:$4 sm:$0xff]  }
 0x2b2   : > { %v2751_v31 = vadd.f32 %v2750_v40, %v2558_v36  ;;  %v2752_v10 = vpop.f32.mrf.mxu1  ;;  %5938 = vmatprep.subr.bf16.mxu0 %v7980_v33  ;;  %v2560_v60 = vadd.f32 %v2559_v13, %v11738_v51  ;;  %4663 = vmatpush2.bf16.msra.mxu1 %v7963_v52  ;;  %v3018_v33 = vmul.f32 0.01, %v2749_v7  ;;  %vm2890_vm7 = vcmp.gt.f32.partialorder %v2749_v7, 0.0 }
 0x2b3   : > { %v2563_v43 = vpop.f32.mrf.mxu0  ;;  %4492 = vmatmul.mubr.bf16.gmra.mxu0 %v11747_v50  ;;  %4358 = vmatprep.mubr.bf16.mxu1 %v10010_v48  ;;  %v3145_v50 = vsel %vm2889_vm9, %v2747_v35, %v3017_v19  ;;  %v7992_v35 = vld [vmem:[#allocation7 + $0x16c] ss:$12 sps:$4 sm:$0xff]  }
 0x2b4   : > { %v2756_v16 = vpop.f32.mrf.mxu1  ;;  %4501 = vmatprep.mubr.bf16.mxu0 %v11749_v37  ;;  %v3021_v34 = vmul.f32 0.01, %v2751_v31  ;;  %v2753_v49 = vadd.f32 %v2752_v10, %v2560_v60  ;;  %vm2893_vm6 = vcmp.gt.f32.partialorder %v2751_v31, 0.0  ;;  %v2564_v55 = vadd.f32 %v2563_v43, %v11737_v53  ;;  %v7989_v43 = vld [vmem:[#allocation7 + $0x4] ss:$12 sps:$4 sm:$0xff]  }
 0x2b5   : > { %v2565_v12 = vpop.f32.mrf.mxu0  ;;  %5939 = vmatpush1.bf16.msra.mxu0 %v7978_v29  ;;  %4359 = vmatmul.mubr.bf16.gmra.mxu1 %v10013_v27 }
 0x2b6   : > { %v2566_v6 = vadd.f32 %v2565_v12, %v11738_v51  ;;  %v2758_v21 = vpop.f32.mrf.mxu1  ;;  %5940 = vmatprep.subr.bf16.mxu0 %v7983_v62  ;;  %vm2894_vm8 = vcmp.gt.f32.partialorder %v2753_v49, 0.0  ;;  %v3022_v60 = vmul.f32 0.01, %v2753_v49  ;;  %v3149_v40 = vsel %vm2893_vm6, %v2751_v31, %v3021_v34 }
 0x2b7   : > { %v2567_v38 = vpop.f32.mrf.mxu0  ;;  %v2757_v29 = vadd.f32 %v2756_v16, %v2564_v55  ;;  %v3146_v62 = vsel %vm2890_vm7, %v2749_v7, %v3018_v33  ;;  %v10026_v31 = vpack.c.bf16 %v3149_v40, %v3145_v50  ;;  %v7987_v33 = vld [vmem:[#allocation7] ss:$12 sps:$4 sm:$0xff]  }
 0x2b8   : > { %v2568_v52 = vadd.f32 %v2567_v38, %v11737_v53  ;;  %v2760_v36 = vpop.f32.mrf.mxu1  ;;  %v3150_v13 = vsel %vm2894_vm8, %v2753_v49, %v3022_v60  ;;  %v2759_v0 = vadd.f32 %v2758_v21, %v2566_v6  ;;  %v11751_v38 = vld [vmem:[#allocation30_spill] sm:$0xff]  ;;  %v11753_v49 = vld [vmem:[#allocation31_spill] sm:$0xff] }
 0x2b9   : > { %v2569_v41 = vpop.f32.mrf.mxu0  ;;  %5941 = vmatpush1.bf16.msra.mxu0 %v7981_v54  ;;  %v10023_v27 = vpack.c.bf16 %v3150_v13, %v3146_v62  ;;  %11752 = vst [vmem:[#allocation26_spill] sm:$0xff] %v10026_v31  ;;  %v3025_v55 = vmul.f32 0.01, %v2757_v29  ;;  %vm2897_vm13 = vcmp.gt.f32.partialorder %v2757_v29, 0.0 }
 0x2ba   : > { %v2761_v10 = vadd.f32 %v2760_v36, %v2568_v52  ;;  %v2762_v59 = vpop.f32.mrf.mxu1  ;;  %5942 = vmatprep.subr.bf16.mxu0 %v7986_v17  ;;  %v2570_v37 = vadd.f32 %v2569_v41, %v11738_v51  ;;  %v3026_v6 = vmul.f32 0.01, %v2759_v0  ;;  %vm2898_vm11 = vcmp.gt.f32.partialorder %v2759_v0, 0.0 }
 0x2bb   : > { %v2573_v12 = vpop.f32.mrf.mxu0  ;;  %11750 = vst [vmem:[#allocation24_spill] sm:$0xff] %v10023_v27  ;;  %4502 = vmatmul.mubr.bf16.gmra.mxu0 %v11751_v38  ;;  %4368 = vmatprep.mubr.bf16.mxu1 %v10023_v27  ;;  %v7995_v38 = vld [vmem:[#allocation7 + $0x154] ss:$12 sps:$4 sm:$0xff]  }
 0x2bc   : > { %v2766_v34 = vpop.f32.mrf.mxu1  ;;  %4511 = vmatprep.mubr.bf16.mxu0 %v11753_v49  ;;  %v3029_v16 = vmul.f32 0.01, %v2761_v10  ;;  %v2763_v54 = vadd.f32 %v2762_v59, %v2570_v37  ;;  %vm2901_vm10 = vcmp.gt.f32.partialorder %v2761_v10, 0.0  ;;  %v2574_v60 = vadd.f32 %v2573_v12, %v11737_v53  ;;  %v7990_v59 = vld [vmem:[#allocation7 + $0x168] ss:$12 sps:$4 sm:$0xff]  }
 0x2bd   : > { %v2575_v7 = vpop.f32.mrf.mxu0  ;;  %5943 = vmatpush1.bf16.msra.mxu0 %v7984_v30  ;;  %4369 = vmatmul.mubr.bf16.gmra.mxu1 %v10026_v31  ;;  %v3153_v49 = vsel %vm2897_vm13, %v2757_v29, %v3025_v55  ;;  %v7993_v29 = vld [vmem:[#allocation7 + $0x150] ss:$12 sps:$4 sm:$0xff]  }
 0x2be   : > { %v2576_v21 = vadd.f32 %v2575_v7, %v11738_v51  ;;  %v2768_v17 = vpop.f32.mrf.mxu1  ;;  %5944 = vmatprep.subr.bf16.mxu0 %v7989_v43  ;;  %vm2902_vm12 = vcmp.gt.f32.partialorder %v2763_v54, 0.0  ;;  %v3030_v19 = vmul.f32 0.01, %v2763_v54  ;;  %v3157_v41 = vsel %vm2901_vm10, %v2761_v10, %v3029_v16 }
 0x2bf   : > { %v2577_v52 = vpop.f32.mrf.mxu0  ;;  %v3154_v43 = vsel %vm2898_vm11, %v2759_v0, %v3026_v6  ;;  %v2767_v7 = vadd.f32 %v2766_v34, %v2574_v60  ;;  %v10039_v10 = vpack.c.bf16 %v3157_v41, %v3153_v49 }
 0x2c0   : > { %v2578_v36 = vadd.f32 %v2577_v52, %v11737_v53  ;;  %v2770_v40 = vpop.f32.mrf.mxu1  ;;  %v3158_v30 = vsel %vm2902_vm12, %v2763_v54, %v3030_v19  ;;  %v2769_v62 = vadd.f32 %v2768_v17, %v2576_v21  ;;  %v11755_v52 = vld [vmem:[#allocation17_spill] sm:$0xff]  ;;  %v11757_v54 = vld [vmem:[#allocation19_spill] sm:$0xff] }
 0x2c1   : > { %v2579_v13 = vpop.f32.mrf.mxu0  ;;  %5945 = vmatpush1.bf16.msra.mxu0 %v7987_v33  ;;  %v10036_v27 = vpack.c.bf16 %v3158_v30, %v3154_v43  ;;  %11756 = vst [vmem:[#allocation28_spill] sm:$0xff] %v10039_v10  ;;  %v7998_v17 = vld [vmem:[#allocation7 + $0x13c] ss:$12 sps:$4 sm:$0xff]   ;;  %v3033_v19 = vmul.f32 0.01, %v2767_v7  ;;  %vm2905_vm1 = vcmp.gt.f32.partialorder %v2767_v7, 0.0 }
 0x2c2   : > { %v2771_v50 = vadd.f32 %v2770_v40, %v2578_v36  ;;  %v2772_v37 = vpop.f32.mrf.mxu1  ;;  %5946 = vmatprep.subr.bf16.mxu0 %v7992_v35  ;;  %v2580_v12 = vadd.f32 %v2579_v13, %v11738_v51  ;;  %v3034_v34 = vmul.f32 0.01, %v2769_v62  ;;  %vm2906_vm15 = vcmp.gt.f32.partialorder %v2769_v62, 0.0 }
 0x2c3   : > { %v2583_v31 = vpop.f32.mrf.mxu0  ;;  %11754 = vst [vmem:[#allocation27_spill] sm:$0xff] %v10036_v27  ;;  %4512 = vmatmul.mubr.bf16.gmra.mxu0 %v11755_v52  ;;  %4378 = vmatprep.mubr.bf16.mxu1 %v10036_v27 }
 0x2c4   : > { %v2776_v16 = vpop.f32.mrf.mxu1  ;;  %4521 = vmatprep.mubr.bf16.mxu0 %v11757_v54  ;;  %v3037_v33 = vmul.f32 0.01, %v2771_v50  ;;  %v2773_v21 = vadd.f32 %v2772_v37, %v2580_v12  ;;  %vm2909_vm14 = vcmp.gt.f32.partialorder %v2771_v50, 0.0  ;;  %v2584_v35 = vadd.f32 %v2583_v31, %v11737_v53  ;;  %v7996_v31 = vld [vmem:[#allocation7 + $0x138] ss:$12 sps:$4 sm:$0xff]  }
 0x2c5   : > { %v2585_v0 = vpop.f32.mrf.mxu0  ;;  %5947 = vmatpush2.bf16.msra.mxu0 %v7990_v59  ;;  %4379 = vmatmul.mubr.bf16.gmra.mxu1 %v10039_v10  ;;  %v8016_v37 = vld [vmem:[#allocation7 + $0x22c] ss:$12 sps:$4 sm:$0xff]   ;;  %v3162_v52 = vsel %vm2906_vm15, %v2769_v62, %v3034_v34  ;;  %v8001_v54 = vld [vmem:[#allocation7 + $0x124] ss:$12 sps:$4 sm:$0xff]  }
 0x2c6   : > { %v2586_v55 = vadd.f32 %v2585_v0, %v11738_v51  ;;  %v2778_v6 = vpop.f32.mrf.mxu1  ;;  %5948 = vmatprep.subr.bf16.mxu0 %v7995_v38  ;;  %vm2910_vm0 = vcmp.gt.f32.partialorder %v2773_v21, 0.0  ;;  %v3038_v60 = vmul.f32 0.01, %v2773_v21  ;;  %v3165_v13 = vsel %vm2909_vm14, %v2771_v50, %v3037_v33  ;;  %6123 = vmatprep.subr.bf16.mxu1 %v8016_v37 }
 0x2c7   : > { %v2587_v36 = vpop.f32.mrf.mxu0  ;;  %v2777_v43 = vadd.f32 %v2776_v16, %v2584_v35  ;;  %v3161_v0 = vsel %vm2905_vm1, %v2767_v7, %v3033_v19  ;;  %v7999_v7 = vld [vmem:[#allocation7 + $0x120] ss:$12 sps:$4 sm:$0xff]  }
 0x2c8   : > { %v2588_v40 = vadd.f32 %v2587_v36, %v11737_v53  ;;  %v2780_v41 = vpop.f32.mrf.mxu1  ;;  %v3166_v59 = vsel %vm2910_vm0, %v2773_v21, %v3038_v60  ;;  %v2779_v49 = vadd.f32 %v2778_v6, %v2586_v55  ;;  %v10053_v50 = vpack.c.bf16 %v3165_v13, %v3161_v0  ;;  %v8002_v13 = vld [vmem:[#allocation7 + $0x108] ss:$12 sps:$4 sm:$0xff]  }
 0x2c9   : > { %v2589_v30 = vpop.f32.mrf.mxu0  ;;  %5949 = vmatpush2.bf16.msra.mxu0 %v7993_v29  ;;  %v10050_v27 = vpack.c.bf16 %v3166_v59, %v3162_v52  ;;  %v8004_v29 = vld [vmem:[#allocation7 + $0x10c] ss:$12 sps:$4 sm:$0xff]   ;;  %v3041_v34 = vmul.f32 0.01, %v2777_v43  ;;  %vm2913_vm5 = vcmp.gt.f32.partialorder %v2777_v43, 0.0 }
 0x2ca   : > { %v2781_v12 = vadd.f32 %v2780_v41, %v2588_v40  ;;  %v2782_v38 = vpop.f32.mrf.mxu1  ;;  %5950 = vmatprep.subr.bf16.mxu0 %v7998_v17  ;;  %v2590_v10 = vadd.f32 %v2589_v30, %v11738_v51  ;;  %v3042_v35 = vmul.f32 0.01, %v2779_v49  ;;  %vm2914_vm3 = vcmp.gt.f32.partialorder %v2779_v49, 0.0 }
 0x2cb   : > { %v2593_v36 = vpop.f32.mrf.mxu0  ;;  %4522 = vmatmul.mubr.bf16.gmra.mxu0 %v9592_v24  ;;  %4388 = vmatprep.mubr.bf16.mxu1 %v10050_v27  ;;  %v3169_v52 = vsel %vm2913_vm5, %v2777_v43, %v3041_v34  ;;  %v8005_v43 = vld [vmem:[#allocation7 + $0xf0] ss:$12 sps:$4 sm:$0xff]  }
 0x2cc   : > { %v2786_v16 = vpop.f32.mrf.mxu1  ;;  %4531 = vmatprep.mubr.bf16.mxu0 %v9623_v46  ;;  %v3045_v33 = vmul.f32 0.01, %v2781_v12  ;;  %v2783_v21 = vadd.f32 %v2782_v38, %v2590_v10  ;;  %vm2917_vm2 = vcmp.gt.f32.partialorder %v2781_v12, 0.0  ;;  %v2594_v10 = vadd.f32 %v2593_v36, %v11737_v53  ;;  %v8007_v38 = vld [vmem:[#allocation7 + $0xf4] ss:$12 sps:$4 sm:$0xff]  }
 0x2cd   : > { %v2595_v62 = vpop.f32.mrf.mxu0  ;;  %5951 = vmatpush2.bf16.msra.mxu0 %v7996_v31  ;;  %4389 = vmatmul.mubr.bf16.gmra.mxu1 %v10053_v50  ;;  %v3170_v37 = vsel %vm2914_vm3, %v2779_v49, %v3042_v35  ;;  %v8010_v35 = vld [vmem:[#allocation7 + $0xdc] ss:$12 sps:$4 sm:$0xff]  }
 0x2ce   : > { %v2596_v24 = vadd.f32 %v2595_v62, %v11738_v51  ;;  %v2788_v55 = vpop.f32.mrf.mxu1  ;;  %5952 = vmatprep.subr.bf16.mxu0 %v8001_v54  ;;  %vm2918_vm4 = vcmp.gt.f32.partialorder %v2783_v21, 0.0  ;;  %v3046_v46 = vmul.f32 0.01, %v2783_v21  ;;  %v3173_v60 = vsel %vm2917_vm2, %v2781_v12, %v3045_v33 }
 0x2cf   : > { %v2597_v6 = vpop.f32.mrf.mxu0  ;;  %v2787_v54 = vadd.f32 %v2786_v16, %v2594_v10  ;;  %v10066_v12 = vpack.c.bf16 %v3173_v60, %v3169_v52  ;;  %v8008_v60 = vld [vmem:[#allocation7 + $0xd8] ss:$12 sps:$4 sm:$0xff]  }
 0x2d0   : > { %v2598_v17 = vadd.f32 %v2597_v6, %v11737_v53  ;;  %v2790_v19 = vpop.f32.mrf.mxu1  ;;  %v3174_v41 = vsel %vm2918_vm4, %v2783_v21, %v3046_v46  ;;  %v2789_v30 = vadd.f32 %v2788_v55, %v2596_v24 }
 0x2d1   : > { %v2599_v40 = vpop.f32.mrf.mxu0  ;;  %5953 = vmatpush2.bf16.msra.mxu0 %v7999_v7  ;;  %v10063_v62 = vpack.c.bf16 %v3174_v41, %v3170_v37  ;;  %v3049_v24 = vmul.f32 0.01, %v2787_v54  ;;  %vm2921_vm9 = vcmp.gt.f32.partialorder %v2787_v54, 0.0 }
 0x2d2   : > { %v2791_v59 = vadd.f32 %v2790_v19, %v2598_v17  ;;  %v2792_v31 = vpop.f32.mrf.mxu1  ;;  %5954 = vmatprep.subr.bf16.mxu0 %v8004_v29  ;;  %v2600_v0 = vadd.f32 %v2599_v40, %v11738_v51  ;;  %v3050_v16 = vmul.f32 0.01, %v2789_v30  ;;  %vm2922_vm7 = vcmp.gt.f32.partialorder %v2789_v30, 0.0 }
 0x2d3   : > { %v2603_v36 = vpop.f32.mrf.mxu0  ;;  %4532 = vmatmul.mubr.bf16.gmra.mxu0 %v9637_v32  ;;  %4398 = vmatprep.mubr.bf16.mxu1 %v10063_v62  ;;  %v3177_v52 = vsel %vm2921_vm9, %v2787_v54, %v3049_v24 }
 0x2d4   : > { %v2796_v33 = vpop.f32.mrf.mxu1  ;;  %4541 = vmatprep.mubr.bf16.mxu0 %v9675_v42  ;;  %v3053_v21 = vmul.f32 0.01, %v2791_v59  ;;  %v2793_v7 = vadd.f32 %v2792_v31, %v2600_v0  ;;  %vm2925_vm6 = vcmp.gt.f32.partialorder %v2791_v59, 0.0  ;;  %v2604_v29 = vadd.f32 %v2603_v36, %v11737_v53 }
 0x2d5   : > { %v2605_v49 = vpop.f32.mrf.mxu0  ;;  %5955 = vmatpush2.bf16.msra.mxu0 %v8002_v13  ;;  %4399 = vmatmul.mubr.bf16.gmra.mxu1 %v10066_v12  ;;  %v3178_v37 = vsel %vm2922_vm7, %v2789_v30, %v3050_v16 }
 0x2d6   : > { %v2606_v32 = vadd.f32 %v2605_v49, %v11738_v51  ;;  %v2798_v34 = vpop.f32.mrf.mxu1  ;;  %5956 = vmatprep.subr.bf16.mxu0 %v8007_v38  ;;  %vm2926_vm8 = vcmp.gt.f32.partialorder %v2793_v7, 0.0  ;;  %v3054_v42 = vmul.f32 0.01, %v2793_v7  ;;  %v3181_v6 = vsel %vm2925_vm6, %v2791_v59, %v3053_v21  ;;  %v8013_v38 = vld [vmem:[#allocation7 + $0xc4] ss:$12 sps:$4 sm:$0xff]  }
 0x2d7   : > { %v2607_v55 = vpop.f32.mrf.mxu0  ;;  %v2797_v40 = vadd.f32 %v2796_v33, %v2604_v29  ;;  %v10079_v59 = vpack.c.bf16 %v3181_v6, %v3177_v52  ;;  %v11758_v52 = vld [vmem:[#allocation22_spill] sm:$0xff] }
 0x2d8   : > { %v2608_v46 = vadd.f32 %v2607_v55, %v11737_v53  ;;  %v2800_v10 = vpop.f32.mrf.mxu1  ;;  %v3182_v19 = vsel %vm2926_vm8, %v2793_v7, %v3054_v42  ;;  %v2799_v41 = vadd.f32 %v2798_v34, %v2606_v32 }
 0x2d9   : > { %v2609_v17 = vpop.f32.mrf.mxu0  ;;  %5957 = vmatpush2.bf16.msra.mxu0 %v8005_v43  ;;  %v10076_v49 = vpack.c.bf16 %v3182_v19, %v3178_v37  ;;  %v8011_v43 = vld [vmem:[#allocation7 + $0xc0] ss:$12 sps:$4 sm:$0xff]   ;;  %v3057_v54 = vmul.f32 0.01, %v2797_v40  ;;  %vm2929_vm13 = vcmp.gt.f32.partialorder %v2797_v40, 0.0 }
 0x2da   : > { %v2801_v13 = vadd.f32 %v2800_v10, %v2608_v46  ;;  %v2802_v31 = vpop.f32.mrf.mxu1  ;;  %5958 = vmatprep.subr.bf16.mxu0 %v8010_v35  ;;  %v2610_v0 = vadd.f32 %v2609_v17, %v11738_v51  ;;  %v3058_v16 = vmul.f32 0.01, %v2799_v41  ;;  %vm2930_vm11 = vcmp.gt.f32.partialorder %v2799_v41, 0.0 }
 0x2db   : > { %v2613_v36 = vpop.f32.mrf.mxu0  ;;  %4542 = vmatmul.mubr.bf16.gmra.mxu0 %v9644_v47  ;;  %4408 = vmatprep.mubr.bf16.mxu1 %v10076_v49  ;;  %v3185_v19 = vsel %vm2929_vm13, %v2797_v40, %v3057_v54 }
 0x2dc   : > { %v2806_v21 = vpop.f32.mrf.mxu1  ;;  %4551 = vmatprep.mubr.bf16.mxu0 %v9705_v2  ;;  %v3061_v33 = vmul.f32 0.01, %v2801_v13  ;;  %v2803_v7 = vadd.f32 %v2802_v31, %v2610_v0  ;;  %vm2933_vm10 = vcmp.gt.f32.partialorder %v2801_v13, 0.0  ;;  %v2614_v2 = vadd.f32 %v2613_v36, %v11737_v53 }
 0x2dd   : > { %v2615_v30 = vpop.f32.mrf.mxu0  ;;  %5959 = vmatpush2.bf16.msra.mxu0 %v8008_v60  ;;  %4409 = vmatmul.mubr.bf16.gmra.mxu1 %v10079_v59  ;;  %v3186_v17 = vsel %vm2930_vm11, %v2799_v41, %v3058_v16 }
 0x2de   : > { %v2616_v29 = vadd.f32 %v2615_v30, %v11738_v51  ;;  %v2808_v47 = vpop.f32.mrf.mxu1  ;;  %5960 = vmatprep.subr.bf16.mxu0 %v8013_v38  ;;  %vm2934_vm12 = vcmp.gt.f32.partialorder %v2803_v7, 0.0  ;;  %v3062_v32 = vmul.f32 0.01, %v2803_v7  ;;  %v3189_v42 = vsel %vm2933_vm10, %v2801_v13, %v3061_v33  ;;  %v11759_v13 = vld [vmem:[#allocation32_spill] sm:$0xff] }
 0x2df   : > { %v2617_v34 = vpop.f32.mrf.mxu0  ;;  %v2807_v60 = vadd.f32 %v2806_v21, %v2614_v2  ;;  %v10093_v0 = vpack.c.bf16 %v3189_v42, %v3185_v19  ;;  %v11760_v2 = vld [vmem:[#allocation25_spill] sm:$0xff] }
 0x2e0   : > { %v2618_v35 = vadd.f32 %v2617_v34, %v11737_v53  ;;  %v2810_v24 = vpop.f32.mrf.mxu1  ;;  %v2809_v55 = vadd.f32 %v2808_v47, %v2616_v29  ;;  %v3190_v10 = vsel %vm2934_vm12, %v2803_v7, %v3062_v32 }
 0x2e1   : > { %v2619_v46 = vpop.f32.mrf.mxu0  ;;  %5961 = vmatpush2.bf16.msra.mxu0 %v8011_v43  ;;  %v10090_v38 = vpack.c.bf16 %v3190_v10, %v3186_v17  ;;  %vm2937_vm1 = vcmp.gt.f32.partialorder %v2807_v60, 0.0  ;;  %v8014_v10 = vld [vmem:[#allocation7 + $0x228] ss:$12 sps:$4 sm:$0xff]  }
 0x2e2   : > { %v2811_v6 = vadd.f32 %v2810_v24, %v2618_v35  ;;  %v2620_v31 = vadd.f32 %v2619_v46, %v11738_v51  ;;  %v2812_v53 = vpop.f32.mrf.mxu1  ;;  %v3066_v36 = vmul.f32 0.01, %v2809_v55  ;;  %vm2938_vm14 = vcmp.gt.f32.partialorder %v2809_v55, 0.0  ;;  %v11761_v35 = vld [vmem:[#allocation21_spill] sm:$0xff] }
 0x2e3   : > { %v10088_v37 = vpop.f32.mrf.mxu0  ;;  %4552 = vmatmul.mubr.bf16.gmra.mxu0 %v11758_v52  ;;  %4418 = vmatprep.mubr.bf16.mxu1 %v10090_v38  ;;  %v3065_v51 = vmul.f32 0.01, %v2807_v60 }
 0x2e4   : > { %4561 = vmatprep.mubr.bf16.mxu0 %v11759_v13  ;;  %v3069_v33 = vmul.f32 0.01, %v2811_v6  ;;  %v2813_v7 = vadd.f32 %v2812_v53, %v2620_v31  ;;  %vm2941_vm15 = vcmp.gt.f32.partialorder %v2811_v6, 0.0  ;;  %v3194_v54 = vsel %vm2938_vm14, %v2809_v55, %v3066_v36  ;;  %v8023_v53 = vld [vmem:[#allocation7 + $0x1e0] ss:$12 sps:$4 sm:$0xff]  }
 0x2e5   : > { %v10097_v40 = vpop.f32.mrf.mxu0  ;;  %4419 = vmatmul.mubr.bf16.gmra.mxu1 %v10093_v0  ;;  %v3193_v47 = vsel %vm2937_vm1, %v2807_v60, %v3065_v51  ;;  %v8022_v60 = vld [vmem:[#allocation7 + $0x1fc] ss:$12 sps:$4 sm:$0xff]   ;;  %v8028_v13 = vld [vmem:[#allocation7 + $0x1cc] ss:$12 sps:$4 sm:$0xff]  }
 0x2e6   : > { %vm2942_vm0 = vcmp.gt.f32.partialorder %v2813_v7, 0.0  ;;  %v3070_v41 = vmul.f32 0.01, %v2813_v7  ;;  %v3197_v30 = vsel %vm2941_vm15, %v2811_v6, %v3069_v33  ;;  %v8019_v6 = vld [vmem:[#allocation7 + $0x214] ss:$12 sps:$4 sm:$0xff]  }
 0x2e7   : > { %v10100_v21 = vpop.f32.mrf.mxu0  ;;  %v10109_v34 = vpack.c.bf16 %v3197_v30, %v3193_v47  ;;  %v8034_v51 = vld [vmem:[#allocation7 + $0x19c] ss:$12 sps:$4 sm:$0xff]  }
 0x2e8   : > { %v3198_v16 = vsel %vm2942_vm0, %v2813_v7, %v3070_v41  ;;  %v8029_v7 = vld [vmem:[#allocation7 + $0x1b0] ss:$12 sps:$4 sm:$0xff]  }
 0x2e9   : > { %v10102_v43 = vpop.f32.mrf.mxu0  ;;  %v10104_v29 = vpack.c.bf16 %v3198_v16, %v3194_v54  ;;  %v8035_v54 = vld [vmem:[#allocation7 + $0x180] ss:$12 sps:$4 sm:$0xff]  }
 0x2ea   : > { %v8040_v16 = vld [vmem:[#allocation7 + $0x2ec] ss:$12 sps:$4 sm:$0xff]  }
 0x2eb   : > { %v10106_v32 = vpop.f32.mrf.mxu0  ;;  %4562 = vmatmul.mubr.bf16.gmra.mxu0 %v11760_v2  ;;  %4428 = vmatprep.mubr.bf16.mxu1 %v10104_v29 }
 0x2ec   : > { %4571 = vmatprep.mubr.bf16.mxu0 %v11761_v35  ;;  %v8041_v35 = vld [vmem:[#allocation7 + $0x2d0] ss:$12 sps:$4 sm:$0xff]  }
 0x2ed   : > { %v10113_v24 = vpop.f32.mrf.mxu0  ;;  %4429 = vmatmul.mubr.bf16.gmra.mxu1 %v10109_v34 }
 0x2ee   : > { %4664 = vmatprep.mubr.bf16.mxu1 %v9818_v14  ;;  %v8017_v14 = vld [vmem:[#allocation7 + $0x210] ss:$12 sps:$4 sm:$0xff]  }
 0x2ef   : > { %v10117_v42 = vpop.f32.mrf.mxu0 }
 0x2f1   : > { %v10119_v55 = vpop.f32.mrf.mxu0 }
 0x2f3   : > { %v10121_v46 = vpop.f32.mrf.mxu0  ;;  %4572 = vmatmul.mubr.bf16.gmra.mxu0 %v9755_v22  ;;  %v8020_v22 = vld [vmem:[#allocation7 + $0x1f8] ss:$12 sps:$4 sm:$0xff]  }
 0x2f4   : > { %4581 = vmatprep.mubr.bf16.mxu0 %v9797_v23  ;;  %v8025_v23 = vld [vmem:[#allocation7 + $0x1e4] ss:$12 sps:$4 sm:$0xff]  }
 0x2f5   : > { %v10125_v17 = vpop.f32.mrf.mxu0  ;;  %4665 = vmatmul.mubr.bf16.vlgmr.msra.gmra.mxu1 %v9827_v57 }
 0x2f6   : > { %4674 = vmatprep.mubr.bf16.mxu1 %v9854_v1  ;;  %6124 = vmatpush1.bf16.msra.mxu1 %v8014_v10  ;;  %v8046_v10 = vld [vmem:[#allocation7 + $0x2bc] ss:$12 sps:$4 sm:$0xff]  }
 0x2f7   : > { %v10129_v19 = vpop.f32.mrf.mxu0  ;;  %6125 = vmatprep.subr.bf16.mxu1 %v8019_v6 }
 0x2f9   : > { %v10131_v31 = vpop.f32.mrf.mxu0 }
 0x2fa   : > { %6126 = vmatpush1.bf16.msra.mxu1 %v8017_v14 }
 0x2fb   : > { %v10133_v52 = vpop.f32.mrf.mxu0  ;;  %4582 = vmatmul.mubr.bf16.gmra.mxu0 %v9779_v15  ;;  %6127 = vmatprep.subr.bf16.mxu1 %v8022_v60  ;;  %v8049_v60 = vld [vmem:[#allocation7 + $0x2a4] ss:$12 sps:$4 sm:$0xff]  }
 0x2fc   : > { %4591 = vmatprep.mubr.bf16.mxu0 %v9803_v9  ;;  %v8026_v9 = vld [vmem:[#allocation7 + $0x1c8] ss:$12 sps:$4 sm:$0xff]  }
 0x2fd   : > { %v10137_v57 = vpop.f32.mrf.mxu0  ;;  %4675 = vmatmul.mubr.bf16.gmra.mxu1 %v9859_v44  ;;  %v8031_v44 = vld [vmem:[#allocation7 + $0x1b4] ss:$12 sps:$4 sm:$0xff]  }
 0x2fe   : > { %4684 = vmatprep.mubr.bf16.mxu1 %v9884_v45  ;;  %6128 = vmatpush1.bf16.msra.mxu1 %v8020_v22 }
 0x2ff   : > { %v10141_v1 = vpop.f32.mrf.mxu0  ;;  %6129 = vmatprep.subr.bf16.mxu1 %v8025_v23 }
 0x301   : > { %v10143_v36 = vpop.f32.mrf.mxu0 }
 0x302   : > { %6130 = vmatpush1.bf16.msra.mxu1 %v8023_v53 }
 0x303   : > { %v10145_v15 = vpop.f32.mrf.mxu0  ;;  %4592 = vmatmul.mubr.bf16.gmra.mxu0 %v9793_v39  ;;  %6131 = vmatprep.subr.bf16.mxu1 %v8028_v13  ;;  %v11763_v13 = vld [vmem:[#allocation18_spill] sm:$0xff] }
 0x304   : > { %4601 = vmatprep.mubr.bf16.mxu0 %v9848_v63  ;;  %v8032_v63 = vld [vmem:[#allocation7 + $0x198] ss:$12 sps:$4 sm:$0xff]  }
 0x305   : > { %v10149_v33 = vpop.f32.mrf.mxu0  ;;  %4685 = vmatmul.mubr.bf16.gmra.mxu1 %v9891_v5  ;;  %v8037_v5 = vld [vmem:[#allocation7 + $0x184] ss:$12 sps:$4 sm:$0xff]  }
 0x306   : > { %4694 = vmatprep.mubr.bf16.mxu1 %v9913_v56  ;;  %6132 = vmatpush1.bf16.msra.mxu1 %v8026_v9  ;;  %v8050_v9 = vld [vmem:[#allocation7 + $0x288] ss:$12 sps:$4 sm:$0xff]  }
 0x307   : > { %v10153_v45 = vpop.f32.mrf.mxu0  ;;  %6133 = vmatprep.subr.bf16.mxu1 %v8031_v44  ;;  %v8052_v44 = vld [vmem:[#allocation7 + $0x28c] ss:$12 sps:$4 sm:$0xff]  }
 0x309   : > { %v10155_v41 = vpop.f32.mrf.mxu0 }
 0x30a   : > { %6134 = vmatpush1.bf16.msra.mxu1 %v8029_v7 }
 0x30b   : > { %v10157_v39 = vpop.f32.mrf.mxu0  ;;  %4602 = vmatmul.mubr.bf16.gmra.mxu0 %v9820_v61  ;;  %6135 = vmatprep.subr.bf16.mxu1 %v8034_v51 }
 0x30c   : > { %4611 = vmatprep.mubr.bf16.mxu0 %v9906_v26  ;;  %v8038_v26 = vld [vmem:[#allocation7 + $0x2e8] ss:$12 sps:$4 sm:$0xff]  }
 0x30d   : > { %v10161_v30 = vpop.f32.mrf.mxu0  ;;  %4695 = vmatmul.mubr.bf16.gmra.mxu1 %v9920_v20  ;;  %v8043_v20 = vld [vmem:[#allocation7 + $0x2d4] ss:$12 sps:$4 sm:$0xff]  }
 0x30e   : > { %4704 = vmatprep.mubr.bf16.mxu1 %v9948_v25  ;;  %6136 = vmatpush1.bf16.msra.mxu1 %v8032_v63 }
 0x30f   : > { %v10165_v56 = vpop.f32.mrf.mxu0  ;;  %6137 = vmatprep.subr.bf16.mxu1 %v8037_v5  ;;  %v11769_v5 = vld [vmem:[#allocation20_spill] sm:$0xff] }
 0x311   : > { %v10167_v47 = vpop.f32.mrf.mxu0 }
 0x312   : > { %6138 = vmatpush1.bf16.msra.mxu1 %v8035_v54 }
 0x313   : > { %v10169_v61 = vpop.f32.mrf.mxu0  ;;  %4612 = vmatmul.mubr.bf16.gmra.mxu0 %v9930_v11  ;;  %6139 = vmatprep.subr.bf16.mxu1 %v8040_v16  ;;  %v8057_v16 = vld [vmem:[#allocation7 + $0x270] ss:$12 sps:$4 sm:$0xff]  }
 0x314   : > { %4621 = vmatprep.mubr.bf16.mxu0 %v9941_v8  ;;  %v8044_v8 = vld [vmem:[#allocation7 + $0x2b8] ss:$12 sps:$4 sm:$0xff]  }
 0x315   : > { %v10173_v2 = vpop.f32.mrf.mxu0  ;;  %4705 = vmatmul.mubr.bf16.gmra.mxu1 %v9950_v3 }
 0x316   : > { %4714 = vmatprep.mubr.bf16.mxu1 %v9968_v18  ;;  %6140 = vmatpush2.bf16.msra.mxu1 %v8038_v26  ;;  %v8047_v18 = vld [vmem:[#allocation7 + $0x2a0] ss:$12 sps:$4 sm:$0xff]  }
 0x317   : > { %v10177_v25 = vpop.f32.mrf.mxu0  ;;  %6141 = vmatprep.subr.bf16.mxu1 %v8043_v20  ;;  %v8059_v26 = vld [vmem:[#allocation7 + $0x274] ss:$12 sps:$4 sm:$0xff]  }
 0x318   : > { %v3391_v20 = vld [vmem:[%s11570_s6] sm:$0xf] }
 0x319   : > { %v10179_v6 = vpop.f32.mrf.mxu0 }
 0x31a   : > { %6142 = vmatpush2.bf16.msra.mxu1 %v8041_v35 }
 0x31b   : > { %v10181_v11 = vpop.f32.mrf.mxu0  ;;  %4622 = vmatmul.mubr.bf16.gmra.mxu0 %v9962_v28  ;;  %6143 = vmatprep.subr.bf16.mxu1 %v8046_v10  ;;  %v8053_v28 = vld [vmem:[#allocation7 + $0x170] ss:$12 sps:$4 sm:$0xff]   ;;  %v11772_v10 = vld [vmem:[#allocation13_spill] sm:$0xff] }
 0x31c   : > { %7279 = vmatprep.subr.bf16.mxu0 %v8053_v28 }
 0x31d   : > { %v10184_v14 = vpop.f32.mrf.mxu0  ;;  %4715 = vmatmul.mubr.bf16.gmra.mxu1 %v9970_v4  ;;  %v11764_v4 = vld [vmem:[#allocation16_spill] sm:$0xff] }
 0x31e   : > { %4724 = vmatprep.mubr.bf16.mxu1 %v9981_v58  ;;  %6144 = vmatpush2.bf16.msra.mxu1 %v8044_v8  ;;  %v10216_v8 = vrot.slane %v3391_v20, %v11772_v10 }
 0x31f   : > { %v10188_v3 = vpop.f32.mrf.mxu0  ;;  %6145 = vmatprep.subr.bf16.mxu1 %v8049_v60  ;;  %v11774_v60 = vld [vmem:[#allocation12_spill] sm:$0xff] }
 0x320   : > { %v10221_v28 = vrot.slane %v3391_v20, %v11774_v60 }
 0x321   : > { %v10190_v22 = vpop.f32.mrf.mxu0 }
 0x322   : > { %6146 = vmatpush2.bf16.msra.mxu1 %v8047_v18  ;;  %v4092_v20 = vadd.f32 %v10100_v21, %v10221_v28 }
 0x323   : > { %v10192_v23 = vpop.f32.mrf.mxu0  ;;  %6147 = vmatprep.subr.bf16.mxu1 %v8052_v44  ;;  %v11777_v44 = vld [vmem:[#allocation24_spill] sm:$0xff] }
 0x324   : > { %11762 = vst [vmem:[#allocation29_spill] sm:$0xff] %v10192_v23 }
 0x325   : > { %v10194_v53 = vpop.f32.mrf.mxu0  ;;  %4725 = vmatmul.mubr.bf16.gmra.mxu1 %v11763_v13 }
 0x326   : > { %4734 = vmatprep.mubr.bf16.mxu1 %v11764_v4  ;;  %6148 = vmatpush2.bf16.msra.mxu1 %v8050_v9  ;;  %v11776_v4 = vld [vmem:[#allocation23_spill] sm:$0xff]  ;;  %v4090_v9 = vadd.f32 %v10097_v40, %v10216_v8  ;;  %v4094_v40 = vadd.f32 %v10102_v43, %v10216_v8 }
 0x327   : > { %v10198_v58 = vpop.f32.mrf.mxu0  ;;  %6149 = vmatprep.subr.bf16.mxu1 %v8059_v26  ;;  %v4088_v26 = vadd.f32 %v10088_v37, %v10221_v28 }
 0x328   : > { %11765 = vst [vmem:[#allocation30_spill] sm:$0xff] %v10198_v58 }
 0x329   : > { %v10200_v7 = vpop.f32.mrf.mxu0 }
 0x32a   : > { %11766 = vst [vmem:[#allocation31_spill] sm:$0xff] %v10200_v7  ;;  %6150 = vmatpush2.bf16.msra.mxu1 %v8057_v16  ;;  %v8064_v16 = vld [vmem:[#allocation7 + $0x258] ss:$12 sps:$4 sm:$0xff]  }
 0x32b   : > { %v10202_v51 = vpop.f32.mrf.mxu0 }
 0x32c   : > { %11767 = vst [vmem:[#allocation17_spill] sm:$0xff] %v10202_v51 }
 0x32d   : > { %v10204_v63 = vpop.f32.mrf.mxu0  ;;  %4735 = vmatmul.mubr.bf16.gmra.mxu1 %v11769_v5 }
 0x32e   : > { %11768 = vst [vmem:[#allocation19_spill] sm:$0xff] %v10204_v63  ;;  %4744 = vmatprep.mubr.bf16.mxu1 %v10010_v48 }
 0x32f   : > { %v10208_v54 = vpop.f32.mrf.mxu0 }
 0x330   : > { %11770 = vst [vmem:[#allocation22_spill] sm:$0xff] %v10208_v54 }
 0x331   : > { %v10213_v35 = vpop.f32.mrf.mxu0 }
 0x332   : > { %11771 = vst [vmem:[#allocation32_spill] sm:$0xff] %v10213_v35 }
 0x333   : > { %v10218_v18 = vpop.f32.mrf.mxu0 }
 0x334   : > { %11773 = vst [vmem:[#allocation25_spill] sm:$0xff] %v10218_v18  ;;  %v4280_v13 = vpop.f32.mrf.mxu1  ;;  %v8066_v18 = vld [vmem:[#allocation7 + $0x25c] ss:$12 sps:$4 sm:$0xff]  }
 0x335   : > { %v10223_v48 = vpop.f32.mrf.mxu0  ;;  %4745 = vmatmul.mubr.bf16.gmra.mxu1 %v11776_v4  ;;  %v4281_v4 = vadd.f32 %v4280_v13, %v4088_v26  ;;  %6151 = vmatprep.subr.bf16.mxu1 %v8066_v18  ;;  %v11782_v13 = vld [vmem:[#allocation26_spill] sm:$0xff]  ;;  %v4100_v18 = vadd.f32 %v10113_v24, %v10216_v8 }
 0x336   : > { %11775 = vst [vmem:[#allocation21_spill] sm:$0xff] %v10223_v48  ;;  %4754 = vmatprep.mubr.bf16.mxu1 %v11777_v44  ;;  %v4282_v10 = vpop.f32.mrf.mxu1  ;;  %6152 = vmatpush2.bf16.msra.mxu1 %v8064_v16  ;;  %v8073_v26 = vld [vmem:[#allocation7 + $0x244] ss:$12 sps:$4 sm:$0xff]   ;;  %v4098_v16 = vadd.f32 %v10106_v32, %v10221_v28 }
 0x337   : > { %v10229_v5 = vpop.f32.mrf.mxu0  ;;  %v4283_v60 = vadd.f32 %v4282_v10, %v4090_v9  ;;  %v4953_v21 = vmul.f32 0.01, %v4281_v4  ;;  %vm4825_vm4 = vcmp.gt.f32.partialorder %v4281_v4, 0.0  ;;  %6153 = vmatprep.subr.bf16.mxu1 %v8073_v26  ;;  %v8054_v32 = vld [vmem:[#allocation7 + $0xb0] ss:$12 sps:$4 sm:$0xff]  }
 0x338   : > { %11778 = vst [vmem:[#allocation18_spill] sm:$0xff] %v10229_v5  ;;  %v4284_v35 = vpop.f32.mrf.mxu1 }
 0x339   : > { %v10235_v48 = vpop.f32.mrf.mxu0  ;;  %v4285_v44 = vadd.f32 %v4284_v35, %v4092_v20  ;;  %v4954_v54 = vmul.f32 0.01, %v4283_v60  ;;  %vm4826_vm3 = vcmp.gt.f32.partialorder %v4283_v60, 0.0  ;;  %v11783_v35 = vld [vmem:[#allocation27_spill] sm:$0xff] }
 0x33a   : > { %11779 = vst [vmem:[#allocation16_spill] sm:$0xff] %v10235_v48  ;;  %v4286_v37 = vpop.f32.mrf.mxu1 }
 0x33b   : > { %v10239_v5 = vpop.f32.mrf.mxu0  ;;  %vm4829_vm2 = vcmp.gt.f32.partialorder %v4285_v44, 0.0  ;;  %v4957_v51 = vmul.f32 0.01, %v4285_v44  ;;  %v4287_v63 = vadd.f32 %v4286_v37, %v4094_v40  ;;  %v8071_v37 = vld [vmem:[#allocation7 + $0x240] ss:$12 sps:$4 sm:$0xff]  }
 0x33c   : > { %11780 = vst [vmem:[#allocation20_spill] sm:$0xff] %v10239_v5  ;;  %v4290_v10 = vpop.f32.mrf.mxu1  ;;  %6154 = vmatpush2.bf16.msra.mxu1 %v8071_v37 }
 0x33d   : > { %v10241_v7 = vpop.f32.mrf.mxu0  ;;  %4755 = vmatmul.mubr.bf16.gmra.mxu1 %v11782_v13  ;;  %vm4830_vm5 = vcmp.gt.f32.partialorder %v4287_v63, 0.0  ;;  %v4958_v43 = vmul.f32 0.01, %v4287_v63  ;;  %v5085_v20 = vsel %vm4829_vm2, %v4285_v44, %v4957_v51  ;;  %v4102_v13 = vadd.f32 %v10117_v42, %v10221_v28 }
 0x33e   : > { %11781 = vst [vmem:[#allocation23_spill] sm:$0xff] %v10241_v7  ;;  %4764 = vmatprep.mubr.bf16.mxu1 %v11783_v35  ;;  %v4292_v40 = vpop.f32.mrf.mxu1  ;;  %v5082_v7 = vsel %vm4826_vm3, %v4283_v60, %v4954_v54  ;;  %v5081_v35 = vsel %vm4825_vm4, %v4281_v4, %v4953_v21  ;;  %v4104_v51 = vadd.f32 %v10119_v55, %v10216_v8  ;;  %v11787_v21 = vld [vmem:[#allocation28_spill] sm:$0xff] }
 0x33f   : > { %v10247_v9 = vpop.f32.mrf.mxu0  ;;  %v4293_v5 = vadd.f32 %v4292_v40, %v4100_v18  ;;  %v5086_v48 = vsel %vm4830_vm5, %v4287_v63, %v4958_v43  ;;  %v10262_v44 = vpack.c.bf16 %v5085_v20, %v5081_v35  ;;  %v8055_v40 = vld [vmem:[#allocation7 + $0x158] ss:$12 sps:$4 sm:$0xff]   ;;  %v4108_v20 = vadd.f32 %v10121_v46, %v10221_v28  ;;  %v8078_v35 = vld [vmem:[#allocation7 + $0x2f0] ss:$12 sps:$4 sm:$0xff]   ;;  %v8061_v46 = vld [vmem:[#allocation7 + $0x80] ss:$12 sps:$4 sm:$0xff]  }
 0x340   : > { %11784 = vst [vmem:[#allocation24_spill] sm:$0xff] %v10247_v9  ;;  %v4291_v9 = vadd.f32 %v4290_v10, %v4098_v16  ;;  %v4294_v58 = vpop.f32.mrf.mxu1  ;;  %v10258_v23 = vpack.c.bf16 %v5086_v48, %v5082_v7  ;;  %v4110_v10 = vadd.f32 %v10125_v17, %v10216_v8  ;;  %v8060_v16 = vld [vmem:[#allocation7 + $0x140] ss:$12 sps:$4 sm:$0xff]   ;;  %7391 = vmatprep.subr.bf16.mxu1 %v8078_v35 }
 0x341   : > { %v10254_v24 = vpop.f32.mrf.mxu0  ;;  %11786 = vst [vmem:[#allocation27_spill] sm:$0xff] %v10262_v44  ;;  %v4295_v42 = vadd.f32 %v4294_v58, %v4102_v13  ;;  %v4962_v63 = vmul.f32 0.01, %v4293_v5  ;;  %vm4834_vm7 = vcmp.gt.f32.partialorder %v4293_v5, 0.0  ;;  %v8056_v58 = vld [vmem:[#allocation7 + $0x98] ss:$12 sps:$4 sm:$0xff]  }
 0x342   : > { %11785 = vst [vmem:[#allocation26_spill] sm:$0xff] %v10258_v23  ;;  %v4296_v54 = vpop.f32.mrf.mxu1  ;;  %5962 = vmatprep.mubr.bf16.mxu0 %v10258_v23  ;;  %v4961_v48 = vmul.f32 0.01, %v4291_v9  ;;  %vm4833_vm8 = vcmp.gt.f32.partialorder %v4291_v9, 0.0 }
 0x343   : > { %v10264_v18 = vpop.f32.mrf.mxu0  ;;  %vm4837_vm6 = vcmp.gt.f32.partialorder %v4295_v42, 0.0  ;;  %v4965_v60 = vmul.f32 0.01, %v4295_v42  ;;  %v4297_v4 = vadd.f32 %v4296_v54, %v4104_v51  ;;  %5963 = vmatmul.mubr.bf16.vlgmr.msra.gmra.mxu0 %v10262_v44  ;;  %v5090_v54 = vsel %vm4834_vm7, %v4293_v5, %v4962_v63  ;;  %v8062_v5 = vld [vmem:[#allocation7 + $0x128] ss:$12 sps:$4 sm:$0xff]  }
 0x344   : > { %v4300_v55 = vpop.f32.mrf.mxu1  ;;  %7280 = vmatpush3.bf16.msra.mxu0 %v8054_v32  ;;  %v4112_v32 = vadd.f32 %v10129_v19, %v10221_v28 }
 0x345   : > { %v10268_v7 = vpop.f32.mrf.mxu0  ;;  %4765 = vmatmul.mubr.bf16.gmra.mxu1 %v11787_v21  ;;  %vm4838_vm9 = vcmp.gt.f32.partialorder %v4297_v4, 0.0  ;;  %v4966_v43 = vmul.f32 0.01, %v4297_v4  ;;  %7281 = vmatprep.subr.bf16.mxu0 %v8055_v40  ;;  %v5093_v37 = vsel %vm4837_vm6, %v4295_v42, %v4965_v60  ;;  %v5089_v21 = vsel %vm4833_vm8, %v4291_v9, %v4961_v48 }
 0x346   : > { %4774 = vmatprep.mubr.bf16.mxu1 %v10050_v27  ;;  %v4302_v13 = vpop.f32.mrf.mxu1  ;;  %v4301_v40 = vadd.f32 %v4300_v55, %v4108_v20  ;;  %v4114_v42 = vadd.f32 %v10131_v31, %v10216_v8  ;;  %v10289_v60 = vpack.c.bf16 %v5093_v37, %v5089_v21  ;;  %v8067_v37 = vld [vmem:[#allocation7 + $0x110] ss:$12 sps:$4 sm:$0xff]  }
 0x347   : > { %v10274_v26 = vpop.f32.mrf.mxu0  ;;  %v4303_v17 = vadd.f32 %v4302_v13, %v4110_v10  ;;  %v5094_v27 = vsel %vm4838_vm9, %v4297_v4, %v4966_v43  ;;  %v4120_v43 = vadd.f32 %v10137_v57, %v10216_v8  ;;  %v4118_v13 = vadd.f32 %v10133_v52, %v10221_v28 }
 0x348   : > { %v4304_v44 = vpop.f32.mrf.mxu1  ;;  %v10285_v23 = vpack.c.bf16 %v5094_v27, %v5090_v54  ;;  %7282 = vmatpush3.bf16.msra.mxu0 %v8056_v58  ;;  %v4969_v58 = vmul.f32 0.01, %v4301_v40  ;;  %vm4841_vm12 = vcmp.gt.f32.partialorder %v4301_v40, 0.0  ;;  %v4124_v52 = vadd.f32 %v10143_v36, %v10216_v8 }
 0x349   : > { %v10281_v51 = vpop.f32.mrf.mxu0  ;;  %v4305_v19 = vadd.f32 %v4304_v44, %v4112_v32  ;;  %7283 = vmatprep.subr.bf16.mxu0 %v8060_v16  ;;  %v4970_v9 = vmul.f32 0.01, %v4303_v17  ;;  %vm4842_vm11 = vcmp.gt.f32.partialorder %v4303_v17, 0.0  ;;  %v8063_v44 = vld [vmem:[#allocation7 + $0x68] ss:$12 sps:$4 sm:$0xff]   ;;  %v4122_v32 = vadd.f32 %v10141_v1, %v10221_v28 }
 0x34a   : > { %v4306_v63 = vpop.f32.mrf.mxu1  ;;  %5972 = vmatprep.mubr.bf16.mxu0 %v10285_v23 }
 0x34b   : > { %v10291_v10 = vpop.f32.mrf.mxu0  ;;  %vm4845_vm10 = vcmp.gt.f32.partialorder %v4305_v19, 0.0  ;;  %v4973_v4 = vmul.f32 0.01, %v4305_v19  ;;  %v4307_v48 = vadd.f32 %v4306_v63, %v4114_v42  ;;  %5973 = vmatmul.mubr.bf16.gmra.mxu0 %v10289_v60  ;;  %v5098_v27 = vsel %vm4842_vm11, %v4303_v17, %v4970_v9  ;;  %v8068_v63 = vld [vmem:[#allocation7 + $0x50] ss:$12 sps:$4 sm:$0xff]  }
 0x34c   : > { %v4310_v31 = vpop.f32.mrf.mxu1  ;;  %7284 = vmatpush3.bf16.msra.mxu0 %v8061_v46 }
 0x34d   : > { %v10295_v55 = vpop.f32.mrf.mxu0  ;;  %4775 = vmatmul.mubr.bf16.gmra.mxu1 %v10053_v50  ;;  %vm4846_vm13 = vcmp.gt.f32.partialorder %v4307_v48, 0.0  ;;  %v4974_v16 = vmul.f32 0.01, %v4307_v48  ;;  %7285 = vmatprep.subr.bf16.mxu0 %v8062_v5  ;;  %v5101_v35 = vsel %vm4845_vm10, %v4305_v19, %v4973_v4  ;;  %v4311_v46 = vadd.f32 %v4310_v31, %v4118_v13  ;;  %v8070_v31 = vld [vmem:[#allocation7 + $0x38] ss:$12 sps:$4 sm:$0xff]  }
 0x34e   : > { %4784 = vmatprep.mubr.bf16.mxu1 %v10063_v62  ;;  %v4312_v50 = vpop.f32.mrf.mxu1  ;;  %v5097_v62 = vsel %vm4841_vm12, %v4301_v40, %v4969_v58  ;;  %v8074_v13 = vld [vmem:[#allocation7 + $0xe0] ss:$12 sps:$4 sm:$0xff]  }
 0x34f   : > { %v10301_v20 = vpop.f32.mrf.mxu0  ;;  %v4313_v54 = vadd.f32 %v4312_v50, %v4120_v43  ;;  %v5102_v21 = vsel %vm4846_vm13, %v4307_v48, %v4974_v16  ;;  %v10315_v19 = vpack.c.bf16 %v5101_v35, %v5097_v62  ;;  %v8069_v43 = vld [vmem:[#allocation7 + $0xf8] ss:$12 sps:$4 sm:$0xff]   ;;  %v4977_v58 = vmul.f32 0.01, %v4311_v46 }
 0x350   : > { %v4314_v42 = vpop.f32.mrf.mxu1  ;;  %v10311_v5 = vpack.c.bf16 %v5102_v21, %v5098_v27  ;;  %7286 = vmatpush3.bf16.msra.mxu0 %v8063_v44  ;;  %v4130_v44 = vadd.f32 %v10149_v33, %v10216_v8  ;;  %vm4849_vm0 = vcmp.gt.f32.partialorder %v4311_v46, 0.0  ;;  %v4128_v35 = vadd.f32 %v10145_v15, %v10221_v28 }
 0x351   : > { %v10308_v57 = vpop.f32.mrf.mxu0  ;;  %11788 = vst [vmem:[#allocation28_spill] sm:$0xff] %v10315_v19  ;;  %v4315_v4 = vadd.f32 %v4314_v42, %v4122_v32  ;;  %7287 = vmatprep.subr.bf16.mxu0 %v8067_v37  ;;  %v4978_v17 = vmul.f32 0.01, %v4313_v54  ;;  %vm4850_vm15 = vcmp.gt.f32.partialorder %v4313_v54, 0.0  ;;  %v4132_v27 = vadd.f32 %v10153_v45, %v10221_v28 }
 0x352   : > { %v4316_v50 = vpop.f32.mrf.mxu1  ;;  %5982 = vmatprep.mubr.bf16.mxu0 %v10311_v5  ;;  %v4134_v15 = vadd.f32 %v10155_v41, %v10216_v8 }
 0x353   : > { %v10317_v1 = vpop.f32.mrf.mxu0  ;;  %vm4853_vm14 = vcmp.gt.f32.partialorder %v4315_v4, 0.0  ;;  %v4981_v40 = vmul.f32 0.01, %v4315_v4  ;;  %v4317_v9 = vadd.f32 %v4316_v50, %v4124_v52  ;;  %5983 = vmatmul.mubr.bf16.gmra.mxu0 %v10315_v19  ;;  %v5106_v62 = vsel %vm4850_vm15, %v4313_v54, %v4978_v17  ;;  %v8075_v50 = vld [vmem:[#allocation7 + $0x20] ss:$12 sps:$4 sm:$0xff]  }
 0x354   : > { %v4320_v36 = vpop.f32.mrf.mxu1  ;;  %7288 = vmatpush3.bf16.msra.mxu0 %v8068_v63 }
 0x355   : > { %v10321_v48 = vpop.f32.mrf.mxu0  ;;  %4785 = vmatmul.mubr.bf16.gmra.mxu1 %v10066_v12  ;;  %vm4854_vm1 = vcmp.gt.f32.partialorder %v4317_v9, 0.0  ;;  %v4982_v16 = vmul.f32 0.01, %v4317_v9  ;;  %7289 = vmatprep.subr.bf16.mxu0 %v8069_v43  ;;  %v5109_v32 = vsel %vm4853_vm14, %v4315_v4, %v4981_v40  ;;  %v4321_v63 = vadd.f32 %v4320_v36, %v4128_v35  ;;  %v8077_v36 = vld [vmem:[#allocation7 + $0x8] ss:$12 sps:$4 sm:$0xff]  }
 0x356   : > { %4794 = vmatprep.mubr.bf16.mxu1 %v10076_v49  ;;  %v4322_v12 = vpop.f32.mrf.mxu1  ;;  %v5105_v49 = vsel %vm4849_vm0, %v4311_v46, %v4977_v58  ;;  %v4138_v35 = vadd.f32 %v10157_v39, %v10221_v28  ;;  %v4144_v39 = vadd.f32 %v10167_v47, %v10216_v8  ;;  %v4150_v47 = vadd.f32 %v10173_v2, %v10216_v8 }
 0x357   : > { %v10327_v37 = vpop.f32.mrf.mxu0  ;;  %v4323_v21 = vadd.f32 %v4322_v12, %v4130_v44  ;;  %v5110_v42 = vsel %vm4854_vm1, %v4317_v9, %v4982_v16  ;;  %v10341_v4 = vpack.c.bf16 %v5109_v32, %v5105_v49  ;;  %v8076_v44 = vld [vmem:[#allocation7 + $0xc8] ss:$12 sps:$4 sm:$0xff]   ;;  %v4985_v58 = vmul.f32 0.01, %v4321_v63 }
 0x358   : > { %v4324_v52 = vpop.f32.mrf.mxu1  ;;  %v10337_v43 = vpack.c.bf16 %v5110_v42, %v5106_v62  ;;  %7290 = vmatpush3.bf16.msra.mxu0 %v8070_v31  ;;  %v4140_v31 = vadd.f32 %v10161_v30, %v10216_v8  ;;  %vm4857_vm4 = vcmp.gt.f32.partialorder %v4321_v63, 0.0 }
 0x359   : > { %v10334_v33 = vpop.f32.mrf.mxu0  ;;  %11790 = vst [vmem:[#allocation34_spill] sm:$0xff] %v10341_v4  ;;  %v4325_v40 = vadd.f32 %v4324_v52, %v4132_v27  ;;  %7291 = vmatprep.subr.bf16.mxu0 %v8074_v13  ;;  %v4986_v54 = vmul.f32 0.01, %v4323_v21  ;;  %vm4858_vm3 = vcmp.gt.f32.partialorder %v4323_v21, 0.0  ;;  %v5113_v52 = vsel %vm4857_vm4, %v4321_v63, %v4985_v58 }
 0x35a   : > { %11789 = vst [vmem:[#allocation33_spill] sm:$0xff] %v10337_v43  ;;  %v4326_v12 = vpop.f32.mrf.mxu1  ;;  %5992 = vmatprep.mubr.bf16.mxu0 %v10337_v43 }
 0x35b   : > { %v10343_v45 = vpop.f32.mrf.mxu0  ;;  %vm4861_vm2 = vcmp.gt.f32.partialorder %v4325_v40, 0.0  ;;  %v4989_v46 = vmul.f32 0.01, %v4325_v40  ;;  %v4327_v17 = vadd.f32 %v4326_v12, %v4134_v15  ;;  %5993 = vmatmul.mubr.bf16.gmra.mxu0 %v10341_v4  ;;  %v5114_v30 = vsel %vm4858_vm3, %v4323_v21, %v4986_v54  ;;  %v11807_v4 = vld [vmem:[#allocation32_spill] sm:$0xff] }
 0x35c   : > { %v4330_v41 = vpop.f32.mrf.mxu1  ;;  %7292 = vmatpush3.bf16.msra.mxu0 %v8075_v50  ;;  %v4184_v43 = vadd.f32 %v11807_v4, %v10216_v8  ;;  %v11811_v4 = vld [vmem:[#allocation21_spill] sm:$0xff] }
 0x35d   : > { %v10347_v9 = vpop.f32.mrf.mxu0  ;;  %4795 = vmatmul.mubr.bf16.gmra.mxu1 %v10079_v59  ;;  %vm4862_vm5 = vcmp.gt.f32.partialorder %v4327_v17, 0.0  ;;  %v4990_v16 = vmul.f32 0.01, %v4327_v17  ;;  %7293 = vmatprep.subr.bf16.mxu0 %v8076_v44  ;;  %v5117_v32 = vsel %vm4861_vm2, %v4325_v40, %v4989_v46  ;;  %v4142_v59 = vadd.f32 %v10165_v56, %v10221_v28 }
 0x35e   : > { %4804 = vmatprep.mubr.bf16.mxu1 %v10090_v38  ;;  %v4332_v27 = vpop.f32.mrf.mxu1  ;;  %v4331_v38 = vadd.f32 %v4330_v41, %v4138_v35  ;;  %v10367_v40 = vpack.c.bf16 %v5117_v32, %v5113_v52  ;;  %v4152_v32 = vadd.f32 %v10177_v25, %v10221_v28 }
 0x35f   : > { %v10353_v13 = vpop.f32.mrf.mxu0  ;;  %v4333_v62 = vadd.f32 %v4332_v27, %v4140_v31  ;;  %v5118_v49 = vsel %vm4862_vm5, %v4327_v17, %v4990_v16  ;;  %v4148_v31 = vadd.f32 %v10169_v61, %v10221_v28 }
 0x360   : > { %v4334_v50 = vpop.f32.mrf.mxu1  ;;  %v10363_v15 = vpack.c.bf16 %v5118_v49, %v5114_v30  ;;  %7294 = vmatpush3.bf16.msra.mxu0 %v8077_v36  ;;  %11792 = vst [vmem:[#allocation36_spill] sm:$0xff] %v10367_v40  ;;  %v4993_v17 = vmul.f32 0.01, %v4331_v38  ;;  %vm4865_vm8 = vcmp.gt.f32.partialorder %v4331_v38, 0.0 }
 0x361   : > { %v10360_v42 = vpop.f32.mrf.mxu0  ;;  %v4335_v44 = vadd.f32 %v4334_v50, %v4142_v59  ;;  %v4994_v46 = vmul.f32 0.01, %v4333_v62  ;;  %vm4866_vm7 = vcmp.gt.f32.partialorder %v4333_v62, 0.0  ;;  %v4154_v50 = vadd.f32 %v10179_v6, %v10216_v8 }
 0x362   : > { %11791 = vst [vmem:[#allocation35_spill] sm:$0xff] %v10363_v15  ;;  %v4336_v56 = vpop.f32.mrf.mxu1  ;;  %6002 = vmatprep.mubr.bf16.mxu0 %v10363_v15  ;;  %v5121_v30 = vsel %vm4865_vm8, %v4331_v38, %v4993_v17  ;;  %v4160_v6 = vadd.f32 %v10184_v14, %v10216_v8 }
 0x363   : > { %v10369_v12 = vpop.f32.mrf.mxu0  ;;  %vm4869_vm6 = vcmp.gt.f32.partialorder %v4335_v44, 0.0  ;;  %v4997_v21 = vmul.f32 0.01, %v4335_v44  ;;  %v4337_v63 = vadd.f32 %v4336_v56, %v4144_v39  ;;  %6003 = vmatmul.mubr.bf16.gmra.mxu0 %v10367_v40  ;;  %v5122_v2 = vsel %vm4866_vm7, %v4333_v62, %v4994_v46 }
 0x365   : > { %v10373_v54 = vpop.f32.mrf.mxu0  ;;  %v4340_v58 = vpop.f32.mrf.mxu1  ;;  %4805 = vmatmul.mubr.bf16.gmra.mxu1 %v10093_v0  ;;  %vm4870_vm9 = vcmp.gt.f32.partialorder %v4337_v63, 0.0  ;;  %v4998_v41 = vmul.f32 0.01, %v4337_v63  ;;  %v5125_v16 = vsel %vm4869_vm6, %v4335_v44, %v4997_v21 }
 0x366   : > { %4814 = vmatprep.mubr.bf16.mxu1 %v10104_v29  ;;  %v4341_v49 = vadd.f32 %v4340_v58, %v4148_v31  ;;  %v10392_v61 = vpack.c.bf16 %v5125_v16, %v5121_v30  ;;  %v4162_v16 = vadd.f32 %v10188_v3, %v10221_v28 }
 0x367   : > { %v10379_v36 = vpop.f32.mrf.mxu0  ;;  %v4342_v35 = vpop.f32.mrf.mxu1  ;;  %v5126_v59 = vsel %vm4870_vm9, %v4337_v63, %v4998_v41 }
 0x368   : > { %v4343_v0 = vadd.f32 %v4342_v35, %v4150_v47  ;;  %v10388_v29 = vpack.c.bf16 %v5126_v59, %v5122_v2  ;;  %11794 = vst [vmem:[#allocation38_spill] sm:$0xff] %v10392_v61  ;;  %v5001_v21 = vmul.f32 0.01, %v4341_v49  ;;  %vm4873_vm12 = vcmp.gt.f32.partialorder %v4341_v49, 0.0 }
 0x369   : > { %v10386_v27 = vpop.f32.mrf.mxu0  ;;  %v4344_v52 = vpop.f32.mrf.mxu1  ;;  %v4158_v47 = vadd.f32 %v10181_v11, %v10221_v28 }
 0x36a   : > { %11793 = vst [vmem:[#allocation37_spill] sm:$0xff] %v10388_v29  ;;  %v4345_v39 = vadd.f32 %v4344_v52, %v4152_v32  ;;  %6012 = vmatprep.mubr.bf16.mxu0 %v10388_v29  ;;  %v5002_v25 = vmul.f32 0.01, %v4343_v0  ;;  %vm4874_vm11 = vcmp.gt.f32.partialorder %v4343_v0, 0.0  ;;  %v5129_v59 = vsel %vm4873_vm12, %v4341_v49, %v5001_v21 }
 0x36b   : > { %v10394_v44 = vpop.f32.mrf.mxu0  ;;  %v4346_v56 = vpop.f32.mrf.mxu1  ;;  %6013 = vmatmul.mubr.bf16.gmra.mxu0 %v10392_v61  ;;  %v11800_v61 = vld [vmem:[#allocation31_spill] sm:$0xff] }
 0x36c   : > { %vm4877_vm10 = vcmp.gt.f32.partialorder %v4345_v39, 0.0  ;;  %v5005_v62 = vmul.f32 0.01, %v4345_v39  ;;  %v4347_v46 = vadd.f32 %v4346_v56, %v4154_v50  ;;  %v4164_v50 = vadd.f32 %v10190_v22, %v10216_v8 }
 0x36d   : > { %v10398_v38 = vpop.f32.mrf.mxu0  ;;  %v4350_v63 = vpop.f32.mrf.mxu1  ;;  %4815 = vmatmul.mubr.bf16.gmra.mxu1 %v10109_v34  ;;  %v5130_v34 = vsel %vm4874_vm11, %v4343_v0, %v5002_v25  ;;  %v4170_v22 = vadd.f32 %v10194_v53, %v10216_v8  ;;  %v4174_v29 = vadd.f32 %v11800_v61, %v10216_v8  ;;  %v11802_v61 = vld [vmem:[#allocation19_spill] sm:$0xff] }
 0x36e   : > { %vm4878_vm13 = vcmp.gt.f32.partialorder %v4347_v46, 0.0  ;;  %v5006_v17 = vmul.f32 0.01, %v4347_v46  ;;  %v5133_v41 = vsel %vm4877_vm10, %v4345_v39, %v5005_v62  ;;  %v4351_v14 = vadd.f32 %v4350_v63, %v4158_v47 }
 0x36f   : > { %v10403_v58 = vpop.f32.mrf.mxu0  ;;  %v4352_v31 = vpop.f32.mrf.mxu1  ;;  %v10415_v56 = vpack.c.bf16 %v5133_v41, %v5129_v59 }
 0x370   : > { %v4353_v35 = vadd.f32 %v4352_v31, %v4160_v6  ;;  %v5134_v2 = vsel %vm4878_vm13, %v4347_v46, %v5006_v17  ;;  %v5009_v46 = vmul.f32 0.01, %v4351_v14  ;;  %vm4881_vm0 = vcmp.gt.f32.partialorder %v4351_v14, 0.0  ;;  %v11797_v17 = vld [vmem:[#allocation29_spill] sm:$0xff] }
 0x371   : > { %v10409_v32 = vpop.f32.mrf.mxu0  ;;  %v4354_v30 = vpop.f32.mrf.mxu1  ;;  %v10411_v52 = vpack.c.bf16 %v5134_v2, %v5130_v34  ;;  %11796 = vst [vmem:[#allocation40_spill] sm:$0xff] %v10415_v56  ;;  %v4168_v47 = vadd.f32 %v11797_v17, %v10221_v28 }
 0x372   : > { %v4355_v11 = vadd.f32 %v4354_v30, %v4162_v16  ;;  %v5010_v3 = vmul.f32 0.01, %v4353_v35  ;;  %vm4882_vm15 = vcmp.gt.f32.partialorder %v4353_v35, 0.0  ;;  %v11798_v16 = vld [vmem:[#allocation30_spill] sm:$0xff] }
 0x373   : > { %11795 = vst [vmem:[#allocation39_spill] sm:$0xff] %v10411_v52  ;;  %v10417_v39 = vpop.f32.mrf.mxu0  ;;  %v4356_v62 = vpop.f32.mrf.mxu1  ;;  %6022 = vmatprep.mubr.bf16.mxu0 %v10411_v52  ;;  %v4172_v34 = vadd.f32 %v11798_v16, %v10221_v28  ;;  %v11804_v16 = vld [vmem:[#allocation22_spill] sm:$0xff] }
 0x374   : > { %vm4885_vm14 = vcmp.gt.f32.partialorder %v4355_v11, 0.0  ;;  %v5013_v0 = vmul.f32 0.01, %v4355_v11  ;;  %v4357_v25 = vadd.f32 %v4356_v62, %v4164_v50  ;;  %6023 = vmatmul.mubr.bf16.gmra.mxu0 %v10415_v56  ;;  %v5138_v30 = vsel %vm4882_vm15, %v4353_v35, %v5010_v3 }
 0x375   : > { %v10421_v49 = vpop.f32.mrf.mxu0  ;;  %v4360_v21 = vpop.f32.mrf.mxu1  ;;  %v5137_v62 = vsel %vm4881_vm0, %v4351_v14, %v5009_v46 }
 0x376   : > { %vm4886_vm1 = vcmp.gt.f32.partialorder %v4357_v25, 0.0  ;;  %v5014_v63 = vmul.f32 0.01, %v4357_v25  ;;  %v5141_v41 = vsel %vm4885_vm14, %v4355_v11, %v5013_v0  ;;  %v4361_v53 = vadd.f32 %v4360_v21, %v4168_v47  ;;  %v11803_v47 = vld [vmem:[#allocation17_spill] sm:$0xff] }
 0x377   : > { %v10425_v6 = vpop.f32.mrf.mxu0  ;;  %v4362_v31 = vpop.f32.mrf.mxu1  ;;  %v10437_v40 = vpack.c.bf16 %v5141_v41, %v5137_v62  ;;  %v4180_v21 = vadd.f32 %v11802_v61, %v10216_v8  ;;  %v4178_v41 = vadd.f32 %v11803_v47, %v10221_v28 }
 0x378   : > { %v4363_v2 = vadd.f32 %v4362_v31, %v4170_v22  ;;  %v5142_v50 = vsel %vm4886_vm1, %v4357_v25, %v5014_v63  ;;  %v5017_v25 = vmul.f32 0.01, %v4361_v53  ;;  %vm4889_vm4 = vcmp.gt.f32.partialorder %v4361_v53, 0.0 }
 0x379   : > { %v10431_v59 = vpop.f32.mrf.mxu0  ;;  %v4364_v56 = vpop.f32.mrf.mxu1  ;;  %v10433_v52 = vpack.c.bf16 %v5142_v50, %v5138_v30  ;;  %11801 = vst [vmem:[#allocation30_spill] sm:$0xff] %v10437_v40 }
 0x37a   : > { %v4365_v11 = vadd.f32 %v4364_v56, %v4172_v34  ;;  %v5018_v22 = vmul.f32 0.01, %v4363_v2  ;;  %vm4890_vm3 = vcmp.gt.f32.partialorder %v4363_v2, 0.0  ;;  %v4182_v34 = vadd.f32 %v11804_v16, %v10221_v28 }
 0x37b   : > { %11799 = vst [vmem:[#allocation29_spill] sm:$0xff] %v10433_v52  ;;  %v10439_v0 = vpop.f32.mrf.mxu0  ;;  %v4366_v17 = vpop.f32.mrf.mxu1  ;;  %6032 = vmatprep.mubr.bf16.mxu0 %v10433_v52 }
 0x37c   : > { %vm4893_vm2 = vcmp.gt.f32.partialorder %v4365_v11, 0.0  ;;  %v5021_v35 = vmul.f32 0.01, %v4365_v11  ;;  %v4367_v3 = vadd.f32 %v4366_v17, %v4174_v29  ;;  %6033 = vmatmul.mubr.bf16.gmra.mxu0 %v10437_v40  ;;  %v5146_v62 = vsel %vm4890_vm3, %v4363_v2, %v5018_v22 }
 0x37d   : > { %v10443_v14 = vpop.f32.mrf.mxu0  ;;  %v4370_v46 = vpop.f32.mrf.mxu1  ;;  %v5145_v40 = vsel %vm4889_vm4, %v4361_v53, %v5017_v25 }
 0x37e   : > { %vm4894_vm5 = vcmp.gt.f32.partialorder %v4367_v3, 0.0  ;;  %v5022_v56 = vmul.f32 0.01, %v4367_v3  ;;  %v5149_v31 = vsel %vm4893_vm2, %v4365_v11, %v5021_v35  ;;  %v4371_v61 = vadd.f32 %v4370_v46, %v4178_v41 }
 0x37f   : > { %v10447_v63 = vpop.f32.mrf.mxu0  ;;  %v4372_v29 = vpop.f32.mrf.mxu1  ;;  %v10459_v19 = vpack.c.bf16 %v5149_v31, %v5145_v40  ;;  %v4190_v40 = vadd.f32 %v11811_v4, %v10216_v8 }
 0x380   : > { %v4373_v30 = vadd.f32 %v4372_v29, %v4180_v21  ;;  %v5150_v17 = vsel %vm4894_vm5, %v4367_v3, %v5022_v56  ;;  %v5025_v3 = vmul.f32 0.01, %v4371_v61  ;;  %vm4897_vm8 = vcmp.gt.f32.partialorder %v4371_v61, 0.0  ;;  %v11813_v56 = vld [vmem:[#allocation25_spill] sm:$0xff]  ;;  %v11814_v29 = vld [vmem:[#allocation18_spill] sm:$0xff] }
 0x381   : > { %v10453_v50 = vpop.f32.mrf.mxu0  ;;  %v4374_v52 = vpop.f32.mrf.mxu1  ;;  %v10455_v15 = vpack.c.bf16 %v5150_v17, %v5146_v62  ;;  %11808 = vst [vmem:[#allocation17_spill] sm:$0xff] %v10459_v19  ;;  %v4188_v41 = vadd.f32 %v11813_v56, %v10221_v28  ;;  %v4192_v16 = vadd.f32 %v11814_v29, %v10221_v28 }
 0x382   : > { %11805 = vst [vmem:[#allocation31_spill] sm:$0xff] %v10453_v50  ;;  %v4375_v11 = vadd.f32 %v4374_v52, %v4182_v34  ;;  %v5026_v21 = vmul.f32 0.01, %v4373_v30  ;;  %vm4898_vm7 = vcmp.gt.f32.partialorder %v4373_v30, 0.0 }
 0x383   : > { %11806 = vst [vmem:[#allocation19_spill] sm:$0xff] %v10455_v15  ;;  %v10461_v35 = vpop.f32.mrf.mxu0  ;;  %v4376_v47 = vpop.f32.mrf.mxu1  ;;  %6042 = vmatprep.mubr.bf16.mxu0 %v10455_v15 }
 0x384   : > { %11809 = vst [vmem:[#allocation22_spill] sm:$0xff] %v10461_v35  ;;  %vm4901_vm6 = vcmp.gt.f32.partialorder %v4375_v11, 0.0  ;;  %v5029_v2 = vmul.f32 0.01, %v4375_v11  ;;  %v4377_v22 = vadd.f32 %v4376_v47, %v4184_v43  ;;  %6043 = vmatmul.mubr.bf16.gmra.mxu0 %v10459_v19  ;;  %v5154_v17 = vsel %vm4898_vm7, %v4373_v30, %v5026_v21 }
 0x385   : > { %v10465_v53 = vpop.f32.mrf.mxu0  ;;  %v4380_v25 = vpop.f32.mrf.mxu1  ;;  %v5153_v19 = vsel %vm4897_vm8, %v4371_v61, %v5025_v3 }
 0x386   : > { %11810 = vst [vmem:[#allocation32_spill] sm:$0xff] %v10465_v53  ;;  %vm4902_vm9 = vcmp.gt.f32.partialorder %v4377_v22, 0.0  ;;  %v5030_v52 = vmul.f32 0.01, %v4377_v22  ;;  %v5157_v31 = vsel %vm4901_vm6, %v4375_v11, %v5029_v2  ;;  %v4381_v4 = vadd.f32 %v4380_v25, %v4188_v41 }
 0x387   : > { %v10469_v46 = vpop.f32.mrf.mxu0  ;;  %v4382_v43 = vpop.f32.mrf.mxu1  ;;  %v10481_v50 = vpack.c.bf16 %v5157_v31, %v5153_v19  ;;  %v11820_v19 = vld [vmem:[#allocation23_spill] sm:$0xff] }
 0x388   : > { %11812 = vst [vmem:[#allocation21_spill] sm:$0xff] %v10469_v46  ;;  %v4383_v34 = vadd.f32 %v4382_v43, %v4190_v40  ;;  %v5158_v47 = vsel %vm4902_vm9, %v4377_v22, %v5030_v52  ;;  %v11816_v46 = vld [vmem:[#allocation16_spill] sm:$0xff]  ;;  %v5033_v22 = vmul.f32 0.01, %v4381_v4  ;;  %v4200_v25 = vadd.f32 %v11820_v19, %v10216_v8 }
 0x389   : > { %v10475_v62 = vpop.f32.mrf.mxu0  ;;  %v4384_v15 = vpop.f32.mrf.mxu1  ;;  %v10477_v35 = vpack.c.bf16 %v5158_v47, %v5154_v17  ;;  %v4194_v53 = vadd.f32 %v11816_v46, %v10216_v8  ;;  %11817 = vst [vmem:[#allocation18_spill] sm:$0xff] %v10481_v50  ;;  %vm4905_vm12 = vcmp.gt.f32.partialorder %v4381_v4, 0.0  ;;  %v11822_v46 = vld [vmem:[#allocation20_spill] sm:$0xff] }
 0x38a   : > { %v4385_v11 = vadd.f32 %v4384_v15, %v4192_v16  ;;  %v5034_v40 = vmul.f32 0.01, %v4383_v34  ;;  %vm4906_vm11 = vcmp.gt.f32.partialorder %v4383_v34, 0.0  ;;  %v4198_v41 = vadd.f32 %v11822_v46, %v10221_v28  ;;  %v11823_v43 = vld [vmem:[#allocation24_spill] sm:$0xff] }
 0x38b   : > { %11815 = vst [vmem:[#allocation25_spill] sm:$0xff] %v10477_v35  ;;  %v10483_v2 = vpop.f32.mrf.mxu0  ;;  %v4386_v56 = vpop.f32.mrf.mxu1  ;;  %6052 = vmatprep.mubr.bf16.mxu0 %v10477_v35  ;;  %v4202_v29 = vadd.f32 %v11823_v43, %v10221_v28 }
 0x38c   : > { %11818 = vst [vmem:[#allocation16_spill] sm:$0xff] %v10483_v2  ;;  %vm4909_vm10 = vcmp.gt.f32.partialorder %v4385_v11, 0.0  ;;  %v5037_v30 = vmul.f32 0.01, %v4385_v11  ;;  %v4387_v21 = vadd.f32 %v4386_v56, %v4194_v53  ;;  %6053 = vmatmul.mubr.bf16.gmra.mxu0 %v10481_v50  ;;  %v5162_v47 = vsel %vm4906_vm11, %v4383_v34, %v5034_v40 }
 0x38d   : > { %v10487_v61 = vpop.f32.mrf.mxu0  ;;  %v4390_v3 = vpop.f32.mrf.mxu1  ;;  %v5161_v50 = vsel %vm4905_vm12, %v4381_v4, %v5033_v22 }
 0x38e   : > { %11819 = vst [vmem:[#allocation41_spill] sm:$0xff] %v10487_v61  ;;  %vm4910_vm13 = vcmp.gt.f32.partialorder %v4387_v21, 0.0  ;;  %v5038_v15 = vmul.f32 0.01, %v4387_v21  ;;  %v5165_v31 = vsel %vm4909_vm10, %v4385_v11, %v5037_v30  ;;  %v4391_v19 = vadd.f32 %v4390_v3, %v4198_v41 }
 0x38f   : > { %v10491_v52 = vpop.f32.mrf.mxu0  ;;  %v4392_v53 = vpop.f32.mrf.mxu1  ;;  %v10503_v61 = vpack.c.bf16 %v5165_v31, %v5161_v50  ;;  %v4208_v3 = vadd.f32 %v10264_v18, %v10221_v28  ;;  %v4212_v41 = vadd.f32 %v10274_v26, %v10221_v28 }
 0x390   : > { %11821 = vst [vmem:[#allocation23_spill] sm:$0xff] %v10491_v52  ;;  %v4393_v16 = vadd.f32 %v4392_v53, %v4200_v25  ;;  %v5166_v56 = vsel %vm4910_vm13, %v4387_v21, %v5038_v15  ;;  %v4204_v52 = vadd.f32 %v10254_v24, %v10216_v8  ;;  %v5041_v21 = vmul.f32 0.01, %v4391_v19 }
 0x391   : > { %v10497_v17 = vpop.f32.mrf.mxu0  ;;  %v4394_v35 = vpop.f32.mrf.mxu1  ;;  %v10499_v2 = vpack.c.bf16 %v5166_v56, %v5162_v47  ;;  %11825 = vst [vmem:[#allocation24_spill] sm:$0xff] %v10503_v61  ;;  %v4210_v24 = vadd.f32 %v10268_v7, %v10216_v8  ;;  %vm4913_vm0 = vcmp.gt.f32.partialorder %v4391_v19, 0.0 }
 0x392   : > { %v4395_v11 = vadd.f32 %v4394_v35, %v4202_v29  ;;  %v5042_v25 = vmul.f32 0.01, %v4393_v16  ;;  %vm4914_vm15 = vcmp.gt.f32.partialorder %v4393_v16, 0.0  ;;  %v5169_v47 = vsel %vm4913_vm0, %v4391_v19, %v5041_v21 }
 0x393   : > { %11824 = vst [vmem:[#allocation20_spill] sm:$0xff] %v10499_v2  ;;  %v10505_v30 = vpop.f32.mrf.mxu0  ;;  %v4396_v46 = vpop.f32.mrf.mxu1  ;;  %6062 = vmatprep.mubr.bf16.mxu0 %v10499_v2 }
 0x394   : > { %vm4917_vm14 = vcmp.gt.f32.partialorder %v4395_v11, 0.0  ;;  %v5045_v34 = vmul.f32 0.01, %v4395_v11  ;;  %v4397_v40 = vadd.f32 %v4396_v46, %v4204_v52  ;;  %6063 = vmatmul.mubr.bf16.gmra.mxu0 %v10503_v61  ;;  %v5170_v43 = vsel %vm4914_vm15, %v4393_v16, %v5042_v25 }
 0x395   : > { %v10509_v4 = vpop.f32.mrf.mxu0  ;;  %v4400_v22 = vpop.f32.mrf.mxu1  ;;  %v4214_v61 = vadd.f32 %v10281_v51, %v10216_v8  ;;  %v4220_v51 = vadd.f32 %v10295_v55, %v10216_v8 }
 0x396   : > { %vm4918_vm1 = vcmp.gt.f32.partialorder %v4397_v40, 0.0  ;;  %v5046_v50 = vmul.f32 0.01, %v4397_v40  ;;  %v5173_v15 = vsel %vm4917_vm14, %v4395_v11, %v5045_v34  ;;  %v4401_v7 = vadd.f32 %v4400_v22, %v4208_v3 }
 0x397   : > { %v10513_v35 = vpop.f32.mrf.mxu0  ;;  %v4402_v52 = vpop.f32.mrf.mxu1  ;;  %v10525_v2 = vpack.c.bf16 %v5173_v15, %v5169_v47  ;;  %v4222_v15 = vadd.f32 %v10301_v20, %v10221_v28 }
 0x398   : > { %v4403_v31 = vadd.f32 %v4402_v52, %v4210_v24  ;;  %v5174_v29 = vsel %vm4918_vm1, %v4397_v40, %v5046_v50  ;;  %v5049_v40 = vmul.f32 0.01, %v4401_v7  ;;  %vm4921_vm4 = vcmp.gt.f32.partialorder %v4401_v7, 0.0 }
 0x399   : > { %v10519_v53 = vpop.f32.mrf.mxu0  ;;  %v4404_v56 = vpop.f32.mrf.mxu1  ;;  %v10521_v46 = vpack.c.bf16 %v5174_v29, %v5170_v43  ;;  %11827 = vst [vmem:[#allocation43_spill] sm:$0xff] %v10525_v2  ;;  %v4218_v50 = vadd.f32 %v10291_v10, %v10221_v28 }
 0x39a   : > { %v4405_v18 = vadd.f32 %v4404_v56, %v4212_v41  ;;  %v5050_v26 = vmul.f32 0.01, %v4403_v31  ;;  %vm4922_vm3 = vcmp.gt.f32.partialorder %v4403_v31, 0.0  ;;  %v5177_v47 = vsel %vm4921_vm4, %v4401_v7, %v5049_v40 }
 0x39b   : > { %11826 = vst [vmem:[#allocation42_spill] sm:$0xff] %v10521_v46  ;;  %v10527_v11 = vpop.f32.mrf.mxu0  ;;  %v4406_v34 = vpop.f32.mrf.mxu1  ;;  %6072 = vmatprep.mubr.bf16.mxu0 %v10521_v46 }
 0x39c   : > { %vm4925_vm2 = vcmp.gt.f32.partialorder %v4405_v18, 0.0  ;;  %v5053_v16 = vmul.f32 0.01, %v4405_v18  ;;  %v4407_v25 = vadd.f32 %v4406_v34, %v4214_v61  ;;  %6073 = vmatmul.mubr.bf16.gmra.mxu0 %v10525_v2  ;;  %v5178_v43 = vsel %vm4922_vm3, %v4403_v31, %v5050_v26 }
 0x39d   : > { %v10531_v19 = vpop.f32.mrf.mxu0  ;;  %v4410_v21 = vpop.f32.mrf.mxu1  ;;  %v4224_v2 = vadd.f32 %v10308_v57, %v10216_v8  ;;  %v4230_v57 = vadd.f32 %v10321_v48, %v10216_v8 }
 0x39e   : > { %vm4926_vm5 = vcmp.gt.f32.partialorder %v4407_v25, 0.0  ;;  %v5054_v22 = vmul.f32 0.01, %v4407_v25  ;;  %v5181_v3 = vsel %vm4925_vm2, %v4405_v18, %v5053_v16  ;;  %v4411_v55 = vadd.f32 %v4410_v21, %v4218_v50 }
 0x39f   : > { %v10535_v24 = vpop.f32.mrf.mxu0  ;;  %v4412_v61 = vpop.f32.mrf.mxu1  ;;  %v10547_v46 = vpack.c.bf16 %v5181_v3, %v5177_v47  ;;  %v4232_v3 = vadd.f32 %v10327_v37, %v10221_v28 }
 0x3a0   : > { %v4413_v52 = vadd.f32 %v4412_v61, %v4220_v51  ;;  %v5182_v29 = vsel %vm4926_vm5, %v4407_v25, %v5054_v22  ;;  %v5057_v25 = vmul.f32 0.01, %v4411_v55  ;;  %vm4929_vm8 = vcmp.gt.f32.partialorder %v4411_v55, 0.0 }
 0x3a1   : > { %v10541_v41 = vpop.f32.mrf.mxu0  ;;  %v4414_v56 = vpop.f32.mrf.mxu1  ;;  %v10543_v34 = vpack.c.bf16 %v5182_v29, %v5178_v43  ;;  %11829 = vst [vmem:[#allocation45_spill] sm:$0xff] %v10547_v46  ;;  %v4228_v22 = vadd.f32 %v10317_v1, %v10221_v28 }
 0x3a2   : > { %v4415_v10 = vadd.f32 %v4414_v56, %v4222_v15  ;;  %v5058_v20 = vmul.f32 0.01, %v4413_v52  ;;  %vm4930_vm7 = vcmp.gt.f32.partialorder %v4413_v52, 0.0  ;;  %v5185_v47 = vsel %vm4929_vm8, %v4411_v55, %v5057_v25 }
 0x3a3   : > { %11828 = vst [vmem:[#allocation44_spill] sm:$0xff] %v10543_v34  ;;  %v10549_v18 = vpop.f32.mrf.mxu0  ;;  %v4416_v16 = vpop.f32.mrf.mxu1  ;;  %6082 = vmatprep.mubr.bf16.mxu0 %v10543_v34 }
 0x3a4   : > { %vm4933_vm6 = vcmp.gt.f32.partialorder %v4415_v10, 0.0  ;;  %v5061_v31 = vmul.f32 0.01, %v4415_v10  ;;  %v4417_v26 = vadd.f32 %v4416_v16, %v4224_v2  ;;  %6083 = vmatmul.mubr.bf16.gmra.mxu0 %v10547_v46  ;;  %v5186_v43 = vsel %vm4930_vm7, %v4413_v52, %v5058_v20 }
 0x3a5   : > { %v10553_v7 = vpop.f32.mrf.mxu0  ;;  %v4420_v40 = vpop.f32.mrf.mxu1  ;;  %v4234_v46 = vadd.f32 %v10334_v33, %v10216_v8  ;;  %v4240_v33 = vadd.f32 %v10347_v9, %v10216_v8 }
 0x3a6   : > { %vm4934_vm9 = vcmp.gt.f32.partialorder %v4417_v26, 0.0  ;;  %v5062_v21 = vmul.f32 0.01, %v4417_v26  ;;  %v5189_v50 = vsel %vm4933_vm6, %v4415_v10, %v5061_v31  ;;  %v4421_v48 = vadd.f32 %v4420_v40, %v4228_v22 }
 0x3a7   : > { %v10557_v51 = vpop.f32.mrf.mxu0  ;;  %v4422_v2 = vpop.f32.mrf.mxu1  ;;  %v10569_v34 = vpack.c.bf16 %v5189_v50, %v5185_v47  ;;  %v4242_v50 = vadd.f32 %v10353_v13, %v10221_v28 }
 0x3a8   : > { %v4423_v61 = vadd.f32 %v4422_v2, %v4230_v57  ;;  %v5190_v29 = vsel %vm4934_vm9, %v4417_v26, %v5062_v21  ;;  %v5065_v26 = vmul.f32 0.01, %v4421_v48  ;;  %vm4937_vm12 = vcmp.gt.f32.partialorder %v4421_v48, 0.0 }
 0x3a9   : > { %v10563_v15 = vpop.f32.mrf.mxu0  ;;  %v4424_v56 = vpop.f32.mrf.mxu1  ;;  %v10565_v16 = vpack.c.bf16 %v5190_v29, %v5186_v43  ;;  %11831 = vst [vmem:[#allocation47_spill] sm:$0xff] %v10569_v34  ;;  %v4238_v21 = vadd.f32 %v10343_v45, %v10221_v28  ;;  %v8350_v45 = vld [vmem:[%s11570_s6] sm:$0xf] }
 0x3aa   : > { %v4425_v1 = vadd.f32 %v4424_v56, %v4232_v3  ;;  %v5066_v37 = vmul.f32 0.01, %v4423_v61  ;;  %vm4938_vm11 = vcmp.gt.f32.partialorder %v4423_v61, 0.0  ;;  %v5193_v47 = vsel %vm4937_vm12, %v4421_v48, %v5065_v26  ;;  %v11835_v48 = vld [vmem:[#allocation15_spill] sm:$0xff] }
 0x3ab   : > { %11830 = vst [vmem:[#allocation46_spill] sm:$0xff] %v10565_v16  ;;  %v10571_v10 = vpop.f32.mrf.mxu0  ;;  %v4426_v31 = vpop.f32.mrf.mxu1  ;;  %6092 = vmatprep.mubr.bf16.mxu0 %v10565_v16 }
 0x3ac   : > { %vm4941_vm10 = vcmp.gt.f32.partialorder %v4425_v1, 0.0  ;;  %v5069_v52 = vmul.f32 0.01, %v4425_v1  ;;  %v4427_v20 = vadd.f32 %v4426_v31, %v4234_v46  ;;  %6093 = vmatmul.mubr.bf16.gmra.mxu0 %v10569_v34  ;;  %v5194_v43 = vsel %vm4938_vm11, %v4423_v61, %v5066_v37 }
 0x3ad   : > { %v10575_v55 = vpop.f32.mrf.mxu0  ;;  %v4430_v25 = vpop.f32.mrf.mxu1  ;;  %v4244_v34 = vadd.f32 %v10360_v42, %v10216_v8  ;;  %v10602_v37 = vrot.slane %v8350_v45, %v11835_v48 }
 0x3ae   : > { %vm4942_vm13 = vcmp.gt.f32.partialorder %v4427_v20, 0.0  ;;  %v5070_v40 = vmul.f32 0.01, %v4427_v20  ;;  %v5197_v22 = vsel %vm4941_vm10, %v4425_v1, %v5069_v52  ;;  %v4431_v9 = vadd.f32 %v4430_v25, %v4238_v21  ;;  %v11833_v1 = vld [vmem:[#allocation14_spill] sm:$0xff] }
 0x3af   : > { %v10579_v57 = vpop.f32.mrf.mxu0  ;;  %v4432_v46 = vpop.f32.mrf.mxu1  ;;  %v10595_v52 = vrot.slane %v8350_v45, %v11833_v1  ;;  %v10597_v28 = vpack.c.bf16 %v5197_v22, %v5193_v47 }
 0x3b0   : > { %v4433_v2 = vadd.f32 %v4432_v46, %v4240_v33  ;;  %v5198_v29 = vsel %vm4942_vm13, %v4427_v20, %v5070_v40  ;;  %v5073_v33 = vmul.f32 0.01, %v4431_v9  ;;  %vm4945_vm0 = vcmp.gt.f32.partialorder %v4431_v9, 0.0 }
 0x3b1   : > { %v10585_v3 = vpop.f32.mrf.mxu0  ;;  %v4434_v56 = vpop.f32.mrf.mxu1  ;;  %v10587_v31 = vpack.c.bf16 %v5198_v29, %v5194_v43  ;;  %11834 = vst [vmem:[#allocation14_spill] sm:$0xff] %v10597_v28  ;;  %v4476_v21 = vadd.f32 %v10373_v54, %v10595_v52  ;;  %v4478_v29 = vadd.f32 %v10379_v36, %v10602_v37 }
 0x3b2   : > { %v4435_v13 = vadd.f32 %v4434_v56, %v4242_v50  ;;  %v5074_v26 = vmul.f32 0.01, %v4433_v2  ;;  %vm4946_vm15 = vcmp.gt.f32.partialorder %v4433_v2, 0.0  ;;  %v4474_v50 = vadd.f32 %v10369_v12, %v10602_v37 }
 0x3b3   : > { %11832 = vst [vmem:[#allocation48_spill] sm:$0xff] %v10587_v31  ;;  %v10599_v61 = vpop.f32.mrf.mxu0  ;;  %v4436_v20 = vpop.f32.mrf.mxu1  ;;  %6102 = vmatprep.mubr.bf16.mxu0 %v10587_v31  ;;  %v4480_v31 = vadd.f32 %v10386_v27, %v10595_v52  ;;  %v11838_v27 = vld [vmem:[#allocation26_spill] sm:$0xff] }
 0x3b4   : > { %vm4949_vm14 = vcmp.gt.f32.partialorder %v4435_v13, 0.0  ;;  %v5077_v8 = vmul.f32 0.01, %v4435_v13  ;;  %v4437_v42 = vadd.f32 %v4436_v20, %v4244_v34  ;;  %6103 = vmatmul.mubr.bf16.gmra.mxu0 %v10597_v28  ;;  %v5202_v45 = vsel %vm4946_vm15, %v4433_v2, %v5074_v26 }
 0x3b5   : > { %v10606_v25 = vpop.f32.mrf.mxu0  ;;  %v4666_v40 = vpop.f32.mrf.mxu1  ;;  %v5201_v20 = vsel %vm4945_vm0, %v4431_v9, %v5073_v33 }
 0x3b6   : > { %vm4950_vm1 = vcmp.gt.f32.partialorder %v4437_v42, 0.0  ;;  %v5078_v22 = vmul.f32 0.01, %v4437_v42  ;;  %v5205_v43 = vsel %vm4949_vm14, %v4435_v13, %v5077_v8  ;;  %v4667_v54 = vadd.f32 %v4666_v40, %v4474_v50 }
 0x3b7   : > { %v10610_v46 = vpop.f32.mrf.mxu0  ;;  %v4668_v34 = vpop.f32.mrf.mxu1  ;;  %v10622_v16 = vpack.c.bf16 %v5205_v43, %v5201_v20  ;;  %v4488_v43 = vadd.f32 %v10403_v58, %v10602_v37 }
 0x3b8   : > { %v4669_v47 = vadd.f32 %v4668_v34, %v4476_v21  ;;  %v5206_v1 = vsel %vm4950_vm1, %v4437_v42, %v5078_v22  ;;  %v4955_v42 = vmul.f32 0.01, %v4667_v54  ;;  %vm4827_vm4 = vcmp.gt.f32.partialorder %v4667_v54, 0.0 }
 0x3b9   : > { %v10616_v56 = vpop.f32.mrf.mxu0  ;;  %v4670_v48 = vpop.f32.mrf.mxu1  ;;  %v10618_v28 = vpack.c.bf16 %v5206_v1, %v5202_v45  ;;  %11837 = vst [vmem:[#allocation50_spill] sm:$0xff] %v10622_v16 }
 0x3ba   : > { %v4671_v12 = vadd.f32 %v4670_v48, %v4478_v29  ;;  %v4956_v36 = vmul.f32 0.01, %v4669_v47  ;;  %vm4828_vm3 = vcmp.gt.f32.partialorder %v4669_v47, 0.0  ;;  %v4486_v48 = vadd.f32 %v10398_v38, %v10595_v52 }
 0x3bb   : > { %11836 = vst [vmem:[#allocation49_spill] sm:$0xff] %v10618_v28  ;;  %v10624_v13 = vpop.f32.mrf.mxu0  ;;  %v4672_v8 = vpop.f32.mrf.mxu1  ;;  %6112 = vmatprep.mubr.bf16.mxu0 %v10618_v28  ;;  %v5083_v1 = vsel %vm4827_vm4, %v4667_v54, %v4955_v42  ;;  %v8081_v42 = vld [vmem:[#allocation7 + $0x218] ss:$12 sps:$4 sm:$0xff]  }
 0x3bc   : > { %vm4831_vm2 = vcmp.gt.f32.partialorder %v4671_v12, 0.0  ;;  %v4959_v2 = vmul.f32 0.01, %v4671_v12  ;;  %v4673_v26 = vadd.f32 %v4672_v8, %v4480_v31  ;;  %6113 = vmatmul.mubr.bf16.gmra.mxu0 %v10622_v16  ;;  %v4484_v31 = vadd.f32 %v10394_v44, %v10602_v37 }
 0x3bd   : > { %v10628_v9 = vpop.f32.mrf.mxu0  ;;  %v4676_v33 = vpop.f32.mrf.mxu1  ;;  %6348 = vmatprep.mubr.bf16.mxu0 %v11838_v27  ;;  %v5084_v29 = vsel %vm4828_vm3, %v4669_v47, %v4956_v36  ;;  %v8079_v27 = vld [vmem:[#allocation7 + $0x230] ss:$12 sps:$4 sm:$0xff]   ;;  %v4490_v16 = vadd.f32 %v10409_v32, %v10595_v52 }
 0x3be   : > { %vm4832_vm5 = vcmp.gt.f32.partialorder %v4673_v26, 0.0  ;;  %v4960_v40 = vmul.f32 0.01, %v4673_v26  ;;  %v5087_v22 = vsel %vm4831_vm2, %v4671_v12, %v4959_v2  ;;  %v4677_v20 = vadd.f32 %v4676_v33, %v4484_v31  ;;  %v8080_v2 = vld [vmem:[#allocation7 + $0x2d8] ss:$12 sps:$4 sm:$0xff]  }
 0x3bf   : > { %v10633_v21 = vpop.f32.mrf.mxu0  ;;  %v4678_v50 = vpop.f32.mrf.mxu1  ;;  %v10643_v28 = vpack.c.bf16 %v5087_v22, %v5083_v1  ;;  %v11840_v36 = vld [vmem:[#allocation27_spill] sm:$0xff]  ;;  %v4496_v33 = vadd.f32 %v10421_v49, %v10595_v52 }
 0x3c0   : > { %11839 = vst [vmem:[#allocation26_spill] sm:$0xff] %v10633_v21  ;;  %v4679_v34 = vadd.f32 %v4678_v50, %v4486_v48  ;;  %v5088_v45 = vsel %vm4832_vm5, %v4673_v26, %v4960_v40  ;;  %v4963_v26 = vmul.f32 0.01, %v4677_v20  ;;  %vm4835_vm8 = vcmp.gt.f32.partialorder %v4677_v20, 0.0 }
 0x3c1   : > { %v4680_v8 = vpop.f32.mrf.mxu1  ;;  %v10639_v38 = vpack.c.bf16 %v5088_v45, %v5084_v29  ;;  %v10645_v12 = vpop.f32.mrf.mxu0 }
 0x3c2   : > { %v4681_v44 = vadd.f32 %v4680_v8, %v4488_v43  ;;  %v4964_v58 = vmul.f32 0.01, %v4679_v34  ;;  %vm4836_vm7 = vcmp.gt.f32.partialorder %v4679_v34, 0.0  ;;  %v5091_v29 = vsel %vm4835_vm8, %v4677_v20, %v4963_v26  ;;  %v8085_v26 = vld [vmem:[#allocation7 + $0x1e8] ss:$12 sps:$4 sm:$0xff]  }
 0x3c3   : > { %v4682_v21 = vpop.f32.mrf.mxu1  ;;  %6155 = vmatprep.mubr.bf16.mxu1 %v10639_v38  ;;  %v10653_v40 = vpop.f32.mrf.mxu0 }
 0x3c4   : > { %vm4839_vm6 = vcmp.gt.f32.partialorder %v4681_v44, 0.0  ;;  %v4967_v47 = vmul.f32 0.01, %v4681_v44  ;;  %v4683_v54 = vadd.f32 %v4682_v21, %v4490_v16  ;;  %6156 = vmatmul.mubr.bf16.vlgmr.msra.gmra.mxu1 %v10643_v28  ;;  %6349 = vmatmul.mubr.bf16.vlgmr.msra.gmra.mxu0 %v11840_v36  ;;  %v8082_v16 = vld [vmem:[#allocation7 + $0x2c0] ss:$12 sps:$4 sm:$0xff]   ;;  %v4494_v21 = vadd.f32 %v10417_v39, %v10602_v37 }
 0x3c5   : > { %7392 = vmatpush3.bf16.msra.mxu1 %v8079_v27  ;;  %v4686_v32 = vpop.f32.mrf.mxu1  ;;  %6356 = vmatprep.mubr.bf16.mxu0 %v10285_v23  ;;  %v4498_v23 = vadd.f32 %v10425_v6, %v10602_v37  ;;  %v5092_v43 = vsel %vm4836_vm7, %v4679_v34, %v4964_v58  ;;  %v8083_v27 = vld [vmem:[#allocation7 + $0x200] ss:$12 sps:$4 sm:$0xff]   ;;  %v4500_v39 = vadd.f32 %v10431_v59, %v10595_v52  ;;  %v8084_v6 = vld [vmem:[#allocation7 + $0x2a8] ss:$12 sps:$4 sm:$0xff]  }
 0x3c6   : > { %vm4840_vm9 = vcmp.gt.f32.partialorder %v4683_v54, 0.0  ;;  %v4968_v48 = vmul.f32 0.01, %v4683_v54  ;;  %7393 = vmatprep.subr.bf16.mxu1 %v8080_v2  ;;  %v5095_v31 = vsel %vm4839_vm6, %v4681_v44, %v4967_v47  ;;  %v4687_v45 = vadd.f32 %v4686_v32, %v4494_v21  ;;  %v10667_v44 = vpop.f32.mrf.mxu0 }
 0x3c7   : > { %v4688_v22 = vpop.f32.mrf.mxu1  ;;  %v10665_v2 = vpack.c.bf16 %v5095_v31, %v5091_v29  ;;  %v4506_v32 = vadd.f32 %v10443_v14, %v10595_v52 }
 0x3c8   : > { %v4689_v50 = vadd.f32 %v4688_v22, %v4496_v33  ;;  %v5096_v49 = vsel %vm4840_vm9, %v4683_v54, %v4968_v48  ;;  %v4971_v54 = vmul.f32 0.01, %v4687_v45  ;;  %vm4843_vm12 = vcmp.gt.f32.partialorder %v4687_v45, 0.0  ;;  %v8086_v48 = vld [vmem:[#allocation7 + $0x290] ss:$12 sps:$4 sm:$0xff]  }
 0x3c9   : > { %v4690_v1 = vpop.f32.mrf.mxu1  ;;  %v10661_v8 = vpack.c.bf16 %v5096_v49, %v5092_v43  ;;  %7394 = vmatpush3.bf16.msra.mxu1 %v8081_v42  ;;  %v10675_v42 = vpop.f32.mrf.mxu0 }
 0x3ca   : > { %v4691_v47 = vadd.f32 %v4690_v1, %v4498_v23  ;;  %7395 = vmatprep.subr.bf16.mxu1 %v8082_v16  ;;  %v4972_v34 = vmul.f32 0.01, %v4689_v50  ;;  %vm4844_vm11 = vcmp.gt.f32.partialorder %v4689_v50, 0.0  ;;  %v5099_v23 = vsel %vm4843_vm12, %v4687_v45, %v4971_v54  ;;  %v8087_v1 = vld [vmem:[#allocation7 + $0x1d0] ss:$12 sps:$4 sm:$0xff]  }
 0x3cb   : > { %v4692_v36 = vpop.f32.mrf.mxu1  ;;  %6165 = vmatprep.mubr.bf16.mxu1 %v10661_v8 }
 0x3cc   : > { %vm4847_vm10 = vcmp.gt.f32.partialorder %v4691_v47, 0.0  ;;  %v4975_v20 = vmul.f32 0.01, %v4691_v47  ;;  %v4693_v58 = vadd.f32 %v4692_v36, %v4500_v39  ;;  %6166 = vmatmul.mubr.bf16.gmra.mxu1 %v10665_v2  ;;  %6357 = vmatmul.mubr.bf16.gmra.mxu0 %v10289_v60  ;;  %v4504_v60 = vadd.f32 %v10439_v0, %v10602_v37 }
 0x3cd   : > { %v4696_v59 = vpop.f32.mrf.mxu1  ;;  %6364 = vmatprep.mubr.bf16.mxu0 %v10311_v5  ;;  %7396 = vmatpush3.bf16.msra.mxu1 %v8083_v27  ;;  %v4508_v5 = vadd.f32 %v10447_v63, %v10602_v37  ;;  %v5100_v22 = vsel %vm4844_vm11, %v4689_v50, %v4972_v34  ;;  %v11841_v27 = vld [vmem:[#allocation31_spill] sm:$0xff] }
 0x3ce   : > { %vm4848_vm13 = vcmp.gt.f32.partialorder %v4693_v58, 0.0  ;;  %v4976_v33 = vmul.f32 0.01, %v4693_v58  ;;  %7397 = vmatprep.subr.bf16.mxu1 %v8084_v6  ;;  %v5103_v16 = vsel %vm4847_vm10, %v4691_v47, %v4975_v20  ;;  %v4697_v43 = vadd.f32 %v4696_v59, %v4504_v60  ;;  %v10689_v47 = vpop.f32.mrf.mxu0  ;;  %v8088_v63 = vld [vmem:[#allocation7 + $0x278] ss:$12 sps:$4 sm:$0xff]   ;;  %v11844_v59 = vld [vmem:[#allocation33_spill] sm:$0xff] }
 0x3cf   : > { %v4698_v21 = vpop.f32.mrf.mxu1  ;;  %v4510_v0 = vadd.f32 %v11841_v27, %v10595_v52  ;;  %v10687_v39 = vpack.c.bf16 %v5103_v16, %v5099_v23  ;;  %v11843_v20 = vld [vmem:[#allocation28_spill] sm:$0xff]  ;;  %v11847_v23 = vld [vmem:[#allocation21_spill] sm:$0xff] }
 0x3d0   : > { %v4699_v31 = vadd.f32 %v4698_v21, %v4506_v32  ;;  %v5104_v14 = vsel %vm4848_vm13, %v4693_v58, %v4976_v33  ;;  %v4979_v58 = vmul.f32 0.01, %v4697_v43  ;;  %v11845_v32 = vld [vmem:[#allocation32_spill] sm:$0xff]  ;;  %vm4851_vm0 = vcmp.gt.f32.partialorder %v4697_v43, 0.0  ;;  %v11846_v21 = vld [vmem:[#allocation22_spill] sm:$0xff] }
 0x3d1   : > { %v4700_v49 = vpop.f32.mrf.mxu1  ;;  %v10683_v29 = vpack.c.bf16 %v5104_v14, %v5100_v22  ;;  %7398 = vmatpush3.bf16.msra.mxu1 %v8085_v26  ;;  %11842 = vst [vmem:[#allocation27_spill] sm:$0xff] %v10687_v39  ;;  %v8089_v26 = vld [vmem:[#allocation7 + $0x1b8] ss:$12 sps:$4 sm:$0xff]   ;;  %v4516_v33 = vadd.f32 %v11845_v32, %v10595_v52  ;;  %v8090_v16 = vld [vmem:[#allocation7 + $0x260] ss:$12 sps:$4 sm:$0xff]  }
 0x3d2   : > { %v4701_v6 = vadd.f32 %v4700_v49, %v4508_v5  ;;  %7399 = vmatprep.subr.bf16.mxu1 %v8086_v48  ;;  %v4980_v50 = vmul.f32 0.01, %v4699_v31  ;;  %vm4852_vm15 = vcmp.gt.f32.partialorder %v4699_v31, 0.0  ;;  %v10697_v48 = vpop.f32.mrf.mxu0  ;;  %v4514_v5 = vadd.f32 %v11846_v21, %v10602_v37 }
 0x3d3   : > { %v4702_v36 = vpop.f32.mrf.mxu1  ;;  %6175 = vmatprep.mubr.bf16.mxu1 %v10683_v29  ;;  %v4518_v49 = vadd.f32 %v11847_v23, %v10602_v37  ;;  %v4520_v21 = vadd.f32 %v10475_v62, %v10595_v52  ;;  %v11853_v23 = vld [vmem:[#allocation16_spill] sm:$0xff] }
 0x3d4   : > { %vm4855_vm14 = vcmp.gt.f32.partialorder %v4701_v6, 0.0  ;;  %v4983_v45 = vmul.f32 0.01, %v4701_v6  ;;  %v4703_v34 = vadd.f32 %v4702_v36, %v4510_v0  ;;  %6176 = vmatmul.mubr.bf16.gmra.mxu1 %v10687_v39  ;;  %6365 = vmatmul.mubr.bf16.gmra.mxu0 %v11843_v20  ;;  %v5108_v27 = vsel %vm4852_vm15, %v4699_v31, %v4980_v50  ;;  %v10709_v39 = vpop.f32.mrf.mxu0 }
 0x3d5   : > { %v4706_v54 = vpop.f32.mrf.mxu1  ;;  %6372 = vmatprep.mubr.bf16.mxu0 %v11844_v59  ;;  %7400 = vmatpush3.bf16.msra.mxu1 %v8087_v1  ;;  %v5107_v36 = vsel %vm4851_vm0, %v4697_v43, %v4979_v58 }
 0x3d6   : > { %vm4856_vm1 = vcmp.gt.f32.partialorder %v4703_v34, 0.0  ;;  %v4984_v60 = vmul.f32 0.01, %v4703_v34  ;;  %7401 = vmatprep.subr.bf16.mxu1 %v8088_v63  ;;  %v5111_v22 = vsel %vm4855_vm14, %v4701_v6, %v4983_v45  ;;  %v4707_v20 = vadd.f32 %v4706_v54, %v4514_v5  ;;  %v8091_v63 = vld [vmem:[#allocation7 + $0x1a0] ss:$12 sps:$4 sm:$0xff]   ;;  %v11851_v54 = vld [vmem:[#allocation35_spill] sm:$0xff]  ;;  %v10719_v5 = vpop.f32.mrf.mxu0 }
 0x3d7   : > { %v4708_v14 = vpop.f32.mrf.mxu1  ;;  %v10711_v6 = vpack.c.bf16 %v5111_v22, %v5107_v36  ;;  %v11854_v36 = vld [vmem:[#allocation23_spill] sm:$0xff] }
 0x3d8   : > { %v4709_v1 = vadd.f32 %v4708_v14, %v4516_v33  ;;  %v5112_v0 = vsel %vm4856_vm1, %v4703_v34, %v4984_v60  ;;  %v8092_v33 = vld [vmem:[#allocation7 + $0x248] ss:$12 sps:$4 sm:$0xff]   ;;  %v4987_v58 = vmul.f32 0.01, %v4707_v20  ;;  %vm4859_vm4 = vcmp.gt.f32.partialorder %v4707_v20, 0.0 }
 0x3d9   : > { %v4710_v59 = vpop.f32.mrf.mxu1  ;;  %v10705_v32 = vpack.c.bf16 %v5112_v0, %v5108_v27  ;;  %7402 = vmatpush3.bf16.msra.mxu1 %v8089_v26  ;;  %11849 = vst [vmem:[#allocation28_spill] sm:$0xff] %v10711_v6  ;;  %v11850_v34 = vld [vmem:[#allocation34_spill] sm:$0xff]  ;;  %v11852_v60 = vld [vmem:[#allocation41_spill] sm:$0xff] }
 0x3da   : > { %v4711_v45 = vadd.f32 %v4710_v59, %v4518_v49  ;;  %7403 = vmatprep.subr.bf16.mxu1 %v8090_v16  ;;  %v4988_v31 = vmul.f32 0.01, %v4709_v1  ;;  %vm4860_vm3 = vcmp.gt.f32.partialorder %v4709_v1, 0.0  ;;  %v8093_v26 = vld [vmem:[#allocation7 + $0x188] ss:$12 sps:$4 sm:$0xff]   ;;  %v4526_v16 = vadd.f32 %v11852_v60, %v10595_v52 }
 0x3db   : > { %11848 = vst [vmem:[#allocation31_spill] sm:$0xff] %v10705_v32  ;;  %v4712_v14 = vpop.f32.mrf.mxu1  ;;  %6185 = vmatprep.mubr.bf16.mxu1 %v10705_v32  ;;  %v4524_v49 = vadd.f32 %v11853_v23, %v10602_v37  ;;  %v4528_v59 = vadd.f32 %v11854_v36, %v10602_v37  ;;  %v10731_v23 = vpop.f32.mrf.mxu0 }
 0x3dc   : > { %vm4863_vm2 = vcmp.gt.f32.partialorder %v4711_v45, 0.0  ;;  %v4991_v43 = vmul.f32 0.01, %v4711_v45  ;;  %v4713_v50 = vadd.f32 %v4712_v14, %v4520_v21  ;;  %6186 = vmatmul.mubr.bf16.gmra.mxu1 %v10711_v6  ;;  %6373 = vmatmul.mubr.bf16.gmra.mxu0 %v11850_v34  ;;  %v5116_v21 = vsel %vm4860_vm3, %v4709_v1, %v4988_v31  ;;  %v11855_v31 = vld [vmem:[#allocation36_spill] sm:$0xff] }
 0x3dd   : > { %v4716_v62 = vpop.f32.mrf.mxu1  ;;  %6380 = vmatprep.mubr.bf16.mxu0 %v11851_v54  ;;  %7404 = vmatpush3.bf16.msra.mxu1 %v8091_v63  ;;  %v5115_v34 = vsel %vm4859_vm4, %v4707_v20, %v4987_v58 }
 0x3de   : > { %vm4864_vm5 = vcmp.gt.f32.partialorder %v4713_v50, 0.0  ;;  %v4992_v22 = vmul.f32 0.01, %v4713_v50  ;;  %7405 = vmatprep.subr.bf16.mxu1 %v8092_v33  ;;  %v5119_v27 = vsel %vm4863_vm2, %v4711_v45, %v4991_v43  ;;  %v4717_v54 = vadd.f32 %v4716_v62, %v4524_v49 }
 0x3df   : > { %v4718_v0 = vpop.f32.mrf.mxu1  ;;  %v4530_v33 = vadd.f32 %v10497_v17, %v10595_v52  ;;  %v10733_v45 = vpack.c.bf16 %v5119_v27, %v5115_v34  ;;  %v11856_v17 = vld [vmem:[#allocation37_spill] sm:$0xff]  ;;  %v4536_v62 = vadd.f32 %v10509_v4, %v10595_v52 }
 0x3e0   : > { %v4719_v63 = vadd.f32 %v4718_v0, %v4526_v16  ;;  %v5120_v14 = vsel %vm4864_vm5, %v4713_v50, %v4992_v22  ;;  %v4995_v50 = vmul.f32 0.01, %v4717_v54  ;;  %vm4867_vm8 = vcmp.gt.f32.partialorder %v4717_v54, 0.0 }
 0x3e1   : > { %v4720_v60 = vpop.f32.mrf.mxu1  ;;  %v10727_v6 = vpack.c.bf16 %v5120_v14, %v5116_v21  ;;  %7406 = vmatpush3.bf16.msra.mxu1 %v8093_v26  ;;  %v10741_v26 = vpop.f32.mrf.mxu0  ;;  %v4538_v0 = vadd.f32 %v10513_v35, %v10602_v37 }
 0x3e2   : > { %v4721_v43 = vadd.f32 %v4720_v60, %v4528_v59  ;;  %v4996_v16 = vmul.f32 0.01, %v4719_v63  ;;  %vm4868_vm7 = vcmp.gt.f32.partialorder %v4719_v63, 0.0  ;;  %v5123_v14 = vsel %vm4867_vm8, %v4717_v54, %v4995_v50  ;;  %v11857_v54 = vld [vmem:[#allocation38_spill] sm:$0xff] }
 0x3e3   : > { %v4722_v32 = vpop.f32.mrf.mxu1  ;;  %6195 = vmatprep.mubr.bf16.mxu1 %v10727_v6  ;;  %v4546_v50 = vadd.f32 %v10531_v19, %v10595_v52 }
 0x3e4   : > { %vm4871_vm6 = vcmp.gt.f32.partialorder %v4721_v43, 0.0  ;;  %v4999_v1 = vmul.f32 0.01, %v4721_v43  ;;  %v4723_v20 = vadd.f32 %v4722_v32, %v4530_v33  ;;  %6196 = vmatmul.mubr.bf16.gmra.mxu1 %v10733_v45  ;;  %6381 = vmatmul.mubr.bf16.gmra.mxu0 %v11855_v31  ;;  %v4534_v32 = vadd.f32 %v10505_v30, %v10602_v37  ;;  %v10751_v31 = vpop.f32.mrf.mxu0 }
 0x3e5   : > { %v4726_v58 = vpop.f32.mrf.mxu1  ;;  %6388 = vmatprep.mubr.bf16.mxu0 %v11856_v17  ;;  %v5124_v59 = vsel %vm4868_vm7, %v4719_v63, %v4996_v16  ;;  %v4540_v33 = vadd.f32 %v10519_v53, %v10595_v52  ;;  %v11858_v53 = vld [vmem:[#allocation39_spill] sm:$0xff] }
 0x3e6   : > { %vm4872_vm9 = vcmp.gt.f32.partialorder %v4723_v20, 0.0  ;;  %v5000_v22 = vmul.f32 0.01, %v4723_v20  ;;  %v5127_v49 = vsel %vm4871_vm6, %v4721_v43, %v4999_v1  ;;  %v4727_v34 = vadd.f32 %v4726_v58, %v4534_v32  ;;  %v10761_v58 = vpop.f32.mrf.mxu0 }
 0x3e7   : > { %v4728_v27 = vpop.f32.mrf.mxu1  ;;  %v10753_v17 = vpack.c.bf16 %v5127_v49, %v5123_v14 }
 0x3e8   : > { %v4729_v36 = vadd.f32 %v4728_v27, %v4536_v62  ;;  %v5128_v21 = vsel %vm4872_vm9, %v4723_v20, %v5000_v22  ;;  %v5003_v1 = vmul.f32 0.01, %v4727_v34  ;;  %vm4875_vm12 = vcmp.gt.f32.partialorder %v4727_v34, 0.0 }
 0x3e9   : > { %v4730_v60 = vpop.f32.mrf.mxu1  ;;  %v10747_v4 = vpack.c.bf16 %v5128_v21, %v5124_v59  ;;  %v4544_v22 = vadd.f32 %v10527_v11, %v10602_v37  ;;  %v4548_v27 = vadd.f32 %v10535_v24, %v10602_v37 }
 0x3ea   : > { %v4731_v30 = vadd.f32 %v4730_v60, %v4538_v0  ;;  %v5004_v35 = vmul.f32 0.01, %v4729_v36  ;;  %vm4876_vm11 = vcmp.gt.f32.partialorder %v4729_v36, 0.0  ;;  %v5131_v14 = vsel %vm4875_vm12, %v4727_v34, %v5003_v1  ;;  %v11859_v34 = vld [vmem:[#allocation40_spill] sm:$0xff] }
 0x3eb   : > { %v4732_v43 = vpop.f32.mrf.mxu1  ;;  %6205 = vmatprep.mubr.bf16.mxu1 %v10747_v4  ;;  %v4556_v1 = vadd.f32 %v10553_v7, %v10595_v52 }
 0x3ec   : > { %vm4879_vm10 = vcmp.gt.f32.partialorder %v4731_v30, 0.0  ;;  %v5007_v63 = vmul.f32 0.01, %v4731_v30  ;;  %v4733_v16 = vadd.f32 %v4732_v43, %v4540_v33  ;;  %6206 = vmatmul.mubr.bf16.gmra.mxu1 %v10753_v17  ;;  %6389 = vmatmul.mubr.bf16.gmra.mxu0 %v11857_v54  ;;  %v5132_v59 = vsel %vm4876_vm11, %v4729_v36, %v5004_v35  ;;  %v10771_v54 = vpop.f32.mrf.mxu0 }
 0x3ed   : > { %v4736_v20 = vpop.f32.mrf.mxu1  ;;  %6396 = vmatprep.mubr.bf16.mxu0 %v11858_v53  ;;  %v4550_v43 = vadd.f32 %v10541_v41, %v10595_v52  ;;  %v11860_v41 = vld [vmem:[#allocation29_spill] sm:$0xff] }
 0x3ee   : > { %vm4880_vm13 = vcmp.gt.f32.partialorder %v4733_v16, 0.0  ;;  %v5008_v62 = vmul.f32 0.01, %v4733_v16  ;;  %v5135_v32 = vsel %vm4879_vm10, %v4731_v30, %v5007_v63  ;;  %v4737_v60 = vadd.f32 %v4736_v20, %v4544_v22  ;;  %v10781_v20 = vpop.f32.mrf.mxu0 }
 0x3ef   : > { %v4738_v49 = vpop.f32.mrf.mxu1  ;;  %v10773_v53 = vpack.c.bf16 %v5135_v32, %v5131_v14 }
 0x3f0   : > { %v4739_v0 = vadd.f32 %v4738_v49, %v4546_v50  ;;  %v5136_v21 = vsel %vm4880_vm13, %v4733_v16, %v5008_v62  ;;  %v5011_v63 = vmul.f32 0.01, %v4737_v60  ;;  %vm4883_vm0 = vcmp.gt.f32.partialorder %v4737_v60, 0.0 }
 0x3f1   : > { %v4740_v33 = vpop.f32.mrf.mxu1  ;;  %v10767_v19 = vpack.c.bf16 %v5136_v21, %v5132_v59  ;;  %v4554_v62 = vadd.f32 %v10549_v18, %v10602_v37  ;;  %v4558_v49 = vadd.f32 %v10557_v51, %v10602_v37 }
 0x3f2   : > { %v4741_v11 = vadd.f32 %v4740_v33, %v4548_v27  ;;  %v5012_v24 = vmul.f32 0.01, %v4739_v0  ;;  %vm4884_vm15 = vcmp.gt.f32.partialorder %v4739_v0, 0.0  ;;  %v5139_v14 = vsel %vm4883_vm0, %v4737_v60, %v5011_v63  ;;  %v11861_v60 = vld [vmem:[#allocation30_spill] sm:$0xff] }
 0x3f3   : > { %v4742_v30 = vpop.f32.mrf.mxu1  ;;  %6215 = vmatprep.mubr.bf16.mxu1 %v10767_v19  ;;  %v4566_v63 = vadd.f32 %v10575_v55, %v10595_v52 }
 0x3f4   : > { %vm4887_vm14 = vcmp.gt.f32.partialorder %v4741_v11, 0.0  ;;  %v5015_v36 = vmul.f32 0.01, %v4741_v11  ;;  %v4743_v35 = vadd.f32 %v4742_v30, %v4550_v43  ;;  %6216 = vmatmul.mubr.bf16.gmra.mxu1 %v10773_v53  ;;  %6397 = vmatmul.mubr.bf16.gmra.mxu0 %v11859_v34  ;;  %v5140_v59 = vsel %vm4884_vm15, %v4739_v0, %v5012_v24  ;;  %v10791_v34 = vpop.f32.mrf.mxu0 }
 0x3f5   : > { %v4746_v16 = vpop.f32.mrf.mxu1  ;;  %6404 = vmatprep.mubr.bf16.mxu0 %v11860_v41  ;;  %v4560_v30 = vadd.f32 %v10563_v15, %v10595_v52  ;;  %v11862_v15 = vld [vmem:[#allocation19_spill] sm:$0xff] }
 0x3f6   : > { %vm4888_vm1 = vcmp.gt.f32.partialorder %v4743_v35, 0.0  ;;  %v5016_v50 = vmul.f32 0.01, %v4743_v35  ;;  %v5143_v22 = vsel %vm4887_vm14, %v4741_v11, %v5015_v36  ;;  %v4747_v33 = vadd.f32 %v4746_v16, %v4554_v62  ;;  %v10801_v16 = vpop.f32.mrf.mxu0 }
 0x3f7   : > { %v4748_v32 = vpop.f32.mrf.mxu1  ;;  %v10793_v41 = vpack.c.bf16 %v5143_v22, %v5139_v14 }
 0x3f8   : > { %v4749_v27 = vadd.f32 %v4748_v32, %v4556_v1  ;;  %v5144_v21 = vsel %vm4888_vm1, %v4743_v35, %v5016_v50  ;;  %v5019_v36 = vmul.f32 0.01, %v4747_v33  ;;  %vm4891_vm4 = vcmp.gt.f32.partialorder %v4747_v33, 0.0 }
 0x3f9   : > { %v4750_v43 = vpop.f32.mrf.mxu1  ;;  %v10787_v7 = vpack.c.bf16 %v5144_v21, %v5140_v59  ;;  %v4564_v50 = vadd.f32 %v10571_v10, %v10602_v37  ;;  %v4568_v32 = vadd.f32 %v10579_v57, %v10602_v37 }
 0x3fa   : > { %v4751_v18 = vadd.f32 %v4750_v43, %v4558_v49  ;;  %v5020_v51 = vmul.f32 0.01, %v4749_v27  ;;  %vm4892_vm3 = vcmp.gt.f32.partialorder %v4749_v27, 0.0  ;;  %v5147_v14 = vsel %vm4891_vm4, %v4747_v33, %v5019_v36  ;;  %v11864_v36 = vld [vmem:[#allocation25_spill] sm:$0xff] }
 0x3fb   : > { %v4752_v11 = vpop.f32.mrf.mxu1  ;;  %6225 = vmatprep.mubr.bf16.mxu1 %v10787_v7 }
 0x3fc   : > { %vm4895_vm2 = vcmp.gt.f32.partialorder %v4751_v18, 0.0  ;;  %v5023_v0 = vmul.f32 0.01, %v4751_v18  ;;  %v4753_v24 = vadd.f32 %v4752_v11, %v4560_v30  ;;  %6226 = vmatmul.mubr.bf16.gmra.mxu1 %v10793_v41  ;;  %6405 = vmatmul.mubr.bf16.gmra.mxu0 %v11861_v60  ;;  %v5148_v59 = vsel %vm4892_vm3, %v4749_v27, %v5020_v51  ;;  %v10811_v60 = vpop.f32.mrf.mxu0 }
 0x3fd   : > { %v4756_v35 = vpop.f32.mrf.mxu1  ;;  %6412 = vmatprep.mubr.bf16.mxu0 %v11862_v15  ;;  %v4570_v11 = vadd.f32 %v10585_v3, %v10595_v52 }
 0x3fe   : > { %vm4896_vm5 = vcmp.gt.f32.partialorder %v4753_v24, 0.0  ;;  %v5024_v1 = vmul.f32 0.01, %v4753_v24  ;;  %v5151_v62 = vsel %vm4895_vm2, %v4751_v18, %v5023_v0  ;;  %v4757_v43 = vadd.f32 %v4756_v35, %v4564_v50  ;;  %v11863_v0 = vld [vmem:[#allocation17_spill] sm:$0xff] }
 0x3ff   : > { %v4758_v22 = vpop.f32.mrf.mxu1  ;;  %v10813_v15 = vpack.c.bf16 %v5151_v62, %v5147_v14  ;;  %v4576_v35 = vadd.f32 %v10606_v25, %v10595_v52  ;;  %v4574_v50 = vadd.f32 %v10599_v61, %v10602_v37 }
 0x400   : > { %v4759_v49 = vadd.f32 %v4758_v22, %v4566_v63  ;;  %v5152_v21 = vsel %vm4896_vm5, %v4753_v24, %v5024_v1  ;;  %v5027_v24 = vmul.f32 0.01, %v4757_v43  ;;  %vm4899_vm8 = vcmp.gt.f32.partialorder %v4757_v43, 0.0 }
 0x401   : > { %v4760_v30 = vpop.f32.mrf.mxu1  ;;  %v10807_v55 = vpack.c.bf16 %v5152_v21, %v5148_v59 }
 0x402   : > { %v4761_v10 = vadd.f32 %v4760_v30, %v4568_v32  ;;  %v5028_v57 = vmul.f32 0.01, %v4759_v49  ;;  %vm4900_vm7 = vcmp.gt.f32.partialorder %v4759_v49, 0.0  ;;  %v4578_v32 = vadd.f32 %v10610_v46, %v10602_v37 }
 0x403   : > { %v4762_v18 = vpop.f32.mrf.mxu1  ;;  %6235 = vmatprep.mubr.bf16.mxu1 %v10807_v55  ;;  %v10816_v33 = vpop.f32.mrf.mxu0  ;;  %v5155_v25 = vsel %vm4899_vm8, %v4757_v43, %v5027_v24 }
 0x404   : > { %vm4903_vm6 = vcmp.gt.f32.partialorder %v4761_v10, 0.0  ;;  %v5031_v27 = vmul.f32 0.01, %v4761_v10  ;;  %v4763_v51 = vadd.f32 %v4762_v18, %v4570_v11  ;;  %6236 = vmatmul.mubr.bf16.gmra.mxu1 %v10813_v15  ;;  %6413 = vmatmul.mubr.bf16.gmra.mxu0 %v11863_v0  ;;  %v5156_v14 = vsel %vm4900_vm7, %v4759_v49, %v5028_v57 }
 0x405   : > { %v4766_v3 = vpop.f32.mrf.mxu1  ;;  %6420 = vmatprep.mubr.bf16.mxu0 %v11864_v36  ;;  %v10823_v1 = vpop.f32.mrf.mxu0  ;;  %v4580_v36 = vadd.f32 %v10616_v56, %v10595_v52 }
 0x406   : > { %vm4904_vm9 = vcmp.gt.f32.partialorder %v4763_v51, 0.0  ;;  %v5032_v63 = vmul.f32 0.01, %v4763_v51  ;;  %11865 = vst [vmem:[#allocation33_spill] sm:$0xff] %v10823_v1  ;;  %v5159_v62 = vsel %vm4903_vm6, %v4761_v10, %v5031_v27  ;;  %v4767_v11 = vadd.f32 %v4766_v3, %v4574_v50  ;;  %v11869_v3 = vld [vmem:[#allocation20_spill] sm:$0xff] }
 0x407   : > { %v4768_v22 = vpop.f32.mrf.mxu1  ;;  %v10830_v21 = vpop.f32.mrf.mxu0  ;;  %v10836_v61 = vpack.c.bf16 %v5159_v62, %v5155_v25 }
 0x408   : > { %v4769_v59 = vadd.f32 %v4768_v22, %v4576_v35  ;;  %v5160_v30 = vsel %vm4904_vm9, %v4763_v51, %v5032_v63  ;;  %v11868_v51 = vld [vmem:[#allocation18_spill] sm:$0xff]  ;;  %v5035_v24 = vmul.f32 0.01, %v4767_v11  ;;  %v4586_v35 = vadd.f32 %v10628_v9, %v10595_v52 }
 0x409   : > { %v4770_v18 = vpop.f32.mrf.mxu1  ;;  %v10832_v0 = vpack.c.bf16 %v5160_v30, %v5156_v14  ;;  %11866 = vst [vmem:[#allocation32_spill] sm:$0xff] %v10836_v61  ;;  %v10838_v27 = vpop.f32.mrf.mxu0  ;;  %vm4907_vm12 = vcmp.gt.f32.partialorder %v4767_v11, 0.0 }
 0x40a   : > { %v4771_v10 = vadd.f32 %v4770_v18, %v4578_v32  ;;  %v5036_v46 = vmul.f32 0.01, %v4769_v59  ;;  %vm4908_vm11 = vcmp.gt.f32.partialorder %v4769_v59, 0.0  ;;  %v11871_v32 = vld [vmem:[#allocation26_spill] sm:$0xff]  ;;  %v5163_v9 = vsel %vm4907_vm12, %v4767_v11, %v5035_v24 }
 0x40b   : > { %v4772_v1 = vpop.f32.mrf.mxu1  ;;  %6245 = vmatprep.mubr.bf16.mxu1 %v10832_v0  ;;  %v10841_v43 = vpop.f32.mrf.mxu0  ;;  %v4588_v14 = vadd.f32 %v11871_v32, %v10602_v37  ;;  %v4598_v32 = vadd.f32 %v10675_v42, %v10602_v37 }
 0x40c   : > { %vm4911_vm10 = vcmp.gt.f32.partialorder %v4771_v10, 0.0  ;;  %v5039_v49 = vmul.f32 0.01, %v4771_v10  ;;  %v4773_v57 = vadd.f32 %v4772_v1, %v4580_v36  ;;  %11867 = vst [vmem:[#allocation22_spill] sm:$0xff] %v10841_v43  ;;  %6246 = vmatmul.mubr.bf16.gmra.mxu1 %v10836_v61  ;;  %6421 = vmatmul.mubr.bf16.gmra.mxu0 %v11868_v51  ;;  %v4584_v1 = vadd.f32 %v10624_v13, %v10602_v37 }
 0x40d   : > { %v4776_v56 = vpop.f32.mrf.mxu1  ;;  %6428 = vmatprep.mubr.bf16.mxu0 %v11869_v3  ;;  %v10848_v50 = vpop.f32.mrf.mxu0  ;;  %v5164_v18 = vsel %vm4908_vm11, %v4769_v59, %v5036_v46 }
 0x40e   : > { %vm4912_vm13 = vcmp.gt.f32.partialorder %v4773_v57, 0.0  ;;  %v5040_v63 = vmul.f32 0.01, %v4773_v57  ;;  %11870 = vst [vmem:[#allocation21_spill] sm:$0xff] %v10848_v50  ;;  %v5167_v62 = vsel %vm4911_vm10, %v4771_v10, %v5039_v49  ;;  %v4777_v51 = vadd.f32 %v4776_v56, %v4584_v1  ;;  %v11874_v56 = vld [vmem:[#allocation42_spill] sm:$0xff] }
 0x40f   : > { %v4778_v22 = vpop.f32.mrf.mxu1  ;;  %v10855_v25 = vpop.f32.mrf.mxu0  ;;  %v4590_v50 = vadd.f32 %v10645_v12, %v10595_v52  ;;  %v10861_v13 = vpack.c.bf16 %v5167_v62, %v5163_v9 }
 0x410   : > { %v4779_v30 = vadd.f32 %v4778_v22, %v4586_v35  ;;  %v5168_v36 = vsel %vm4912_vm13, %v4773_v57, %v5040_v63  ;;  %v11873_v57 = vld [vmem:[#allocation24_spill] sm:$0xff]  ;;  %v5043_v24 = vmul.f32 0.01, %v4777_v51  ;;  %v4596_v63 = vadd.f32 %v10667_v44, %v10595_v52 }
 0x411   : > { %v4780_v3 = vpop.f32.mrf.mxu1  ;;  %v10857_v61 = vpack.c.bf16 %v5168_v36, %v5164_v18  ;;  %11872 = vst [vmem:[#allocation34_spill] sm:$0xff] %v10861_v13  ;;  %v10863_v49 = vpop.f32.mrf.mxu0  ;;  %vm4915_vm0 = vcmp.gt.f32.partialorder %v4777_v51, 0.0 }
 0x412   : > { %v4781_v10 = vadd.f32 %v4780_v3, %v4588_v14  ;;  %v5044_v35 = vmul.f32 0.01, %v4779_v30  ;;  %vm4916_vm15 = vcmp.gt.f32.partialorder %v4779_v30, 0.0  ;;  %v5171_v44 = vsel %vm4915_vm0, %v4777_v51, %v5043_v24 }
 0x413   : > { %v4782_v43 = vpop.f32.mrf.mxu1  ;;  %6255 = vmatprep.mubr.bf16.mxu1 %v10857_v61  ;;  %v10866_v11 = vpop.f32.mrf.mxu0 }
 0x414   : > { %vm4919_vm14 = vcmp.gt.f32.partialorder %v4781_v10, 0.0  ;;  %v5047_v59 = vmul.f32 0.01, %v4781_v10  ;;  %v4783_v46 = vadd.f32 %v4782_v43, %v4590_v50  ;;  %6256 = vmatmul.mubr.bf16.gmra.mxu1 %v10861_v13  ;;  %6429 = vmatmul.mubr.bf16.gmra.mxu0 %v11873_v57  ;;  %v4594_v43 = vadd.f32 %v10653_v40, %v10602_v37 }
 0x415   : > { %v4786_v12 = vpop.f32.mrf.mxu1  ;;  %6436 = vmatprep.mubr.bf16.mxu0 %v11874_v56  ;;  %v10873_v62 = vpop.f32.mrf.mxu0  ;;  %v5172_v36 = vsel %vm4916_vm15, %v4779_v30, %v5044_v35 }
 0x416   : > { %vm4920_vm1 = vcmp.gt.f32.partialorder %v4783_v46, 0.0  ;;  %v5048_v1 = vmul.f32 0.01, %v4783_v46  ;;  %11875 = vst [vmem:[#allocation35_spill] sm:$0xff] %v10873_v62  ;;  %v5175_v50 = vsel %vm4919_vm14, %v4781_v10, %v5047_v59  ;;  %v4787_v3 = vadd.f32 %v4786_v12, %v4594_v43  ;;  %v11878_v12 = vld [vmem:[#allocation44_spill] sm:$0xff] }
 0x417   : > { %v4788_v22 = vpop.f32.mrf.mxu1  ;;  %v10880_v18 = vpop.f32.mrf.mxu0  ;;  %v4600_v62 = vadd.f32 %v10689_v47, %v10595_v52  ;;  %v10886_v40 = vpack.c.bf16 %v5175_v50, %v5171_v44 }
 0x418   : > { %v4789_v14 = vadd.f32 %v4788_v22, %v4596_v63  ;;  %v5176_v9 = vsel %vm4920_vm1, %v4783_v46, %v5048_v1  ;;  %v11877_v46 = vld [vmem:[#allocation43_spill] sm:$0xff]  ;;  %v5051_v24 = vmul.f32 0.01, %v4787_v3  ;;  %v4606_v63 = vadd.f32 %v10709_v39, %v10595_v52 }
 0x419   : > { %v4790_v57 = vpop.f32.mrf.mxu1  ;;  %v10882_v56 = vpack.c.bf16 %v5176_v9, %v5172_v36  ;;  %11876 = vst [vmem:[#allocation41_spill] sm:$0xff] %v10886_v40  ;;  %v10888_v59 = vpop.f32.mrf.mxu0  ;;  %vm4923_vm4 = vcmp.gt.f32.partialorder %v4787_v3, 0.0  ;;  %v4608_v22 = vadd.f32 %v10719_v5, %v10602_v37 }
 0x41a   : > { %v4791_v10 = vadd.f32 %v4790_v57, %v4598_v32  ;;  %v5052_v42 = vmul.f32 0.01, %v4789_v14  ;;  %vm4924_vm3 = vcmp.gt.f32.partialorder %v4789_v14, 0.0  ;;  %v5179_v39 = vsel %vm4923_vm4, %v4787_v3, %v5051_v24 }
 0x41b   : > { %v4792_v13 = vpop.f32.mrf.mxu1  ;;  %6265 = vmatprep.mubr.bf16.mxu1 %v10882_v56  ;;  %v10891_v51 = vpop.f32.mrf.mxu0 }
 0x41c   : > { %vm4927_vm2 = vcmp.gt.f32.partialorder %v4791_v10, 0.0  ;;  %v5055_v30 = vmul.f32 0.01, %v4791_v10  ;;  %v4793_v35 = vadd.f32 %v4792_v13, %v4600_v62  ;;  %6266 = vmatmul.mubr.bf16.gmra.mxu1 %v10886_v40  ;;  %6437 = vmatmul.mubr.bf16.gmra.mxu0 %v11877_v46  ;;  %v4604_v13 = vadd.f32 %v10697_v48, %v10602_v37 }
 0x41d   : > { %v4796_v47 = vpop.f32.mrf.mxu1  ;;  %6444 = vmatprep.mubr.bf16.mxu0 %v11878_v12  ;;  %v10898_v43 = vpop.f32.mrf.mxu0  ;;  %v5180_v9 = vsel %vm4924_vm3, %v4789_v14, %v5052_v42 }
 0x41e   : > { %vm4928_vm5 = vcmp.gt.f32.partialorder %v4793_v35, 0.0  ;;  %v5056_v1 = vmul.f32 0.01, %v4793_v35  ;;  %11879 = vst [vmem:[#allocation16_spill] sm:$0xff] %v10898_v43  ;;  %v5183_v62 = vsel %vm4927_vm2, %v4791_v10, %v5055_v30  ;;  %v4797_v57 = vadd.f32 %v4796_v47, %v4604_v13  ;;  %v11882_v47 = vld [vmem:[#allocation46_spill] sm:$0xff] }
 0x41f   : > { %v4798_v50 = vpop.f32.mrf.mxu1  ;;  %v10905_v36 = vpop.f32.mrf.mxu0  ;;  %v4610_v43 = vadd.f32 %v10731_v23, %v10595_v52  ;;  %v10911_v48 = vpack.c.bf16 %v5183_v62, %v5179_v39 }
 0x420   : > { %v4799_v32 = vadd.f32 %v4798_v50, %v4606_v63  ;;  %v5184_v44 = vsel %vm4928_vm5, %v4793_v35, %v5056_v1  ;;  %v11881_v35 = vld [vmem:[#allocation45_spill] sm:$0xff]  ;;  %v5059_v24 = vmul.f32 0.01, %v4797_v57  ;;  %v4616_v63 = vadd.f32 %v10751_v31, %v10595_v52 }
 0x421   : > { %v4800_v46 = vpop.f32.mrf.mxu1  ;;  %v10907_v12 = vpack.c.bf16 %v5184_v44, %v5180_v9  ;;  %11880 = vst [vmem:[#allocation23_spill] sm:$0xff] %v10911_v48  ;;  %v10913_v30 = vpop.f32.mrf.mxu0  ;;  %vm4931_vm8 = vcmp.gt.f32.partialorder %v4797_v57, 0.0  ;;  %v4618_v50 = vadd.f32 %v10761_v58, %v10602_v37 }
 0x422   : > { %v4801_v10 = vadd.f32 %v4800_v46, %v4608_v22  ;;  %v5060_v5 = vmul.f32 0.01, %v4799_v32  ;;  %vm4932_vm7 = vcmp.gt.f32.partialorder %v4799_v32, 0.0  ;;  %v5187_v31 = vsel %vm4931_vm8, %v4797_v57, %v5059_v24 }
 0x423   : > { %v4802_v40 = vpop.f32.mrf.mxu1  ;;  %6275 = vmatprep.mubr.bf16.mxu1 %v10907_v12  ;;  %v10916_v3 = vpop.f32.mrf.mxu0 }
 0x424   : > { %vm4935_vm6 = vcmp.gt.f32.partialorder %v4801_v10, 0.0  ;;  %v5063_v14 = vmul.f32 0.01, %v4801_v10  ;;  %v4803_v42 = vadd.f32 %v4802_v40, %v4610_v43  ;;  %6276 = vmatmul.mubr.bf16.gmra.mxu1 %v10911_v48  ;;  %6445 = vmatmul.mubr.bf16.gmra.mxu0 %v11881_v35  ;;  %v4614_v40 = vadd.f32 %v10741_v26, %v10602_v37 }
 0x425   : > { %v4806_v23 = vpop.f32.mrf.mxu1  ;;  %6452 = vmatprep.mubr.bf16.mxu0 %v11882_v47  ;;  %v10923_v13 = vpop.f32.mrf.mxu0  ;;  %v5188_v44 = vsel %vm4932_vm7, %v4799_v32, %v5060_v5 }
 0x426   : > { %vm4936_vm9 = vcmp.gt.f32.partialorder %v4803_v42, 0.0  ;;  %v5064_v1 = vmul.f32 0.01, %v4803_v42  ;;  %11883 = vst [vmem:[#allocation36_spill] sm:$0xff] %v10923_v13  ;;  %v5191_v43 = vsel %vm4935_vm6, %v4801_v10, %v5063_v14  ;;  %v4807_v46 = vadd.f32 %v4806_v23, %v4614_v40  ;;  %v11886_v23 = vld [vmem:[#allocation48_spill] sm:$0xff] }
 0x427   : > { %v4808_v62 = vpop.f32.mrf.mxu1  ;;  %v10930_v9 = vpop.f32.mrf.mxu0  ;;  %v4620_v13 = vadd.f32 %v10771_v54, %v10595_v52  ;;  %v10936_v26 = vpack.c.bf16 %v5191_v43, %v5187_v31 }
 0x428   : > { %v4809_v22 = vadd.f32 %v4808_v62, %v4616_v63  ;;  %v5192_v39 = vsel %vm4936_vm9, %v4803_v42, %v5064_v1  ;;  %v11885_v42 = vld [vmem:[#allocation47_spill] sm:$0xff]  ;;  %v5067_v24 = vmul.f32 0.01, %v4807_v46  ;;  %v4626_v63 = vadd.f32 %v10791_v34, %v10595_v52 }
 0x429   : > { %v4810_v35 = vpop.f32.mrf.mxu1  ;;  %v10932_v47 = vpack.c.bf16 %v5192_v39, %v5188_v44  ;;  %11884 = vst [vmem:[#allocation37_spill] sm:$0xff] %v10936_v26  ;;  %v10938_v14 = vpop.f32.mrf.mxu0  ;;  %vm4939_vm12 = vcmp.gt.f32.partialorder %v4807_v46, 0.0  ;;  %v4628_v62 = vadd.f32 %v10801_v16, %v10602_v37 }
 0x42a   : > { %v4811_v10 = vadd.f32 %v4810_v35, %v4618_v50  ;;  %v5068_v58 = vmul.f32 0.01, %v4809_v22  ;;  %vm4940_vm11 = vcmp.gt.f32.partialorder %v4809_v22, 0.0  ;;  %v5195_v34 = vsel %vm4939_vm12, %v4807_v46, %v5067_v24 }
 0x42b   : > { %v4812_v48 = vpop.f32.mrf.mxu1  ;;  %6285 = vmatprep.mubr.bf16.mxu1 %v10932_v47  ;;  %v10941_v57 = vpop.f32.mrf.mxu0 }
 0x42c   : > { %vm4943_vm10 = vcmp.gt.f32.partialorder %v4811_v10, 0.0  ;;  %v5071_v32 = vmul.f32 0.01, %v4811_v10  ;;  %v4813_v5 = vadd.f32 %v4812_v48, %v4620_v13  ;;  %6286 = vmatmul.mubr.bf16.gmra.mxu1 %v10936_v26  ;;  %6453 = vmatmul.mubr.bf16.gmra.mxu0 %v11885_v42  ;;  %v4624_v48 = vadd.f32 %v10781_v20, %v10602_v37 }
 0x42d   : > { %v4816_v54 = vpop.f32.mrf.mxu1  ;;  %6460 = vmatprep.mubr.bf16.mxu0 %v11886_v23  ;;  %v10948_v40 = vpop.f32.mrf.mxu0  ;;  %v5196_v39 = vsel %vm4940_vm11, %v4809_v22, %v5068_v58  ;;  %v11888_v58 = vld [vmem:[#allocation14_spill] sm:$0xff] }
 0x42e   : > { %vm4944_vm13 = vcmp.gt.f32.partialorder %v4813_v5, 0.0  ;;  %v5072_v1 = vmul.f32 0.01, %v4813_v5  ;;  %11887 = vst [vmem:[#allocation38_spill] sm:$0xff] %v10948_v40  ;;  %v5199_v13 = vsel %vm4943_vm10, %v4811_v10, %v5071_v32  ;;  %v4817_v35 = vadd.f32 %v4816_v54, %v4624_v48 }
 0x42f   : > { %v4818_v43 = vpop.f32.mrf.mxu1  ;;  %v10955_v44 = vpop.f32.mrf.mxu0  ;;  %v4630_v40 = vadd.f32 %v10811_v60, %v10595_v52  ;;  %v10961_v20 = vpack.c.bf16 %v5199_v13, %v5195_v34  ;;  %v11889_v52 = vld [vmem:[#allocation49_spill] sm:$0xff] }
 0x430   : > { %v4819_v50 = vadd.f32 %v4818_v43, %v4626_v63  ;;  %v5200_v31 = vsel %vm4944_vm13, %v4813_v5, %v5072_v1  ;;  %v5075_v5 = vmul.f32 0.01, %v4817_v35  ;;  %vm4947_vm0 = vcmp.gt.f32.partialorder %v4817_v35, 0.0 }
 0x431   : > { %v4820_v42 = vpop.f32.mrf.mxu1  ;;  %v10957_v23 = vpack.c.bf16 %v5200_v31, %v5196_v39  ;;  %v10963_v32 = vpop.f32.mrf.mxu0  ;;  %v11890_v39 = vld [vmem:[#allocation50_spill] sm:$0xff] }
 0x432   : > { %v4821_v10 = vadd.f32 %v4820_v42, %v4628_v62  ;;  %v5076_v37 = vmul.f32 0.01, %v4819_v50  ;;  %vm4948_vm15 = vcmp.gt.f32.partialorder %v4819_v50, 0.0 }
 0x433   : > { %v4822_v26 = vpop.f32.mrf.mxu1  ;;  %6295 = vmatprep.mubr.bf16.mxu1 %v10957_v23 }
 0x434   : > { %vm4951_vm14 = vcmp.gt.f32.partialorder %v4821_v10, 0.0  ;;  %v5079_v16 = vmul.f32 0.01, %v4821_v10  ;;  %v4823_v22 = vadd.f32 %v4822_v26, %v4630_v40  ;;  %v10966_v46 = vpop.f32.mrf.mxu0  ;;  %6296 = vmatmul.mubr.bf16.gmra.mxu1 %v10961_v20  ;;  %6461 = vmatmul.mubr.bf16.gmra.mxu0 %v11888_v58  ;;  %v5204_v1 = vsel %vm4948_vm15, %v4819_v50, %v5076_v37 }
 0x435   : > { %6468 = vmatprep.mubr.bf16.mxu0 %v11889_v52  ;;  %v5203_v40 = vsel %vm4947_vm0, %v4817_v35, %v5075_v5  ;;  %v11892_v5 = vld [vmem:[#allocation31_spill] sm:$0xff] }
 0x436   : > { %vm4952_vm1 = vcmp.gt.f32.partialorder %v4823_v22, 0.0  ;;  %v5080_v60 = vmul.f32 0.01, %v4823_v22  ;;  %v10971_v24 = vpop.f32.mrf.mxu0  ;;  %v5207_v54 = vsel %vm4951_vm14, %v4821_v10, %v5079_v16 }
 0x437   : > { %v10977_v13 = vpack.c.bf16 %v5207_v54, %v5203_v40 }
 0x438   : > { %v10973_v63 = vpop.f32.mrf.mxu0  ;;  %v5208_v26 = vsel %vm4952_vm1, %v4823_v22, %v5080_v60 }
 0x439   : > { %v10975_v48 = vpack.c.bf16 %v5208_v26, %v5204_v1 }
 0x43a   : > { %v10979_v43 = vpop.f32.mrf.mxu0 }
 0x43b   : > { %6305 = vmatprep.mubr.bf16.mxu1 %v10975_v48 }
 0x43c   : > { %v10982_v62 = vpop.f32.mrf.mxu0  ;;  %6306 = vmatmul.mubr.bf16.gmra.mxu1 %v10977_v13  ;;  %6469 = vmatmul.mubr.bf16.gmra.mxu0 %v11890_v39 }
 0x43d   : > { %6509 = vmatprep.mubr.bf16.mxu1 %v10639_v38 }
 0x43e   : > { %v10987_v31 = vpop.f32.mrf.mxu0 }
 0x440   : > { %v10989_v50 = vpop.f32.mrf.mxu0 }
 0x442   : > { %v10991_v34 = vpop.f32.mrf.mxu0 }
 0x444   : > { %v10993_v35 = vpop.f32.mrf.mxu0  ;;  %6510 = vmatmul.mubr.bf16.vlgmr.msra.gmra.mxu1 %v10643_v28 }
 0x445   : > { %6517 = vmatprep.mubr.bf16.mxu1 %v10661_v8  ;;  %v11891_v8 = vld [vmem:[#allocation27_spill] sm:$0xff] }
 0x446   : > { %v10997_v42 = vpop.f32.mrf.mxu0 }
 0x448   : > { %v10999_v10 = vpop.f32.mrf.mxu0 }
 0x44a   : > { %v11001_v37 = vpop.f32.mrf.mxu0 }
 0x44c   : > { %v11003_v16 = vpop.f32.mrf.mxu0  ;;  %6518 = vmatmul.mubr.bf16.gmra.mxu1 %v10665_v2 }
 0x44d   : > { %6525 = vmatprep.mubr.bf16.mxu1 %v10683_v29  ;;  %v11894_v29 = vld [vmem:[#allocation28_spill] sm:$0xff] }
 0x44e   : > { %v11007_v38 = vpop.f32.mrf.mxu0 }
 0x450   : > { %v11009_v22 = vpop.f32.mrf.mxu0 }
 0x452   : > { %v11011_v58 = vpop.f32.mrf.mxu0 }
 0x454   : > { %v11013_v28 = vpop.f32.mrf.mxu0  ;;  %6526 = vmatmul.mubr.bf16.gmra.mxu1 %v11891_v8 }
 0x455   : > { %6533 = vmatprep.mubr.bf16.mxu1 %v11892_v5 }
 0x456   : > { %v11017_v52 = vpop.f32.mrf.mxu0 }
 0x458   : > { %v11019_v60 = vpop.f32.mrf.mxu0 }
 0x45a   : > { %v11021_v54 = vpop.f32.mrf.mxu0 }
 0x45c   : > { %v11023_v2 = vpop.f32.mrf.mxu0  ;;  %6534 = vmatmul.mubr.bf16.gmra.mxu1 %v11894_v29 }
 0x45d   : > { %11893 = vst [vmem:[#allocation39_spill] sm:$0xff] %v11023_v2  ;;  %6541 = vmatprep.mubr.bf16.mxu1 %v10727_v6 }
 0x45e   : > { %v11027_v1 = vpop.f32.mrf.mxu0 }
 0x460   : > { %v11029_v26 = vpop.f32.mrf.mxu0 }
 0x462   : > { %v11031_v40 = vpop.f32.mrf.mxu0 }
 0x464   : > { %v11033_v39 = vpop.f32.mrf.mxu0  ;;  %6542 = vmatmul.mubr.bf16.gmra.mxu1 %v10733_v45 }
 0x465   : > { %11895 = vst [vmem:[#allocation40_spill] sm:$0xff] %v11033_v39  ;;  %6549 = vmatprep.mubr.bf16.mxu1 %v10747_v4 }
 0x466   : > { %v11037_v8 = vpop.f32.mrf.mxu0 }
 0x468   : > { %v11039_v5 = vpop.f32.mrf.mxu0 }
 0x469   : > { %11896 = vst [vmem:[#allocation29_spill] sm:$0xff] %v11039_v5 }
 0x46a   : > { %v11041_v2 = vpop.f32.mrf.mxu0 }
 0x46b   : > { %11897 = vst [vmem:[#allocation30_spill] sm:$0xff] %v11041_v2 }
 0x46c   : > { %v11043_v29 = vpop.f32.mrf.mxu0  ;;  %6550 = vmatmul.mubr.bf16.gmra.mxu1 %v10753_v17 }
 0x46d   : > { %11898 = vst [vmem:[#allocation19_spill] sm:$0xff] %v11043_v29  ;;  %6557 = vmatprep.mubr.bf16.mxu1 %v10767_v19  ;;  %v11066_v19 = vld [vmem:[%s11572_s8] sm:$0x7] }
 0x46e   : > { %v11047_v6 = vpop.f32.mrf.mxu0  ;;  %11906 = vst [vmem:[#allocation43_spill] sm:$0xff] %v11066_v19 }
 0x46f   : > { %11899 = vst [vmem:[#allocation17_spill] sm:$0xff] %v11047_v6 }
 0x470   : > { %v11049_v39 = vpop.f32.mrf.mxu0 }
 0x471   : > { %11900 = vst [vmem:[#allocation25_spill] sm:$0xff] %v11049_v39 }
 0x472   : > { %v11051_v45 = vpop.f32.mrf.mxu0 }
 0x473   : > { %11901 = vst [vmem:[#allocation18_spill] sm:$0xff] %v11051_v45 }
 0x474   : > { %v11053_v4 = vpop.f32.mrf.mxu0  ;;  %6558 = vmatmul.mubr.bf16.gmra.mxu1 %v10773_v53 }
 0x475   : > { %11902 = vst [vmem:[#allocation20_spill] sm:$0xff] %v11053_v4  ;;  %6565 = vmatprep.mubr.bf16.mxu1 %v10787_v7  ;;  %v11909_v7 = vld [vmem:[#allocation12_spill] sm:$0xff] }
 0x476   : > { %v11057_v2 = vpop.f32.mrf.mxu0 }
 0x477   : > { %11903 = vst [vmem:[#allocation26_spill] sm:$0xff] %v11057_v2  ;;  %v11077_v2 = vrot.slane %v11066_v19, %v11909_v7  ;;  %v11913_v7 = vld [vmem:[#allocation33_spill] sm:$0xff] }
 0x478   : > { %v11059_v29 = vpop.f32.mrf.mxu0 }
 0x479   : > { %11904 = vst [vmem:[#allocation24_spill] sm:$0xff] %v11059_v29 }
 0x47a   : > { %v11061_v17 = vpop.f32.mrf.mxu0 }
 0x47b   : > { %11905 = vst [vmem:[#allocation42_spill] sm:$0xff] %v11061_v17  ;;  %v11911_v17 = vld [vmem:[#allocation13_spill] sm:$0xff] }
 0x47c   : > { %v11068_v39 = vpop.f32.mrf.mxu0  ;;  %6566 = vmatmul.mubr.bf16.gmra.mxu1 %v10793_v41  ;;  %v11085_v4 = vrot.slane %v11066_v19, %v11911_v17  ;;  %v5965_v41 = vadd.f32 %v10816_v33, %v11077_v2  ;;  %v5969_v17 = vadd.f32 %v10830_v21, %v11077_v2  ;;  %v11916_v21 = vld [vmem:[#allocation22_spill] sm:$0xff] }
 0x47d   : > { %11907 = vst [vmem:[#allocation44_spill] sm:$0xff] %v11068_v39  ;;  %6573 = vmatprep.mubr.bf16.mxu1 %v10807_v55 }
 0x47e   : > { %v11073_v53 = vpop.f32.mrf.mxu0 }
 0x47f   : > { %11908 = vst [vmem:[#allocation45_spill] sm:$0xff] %v11073_v53  ;;  %v5967_v53 = vadd.f32 %v11913_v7, %v11085_v4  ;;  %v5975_v7 = vadd.f32 %v11916_v21, %v11077_v2 }
 0x480   : > { %v11079_v29 = vpop.f32.mrf.mxu0 }
 0x481   : > { %11910 = vst [vmem:[#allocation46_spill] sm:$0xff] %v11079_v29 }
 0x482   : > { %v11087_v39 = vpop.f32.mrf.mxu0 }
 0x484   : > { %v6157_v55 = vpop.f32.mrf.mxu1  ;;  %v11091_v45 = vpop.f32.mrf.mxu0  ;;  %6574 = vmatmul.mubr.bf16.gmra.mxu1 %v10813_v15 }
 0x485   : > { %11912 = vst [vmem:[#allocation47_spill] sm:$0xff] %v11091_v45  ;;  %v6158_v29 = vadd.f32 %v6157_v55, %v5965_v41  ;;  %6581 = vmatprep.mubr.bf16.mxu1 %v10832_v0  ;;  %v5971_v0 = vadd.f32 %v10838_v27, %v11085_v4 }
 0x486   : > { %v6159_v6 = vpop.f32.mrf.mxu1  ;;  %v11097_v5 = vpop.f32.mrf.mxu0 }
 0x487   : > { %11914 = vst [vmem:[#allocation48_spill] sm:$0xff] %v11097_v5  ;;  %6638 = vst [vmem:[%s11101_s21] sm:$0xff] %v6158_v29  ;;  %v6160_v15 = vadd.f32 %v6159_v6, %v5967_v53  ;;  %v11917_v6 = vld [vmem:[#allocation32_spill] sm:$0xff]  ;;  %v11918_v53 = vld [vmem:[#allocation21_spill] sm:$0xff] }
 0x488   : > { %v6161_v33 = vpop.f32.mrf.mxu1  ;;  %v11104_v45 = vpop.f32.mrf.mxu0 }
 0x489   : > { %11915 = vst [vmem:[#allocation14_spill] sm:$0xff] %v11104_v45  ;;  %6639 = vst [vmem:[%s11101_s21 + $0x8] sm:$0xff] %v6160_v15  ;;  %v6162_v41 = vadd.f32 %v6161_v33, %v5969_v17  ;;  %v5977_v45 = vadd.f32 %v11918_v53, %v11085_v4  ;;  %v5979_v15 = vadd.f32 %v10855_v25, %v11077_v2 }
 0x48a   : > { %v6163_v55 = vpop.f32.mrf.mxu1  ;;  %v11112_v19 = vpop.f32.mrf.mxu0 }
 0x48b   : > { %6641 = vst [vmem:[%s11101_s21 + $0x18] sm:$0xff] %v6162_v41  ;;  %v6164_v5 = vadd.f32 %v6163_v55, %v5971_v0  ;;  %v5981_v55 = vadd.f32 %v10863_v49, %v11085_v4 }
 0x48c   : > { %v6167_v29 = vpop.f32.mrf.mxu1  ;;  %6582 = vmatmul.mubr.bf16.gmra.mxu1 %v11917_v6  ;;  %v11122_v0 = vpop.f32.mrf.mxu0  ;;  %v11920_v6 = vld [vmem:[#allocation35_spill] sm:$0xff] }
 0x48d   : > { %6642 = vst [vmem:[%s11101_s21 + $0x20] sm:$0xff] %v6164_v5  ;;  %v6168_v27 = vadd.f32 %v6167_v29, %v5975_v7  ;;  %6589 = vmatprep.mubr.bf16.mxu1 %v10857_v61  ;;  %v5985_v61 = vadd.f32 %v10866_v11, %v11077_v2  ;;  %v5987_v53 = vadd.f32 %v11920_v6, %v11085_v4 }
 0x48e   : > { %v6169_v17 = vpop.f32.mrf.mxu1  ;;  %v11130_v25 = vpop.f32.mrf.mxu0  ;;  %v5989_v11 = vadd.f32 %v10880_v18, %v11077_v2 }
 0x48f   : > { %6644 = vst [vmem:[%s11101_s21 + $0x30] sm:$0xff] %v6168_v27  ;;  %v6170_v33 = vadd.f32 %v6169_v17, %v5977_v45  ;;  %v11919_v45 = vld [vmem:[#allocation34_spill] sm:$0xff] }
 0x490   : > { %v6171_v41 = vpop.f32.mrf.mxu1 }
 0x491   : > { %6645 = vst [vmem:[%s11101_s21 + $0x38] sm:$0xff] %v6170_v33  ;;  %v6172_v21 = vadd.f32 %v6171_v41, %v5979_v15  ;;  %v11140_v15 = vpop.f32.mrf.mxu0  ;;  %v5991_v41 = vadd.f32 %v10888_v59, %v11085_v4 }
 0x492   : > { %v6173_v5 = vpop.f32.mrf.mxu1 }
 0x493   : > { %6647 = vst [vmem:[%s11101_s21 + $0x48] sm:$0xff] %v6172_v21  ;;  %v6174_v7 = vadd.f32 %v6173_v5, %v5981_v55  ;;  %v11148_v18 = vpop.f32.mrf.mxu0 }
 0x494   : > { %v6177_v29 = vpop.f32.mrf.mxu1  ;;  %6590 = vmatmul.mubr.bf16.gmra.mxu1 %v11919_v45 }
 0x495   : > { %6648 = vst [vmem:[%s11101_s21 + $0x50] sm:$0xff] %v6174_v7  ;;  %v6178_v49 = vadd.f32 %v6177_v29, %v5985_v61  ;;  %6597 = vmatprep.mubr.bf16.mxu1 %v10882_v56  ;;  %v5995_v56 = vadd.f32 %v10891_v51, %v11077_v2  ;;  %v11921_v7 = vld [vmem:[#allocation41_spill] sm:$0xff]  ;;  %v11922_v29 = vld [vmem:[#allocation16_spill] sm:$0xff]  ;;  %v5999_v51 = vadd.f32 %v10905_v36, %v11077_v2 }
 0x496   : > { %v6179_v27 = vpop.f32.mrf.mxu1  ;;  %v5997_v45 = vadd.f32 %v11922_v29, %v11085_v4 }
 0x497   : > { %6650 = vst [vmem:[%s11101_s21 + $0x60] sm:$0xff] %v6178_v49  ;;  %v6180_v17 = vadd.f32 %v6179_v27, %v5987_v53  ;;  %v11158_v49 = vpop.f32.mrf.mxu0 }
 0x498   : > { %v6181_v33 = vpop.f32.mrf.mxu1 }
 0x499   : > { %6651 = vst [vmem:[%s11101_s21 + $0x68] sm:$0xff] %v6180_v17  ;;  %v6182_v55 = vadd.f32 %v6181_v33, %v5989_v11  ;;  %v6001_v11 = vadd.f32 %v10913_v30, %v11085_v4  ;;  %v11166_v36 = vpop.f32.mrf.mxu0 }
 0x49a   : > { %v6183_v21 = vpop.f32.mrf.mxu1 }
 0x49b   : > { %6653 = vst [vmem:[%s11101_s21 + $0x78] sm:$0xff] %v6182_v55  ;;  %v6184_v5 = vadd.f32 %v6183_v21, %v5991_v41  ;;  %v11923_v21 = vld [vmem:[#allocation23_spill] sm:$0xff]  ;;  %v11176_v29 = vpop.f32.mrf.mxu0 }
 0x49c   : > { %v6187_v61 = vpop.f32.mrf.mxu1  ;;  %6598 = vmatmul.mubr.bf16.gmra.mxu1 %v11921_v7 }
 0x49d   : > { %6654 = vst [vmem:[%s11101_s21 + $0x80] sm:$0xff] %v6184_v5  ;;  %v6188_v59 = vadd.f32 %v6187_v61, %v5995_v56  ;;  %6605 = vmatprep.mubr.bf16.mxu1 %v10907_v12  ;;  %v6005_v12 = vadd.f32 %v10916_v3, %v11077_v2  ;;  %v11924_v56 = vld [vmem:[#allocation36_spill] sm:$0xff]  ;;  %v6009_v3 = vadd.f32 %v10930_v9, %v11077_v2  ;;  %v11184_v9 = vpop.f32.mrf.mxu0 }
 0x49e   : > { %v6189_v6 = vpop.f32.mrf.mxu1  ;;  %v6007_v5 = vadd.f32 %v11924_v56, %v11085_v4  ;;  %v6021_v56 = vadd.f32 %v10963_v32, %v11085_v4 }
 0x49f   : > { %6656 = vst [vmem:[%s11101_s21 + $0x90] sm:$0xff] %v6188_v59  ;;  %v6190_v53 = vadd.f32 %v6189_v6, %v5997_v45  ;;  %v6011_v59 = vadd.f32 %v10938_v14, %v11085_v4 }
 0x4a0   : > { %v6191_v27 = vpop.f32.mrf.mxu1 }
 0x4a1   : > { %6657 = vst [vmem:[%s11101_s21 + $0x98] sm:$0xff] %v6190_v53  ;;  %v6192_v17 = vadd.f32 %v6191_v27, %v5999_v51 }
 0x4a2   : > { %v6193_v33 = vpop.f32.mrf.mxu1 }
 0x4a3   : > { %6659 = vst [vmem:[%s11101_s21 + $0xa8] sm:$0xff] %v6192_v17  ;;  %v6194_v41 = vadd.f32 %v6193_v33, %v6001_v11  ;;  %v11925_v11 = vld [vmem:[#allocation37_spill] sm:$0xff]  ;;  %v11926_v17 = vld [vmem:[#allocation38_spill] sm:$0xff] }
 0x4a4   : > { %v6197_v55 = vpop.f32.mrf.mxu1  ;;  %6606 = vmatmul.mubr.bf16.gmra.mxu1 %v11923_v21  ;;  %v6017_v33 = vadd.f32 %v11926_v17, %v11085_v4 }
 0x4a5   : > { %6660 = vst [vmem:[%s11101_s21 + $0xb0] sm:$0xff] %v6194_v41  ;;  %v6198_v30 = vadd.f32 %v6197_v55, %v6005_v12  ;;  %6613 = vmatprep.mubr.bf16.mxu1 %v10932_v47  ;;  %v6015_v47 = vadd.f32 %v10941_v57, %v11077_v2  ;;  %v6019_v57 = vadd.f32 %v10955_v44, %v11077_v2  ;;  %v11194_v55 = vpop.f32.mrf.mxu0 }
 0x4a6   : > { %v6199_v61 = vpop.f32.mrf.mxu1 }
 0x4a7   : > { %6662 = vst [vmem:[%s11101_s21 + $0xc0] sm:$0xff] %v6198_v30  ;;  %v6200_v7 = vadd.f32 %v6199_v61, %v6007_v5  ;;  %v11202_v44 = vpop.f32.mrf.mxu0 }
 0x4a8   : > { %v6201_v45 = vpop.f32.mrf.mxu1 }
 0x4a9   : > { %6663 = vst [vmem:[%s11101_s21 + $0xc8] sm:$0xff] %v6200_v7  ;;  %v6202_v6 = vadd.f32 %v6201_v45, %v6009_v3  ;;  %v6027_v7 = vadd.f32 %v10971_v24, %v11085_v4 }
 0x4aa   : > { %v6203_v51 = vpop.f32.mrf.mxu1 }
 0x4ab   : > { %6665 = vst [vmem:[%s11101_s21 + $0xd8] sm:$0xff] %v6202_v6  ;;  %v6204_v53 = vadd.f32 %v6203_v51, %v6011_v59  ;;  %v11212_v6 = vpop.f32.mrf.mxu0 }
 0x4ac   : > { %v6207_v27 = vpop.f32.mrf.mxu1  ;;  %6614 = vmatmul.mubr.bf16.gmra.mxu1 %v11925_v11  ;;  %v6037_v11 = vadd.f32 %v10987_v31, %v11085_v4  ;;  %v6045_v31 = vadd.f32 %v10993_v35, %v11077_v2 }
 0x4ad   : > { %6666 = vst [vmem:[%s11101_s21 + $0xe0] sm:$0xff] %v6204_v53  ;;  %v6208_v14 = vadd.f32 %v6207_v27, %v6015_v47  ;;  %6621 = vmatprep.mubr.bf16.mxu1 %v10957_v23  ;;  %v6025_v23 = vadd.f32 %v10966_v46, %v11077_v2  ;;  %v6029_v46 = vadd.f32 %v10973_v63, %v11077_v2  ;;  %v11220_v63 = vpop.f32.mrf.mxu0 }
 0x4ae   : > { %v6209_v12 = vpop.f32.mrf.mxu1 }
 0x4af   : > { %6668 = vst [vmem:[%s11101_s21 + $0xf0] sm:$0xff] %v6208_v14  ;;  %v6210_v41 = vadd.f32 %v6209_v12, %v6017_v33  ;;  %v6039_v33 = vadd.f32 %v10989_v50, %v11077_v2  ;;  %v11229_v14 = vpop.f32.mrf.mxu0 }
 0x4b0   : > { %v6211_v21 = vpop.f32.mrf.mxu1 }
 0x4b1   : > { %6669 = vst [vmem:[%s11101_s21 + $0xf8] sm:$0xff] %v6210_v41  ;;  %v6212_v5 = vadd.f32 %v6211_v21, %v6019_v57  ;;  %v6041_v57 = vadd.f32 %v10991_v34, %v11085_v4  ;;  %v6049_v34 = vadd.f32 %v10999_v10, %v11077_v2 }
 0x4b2   : > { %v6213_v30 = vpop.f32.mrf.mxu1 }
 0x4b3   : > { %6671 = vst [vmem:[%s11101_s21 + $0x108] sm:$0xff] %v6212_v5  ;;  %v6214_v61 = vadd.f32 %v6213_v30, %v6021_v56  ;;  %v11237_v56 = vpop.f32.mrf.mxu0  ;;  %v6047_v5 = vadd.f32 %v10997_v42, %v11085_v4  ;;  %v6055_v42 = vadd.f32 %v11003_v16, %v11077_v2 }
 0x4b4   : > { %v6217_v3 = vpop.f32.mrf.mxu1  ;;  %6622 = vmatmul.mubr.bf16.gmra.mxu1 %v10961_v20  ;;  %v6031_v20 = vadd.f32 %v10979_v43, %v11085_v4 }
 0x4b5   : > { %6672 = vst [vmem:[%s11101_s21 + $0x110] sm:$0xff] %v6214_v61  ;;  %v6218_v32 = vadd.f32 %v6217_v3, %v6025_v23  ;;  %6629 = vmatprep.mubr.bf16.mxu1 %v10975_v48  ;;  %v6035_v48 = vadd.f32 %v10982_v62, %v11077_v2  ;;  %v11245_v3 = vpop.f32.mrf.mxu0 }
 0x4b6   : > { %v6219_v45 = vpop.f32.mrf.mxu1 }
 0x4b7   : > { %6674 = vst [vmem:[%s11101_s21 + $0x120] sm:$0xff] %v6218_v32  ;;  %v6220_v59 = vadd.f32 %v6219_v45, %v6027_v7  ;;  %v6051_v7 = vadd.f32 %v11001_v37, %v11085_v4  ;;  %v6059_v37 = vadd.f32 %v11009_v22, %v11077_v2 }
 0x4b8   : > { %v6221_v51 = vpop.f32.mrf.mxu1 }
 0x4b9   : > { %6675 = vst [vmem:[%s11101_s21 + $0x128] sm:$0xff] %v6220_v59  ;;  %v6222_v24 = vadd.f32 %v6221_v51, %v6029_v46  ;;  %v11253_v59 = vpop.f32.mrf.mxu0  ;;  %v6057_v51 = vadd.f32 %v11007_v38, %v11085_v4  ;;  %v6065_v38 = vadd.f32 %v11013_v28, %v11077_v2 }
 0x4ba   : > { %v6223_v47 = vpop.f32.mrf.mxu1 }
 0x4bb   : > { %6677 = vst [vmem:[%s11101_s21 + $0x138] sm:$0xff] %v6222_v24  ;;  %v6224_v53 = vadd.f32 %v6223_v47, %v6031_v20 }
 0x4bc   : > { %v6227_v27 = vpop.f32.mrf.mxu1  ;;  %6630 = vmatmul.mubr.bf16.gmra.mxu1 %v10977_v13 }
 0x4bd   : > { %6678 = vst [vmem:[%s11101_s21 + $0x140] sm:$0xff] %v6224_v53  ;;  %v6228_v43 = vadd.f32 %v6227_v27, %v6035_v48  ;;  %v11261_v48 = vpop.f32.mrf.mxu0  ;;  %v6061_v53 = vadd.f32 %v11011_v58, %v11085_v4  ;;  %v6069_v58 = vadd.f32 %v11019_v60, %v11077_v2 }
 0x4be   : > { %v6229_v17 = vpop.f32.mrf.mxu1 }
 0x4bf   : > { %6680 = vst [vmem:[%s11101_s21 + $0x150] sm:$0xff] %v6228_v43  ;;  %v6230_v62 = vadd.f32 %v6229_v17, %v6037_v11  ;;  %v11269_v17 = vpop.f32.mrf.mxu0 }
 0x4c0   : > { %v6231_v12 = vpop.f32.mrf.mxu1 }
 0x4c1   : > { %6681 = vst [vmem:[%s11101_s21 + $0x158] sm:$0xff] %v6230_v62  ;;  %v6232_v13 = vadd.f32 %v6231_v12, %v6039_v33  ;;  %v6067_v33 = vadd.f32 %v11017_v52, %v11085_v4  ;;  %v11927_v52 = vld [vmem:[#allocation39_spill] sm:$0xff] }
 0x4c2   : > { %v6233_v41 = vpop.f32.mrf.mxu1 }
 0x4c3   : > { %6683 = vst [vmem:[%s11101_s21 + $0x168] sm:$0xff] %v6232_v13  ;;  %v6234_v21 = vadd.f32 %v6233_v41, %v6041_v57  ;;  %v11277_v13 = vpop.f32.mrf.mxu0  ;;  %v6071_v41 = vadd.f32 %v11021_v54, %v11085_v4  ;;  %v6079_v54 = vadd.f32 %v11029_v26, %v11077_v2 }
 0x4c4   : > { %v6237_v50 = vpop.f32.mrf.mxu1 }
 0x4c5   : > { %6684 = vst [vmem:[%s11101_s21 + $0x170] sm:$0xff] %v6234_v21  ;;  %v6238_v30 = vadd.f32 %v6237_v50, %v6045_v31  ;;  %v6075_v50 = vadd.f32 %v11927_v52, %v11077_v2  ;;  %v11933_v52 = vld [vmem:[#allocation25_spill] sm:$0xff] }
 0x4c6   : > { %v6239_v23 = vpop.f32.mrf.mxu1 }
 0x4c7   : > { %6686 = vst [vmem:[%s11101_s21 + $0x180] sm:$0xff] %v6238_v30  ;;  %v6240_v61 = vadd.f32 %v6239_v23, %v6047_v5  ;;  %v11285_v30 = vpop.f32.mrf.mxu0  ;;  %v6077_v23 = vadd.f32 %v11027_v1, %v11085_v4  ;;  %v11928_v1 = vld [vmem:[#allocation40_spill] sm:$0xff] }
 0x4c8   : > { %v6241_v35 = vpop.f32.mrf.mxu1 }
 0x4c9   : > { %6687 = vst [vmem:[%s11101_s21 + $0x188] sm:$0xff] %v6240_v61  ;;  %v6242_v32 = vadd.f32 %v6241_v35, %v6049_v34 }
 0x4ca   : > { %v6243_v45 = vpop.f32.mrf.mxu1 }
 0x4cb   : > { %6689 = vst [vmem:[%s11101_s21 + $0x198] sm:$0xff] %v6242_v32  ;;  %v6244_v46 = vadd.f32 %v6243_v45, %v6051_v7  ;;  %v11293_v7 = vpop.f32.mrf.mxu0  ;;  %v6081_v45 = vadd.f32 %v11031_v40, %v11085_v4  ;;  %v11929_v40 = vld [vmem:[#allocation29_spill] sm:$0xff] }
 0x4cc   : > { %v6247_v10 = vpop.f32.mrf.mxu1 }
 0x4cd   : > { %6690 = vst [vmem:[%s11101_s21 + $0x1a0] sm:$0xff] %v6244_v46  ;;  %v6248_v20 = vadd.f32 %v6247_v10, %v6055_v42  ;;  %v6085_v10 = vadd.f32 %v11928_v1, %v11077_v2 }
 0x4ce   : > { %v6249_v24 = vpop.f32.mrf.mxu1 }
 0x4cf   : > { %6692 = vst [vmem:[%s11101_s21 + $0x1b0] sm:$0xff] %v6248_v20  ;;  %v6250_v47 = vadd.f32 %v6249_v24, %v6057_v51  ;;  %v11301_v20 = vpop.f32.mrf.mxu0  ;;  %v6087_v24 = vadd.f32 %v11037_v8, %v11085_v4  ;;  %v11931_v8 = vld [vmem:[#allocation19_spill] sm:$0xff] }
 0x4d0   : > { %v6251_v16 = vpop.f32.mrf.mxu1 }
 0x4d1   : > { %6693 = vst [vmem:[%s11101_s21 + $0x1b8] sm:$0xff] %v6250_v47  ;;  %v6252_v27 = vadd.f32 %v6251_v16, %v6059_v37  ;;  %v6089_v16 = vadd.f32 %v11929_v40, %v11077_v2 }
 0x4d2   : > { %v6253_v11 = vpop.f32.mrf.mxu1 }
 0x4d3   : > { %6695 = vst [vmem:[%s11101_s21 + $0x1c8] sm:$0xff] %v6252_v27  ;;  %v6254_v43 = vadd.f32 %v6253_v11, %v6061_v53  ;;  %v11309_v27 = vpop.f32.mrf.mxu0 }
 0x4d4   : > { %v6257_v22 = vpop.f32.mrf.mxu1 }
 0x4d5   : > { %6696 = vst [vmem:[%s11101_s21 + $0x1d0] sm:$0xff] %v6254_v43  ;;  %v6258_v62 = vadd.f32 %v6257_v22, %v6065_v38  ;;  %v11930_v38 = vld [vmem:[#allocation30_spill] sm:$0xff] }
 0x4d6   : > { %v6259_v12 = vpop.f32.mrf.mxu1  ;;  %v6091_v43 = vadd.f32 %v11930_v38, %v11085_v4 }
 0x4d7   : > { %6698 = vst [vmem:[%s11101_s21 + $0x1e0] sm:$0xff] %v6258_v62  ;;  %v6260_v57 = vadd.f32 %v6259_v12, %v6067_v33  ;;  %v6095_v62 = vadd.f32 %v11931_v8, %v11077_v2 }
 0x4d8   : > { %v6261_v28 = vpop.f32.mrf.mxu1 }
 0x4d9   : > { %6699 = vst [vmem:[%s11101_s21 + $0x1e8] sm:$0xff] %v6260_v57  ;;  %v6262_v31 = vadd.f32 %v6261_v28, %v6069_v58  ;;  %v11317_v58 = vpop.f32.mrf.mxu0  ;;  %v11932_v28 = vld [vmem:[#allocation17_spill] sm:$0xff] }
 0x4da   : > { %v6263_v21 = vpop.f32.mrf.mxu1 }
 0x4db   : > { %6701 = vst [vmem:[%s11101_s21 + $0x1f8] sm:$0xff] %v6262_v31  ;;  %v6264_v5 = vadd.f32 %v6263_v21, %v6071_v41  ;;  %v6097_v41 = vadd.f32 %v11932_v28, %v11085_v4  ;;  %v11940_v28 = vld [vmem:[#allocation45_spill] sm:$0xff] }
 0x4dc   : > { %v6267_v60 = vpop.f32.mrf.mxu1 }
 0x4dd   : > { %6702 = vst [vmem:[%s11101_s21 + $0x200] sm:$0xff] %v6264_v5  ;;  %v6268_v34 = vadd.f32 %v6267_v60, %v6075_v50  ;;  %v6099_v50 = vadd.f32 %v11933_v52, %v11077_v2  ;;  %v11325_v60 = vpop.f32.mrf.mxu0  ;;  %v11941_v52 = vld [vmem:[#allocation46_spill] sm:$0xff] }
 0x4de   : > { %v6269_v61 = vpop.f32.mrf.mxu1 }
 0x4df   : > { %6704 = vst [vmem:[%s11101_s21 + $0x210] sm:$0xff] %v6268_v34  ;;  %v6270_v35 = vadd.f32 %v6269_v61, %v6077_v23  ;;  %v11934_v34 = vld [vmem:[#allocation18_spill] sm:$0xff] }
 0x4e0   : > { %v6271_v32 = vpop.f32.mrf.mxu1  ;;  %v6101_v61 = vadd.f32 %v11934_v34, %v11085_v4 }
 0x4e1   : > { %6705 = vst [vmem:[%s11101_s21 + $0x218] sm:$0xff] %v6270_v35  ;;  %v6272_v42 = vadd.f32 %v6271_v32, %v6079_v54  ;;  %v11935_v32 = vld [vmem:[#allocation20_spill] sm:$0xff] }
 0x4e2   : > { %v6273_v46 = vpop.f32.mrf.mxu1 }
 0x4e3   : > { %6707 = vst [vmem:[%s11101_s21 + $0x228] sm:$0xff] %v6272_v42  ;;  %v6274_v51 = vadd.f32 %v6273_v46, %v6081_v45  ;;  %v6105_v45 = vadd.f32 %v11935_v32, %v11077_v2  ;;  %v11333_v46 = vpop.f32.mrf.mxu0  ;;  %v11942_v32 = vld [vmem:[#allocation15_spill] sm:$0xff] }
 0x4e4   : > { %v6277_v26 = vpop.f32.mrf.mxu1 }
 0x4e5   : > { %6708 = vst [vmem:[%s11101_s21 + $0x230] sm:$0xff] %v6274_v51  ;;  %v6278_v37 = vadd.f32 %v6277_v26, %v6085_v10  ;;  %v11936_v10 = vld [vmem:[#allocation26_spill] sm:$0xff] }
 0x4e6   : > { %v6279_v47 = vpop.f32.mrf.mxu1  ;;  %v6107_v51 = vadd.f32 %v11936_v10, %v11085_v4  ;;  %v11945_v10 = vld [vmem:[#allocation48_spill] sm:$0xff] }
 0x4e7   : > { %6710 = vst [vmem:[%s11101_s21 + $0x240] sm:$0xff] %v6278_v37  ;;  %v6280_v53 = vadd.f32 %v6279_v47, %v6087_v24  ;;  %v11937_v37 = vld [vmem:[#allocation24_spill] sm:$0xff] }
 0x4e8   : > { %v6281_v11 = vpop.f32.mrf.mxu1  ;;  %v6109_v47 = vadd.f32 %v11937_v37, %v11077_v2 }
 0x4e9   : > { %6711 = vst [vmem:[%s11101_s21 + $0x248] sm:$0xff] %v6280_v53  ;;  %v6282_v22 = vadd.f32 %v6281_v11, %v6089_v16  ;;  %v11341_v16 = vpop.f32.mrf.mxu0  ;;  %v11938_v11 = vld [vmem:[#allocation42_spill] sm:$0xff] }
 0x4ea   : > { %v6283_v33 = vpop.f32.mrf.mxu1  ;;  %v6111_v38 = vadd.f32 %v11938_v11, %v11085_v4 }
 0x4eb   : > { %6713 = vst [vmem:[%s11101_s21 + $0x258] sm:$0xff] %v6282_v22  ;;  %v6284_v12 = vadd.f32 %v6283_v33, %v6091_v43  ;;  %v11939_v33 = vld [vmem:[#allocation44_spill] sm:$0xff] }
 0x4ec   : > { %v6287_v57 = vpop.f32.mrf.mxu1  ;;  %v6115_v8 = vadd.f32 %v11939_v33, %v11077_v2  ;;  %v7303_v33 = vadd.f32 %v11130_v25, %v11122_v0 }
 0x4ed   : > { %6714 = vst [vmem:[%s11101_s21 + $0x260] sm:$0xff] %v6284_v12  ;;  %v6288_v31 = vadd.f32 %v6287_v57, %v6095_v62  ;;  %v11349_v12 = vpop.f32.mrf.mxu0 }
 0x4ee   : > { %v6289_v21 = vpop.f32.mrf.mxu1 }
 0x4ef   : > { %6716 = vst [vmem:[%s11101_s21 + $0x270] sm:$0xff] %v6288_v31  ;;  %v6290_v5 = vadd.f32 %v6289_v21, %v6097_v41  ;;  %v6117_v41 = vadd.f32 %v11940_v28, %v11085_v4 }
 0x4f0   : > { %v6291_v23 = vpop.f32.mrf.mxu1 }
 0x4f1   : > { %6717 = vst [vmem:[%s11101_s21 + $0x278] sm:$0xff] %v6290_v5  ;;  %v6292_v54 = vadd.f32 %v6291_v23, %v6099_v50  ;;  %v6119_v50 = vadd.f32 %v11941_v52, %v11077_v2  ;;  %v11357_v23 = vpop.f32.mrf.mxu0 }
 0x4f2   : > { %v6293_v35 = vpop.f32.mrf.mxu1 }
 0x4f3   : > { %6719 = vst [vmem:[%s11101_s21 + $0x288] sm:$0xff] %v6292_v54  ;;  %v6294_v42 = vadd.f32 %v6293_v35, %v6101_v61  ;;  %v6121_v61 = vadd.f32 %v11087_v39, %v11085_v4  ;;  %v11946_v4 = vld [vmem:[#allocation14_spill] sm:$0xff] }
 0x4f4   : > { %v6297_v1 = vpop.f32.mrf.mxu1 }
 0x4f5   : > { %6720 = vst [vmem:[%s11101_s21 + $0x290] sm:$0xff] %v6294_v42  ;;  %v6298_v26 = vadd.f32 %v6297_v1, %v6105_v45  ;;  %v11943_v45 = vld [vmem:[#allocation43_spill] sm:$0xff] }
 0x4f6   : > { %v6299_v24 = vpop.f32.mrf.mxu1  ;;  %v11364_v42 = vrot.slane %v11943_v45, %v11942_v32  ;;  %v11944_v1 = vld [vmem:[#allocation47_spill] sm:$0xff]  ;;  %v7312_v45 = vadd.f32 %v11184_v9, %v11176_v29 }
 0x4f7   : > { %6722 = vst [vmem:[%s11101_s21 + $0x2a0] sm:$0xff] %v6298_v26  ;;  %v6300_v40 = vadd.f32 %v6299_v24, %v6107_v51  ;;  %v7297_v51 = vadd.f32 %v11945_v10, %v11944_v1  ;;  %v11369_v26 = vpop.f32.mrf.mxu0 }
 0x4f8   : > { %v6301_v53 = vpop.f32.mrf.mxu1 }
 0x4f9   : > { %6723 = vst [vmem:[%s11101_s21 + $0x2a8] sm:$0xff] %v6300_v40  ;;  %v6302_v43 = vadd.f32 %v6301_v53, %v6109_v47  ;;  %v6351_v39 = vadd.f32 %v7297_v51, %v11364_v42  ;;  %v7300_v47 = vadd.f32 %v11112_v19, %v11946_v4  ;;  %v11375_v53 = vpop.f32.mrf.mxu0 }
 0x4fa   : > { %v6303_v22 = vpop.f32.mrf.mxu1 }
 0x4fb   : > { %6725 = vst [vmem:[%s11101_s21 + $0x2b8] sm:$0xff] %v6302_v43  ;;  %v6304_v62 = vadd.f32 %v6303_v22, %v6111_v38  ;;  %v6354_v22 = vadd.f32 %v7300_v47, %v11364_v42 }
 0x4fc   : > { %v6307_v57 = vpop.f32.mrf.mxu1 }
 0x4fd   : > { %6726 = vst [vmem:[%s11101_s21 + $0x2c0] sm:$0xff] %v6304_v62  ;;  %v6308_v31 = vadd.f32 %v6307_v57, %v6115_v8  ;;  %v11381_v62 = vpop.f32.mrf.mxu0 }
 0x4fe   : > { %v6309_v21 = vpop.f32.mrf.mxu1 }
 0x4ff   : > { %6728 = vst [vmem:[%s11101_s21 + $0x2d0] sm:$0xff] %v6308_v31  ;;  %v6310_v5 = vadd.f32 %v6309_v21, %v6117_v41  ;;  %v6359_v41 = vadd.f32 %v7303_v33, %v11364_v42  ;;  %v7306_v31 = vadd.f32 %v11148_v18, %v11140_v15  ;;  %v11387_v52 = vpop.f32.mrf.mxu0  ;;  %v7321_v33 = vadd.f32 %v11237_v56, %v11229_v14 }
 0x500   : > { %v6311_v34 = vpop.f32.mrf.mxu1 }
 0x501   : > { %6729 = vst [vmem:[%s11101_s21 + $0x2d8] sm:$0xff] %v6310_v5  ;;  %v6312_v54 = vadd.f32 %v6311_v34, %v6119_v50  ;;  %v6362_v5 = vadd.f32 %v7306_v31, %v11364_v42  ;;  %v7309_v34 = vadd.f32 %v11166_v36, %v11158_v49 }
 0x502   : > { %v6313_v35 = vpop.f32.mrf.mxu1 }
 0x503   : > { %6731 = vst [vmem:[%s11101_s21 + $0x2e8] sm:$0xff] %v6312_v54  ;;  %v6314_v2 = vadd.f32 %v6313_v35, %v6121_v61  ;;  %v11393_v54 = vpop.f32.mrf.mxu0  ;;  %v6367_v32 = vadd.f32 %v7309_v34, %v11364_v42 }
 0x504   : > { %v7407_v24 = vpop.f32.mrf.mxu1 }
 0x505   : > { %6732 = vst [vmem:[%s11101_s21 + $0x2f0] sm:$0xff] %v6314_v2  ;;  %v11399_v10 = vpop.f32.mrf.mxu0  ;;  %v6370_v2 = vadd.f32 %v7312_v45, %v11364_v42 }
 0x506   : > { %v7408_v37 = vpop.f32.mrf.mxu1 }
 0x507   : > { %v7409_v40 = vadd.f32 %v7408_v37, %v7407_v24  ;;  %v7315_v24 = vadd.f32 %v11202_v44, %v11194_v55 }
 0x508   : > { %v7410_v11 = vpop.f32.mrf.mxu1 }
 0x509   : > { %v6512_v38 = vadd.f32 %v7409_v40, %v6351_v39  ;;  %v11405_v39 = vpop.f32.mrf.mxu0  ;;  %v6375_v47 = vadd.f32 %v7315_v24, %v11364_v42  ;;  %v7318_v40 = vadd.f32 %v11220_v63, %v11212_v6 }
 0x50a   : > { %v7411_v43 = vpop.f32.mrf.mxu1 }
 0x50b   : > { %6640 = vst [vmem:[%s11101_s21 + $0x10] sm:$0xff] %v6512_v38  ;;  %v7412_v8 = vadd.f32 %v7411_v43, %v7410_v11  ;;  %v11411_v38 = vpop.f32.mrf.mxu0 }
 0x50c   : > { %v7413_v57 = vpop.f32.mrf.mxu1 }
 0x50d   : > { %v6515_v28 = vadd.f32 %v7412_v8, %v6354_v22  ;;  %v6378_v22 = vadd.f32 %v7318_v40, %v11364_v42  ;;  %v7339_v40 = vadd.f32 %v11333_v46, %v11325_v60 }
 0x50e   : > { %v7414_v19 = vpop.f32.mrf.mxu1 }
 0x50f   : > { %6643 = vst [vmem:[%s11101_s21 + $0x28] sm:$0xff] %v6515_v28  ;;  %v7415_v21 = vadd.f32 %v7414_v19, %v7413_v57  ;;  %v11417_v57 = vpop.f32.mrf.mxu0  ;;  %v6383_v19 = vadd.f32 %v7321_v33, %v11364_v42 }
 0x510   : > { %v7416_v50 = vpop.f32.mrf.mxu1 }
 0x511   : > { %v6520_v0 = vadd.f32 %v7415_v21, %v6359_v41  ;;  %v7324_v41 = vadd.f32 %v11253_v59, %v11245_v3  ;;  %v11423_v21 = vpop.f32.mrf.mxu0 }
 0x512   : > { %v7417_v25 = vpop.f32.mrf.mxu1 }
 0x513   : > { %6646 = vst [vmem:[%s11101_s21 + $0x40] sm:$0xff] %v6520_v0  ;;  %v7418_v61 = vadd.f32 %v7417_v25, %v7416_v50  ;;  %v6386_v0 = vadd.f32 %v7324_v41, %v11364_v42  ;;  %v7327_v25 = vadd.f32 %v11269_v17, %v11261_v48  ;;  %v11429_v34 = vpop.f32.mrf.mxu0 }
 0x514   : > { %v7419_v35 = vpop.f32.mrf.mxu1 }
 0x515   : > { %v6523_v15 = vadd.f32 %v7418_v61, %v6362_v5 }
 0x516   : > { %v7420_v18 = vpop.f32.mrf.mxu1 }
 0x517   : > { %6649 = vst [vmem:[%s11101_s21 + $0x58] sm:$0xff] %v6523_v15  ;;  %v7421_v1 = vadd.f32 %v7420_v18, %v7419_v35  ;;  %v6391_v35 = vadd.f32 %v7327_v25, %v11364_v42  ;;  %v7330_v15 = vadd.f32 %v11285_v30, %v11277_v13 }
 0x518   : > { %v7422_v51 = vpop.f32.mrf.mxu1 }
 0x519   : > { %v6528_v49 = vadd.f32 %v7421_v1, %v6367_v32  ;;  %v11435_v32 = vpop.f32.mrf.mxu0  ;;  %v6394_v1 = vadd.f32 %v7330_v15, %v11364_v42 }
 0x51a   : > { %v7423_v36 = vpop.f32.mrf.mxu1 }
 0x51b   : > { %6652 = vst [vmem:[%s11101_s21 + $0x70] sm:$0xff] %v6528_v49  ;;  %v7424_v37 = vadd.f32 %v7423_v36, %v7422_v51  ;;  %v7333_v51 = vadd.f32 %v11301_v20, %v11293_v7  ;;  %v11441_v36 = vpop.f32.mrf.mxu0 }
 0x51c   : > { %v7425_v4 = vpop.f32.mrf.mxu1 }
 0x51d   : > { %v6531_v29 = vadd.f32 %v7424_v37, %v6370_v2  ;;  %v6399_v24 = vadd.f32 %v7333_v51, %v11364_v42  ;;  %v7336_v37 = vadd.f32 %v11317_v58, %v11309_v27 }
 0x51e   : > { %v7426_v9 = vpop.f32.mrf.mxu1 }
 0x51f   : > { %6655 = vst [vmem:[%s11101_s21 + $0x88] sm:$0xff] %v6531_v29  ;;  %v7427_v11 = vadd.f32 %v7426_v9, %v7425_v4  ;;  %v11447_v29 = vpop.f32.mrf.mxu0 }
 0x520   : > { %v7428_v43 = vpop.f32.mrf.mxu1 }
 0x521   : > { %v6536_v55 = vadd.f32 %v7427_v11, %v6375_v47  ;;  %v6402_v47 = vadd.f32 %v7336_v37, %v11364_v42 }
 0x522   : > { %v7429_v44 = vpop.f32.mrf.mxu1 }
 0x523   : > { %6658 = vst [vmem:[%s11101_s21 + $0xa0] sm:$0xff] %v6536_v55  ;;  %v7430_v8 = vadd.f32 %v7429_v44, %v7428_v43  ;;  %v11453_v43 = vpop.f32.mrf.mxu0  ;;  %v6407_v44 = vadd.f32 %v7339_v40, %v11364_v42 }
 0x524   : > { %v7431_v28 = vpop.f32.mrf.mxu1 }
 0x525   : > { %v6539_v6 = vadd.f32 %v7430_v8, %v6378_v22  ;;  %v7342_v22 = vadd.f32 %v11349_v12, %v11341_v16  ;;  %v11459_v8 = vpop.f32.mrf.mxu0 }
 0x526   : > { %v7432_v63 = vpop.f32.mrf.mxu1 }
 0x527   : > { %6661 = vst [vmem:[%s11101_s21 + $0xb8] sm:$0xff] %v6539_v6  ;;  %v7433_v31 = vadd.f32 %v7432_v63, %v7431_v28  ;;  %v6410_v6 = vadd.f32 %v7342_v22, %v11364_v42  ;;  %v7345_v63 = vadd.f32 %v11369_v26, %v11357_v23  ;;  %v7368_v41 = vpop.f32.mrf.mxu0  ;;  %v7351_v26 = vadd.f32 %v11393_v54, %v11387_v52 }
 0x528   : > { %v7434_v50 = vpop.f32.mrf.mxu1  ;;  %v7357_v54 = vadd.f32 %v11417_v57, %v11411_v38  ;;  %v7363_v57 = vadd.f32 %v11441_v36, %v11435_v32  ;;  %v7369_v36 = vadd.f32 %v7368_v41, %v11459_v8 }
 0x529   : > { %v6544_v14 = vadd.f32 %v7433_v31, %v6383_v19  ;;  %v6415_v12 = vadd.f32 %v7345_v63, %v11364_v42 }
 0x52a   : > { %v7435_v56 = vpop.f32.mrf.mxu1 }
 0x52b   : > { %6664 = vst [vmem:[%s11101_s21 + $0xd0] sm:$0xff] %v6544_v14  ;;  %v7436_v5 = vadd.f32 %v7435_v56, %v7434_v50  ;;  %v7348_v14 = vadd.f32 %v11381_v62, %v11375_v53  ;;  %v6423_v53 = vadd.f32 %v7351_v26, %v11364_v42  ;;  %v7354_v62 = vadd.f32 %v11405_v39, %v11399_v10 }
 0x52c   : > { %v7437_v61 = vpop.f32.mrf.mxu1  ;;  %v6431_v10 = vadd.f32 %v7357_v54, %v11364_v42  ;;  %v7360_v39 = vadd.f32 %v11429_v34, %v11423_v21  ;;  %v6439_v21 = vadd.f32 %v7363_v57, %v11364_v42  ;;  %v7366_v34 = vadd.f32 %v11453_v43, %v11447_v29 }
 0x52d   : > { %v6547_v3 = vadd.f32 %v7436_v5, %v6386_v0  ;;  %v7370_v0 = vpop.f32.mrf.mxu0  ;;  %v6418_v23 = vadd.f32 %v7348_v14, %v11364_v42  ;;  %v6426_v52 = vadd.f32 %v7354_v62, %v11364_v42  ;;  %v6447_v29 = vadd.f32 %v7369_v36, %v11364_v42 }
 0x52e   : > { %v7438_v59 = vpop.f32.mrf.mxu1  ;;  %v6434_v38 = vadd.f32 %v7360_v39, %v11364_v42  ;;  %v6442_v32 = vadd.f32 %v7366_v34, %v11364_v42 }
 0x52f   : > { %6667 = vst [vmem:[%s11101_s21 + $0xe8] sm:$0xff] %v6547_v3  ;;  %v7439_v18 = vadd.f32 %v7438_v59, %v7437_v61  ;;  %v7371_v59 = vpop.f32.mrf.mxu0 }
 0x530   : > { %v7440_v45 = vpop.f32.mrf.mxu1  ;;  %v7372_v43 = vadd.f32 %v7371_v59, %v7370_v0 }
 0x531   : > { %v6552_v48 = vadd.f32 %v7439_v18, %v6391_v35 }
 0x532   : > { %v7441_v17 = vpop.f32.mrf.mxu1 }
 0x533   : > { %6670 = vst [vmem:[%s11101_s21 + $0x100] sm:$0xff] %v6552_v48  ;;  %v7442_v49 = vadd.f32 %v7441_v17, %v7440_v45  ;;  %v7373_v48 = vpop.f32.mrf.mxu0 }
 0x534   : > { %v7443_v2 = vpop.f32.mrf.mxu1 }
 0x535   : > { %v6555_v13 = vadd.f32 %v7442_v49, %v6394_v1 }
 0x536   : > { %v7444_v30 = vpop.f32.mrf.mxu1 }
 0x537   : > { %6673 = vst [vmem:[%s11101_s21 + $0x118] sm:$0xff] %v6555_v13  ;;  %v7445_v4 = vadd.f32 %v7444_v30, %v7443_v2  ;;  %v7374_v2 = vpop.f32.mrf.mxu0 }
 0x538   : > { %v7446_v9 = vpop.f32.mrf.mxu1  ;;  %v7375_v8 = vadd.f32 %v7374_v2, %v7373_v48 }
 0x539   : > { %v6560_v7 = vadd.f32 %v7445_v4, %v6399_v24  ;;  %v7376_v4 = vpop.f32.mrf.mxu0 }
 0x53a   : > { %v7447_v20 = vpop.f32.mrf.mxu1  ;;  %v6455_v26 = vadd.f32 %v7375_v8, %v11364_v42 }
 0x53b   : > { %6676 = vst [vmem:[%s11101_s21 + $0x130] sm:$0xff] %v6560_v7  ;;  %v7448_v11 = vadd.f32 %v7447_v20, %v7446_v9  ;;  %v7377_v40 = vpop.f32.mrf.mxu0 }
 0x53c   : > { %v7449_v55 = vpop.f32.mrf.mxu1  ;;  %v7378_v0 = vadd.f32 %v7377_v40, %v7376_v4 }
 0x53d   : > { %v6563_v27 = vadd.f32 %v7448_v11, %v6402_v47 }
 0x53e   : > { %v7450_v58 = vpop.f32.mrf.mxu1 }
 0x53f   : > { %6679 = vst [vmem:[%s11101_s21 + $0x148] sm:$0xff] %v6563_v27  ;;  %v7451_v33 = vadd.f32 %v7450_v58, %v7449_v55 }
 0x540   : > { %v7452_v28 = vpop.f32.mrf.mxu1 }
 0x541   : > { %v6568_v60 = vadd.f32 %v7451_v33, %v6407_v44  ;;  %v7379_v44 = vpop.f32.mrf.mxu0 }
 0x542   : > { %v7453_v46 = vpop.f32.mrf.mxu1 }
 0x543   : > { %6682 = vst [vmem:[%s11101_s21 + $0x160] sm:$0xff] %v6568_v60  ;;  %v7454_v19 = vadd.f32 %v7453_v46, %v7452_v28  ;;  %v7380_v46 = vpop.f32.mrf.mxu0 }
 0x544   : > { %v7455_v31 = vpop.f32.mrf.mxu1  ;;  %v7381_v62 = vadd.f32 %v7380_v46, %v7379_v44 }
 0x545   : > { %v6571_v50 = vadd.f32 %v7454_v19, %v6410_v6 }
 0x546   : > { %v7456_v16 = vpop.f32.mrf.mxu1 }
 0x547   : > { %6685 = vst [vmem:[%s11101_s21 + $0x178] sm:$0xff] %v6571_v50  ;;  %v7457_v56 = vadd.f32 %v7456_v16, %v7455_v31  ;;  %v7382_v50 = vpop.f32.mrf.mxu0 }
 0x548   : > { %v7458_v25 = vpop.f32.mrf.mxu1 }
 0x549   : > { %v6576_v5 = vadd.f32 %v7457_v56, %v6415_v12  ;;  %v6450_v56 = vadd.f32 %v7372_v43, %v11364_v42 }
 0x54a   : > { %v7459_v61 = vpop.f32.mrf.mxu1 }
 0x54b   : > { %6688 = vst [vmem:[%s11101_s21 + $0x190] sm:$0xff] %v6576_v5  ;;  %v7460_v3 = vadd.f32 %v7459_v61, %v7458_v25  ;;  %v7383_v25 = vpop.f32.mrf.mxu0 }
 0x54c   : > { %v7461_v35 = vpop.f32.mrf.mxu1  ;;  %v7384_v54 = vadd.f32 %v7383_v25, %v7382_v50 }
 0x54d   : > { %v6579_v15 = vadd.f32 %v7460_v3, %v6418_v23  ;;  %v7385_v59 = vpop.f32.mrf.mxu0 }
 0x54e   : > { %v7462_v18 = vpop.f32.mrf.mxu1 }
 0x54f   : > { %6691 = vst [vmem:[%s11101_s21 + $0x1a8] sm:$0xff] %v6579_v15  ;;  %v7463_v45 = vadd.f32 %v7462_v18, %v7461_v35  ;;  %v7386_v48 = vpop.f32.mrf.mxu0 }
 0x550   : > { %v7464_v17 = vpop.f32.mrf.mxu1  ;;  %v7387_v39 = vadd.f32 %v7386_v48, %v7385_v59 }
 0x551   : > { %v6584_v1 = vadd.f32 %v7463_v45, %v6423_v53  ;;  %v6458_v53 = vadd.f32 %v7378_v0, %v11364_v42  ;;  %v7388_v2 = vpop.f32.mrf.mxu0 }
 0x552   : > { %v7465_v51 = vpop.f32.mrf.mxu1 }
 0x553   : > { %6694 = vst [vmem:[%s11101_s21 + $0x1c0] sm:$0xff] %v6584_v1  ;;  %v7466_v49 = vadd.f32 %v7465_v51, %v7464_v17  ;;  %v7389_v4 = vpop.f32.mrf.mxu0 }
 0x554   : > { %v7467_v13 = vpop.f32.mrf.mxu1  ;;  %v7390_v57 = vadd.f32 %v7389_v4, %v7388_v2 }
 0x555   : > { %v6587_v30 = vadd.f32 %v7466_v49, %v6426_v52  ;;  %v6463_v52 = vadd.f32 %v7381_v62, %v11364_v42 }
 0x556   : > { %v7468_v24 = vpop.f32.mrf.mxu1 }
 0x557   : > { %6697 = vst [vmem:[%s11101_s21 + $0x1d8] sm:$0xff] %v6587_v30  ;;  %v7469_v37 = vadd.f32 %v7468_v24, %v7467_v13 }
 0x558   : > { %v7470_v9 = vpop.f32.mrf.mxu1 }
 0x559   : > { %v6592_v7 = vadd.f32 %v7469_v37, %v6431_v10  ;;  %v6466_v10 = vadd.f32 %v7384_v54, %v11364_v42 }
 0x55a   : > { %v7471_v20 = vpop.f32.mrf.mxu1 }
 0x55b   : > { %6700 = vst [vmem:[%s11101_s21 + $0x1f0] sm:$0xff] %v6592_v7  ;;  %v7472_v47 = vadd.f32 %v7471_v20, %v7470_v9 }
 0x55c   : > { %v7473_v11 = vpop.f32.mrf.mxu1 }
 0x55d   : > { %v6595_v55 = vadd.f32 %v7472_v47, %v6434_v38  ;;  %v6471_v38 = vadd.f32 %v7387_v39, %v11364_v42 }
 0x55e   : > { %v7474_v27 = vpop.f32.mrf.mxu1 }
 0x55f   : > { %6703 = vst [vmem:[%s11101_s21 + $0x208] sm:$0xff] %v6595_v55  ;;  %v7475_v58 = vadd.f32 %v7474_v27, %v7473_v11  ;;  %v6474_v27 = vadd.f32 %v7390_v57, %v11364_v42 }
 0x560   : > { %v7476_v22 = vpop.f32.mrf.mxu1 }
 0x561   : > { %v6600_v33 = vadd.f32 %v7475_v58, %v6439_v21 }
 0x562   : > { %v7477_v28 = vpop.f32.mrf.mxu1 }
 0x563   : > { %6706 = vst [vmem:[%s11101_s21 + $0x220] sm:$0xff] %v6600_v33  ;;  %v7478_v60 = vadd.f32 %v7477_v28, %v7476_v22 }
 0x564   : > { %v7479_v6 = vpop.f32.mrf.mxu1 }
 0x565   : > { %v6603_v63 = vadd.f32 %v7478_v60, %v6442_v32 }
 0x566   : > { %v7480_v19 = vpop.f32.mrf.mxu1 }
 0x567   : > { %6709 = vst [vmem:[%s11101_s21 + $0x238] sm:$0xff] %v6603_v63  ;;  %v7481_v31 = vadd.f32 %v7480_v19, %v7479_v6 }
 0x568   : > { %v7482_v16 = vpop.f32.mrf.mxu1 }
 0x569   : > { %v6608_v12 = vadd.f32 %v7481_v31, %v6447_v29 }
 0x56a   : > { %v7483_v14 = vpop.f32.mrf.mxu1 }
 0x56b   : > { %6712 = vst [vmem:[%s11101_s21 + $0x250] sm:$0xff] %v6608_v12  ;;  %v7484_v41 = vadd.f32 %v7483_v14, %v7482_v16 }
 0x56c   : > { %v7485_v5 = vpop.f32.mrf.mxu1 }
 0x56d   : > { %v6611_v61 = vadd.f32 %v7484_v41, %v6450_v56 }
 0x56e   : > { %v7486_v23 = vpop.f32.mrf.mxu1 }
 0x56f   : > { %6715 = vst [vmem:[%s11101_s21 + $0x268] sm:$0xff] %v6611_v61  ;;  %v7487_v3 = vadd.f32 %v7486_v23, %v7485_v5 }
 0x570   : > { %v7488_v35 = vpop.f32.mrf.mxu1 }
 0x571   : > { %v6616_v15 = vadd.f32 %v7487_v3, %v6455_v26 }
 0x572   : > { %v7489_v18 = vpop.f32.mrf.mxu1 }
 0x573   : > { %6718 = vst [vmem:[%s11101_s21 + $0x280] sm:$0xff] %v6616_v15  ;;  %v7490_v45 = vadd.f32 %v7489_v18, %v7488_v35 }
 0x574   : > { %v7491_v17 = vpop.f32.mrf.mxu1 }
 0x575   : > { %v6619_v1 = vadd.f32 %v7490_v45, %v6458_v53 }
 0x576   : > { %v7492_v51 = vpop.f32.mrf.mxu1 }
 0x577   : > { %6721 = vst [vmem:[%s11101_s21 + $0x298] sm:$0xff] %v6619_v1  ;;  %v7493_v49 = vadd.f32 %v7492_v51, %v7491_v17 }
 0x578   : > { %v7494_v13 = vpop.f32.mrf.mxu1 }
 0x579   : > { %v6624_v30 = vadd.f32 %v7493_v49, %v6463_v52 }
 0x57a   : > { %v7495_v24 = vpop.f32.mrf.mxu1 }
 0x57b   : > { %6724 = vst [vmem:[%s11101_s21 + $0x2b0] sm:$0xff] %v6624_v30  ;;  %v7496_v37 = vadd.f32 %v7495_v24, %v7494_v13 }
 0x57c   : > { %v7497_v9 = vpop.f32.mrf.mxu1 }
 0x57d   : > { %v6627_v7 = vadd.f32 %v7496_v37, %v6466_v10 }
 0x57e   : > { %v7498_v20 = vpop.f32.mrf.mxu1 }
 0x57f   : > { %6727 = vst [vmem:[%s11101_s21 + $0x2c8] sm:$0xff] %v6627_v7  ;;  %v7499_v47 = vadd.f32 %v7498_v20, %v7497_v9 }
 0x580   : > { %v7500_v40 = vpop.f32.mrf.mxu1 }
 0x581   : > { %v6632_v11 = vadd.f32 %v7499_v47, %v6471_v38 }
 0x582   : > { %v7501_v55 = vpop.f32.mrf.mxu1 }
 0x583   : > { %6730 = vst [vmem:[%s11101_s21 + $0x2e0] sm:$0xff] %v6632_v11  ;;  %v7502_v21 = vadd.f32 %v7501_v55, %v7500_v40 }
 0x585   : > { %v6635_v34 = vadd.f32 %v7502_v21, %v6474_v27 }
 0x587   : > { %6733 = vst [vmem:[%s11101_s21 + $0x2f8] sm:$0xff] %v6635_v34 }
 0x588   : > { %8442 = shalt.err (!%p8439_p0)
}
 0x589   : > { %s8443_s27 = scalar_lea.hbm %s11517_s29, 12288  ;;  %s8447_s26 = scalar_lea.hbm %s11573_s9, 24576 }
 0x58a   : > { %p8444_p6 = scmp.ne.s32.totalorder %s11517_s29, %s8443_s27  ;;  %p8448_p5 = scmp.lt.s32.totalorder %s11517_s29, %s11573_s9 }
 0x58b   : > { %p8449_p1 = scmp.lt.s32.totalorder %s8447_s26, %s8443_s27 }
 0x58c   : > { %p8445_p9 = pnand %p8444_p6, %p11947_p3 }
 0x58d   : > { %p8450_p10 = por %p8449_p1, %p8448_p5 }
 0x58e   : > { %p8446_p13 = pneg %p8445_p9 }
 0x590   : > { %p8451_p12 = pnand %p8450_p10, %p8446_p13 }
 0x592   : > { %8454 = shalt.err (!%p8451_p12)
}
 0x593   : > { %s8508_s23 = smov 384   ;;  %s8509_s17 = smov 24  }
 0x594   : > { %7517 = dma.vmem_to_hbm [thread:$0]  (%p11947_p3), %s11519_s28, 12288, %s11517_s29, %s11524_s13, %s8508_s23, %s8508_s23, %s8509_s17  }
 0x595 PF: > { %p7539_p2 = scmp.ge.s32.totalorder %s8497_s12, 2  ;;  %s6764_s22 = sand.u32 1, %s8485_s30  }
 0x596   : > { %p11948_p4 = scmp.ne.s32.totalorder %s11663_s20, 0  ;;  %s6765_s25 = scalar_lea.sflag [#allocation4], %s6764_s22 }
 0x598   : > { %p7530_p7 = pnand %p7539_p2, %p11948_p4 }
 0x59a   : > { %p7531_p8 = pneg %p7530_p7 }
 0x59c   : > { %8480 = dma.done.wait (%p7531_p8), %s6765_s25, 12288  }
 0x59d   : > { %8482 = vsyncadd (%p7531_p8), %s6765_s25, 4294955008  ;;  %p21_p11 = scmp.ge.s32.totalorder %s8585_s15, 4   ;;  %s11949_s30 = smov %s8489_s10 }
 0x59e   : > { %s11950_s10 = smov %s8493_s11  ;;  %s11951_s11 = smov %s8596_s18 }
 0x59f   : > { %s11952_s12 = smov %s8585_s15  ;;  %23 = sbr.rel (!%p21_p11) target bundleno = 5 (0x5), region = 104 }
 0x5a4   :  { %6770 = vsyncpa [#allocation3], 1 }
 0x5a5   :  { %6772 = vsyncpa [#allocation3 + $0x1], 1 }
 0x5a6   :  { %6773 = vsyncpa [#allocation6], 1 }
 0x5a7   :  { %6774 = vsyncpa [#allocation4], 1 }
 0x5a8   :  { %6776 = vsyncpa [#allocation4 + $0x1], 1 }

</bundles_post_ra>
